<compile_context>
chip_gen: v5e
topology: v5e:2x2
jax: 0.10.0
libtpu: 0.0.40
codegen_flags: <defaults>
</compile_context>

<pallas_src>
import numpy as np
import jax
import jax.numpy as jnp
from jax import lax
from jax.experimental import pallas as pl
from jax.experimental.pallas import tpu as pltpu


_VMEM_LIMIT = 32 * 1024 * 1024   # safe on v5e (128 MiB phys) .. v7x (64 MiB phys)


# ----------------------------------------------------------------------------
# Quantization-grid construction (deterministic parameter setup, numpy glue).
# ----------------------------------------------------------------------------
def int_value(bit, is_signed):
    B = bit - 1 if is_signed else bit
    values = [0.0]
    for i in range(1, 2 ** B):
        values.append(float(i))
        if is_signed:
            values.append(float(-i))
    values = np.sort(np.asarray(values, dtype=np.float64))
    values *= 32.0 / 2 ** B
    return values.astype(np.float32)


def flint_value(bit, is_signed, exp_base=0):
    B = bit - 1 if is_signed else bit
    value_bit = B
    assert value_bit >= 2
    neg_exp_num = value_bit - 1
    pos_exp_num = value_bit - 1
    exp_max = pos_exp_num + exp_base
    values = [0.0]
    for i in range(0, neg_exp_num + 1):
        exp_bit = i + 2
        exp_value = -(exp_bit - 1)
        mant_bit = value_bit - exp_bit
        for j in range(int(2 ** mant_bit)):
            v = 2.0 ** exp_value * (1 + 2.0 ** (-mant_bit) * j)
            values.append(v)
            if is_signed:
                values.append(-v)
    exp_bit = 2
    exp_value = 0
    mant_bit = value_bit - exp_bit
    for j in range(int(2 ** mant_bit)):
        v = 2.0 ** (exp_value + exp_base) * (1 + 2.0 ** (-mant_bit) * j)
        values.append(v)
        if is_signed:
            values.append(-v)
    for i in range(1, pos_exp_num):
        exp_bit = i + 2
        exp_value = i
        mant_bit = value_bit - exp_bit
        for j in range(int(2 ** mant_bit)):
            v = 2.0 ** (exp_value + exp_base) * (1 + 2.0 ** (-mant_bit) * j)
            values.append(v)
            if is_signed:
                values.append(-v)
    values.append(2.0 ** exp_max)
    if is_signed:
        values.append(-2.0 ** exp_max)
    values = np.sort(np.asarray(values, dtype=np.float64)) * (32.0 / 2 ** exp_max)
    return values.astype(np.float32)


def outlier_value(bit, is_signed, exp_bit=2, exp_base=5):
    B = bit - 1 if is_signed else bit
    mant_bit = B - exp_bit
    values = []
    for i in range(exp_base, exp_base + 2 ** exp_bit):
        for j in range(int(2 ** mant_bit)):
            if i == exp_base and j == 0:
                continue
            v = 2.0 ** i * (1 + 2.0 ** (-mant_bit) * j)
            values.append(v)
            if is_signed:
                values.append(-v)
    return np.sort(np.asarray(values, dtype=np.float32)).astype(np.float32)


# ----------------------------------------------------------------------------
# Small helpers shared by the kernels.
# ----------------------------------------------------------------------------
def _round_up(x, m):
    return (x + m - 1) // m * m


def _pick_tile(dim, pref, align):
    """Pick a tile size (multiple of `align`); shrink if padding waste > 25%."""
    pref = max(pref, align)
    if dim <= pref:
        return _round_up(dim, align)
    t = pref
    while t > align and (_round_up(dim, t) - dim) * 4 > dim:
        t = max(align, t // 2)
    return t


def _row_tiling(R, K, align=8):
    """Row-tile size (multiple of `align`) and padded row count.

    Budget: keep ~8 live (tile_r, K) f32 buffers under ~8 MiB so the kernels fit the
    scoped-VMEM limit on every generation (v5e 16 MiB default, v7x 64 MiB physical).
    For small R we still try to emit >=2 grid steps so both v7x TensorCores get work."""
    budget = max(align, (8 << 20) // max(1, 32 * K))
    tile = max(align, (min(128, budget) // align) * align)
    if R <= tile:
        half = _round_up(max(1, (R + 1) // 2), align)
        full = _round_up(R, align)
        tile = half if (R > align and half < full) else full
    return tile, _round_up(R, tile)


def _pad_rows(arr, R_pad):
    R = arr.shape[0]
    if R_pad == R:
        return arr
    return jnp.pad(arr, ((0, R_pad - R), (0, 0)))


def _midpoint_snap(xs, grid):
    """Nearest value of the sorted grid via midpoint scan (strict '>' keeps the
    lower value on exact ties, i.e. matches argmin-first over a sorted grid)."""
    g = [float(v) for v in np.asarray(grid, np.float64)]
    q = jnp.full(xs.shape, g[0], dtype=jnp.float32)
    for lo, hi in zip(g[:-1], g[1:]):
        mid = float((np.float64(lo) + np.float64(hi)) * 0.5)
        q = jnp.where(xs > mid, hi, q)
    return q


def _is_uniform(grid):
    g = np.asarray(grid, np.float64)
    if g.size < 2:
        return False
    d = np.diff(g)
    return bool(np.allclose(d, d[0], rtol=1e-6, atol=0.0))


def _make_fast_snap(base_grid, outlier_grid):
    """Fast nearest-grid snap (used by both the search and apply kernels).

    Uniform base grid ('int' mode): nearest value via ceil-based round+clip (~7 VALU ops,
    ties resolve to the LOWER grid value exactly like argmin-first over the sorted grid);
    only the few outlier values are midpoint-scanned.  Non-uniform ('flint'): one midpoint
    scan over the full sorted concat grid (also argmin-first-exact)."""
    base = np.sort(np.asarray(base_grid, np.float64))
    outl = None if outlier_grid is None else np.sort(np.asarray(outlier_grid, np.float64))
    if _is_uniform(base):
        step = float(base[1] - base[0])
        inv_step = float(1.0 / step)
        b0 = float(base[0])
        n_hi = float(base.size - 1)
        c_off = float(-base[0] / step - 0.5)

        def snap(xs):
            # nearest uniform-grid index; ceil(t - 0.5) makes ties pick the lower index
            i = jnp.clip(jnp.ceil(xs * inv_step + c_off), 0.0, n_hi)
            qb = i * step + b0
            if outl is None:
                return qb
            # TODO(synk): replace the outlier midpoint scan with exponent/mantissa
            # bit-math rounding (pltpu.bitcast) to cut the search-loop VALU cost further.
            qo = _midpoint_snap(xs, outl)
            do = jnp.abs(xs - qo)
            db = jnp.abs(xs - qb)
            take_o = jnp.logical_or(do < db, jnp.logical_and(do == db, qo < qb))
            return jnp.where(take_o, qo, qb)

        return snap
    full = base if outl is None else np.sort(np.concatenate([base, outl]))
    return lambda xs: _midpoint_snap(xs, full)


def _zero_victims(q, K, is_odd):
    """ANT outlier/victim zeroing on pairs (2k, 2k+1) within each (even-length) row.
    Uses f32 lane rolls (XLU) and avoids extra mask casts."""
    absq = jnp.abs(q)
    left_abs = pltpu.roll(absq, shift=1, axis=q.ndim - 1)
    victim_odd = jnp.logical_and(is_odd, left_abs > 32.0)
    rem_abs = jnp.where(victim_odd, 0.0, absq)
    right_abs = pltpu.roll(rem_abs, shift=K - 1, axis=q.ndim - 1)   # == shift -1
    victim_even = jnp.logical_and(jnp.logical_not(is_odd), right_abs > 32.0)
    victim = jnp.logical_or(victim_odd, victim_even)
    return jnp.where(victim, 0.0, q)


# ----------------------------------------------------------------------------
# Pallas kernel 1: fused alpha-search (all candidates in one pass, MSE only).
# ----------------------------------------------------------------------------
_SEARCH_FN_CACHE = {}
_APPLY_FN_CACHE = {}
_ADDMM_FN_CACHE = {}


def _build_search_fn(R_pad, tile_r, K, NC, base_grid, outlier_grid, use_outlier):
    assert R_pad % tile_r == 0
    if use_outlier:
        assert K % 2 == 0, "row length must be even for outlier/victim pairing"
    NC_PAD = _round_up(max(NC, 1), 128)          # lane-dense MSE output (unmasked stores)
    snap = _make_fast_snap(base_grid, outlier_grid if use_outlier else None)
    inv_k = float(1.0 / K)
    # TODO(synk): for very large K (GPT-2 c_fc) add a K grid axis ("arbitrary") with an
    # MSE accumulator instead of relying only on the row-tile VMEM budget.

    def kernel(ratio_ref, inv_ratio_ref, scale_ref, x_ref, mse_ref):
        x = x_ref[...]                            # (tile_r, K) f32, loaded once
        s0 = scale_ref[...]                       # (tile_r, 1) base scale (ratio == 1)
        safe_s0 = jnp.where(s0 == 0.0, 1.0, s0)   # guard all-zero rows (alpha == 0)
        inv_s0 = 1.0 / safe_s0                    # column reciprocal, not a K-wide divide
        x_n = x * inv_s0                          # normalize once; per-candidate is one mul
        lane = lax.broadcasted_iota(jnp.int32, (tile_r, NC_PAD), 1)
        if use_outlier:
            col = lax.broadcasted_iota(jnp.int32, (tile_r, K), 1)
            is_odd = (col & 1) == 1
        else:
            is_odd = None

        def eval_cand(c, acc):
            r = ratio_ref[c]
            xs = x_n * inv_ratio_ref[c]
            q = snap(xs)
            if use_outlier:
                q = _zero_victims(q, K, is_odd)
            err = q * (s0 * r) - x
            col_mse = jnp.sum(err * err, axis=1, keepdims=True) * inv_k
            return jnp.where(lane == c, col_mse, acc)

        # Manual unroll-by-2: two independent candidates per fori iteration gives the
        # LLO scheduler room to interleave around the VALU chain; odd remainder inlined.
        def body(p, acc):
            c = 2 * p
            acc = eval_cand(c, acc)
            return eval_cand(c + 1, acc)

        acc = lax.fori_loop(0, NC // 2, body,
                            jnp.zeros((tile_r, NC_PAD), jnp.float32))
        if NC % 2 == 1:
            acc = eval_cand(NC - 1, acc)
        mse_ref[...] = acc

    grid_spec = pltpu.PrefetchScalarGridSpec(
        num_scalar_prefetch=2,                    # candidate ratios, 1/ratios -> SMEM
        grid=(R_pad // tile_r,),
        in_specs=[pl.BlockSpec((tile_r, 1), lambda i, rr, ir: (i, 0)),
                  pl.BlockSpec((tile_r, K), lambda i, rr, ir: (i, 0))],
        out_specs=pl.BlockSpec((tile_r, NC_PAD), lambda i, rr, ir: (i, 0)),
    )
    fn = pl.pallas_call(
        kernel,
        grid_spec=grid_spec,
        out_shape=jax.ShapeDtypeStruct((R_pad, NC_PAD), jnp.float32),
        compiler_params=pltpu.CompilerParams(
            dimension_semantics=("parallel",),
            vmem_limit_bytes=_VMEM_LIMIT),
    )
    return jax.jit(lambda ratios, inv_ratios, scale_rows, x2d:
                   fn(ratios, inv_ratios, scale_rows, x2d))


def _get_search_fn(R_pad, tile_r, K, NC, base_grid, outlier_grid, use_outlier, grid_key):
    key = (R_pad, tile_r, K, NC, grid_key)
    if key not in _SEARCH_FN_CACHE:
        _SEARCH_FN_CACHE[key] = _build_search_fn(
            R_pad, tile_r, K, NC, base_grid, outlier_grid, use_outlier)
    return _SEARCH_FN_CACHE[key]


# ----------------------------------------------------------------------------
# Pallas kernel 2: single-scale fake-quantization (apply).
# with_mse=True  -> f32 quantized output + per-row MSE (init / parity path)
# with_mse=False -> quantized output only, selectable dtype (steady-state path)
# ----------------------------------------------------------------------------
def _build_apply_fn(R_pad, tile_r, K, base_grid, outlier_grid, use_outlier,
                    with_mse, out_dtype):
    assert R_pad % tile_r == 0
    if use_outlier:
        assert K % 2 == 0
    snap = _make_fast_snap(base_grid, outlier_grid if use_outlier else None)
    inv_k = float(1.0 / K)

    def kernel(scale_ref, x_ref, q_ref, *mse_refs):
        x = x_ref[...]
        s = scale_ref[...]
        safe_s = jnp.where(s == 0.0, 1.0, s)
        xs = x * (1.0 / safe_s)                   # column reciprocal + K-wide mul
        q = snap(xs)
        if use_outlier:
            col = lax.broadcasted_iota(jnp.int32, xs.shape, 1)
            q = _zero_victims(q, K, (col & 1) == 1)
        out = q * s
        q_ref[...] = out.astype(q_ref.dtype)
        if with_mse:
            err = out - x
            mse_refs[0][...] = jnp.sum(err * err, axis=1, keepdims=True) * inv_k

    if with_mse:
        out_specs = (pl.BlockSpec((tile_r, K), lambda i: (i, 0)),
                     pl.BlockSpec((tile_r, 1), lambda i: (i, 0)))
        out_shape = (jax.ShapeDtypeStruct((R_pad, K), out_dtype),
                     jax.ShapeDtypeStruct((R_pad, 1), jnp.float32))
    else:
        out_specs = pl.BlockSpec((tile_r, K), lambda i: (i, 0))
        out_shape = jax.ShapeDtypeStruct((R_pad, K), out_dtype)

    fn = pl.pallas_call(
        kernel,
        grid=(R_pad // tile_r,),
        in_specs=[pl.BlockSpec((tile_r, 1), lambda i: (i, 0)),
                  pl.BlockSpec((tile_r, K), lambda i: (i, 0))],
        out_specs=out_specs,
        out_shape=out_shape,
        compiler_params=pltpu.CompilerParams(
            dimension_semantics=("parallel",),
            vmem_limit_bytes=_VMEM_LIMIT),
    )
    return jax.jit(lambda scale_rows, x2d: fn(scale_rows, x2d))


def _get_apply_fn(R_pad, tile_r, K, base_grid, outlier_grid, use_outlier,
                  with_mse, out_dtype, grid_key):
    key = (R_pad, tile_r, K, grid_key, bool(with_mse), np.dtype(out_dtype).name)
    if key not in _APPLY_FN_CACHE:
        _APPLY_FN_CACHE[key] = _build_apply_fn(
            R_pad, tile_r, K, base_grid, outlier_grid, use_outlier, with_mse, out_dtype)
    return _APPLY_FN_CACHE[key]


# ----------------------------------------------------------------------------
# Pallas kernel 3: addmm  (y = bias + x2d @ W) -- the Conv1D "conv" forward.
# bf16-fed MXU, f32 accumulation directly in the output block, bias folded into
# the k==0 partial product (no separate init/write pass).
# ----------------------------------------------------------------------------
def _build_addmm_fn(Mp, Kp, Np, tm, tk, tn):
    def kernel(x_ref, w_ref, b_ref, o_ref):
        part = jnp.dot(x_ref[...], w_ref[...], preferred_element_type=jnp.float32)

        @pl.when(pl.program_id(2) == 0)
        def _():
            o_ref[...] = b_ref[...] + part        # (1, tn) broadcasts over (tm, tn)

        @pl.when(pl.program_id(2) > 0)
        def _():
            o_ref[...] += part

    fn = pl.pallas_call(
        kernel,
        grid=(Mp // tm, Np // tn, Kp // tk),
        in_specs=[pl.BlockSpec((tm, tk), lambda i, j, k: (i, k)),
                  pl.BlockSpec((tk, tn), lambda i, j, k: (k, j)),
                  pl.BlockSpec((1, tn), lambda i, j, k: (0, j))],
        out_specs=pl.BlockSpec((tm, tn), lambda i, j, k: (i, j)),
        out_shape=jax.ShapeDtypeStruct((Mp, Np), jnp.float32),
        compiler_params=pltpu.CompilerParams(
            dimension_semantics=("parallel", "parallel", "arbitrary")),
    )
    return jax.jit(lambda xb, wb, bb: fn(xb, wb, bb))


def _get_addmm_fn(Mp, Kp, Np, tm, tk, tn):
    key = (Mp, Kp, Np, tm, tk, tn)
    if key not in _ADDMM_FN_CACHE:
        _ADDMM_FN_CACHE[key] = _build_addmm_fn(Mp, Kp, Np, tm, tk, tn)
    return _ADDMM_FN_CACHE[key]


# ----------------------------------------------------------------------------
# Quantizer glue (mirrors TensorQuantizer.tensor_forward / _init / search_mse).
# ----------------------------------------------------------------------------
class ANTTensorQuantizer:
    def __init__(self, mode, bit, is_signed, is_input, args):
        self.mode = mode
        self.bit = int(bit)
        self.is_signed = is_signed
        self.is_input = is_input
        self.is_perchannel = not is_input
        self.args = args
        self.alpha = None
        self.quant_grid = None
        self.outliers = None
        self.grid_concat = None
        self.use_outlier = not args["no_outlier"]
        self._grid_key = None
        self.mse = 0.0
        self.inited = False

    # -- 2D views / per-row scales ------------------------------------------
    def _2d_view(self, tensor):
        if self.is_perchannel:
            return tensor.reshape(tensor.shape[0], -1)
        return tensor.reshape(-1, tensor.shape[-1])

    def _scale_rows(self, alpha, R):
        max_grid = float(np.max(self.quant_grid))
        if self.is_perchannel:
            return jnp.asarray(alpha, jnp.float32).reshape(R, 1) / max_grid
        s = jnp.asarray(alpha, jnp.float32) / max_grid
        return jnp.full((R, 1), 1.0, jnp.float32) * s

    # Equivalent of Quantizer._forward (STE is identity in forward); f32 + per-row MSE.
    def _forward(self, tensor, alpha):
        shape = tensor.shape
        x2d = self._2d_view(tensor)
        R, K = x2d.shape
        tile_r, R_pad = _row_tiling(R, K, align=8)
        scale_rows = self._scale_rows(alpha, R)
        fn = _get_apply_fn(R_pad, tile_r, K, self.quant_grid, self.outliers,
                           self.use_outlier, True, jnp.float32, self._grid_key)
        q2d, mse_rows = fn(_pad_rows(scale_rows, R_pad), _pad_rows(x2d, R_pad))
        return q2d[:R].reshape(shape), mse_rows[:R]

    # Steady-state fake-quantization: no MSE output, optional bf16 output dtype.
    def quantize_fast(self, tensor, out_dtype=jnp.float32):
        if self.mode == "base":
            return tensor
        if not self.inited:
            self._init(tensor)
        shape = tensor.shape
        x2d = self._2d_view(tensor)
        R, K = x2d.shape
        align = 16 if out_dtype == jnp.bfloat16 else 8
        tile_r, R_pad = _row_tiling(R, K, align=align)
        scale_rows = self._scale_rows(self.alpha, R)
        fn = _get_apply_fn(R_pad, tile_r, K, self.quant_grid, self.outliers,
                           self.use_outlier, False, out_dtype, self._grid_key)
        q2d = fn(_pad_rows(scale_rows, R_pad), _pad_rows(x2d, R_pad))
        return q2d[:R].reshape(shape)

    # Fused candidate search: one kernel pass evaluates every candidate scale.
    def _search_candidates(self, x2d, base_scale_rows, lb, ub):
        ratios64 = [i * 0.01 for i in range(lb, ub, 2)]
        NC = len(ratios64)
        if NC == 0:
            return None, ratios64
        ratios = jnp.asarray(np.asarray(ratios64, np.float32))
        inv_ratios = jnp.asarray(np.asarray([1.0 / r for r in ratios64], np.float32))
        R, K = x2d.shape
        tile_r, R_pad = _row_tiling(R, K, align=8)
        fn = _get_search_fn(R_pad, tile_r, K, NC, self.quant_grid, self.outliers,
                            self.use_outlier, self._grid_key)
        mse = fn(ratios, inv_ratios, _pad_rows(base_scale_rows, R_pad),
                 _pad_rows(x2d, R_pad))
        return mse[:R, :NC], ratios64

    # Equivalent of Quantizer.search_mse (per-candidate MSE computed in-kernel).
    def _search_mse(self, tensor):
        a = self.args
        max_grid = float(np.max(self.quant_grid))
        if self.is_perchannel and not self.is_input:
            x2d = tensor.reshape(tensor.shape[0], -1)
            if not a["no_outlier"]:
                mean = jnp.mean(x2d, axis=-1)
                std = jnp.std(x2d, axis=-1, ddof=1)          # torch unbiased std
                x_max = jnp.maximum(jnp.abs(mean + 3 * std), jnp.abs(mean - 3 * std))
            else:
                x_max = jnp.max(jnp.abs(x2d), axis=-1)
            base = x_max[:, None]                            # (R, 1)
            mse, ratios = self._search_candidates(x2d, base / max_grid,
                                                  int(a["w_low"]), int(a["w_up"]))
            if mse is None:
                return base
            idx = jnp.argmin(mse, axis=1)                    # first-min per row (torch `<`)
            ratio_sel = jnp.asarray(np.asarray(ratios, np.float32))[idx][:, None]
            return base * ratio_sel
        else:
            x2d = tensor.reshape(-1, tensor.shape[-1])
            if not a["no_outlier"]:
                mean = jnp.mean(tensor)
                std = jnp.std(tensor, ddof=1)
                x_max = jnp.maximum(jnp.abs(mean + 3 * std), jnp.abs(mean - 3 * std))
            else:
                x_max = jnp.max(jnp.abs(tensor))
            base_rows = jnp.full((x2d.shape[0], 1), 1.0, jnp.float32) * (x_max / max_grid)
            mse, ratios = self._search_candidates(x2d, base_rows,
                                                  int(a["a_low"]), int(a["a_up"]))
            if mse is None:
                return x_max
            scores = jnp.mean(mse, axis=0)                   # per-tensor MSE per candidate
            idx = int(jnp.argmin(scores))                    # first-min (torch `<`)
            return x_max * float(ratios[idx])

    # Equivalent of Quantizer._init_quant_para.
    def _init(self, tensor):
        if float(jnp.min(tensor)) < 0:
            self.is_signed = True
        self.outliers = outlier_value(self.bit, self.is_signed)
        if self.bit > 6:
            self.mode = "int"
        # TODO(synk): adaptive 'ant-*' numeric-type search (search_adaptive_numeric_type)
        # not implemented; only 'int'/'flint' grids.
        if self.mode == "flint":
            self.quant_grid = flint_value(self.bit, self.is_signed)
        elif self.mode == "int":
            self.quant_grid = int_value(self.bit, self.is_signed)
        else:
            raise RuntimeError("Unsupported mode: " + str(self.mode))
        self.use_outlier = not self.args["no_outlier"]
        self._grid_key = (self.mode, self.bit, bool(self.is_signed), self.use_outlier)
        if self.use_outlier:
            self.grid_concat = np.sort(np.concatenate([self.quant_grid, self.outliers]))
        else:
            self.grid_concat = np.sort(self.quant_grid)
        if self.is_perchannel:
            self.alpha = jnp.max(jnp.abs(tensor.reshape(tensor.shape[0], -1)),
                                 axis=1, keepdims=True)
        else:
            self.alpha = jnp.max(jnp.abs(tensor))
        self.alpha = self._search_mse(tensor)
        _, mse_rows = self._forward(tensor, self.alpha)
        self.mse = float(jnp.mean(mse_rows))
        self.inited = True

    # Equivalent of TensorQuantizer.forward / tensor_forward.
    def __call__(self, tensor, input_tensor=None):
        if self.mode == "base":
            return tensor
        if not self.inited:
            self._init(tensor)
        return self.quantize_fast(tensor, out_dtype=jnp.float32)


# ----------------------------------------------------------------------------
# Conv1dQuantizer (GPT-2 Conv1D + weight/activation quantizers).
# The quantized weight (bf16, tile-padded) and padded bias are cached after init,
# so steady-state forwards run only: input apply kernel (bf16 out) + addmm kernel.
# ----------------------------------------------------------------------------
class Conv1dQuantizerPallas:
    def __init__(self, mode, wbit, abit, args):
        assert mode is not None
        self.quant_weight = ANTTensorQuantizer(mode, wbit, True, False, args)
        self.quant_input = ANTTensorQuantizer(mode, abit, False, True, args)
        self.weight = None
        self.bias = None
        self.nf = None
        self._w_ready = False
        self._w_pad = None
        self._b_pad = None
        self._w_dims = None

    def set_param(self, nf, weight, bias):
        self.nf = nf
        self.weight = weight
        self.bias = bias
        self._w_ready = False

    def _prepare_weight(self, x):
        # Quantize the weight once (alpha/grid are fixed after init) and cache the bf16,
        # tile-padded operand + padded bias: no per-forward weight work remains.
        wq = self.quant_weight(self.weight, x)      # Pallas apply kernel (init on 1st call)
        nx, nf = self.weight.shape
        tk = _pick_tile(nx, 512, 128)
        tn = _pick_tile(nf, 512, 128)
        Kp, Np = _round_up(nx, tk), _round_up(nf, tn)
        wb = wq.astype(jnp.bfloat16)
        if (Kp, Np) != (nx, nf):
            wb = jnp.pad(wb, ((0, Kp - nx), (0, Np - nf)))
        bias = self.bias if self.bias is not None else jnp.zeros((nf,), jnp.float32)
        b2 = bias.reshape(1, nf).astype(jnp.float32)
        if Np != nf:
            b2 = jnp.pad(b2, ((0, 0), (0, Np - nf)))
        self._w_pad = jax.block_until_ready(wb)
        self._b_pad = jax.block_until_ready(b2)
        self._w_dims = (nx, nf, Kp, Np, tk, tn)
        self._w_ready = True

    def _conv_forward(self, xq):
        nx, nf, Kp, Np, tk, tn = self._w_dims
        size_out = xq.shape[:-1] + (nf,)
        x2d = xq.reshape(-1, nx)
        M = x2d.shape[0]
        tm = _pick_tile(M, 256, 8)
        Mp = _round_up(M, tm)
        xb = x2d.astype(jnp.bfloat16)               # no-op when xq is already bf16
        if (Mp, Kp) != (M, nx):
            xb = jnp.pad(xb, ((0, Mp - M), (0, Kp - nx)))
        fn = _get_addmm_fn(Mp, Kp, Np, tm, tk, tn)
        y = fn(xb, self._w_pad, self._b_pad)[:M, :nf]
        return y.reshape(size_out)

    def __call__(self, x):
        if not self._w_ready:
            self._prepare_weight(x)
        xq = self.quant_input.quantize_fast(x, out_dtype=jnp.bfloat16)
        return self._conv_forward(xq)


# ----------------------------------------------------------------------------
# Pure-JAX reference of Quantizer._forward (mirrors the torch code verbatim)
# used to cross-check the Pallas kernels.
# ----------------------------------------------------------------------------
def ref_quantizer_forward(tensor, q):
    max_grid = float(np.max(q.quant_grid))
    scale = jnp.asarray(q.alpha, jnp.float32) / max_grid
    shape = tensor.shape
    if q.is_perchannel:
        data = (tensor.reshape(shape[0], -1) / scale).reshape(shape)
    else:
        data = tensor / scale
    grid = jnp.asarray(q.grid_concat, jnp.float32)
    flat = data.reshape(-1)
    qv = grid[jnp.argmin(jnp.abs(flat[:, None] - grid[None, :]), axis=-1)]
    if not q.args["no_outlier"]:
        mask = jnp.abs(qv) > 32
        vo = jnp.roll(mask, 1).at[::2].set(False)
        ve = jnp.roll(mask & ~vo, -1).at[1::2].set(False)
        victim = vo | ve
        qv = qv * (~victim)
    qv = qv.reshape(shape)
    if q.is_perchannel:
        return (qv.reshape(shape[0], -1) * scale).reshape(shape)
    return qv * scale


# ----------------------------------------------------------------------------
if __name__ == "__main__":
    # args of the ANT repo (chosen deterministic values for this synthetic run)
    ARGS = dict(w_up=100.0, w_low=50.0, a_up=100.0, a_low=50.0,
                percent=100.0, search=False, no_outlier=False)

    B, S, NX, NF = 2, 8, 256, 128
    key = jax.random.PRNGKey(0)
    kw, kb, kx = jax.random.split(key, 3)
    weight = (0.02 * jax.random.normal(kw, (NX, NF))).astype(jnp.float32)
    bias = (0.1 * jax.random.normal(kb, (NF,))).astype(jnp.float32)
    x = jax.random.normal(kx, (B, S, NX), dtype=jnp.float32)

    mod = Conv1dQuantizerPallas(mode="int", wbit=4, abit=4, args=ARGS)
    mod.set_param(NF, weight, bias)

    out = mod(x)
    out = jax.block_until_ready(out)
    assert out.shape == (B, S, NF)

    # second call exercises the cached-weight steady-state path
    out2 = jax.block_until_ready(mod(x))
    np.testing.assert_allclose(np.asarray(out2), np.asarray(out), rtol=0, atol=0)

    # --- correctness cross-check against a pure-JAX reference -------------
    qw_ref = ref_quantizer_forward(weight, mod.quant_weight)
    qx_ref = ref_quantizer_forward(x, mod.quant_input)
    ref_out = (qx_ref.reshape(-1, NX) @ qw_ref + bias).reshape(B, S, NF)

    qw_pal, _ = mod.quant_weight._forward(weight, mod.quant_weight.alpha)
    qx_pal, _ = mod.quant_input._forward(x, mod.quant_input.alpha)

    np.testing.assert_allclose(np.asarray(qw_pal), np.asarray(qw_ref),
                               rtol=1e-4, atol=1e-5)
    np.testing.assert_allclose(np.asarray(qx_pal), np.asarray(qx_ref),
                               rtol=1e-4, atol=1e-5)
    np.testing.assert_allclose(np.asarray(out), np.asarray(ref_out),
                               rtol=2e-2, atol=2e-2)

    print("KERNEL_OK")
</pallas_src>

<mosaic_0001>
module attributes {stable_mosaic.version = 11 : i64} {
  func.func @kernel(%arg0: i32, %arg1: memref<25xf32, #tpu.memory_space<smem>>, %arg2: memref<25xf32, #tpu.memory_space<smem>>, %arg3: memref<128x1xf32, #tpu.memory_space<vmem>>, %arg4: memref<128x128xf32, #tpu.memory_space<vmem>>, %arg5: memref<128x128xf32, #tpu.memory_space<vmem>>) attributes {dimension_semantics = [#tpu.dimension_semantics<parallel>], iteration_bounds = array<i64: 2>, scalar_prefetch = 2 : i64, scratch_operands = 0 : i64, tpu.core_type = #tpu.core_type<tc>, window_params = [{transform_indices = @transform_0, window_bounds = array<i64: 128, 1>}, {transform_indices = @transform_1, window_bounds = array<i64: 128, 128>}, {transform_indices = @transform_2, window_bounds = array<i64: 128, 128>}]} {
    %c0 = arith.constant 0 : index
    %c0_0 = arith.constant 0 : index
    %0 = vector.load %arg4[%c0, %c0_0] : memref<128x128xf32, #tpu.memory_space<vmem>>, vector<128x128xf32>
    %c0_1 = arith.constant 0 : index
    %c0_2 = arith.constant 0 : index
    %1 = vector.load %arg3[%c0_1, %c0_2] : memref<128x1xf32, #tpu.memory_space<vmem>>, vector<128x1xf32>
    %cst = arith.constant 0.000000e+00 : f32
    %2 = vector.broadcast %cst : f32 to vector<128x1xf32>
    %3 = arith.cmpf oeq, %1, %2 : vector<128x1xf32>
    %cst_3 = arith.constant 1.000000e+00 : f32
    %4 = vector.broadcast %cst_3 : f32 to vector<128x1xf32>
    %5 = arith.select %3, %4, %1 : vector<128x1xi1>, vector<128x1xf32>
    %cst_4 = arith.constant 1.000000e+00 : f32
    %6 = vector.broadcast %cst_4 : f32 to vector<128x1xf32>
    %7 = arith.divf %6, %5 : vector<128x1xf32>
    %8 = vector.broadcast %7 : vector<128x1xf32> to vector<128x128xf32>
    %9 = arith.mulf %0, %8 : vector<128x128xf32>
    %10 = tpu.iota {dimensions = array<i32: 1>} : vector<128x128xi32>
    %11 = tpu.iota {dimensions = array<i32: 1>} : vector<128x128xi32>
    %c1_i32 = arith.constant 1 : i32
    %12 = vector.broadcast %c1_i32 : i32 to vector<128x128xi32>
    %13 = arith.andi %11, %12 : vector<128x128xi32>
    %c1_i32_5 = arith.constant 1 : i32
    %14 = vector.broadcast %c1_i32_5 : i32 to vector<128x128xi32>
    %15 = arith.cmpi eq, %13, %14 : vector<128x128xi32>
    %cst_6 = arith.constant 0.000000e+00 : f32
    %16 = vector.broadcast %cst_6 : f32 to vector<128x128xf32>
    %c0_i32 = arith.constant 0 : i32
    %c12_i32 = arith.constant 12 : i32
    %17 = arith.addi %c0_i32, %c12_i32 : i32
    %c1_i32_7 = arith.constant 1 : i32
    %18 = scf.for %arg6 = %c0_i32 to %17 step %c1_i32_7 iter_args(%arg7 = %16) -> (vector<128x128xf32>)  : i32 {
      %c2_i32 = arith.constant 2 : i32
      %130 = arith.muli %c2_i32, %arg6 : i32
      %131 = arith.index_cast %130 : i32 to index
      %132 = memref.load %arg1[%131] : memref<25xf32, #tpu.memory_space<smem>>
      %133 = arith.index_cast %130 : i32 to index
      %134 = memref.load %arg2[%133] : memref<25xf32, #tpu.memory_space<smem>>
      %135 = vector.broadcast %134 : f32 to vector<128x128xf32>
      %136 = arith.mulf %9, %135 : vector<128x128xf32>
      %cst_53 = arith.constant 2.500000e-01 : f32
      %137 = vector.broadcast %cst_53 : f32 to vector<128x128xf32>
      %138 = arith.mulf %136, %137 : vector<128x128xf32>
      %cst_54 = arith.constant 6.500000e+00 : f32
      %139 = vector.broadcast %cst_54 : f32 to vector<128x128xf32>
      %140 = arith.addf %138, %139 : vector<128x128xf32>
      %141 = math.ceil %140 : vector<128x128xf32>
      %cst_55 = arith.constant 0.000000e+00 : f32
      %cst_56 = arith.constant 1.400000e+01 : f32
      %142 = vector.broadcast %cst_55 : f32 to vector<128x128xf32>
      %143 = arith.maximumf %142, %141 : vector<128x128xf32>
      %144 = vector.broadcast %cst_56 : f32 to vector<128x128xf32>
      %145 = arith.minimumf %144, %143 : vector<128x128xf32>
      %cst_57 = arith.constant 4.000000e+00 : f32
      %146 = vector.broadcast %cst_57 : f32 to vector<128x128xf32>
      %147 = arith.mulf %145, %146 : vector<128x128xf32>
      %cst_58 = arith.constant -2.800000e+01 : f32
      %148 = vector.broadcast %cst_58 : f32 to vector<128x128xf32>
      %149 = arith.addf %147, %148 : vector<128x128xf32>
      %cst_59 = arith.constant -3.840000e+02 : f32
      %150 = vector.broadcast %cst_59 : f32 to vector<128x128xf32>
      %cst_60 = arith.constant -3.200000e+02 : f32
      %151 = vector.broadcast %cst_60 : f32 to vector<128x128xf32>
      %152 = arith.cmpf ogt, %136, %151 : vector<128x128xf32>
      %cst_61 = arith.constant -2.560000e+02 : f32
      %153 = vector.broadcast %cst_61 : f32 to vector<128x128xf32>
      %154 = arith.select %152, %153, %150 : vector<128x128xi1>, vector<128x128xf32>
      %cst_62 = arith.constant -2.240000e+02 : f32
      %155 = vector.broadcast %cst_62 : f32 to vector<128x128xf32>
      %156 = arith.cmpf ogt, %136, %155 : vector<128x128xf32>
      %cst_63 = arith.constant -1.920000e+02 : f32
      %157 = vector.broadcast %cst_63 : f32 to vector<128x128xf32>
      %158 = arith.select %156, %157, %154 : vector<128x128xi1>, vector<128x128xf32>
      %cst_64 = arith.constant -1.600000e+02 : f32
      %159 = vector.broadcast %cst_64 : f32 to vector<128x128xf32>
      %160 = arith.cmpf ogt, %136, %159 : vector<128x128xf32>
      %cst_65 = arith.constant -1.280000e+02 : f32
      %161 = vector.broadcast %cst_65 : f32 to vector<128x128xf32>
      %162 = arith.select %160, %161, %158 : vector<128x128xi1>, vector<128x128xf32>
      %cst_66 = arith.constant -1.120000e+02 : f32
      %163 = vector.broadcast %cst_66 : f32 to vector<128x128xf32>
      %164 = arith.cmpf ogt, %136, %163 : vector<128x128xf32>
      %cst_67 = arith.constant -9.600000e+01 : f32
      %165 = vector.broadcast %cst_67 : f32 to vector<128x128xf32>
      %166 = arith.select %164, %165, %162 : vector<128x128xi1>, vector<128x128xf32>
      %cst_68 = arith.constant -8.000000e+01 : f32
      %167 = vector.broadcast %cst_68 : f32 to vector<128x128xf32>
      %168 = arith.cmpf ogt, %136, %167 : vector<128x128xf32>
      %cst_69 = arith.constant -6.400000e+01 : f32
      %169 = vector.broadcast %cst_69 : f32 to vector<128x128xf32>
      %170 = arith.select %168, %169, %166 : vector<128x128xi1>, vector<128x128xf32>
      %cst_70 = arith.constant -5.600000e+01 : f32
      %171 = vector.broadcast %cst_70 : f32 to vector<128x128xf32>
      %172 = arith.cmpf ogt, %136, %171 : vector<128x128xf32>
      %cst_71 = arith.constant -4.800000e+01 : f32
      %173 = vector.broadcast %cst_71 : f32 to vector<128x128xf32>
      %174 = arith.select %172, %173, %170 : vector<128x128xi1>, vector<128x128xf32>
      %cst_72 = arith.constant 0.000000e+00 : f32
      %175 = vector.broadcast %cst_72 : f32 to vector<128x128xf32>
      %176 = arith.cmpf ogt, %136, %175 : vector<128x128xf32>
      %cst_73 = arith.constant 4.800000e+01 : f32
      %177 = vector.broadcast %cst_73 : f32 to vector<128x128xf32>
      %178 = arith.select %176, %177, %174 : vector<128x128xi1>, vector<128x128xf32>
      %cst_74 = arith.constant 5.600000e+01 : f32
      %179 = vector.broadcast %cst_74 : f32 to vector<128x128xf32>
      %180 = arith.cmpf ogt, %136, %179 : vector<128x128xf32>
      %cst_75 = arith.constant 6.400000e+01 : f32
      %181 = vector.broadcast %cst_75 : f32 to vector<128x128xf32>
      %182 = arith.select %180, %181, %178 : vector<128x128xi1>, vector<128x128xf32>
      %cst_76 = arith.constant 8.000000e+01 : f32
      %183 = vector.broadcast %cst_76 : f32 to vector<128x128xf32>
      %184 = arith.cmpf ogt, %136, %183 : vector<128x128xf32>
      %cst_77 = arith.constant 9.600000e+01 : f32
      %185 = vector.broadcast %cst_77 : f32 to vector<128x128xf32>
      %186 = arith.select %184, %185, %182 : vector<128x128xi1>, vector<128x128xf32>
      %cst_78 = arith.constant 1.120000e+02 : f32
      %187 = vector.broadcast %cst_78 : f32 to vector<128x128xf32>
      %188 = arith.cmpf ogt, %136, %187 : vector<128x128xf32>
      %cst_79 = arith.constant 1.280000e+02 : f32
      %189 = vector.broadcast %cst_79 : f32 to vector<128x128xf32>
      %190 = arith.select %188, %189, %186 : vector<128x128xi1>, vector<128x128xf32>
      %cst_80 = arith.constant 1.600000e+02 : f32
      %191 = vector.broadcast %cst_80 : f32 to vector<128x128xf32>
      %192 = arith.cmpf ogt, %136, %191 : vector<128x128xf32>
      %cst_81 = arith.constant 1.920000e+02 : f32
      %193 = vector.broadcast %cst_81 : f32 to vector<128x128xf32>
      %194 = arith.select %192, %193, %190 : vector<128x128xi1>, vector<128x128xf32>
      %cst_82 = arith.constant 2.240000e+02 : f32
      %195 = vector.broadcast %cst_82 : f32 to vector<128x128xf32>
      %196 = arith.cmpf ogt, %136, %195 : vector<128x128xf32>
      %cst_83 = arith.constant 2.560000e+02 : f32
      %197 = vector.broadcast %cst_83 : f32 to vector<128x128xf32>
      %198 = arith.select %196, %197, %194 : vector<128x128xi1>, vector<128x128xf32>
      %cst_84 = arith.constant 3.200000e+02 : f32
      %199 = vector.broadcast %cst_84 : f32 to vector<128x128xf32>
      %200 = arith.cmpf ogt, %136, %199 : vector<128x128xf32>
      %cst_85 = arith.constant 3.840000e+02 : f32
      %201 = vector.broadcast %cst_85 : f32 to vector<128x128xf32>
      %202 = arith.select %200, %201, %198 : vector<128x128xi1>, vector<128x128xf32>
      %203 = arith.subf %136, %202 : vector<128x128xf32>
      %204 = math.absf %203 : vector<128x128xf32>
      %205 = arith.subf %136, %149 : vector<128x128xf32>
      %206 = math.absf %205 : vector<128x128xf32>
      %207 = arith.cmpf olt, %204, %206 : vector<128x128xf32>
      %208 = arith.cmpf oeq, %204, %206 : vector<128x128xf32>
      %209 = arith.cmpf olt, %202, %149 : vector<128x128xf32>
      %210 = arith.andi %208, %209 : vector<128x128xi1>
      %211 = arith.ori %207, %210 : vector<128x128xi1>
      %212 = arith.select %211, %202, %149 : vector<128x128xi1>, vector<128x128xf32>
      %213 = math.absf %212 : vector<128x128xf32>
      %c1_i32_86 = arith.constant 1 : i32
      %214 = tpu.dynamic_rotate %213 by %c1_i32_86 dim 1 : vector<128x128xf32>, i32 -> vector<128x128xf32>
      %cst_87 = arith.constant 3.200000e+01 : f32
      %215 = vector.broadcast %cst_87 : f32 to vector<128x128xf32>
      %216 = arith.cmpf ogt, %214, %215 : vector<128x128xf32>
      %217 = arith.andi %15, %216 : vector<128x128xi1>
      %cst_88 = arith.constant 0.000000e+00 : f32
      %218 = vector.broadcast %cst_88 : f32 to vector<128x128xf32>
      %219 = arith.select %217, %218, %213 : vector<128x128xi1>, vector<128x128xf32>
      %c127_i32_89 = arith.constant 127 : i32
      %220 = tpu.dynamic_rotate %219 by %c127_i32_89 dim 1 : vector<128x128xf32>, i32 -> vector<128x128xf32>
      %cst_90 = arith.constant dense<true> : vector<128x128xi1>
      %221 = arith.xori %15, %cst_90 : vector<128x128xi1>
      %cst_91 = arith.constant 3.200000e+01 : f32
      %222 = vector.broadcast %cst_91 : f32 to vector<128x128xf32>
      %223 = arith.cmpf ogt, %220, %222 : vector<128x128xf32>
      %224 = arith.andi %221, %223 : vector<128x128xi1>
      %225 = arith.ori %217, %224 : vector<128x128xi1>
      %cst_92 = arith.constant 0.000000e+00 : f32
      %226 = vector.broadcast %cst_92 : f32 to vector<128x128xf32>
      %227 = arith.select %225, %226, %212 : vector<128x128xi1>, vector<128x128xf32>
      %228 = vector.broadcast %132 : f32 to vector<128x1xf32>
      %229 = arith.mulf %1, %228 : vector<128x1xf32>
      %230 = vector.broadcast %229 : vector<128x1xf32> to vector<128x128xf32>
      %231 = arith.mulf %227, %230 : vector<128x128xf32>
      %232 = arith.subf %231, %0 : vector<128x128xf32>
      %233 = arith.mulf %232, %232 : vector<128x128xf32>
      %cst_93 = arith.constant dense<0.000000e+00> : vector<128xf32>
      %234 = vector.multi_reduction <add>, %233, %cst_93 [1] : vector<128x128xf32> to vector<128xf32>
      %235 = vector.shape_cast %234 : vector<128xf32> to vector<128x1xf32>
      %cst_94 = arith.constant 7.812500e-03 : f32
      %236 = vector.broadcast %cst_94 : f32 to vector<128x1xf32>
      %237 = arith.mulf %235, %236 : vector<128x1xf32>
      %238 = vector.broadcast %130 : i32 to vector<128x128xi32>
      %239 = arith.cmpi eq, %10, %238 : vector<128x128xi32>
      %240 = vector.shape_cast %237 : vector<128x1xf32> to vector<128x1xf32>
      %241 = vector.broadcast %240 : vector<128x1xf32> to vector<128x128xf32>
      %242 = arith.select %239, %241, %arg7 : vector<128x128xi1>, vector<128x128xf32>
      %c1_i32_95 = arith.constant 1 : i32
      %243 = arith.addi %130, %c1_i32_95 : i32
      %244 = arith.index_cast %243 : i32 to index
      %245 = memref.load %arg1[%244] : memref<25xf32, #tpu.memory_space<smem>>
      %246 = arith.index_cast %243 : i32 to index
      %247 = memref.load %arg2[%246] : memref<25xf32, #tpu.memory_space<smem>>
      %248 = vector.broadcast %247 : f32 to vector<128x128xf32>
      %249 = arith.mulf %9, %248 : vector<128x128xf32>
      %cst_96 = arith.constant 2.500000e-01 : f32
      %250 = vector.broadcast %cst_96 : f32 to vector<128x128xf32>
      %251 = arith.mulf %249, %250 : vector<128x128xf32>
      %cst_97 = arith.constant 6.500000e+00 : f32
      %252 = vector.broadcast %cst_97 : f32 to vector<128x128xf32>
      %253 = arith.addf %251, %252 : vector<128x128xf32>
      %254 = math.ceil %253 : vector<128x128xf32>
      %cst_98 = arith.constant 0.000000e+00 : f32
      %cst_99 = arith.constant 1.400000e+01 : f32
      %255 = vector.broadcast %cst_98 : f32 to vector<128x128xf32>
      %256 = arith.maximumf %255, %254 : vector<128x128xf32>
      %257 = vector.broadcast %cst_99 : f32 to vector<128x128xf32>
      %258 = arith.minimumf %257, %256 : vector<128x128xf32>
      %cst_100 = arith.constant 4.000000e+00 : f32
      %259 = vector.broadcast %cst_100 : f32 to vector<128x128xf32>
      %260 = arith.mulf %258, %259 : vector<128x128xf32>
      %cst_101 = arith.constant -2.800000e+01 : f32
      %261 = vector.broadcast %cst_101 : f32 to vector<128x128xf32>
      %262 = arith.addf %260, %261 : vector<128x128xf32>
      %cst_102 = arith.constant -3.840000e+02 : f32
      %263 = vector.broadcast %cst_102 : f32 to vector<128x128xf32>
      %cst_103 = arith.constant -3.200000e+02 : f32
      %264 = vector.broadcast %cst_103 : f32 to vector<128x128xf32>
      %265 = arith.cmpf ogt, %249, %264 : vector<128x128xf32>
      %cst_104 = arith.constant -2.560000e+02 : f32
      %266 = vector.broadcast %cst_104 : f32 to vector<128x128xf32>
      %267 = arith.select %265, %266, %263 : vector<128x128xi1>, vector<128x128xf32>
      %cst_105 = arith.constant -2.240000e+02 : f32
      %268 = vector.broadcast %cst_105 : f32 to vector<128x128xf32>
      %269 = arith.cmpf ogt, %249, %268 : vector<128x128xf32>
      %cst_106 = arith.constant -1.920000e+02 : f32
      %270 = vector.broadcast %cst_106 : f32 to vector<128x128xf32>
      %271 = arith.select %269, %270, %267 : vector<128x128xi1>, vector<128x128xf32>
      %cst_107 = arith.constant -1.600000e+02 : f32
      %272 = vector.broadcast %cst_107 : f32 to vector<128x128xf32>
      %273 = arith.cmpf ogt, %249, %272 : vector<128x128xf32>
      %cst_108 = arith.constant -1.280000e+02 : f32
      %274 = vector.broadcast %cst_108 : f32 to vector<128x128xf32>
      %275 = arith.select %273, %274, %271 : vector<128x128xi1>, vector<128x128xf32>
      %cst_109 = arith.constant -1.120000e+02 : f32
      %276 = vector.broadcast %cst_109 : f32 to vector<128x128xf32>
      %277 = arith.cmpf ogt, %249, %276 : vector<128x128xf32>
      %cst_110 = arith.constant -9.600000e+01 : f32
      %278 = vector.broadcast %cst_110 : f32 to vector<128x128xf32>
      %279 = arith.select %277, %278, %275 : vector<128x128xi1>, vector<128x128xf32>
      %cst_111 = arith.constant -8.000000e+01 : f32
      %280 = vector.broadcast %cst_111 : f32 to vector<128x128xf32>
      %281 = arith.cmpf ogt, %249, %280 : vector<128x128xf32>
      %cst_112 = arith.constant -6.400000e+01 : f32
      %282 = vector.broadcast %cst_112 : f32 to vector<128x128xf32>
      %283 = arith.select %281, %282, %279 : vector<128x128xi1>, vector<128x128xf32>
      %cst_113 = arith.constant -5.600000e+01 : f32
      %284 = vector.broadcast %cst_113 : f32 to vector<128x128xf32>
      %285 = arith.cmpf ogt, %249, %284 : vector<128x128xf32>
      %cst_114 = arith.constant -4.800000e+01 : f32
      %286 = vector.broadcast %cst_114 : f32 to vector<128x128xf32>
      %287 = arith.select %285, %286, %283 : vector<128x128xi1>, vector<128x128xf32>
      %cst_115 = arith.constant 0.000000e+00 : f32
      %288 = vector.broadcast %cst_115 : f32 to vector<128x128xf32>
      %289 = arith.cmpf ogt, %249, %288 : vector<128x128xf32>
      %cst_116 = arith.constant 4.800000e+01 : f32
      %290 = vector.broadcast %cst_116 : f32 to vector<128x128xf32>
      %291 = arith.select %289, %290, %287 : vector<128x128xi1>, vector<128x128xf32>
      %cst_117 = arith.constant 5.600000e+01 : f32
      %292 = vector.broadcast %cst_117 : f32 to vector<128x128xf32>
      %293 = arith.cmpf ogt, %249, %292 : vector<128x128xf32>
      %cst_118 = arith.constant 6.400000e+01 : f32
      %294 = vector.broadcast %cst_118 : f32 to vector<128x128xf32>
      %295 = arith.select %293, %294, %291 : vector<128x128xi1>, vector<128x128xf32>
      %cst_119 = arith.constant 8.000000e+01 : f32
      %296 = vector.broadcast %cst_119 : f32 to vector<128x128xf32>
      %297 = arith.cmpf ogt, %249, %296 : vector<128x128xf32>
      %cst_120 = arith.constant 9.600000e+01 : f32
      %298 = vector.broadcast %cst_120 : f32 to vector<128x128xf32>
      %299 = arith.select %297, %298, %295 : vector<128x128xi1>, vector<128x128xf32>
      %cst_121 = arith.constant 1.120000e+02 : f32
      %300 = vector.broadcast %cst_121 : f32 to vector<128x128xf32>
      %301 = arith.cmpf ogt, %249, %300 : vector<128x128xf32>
      %cst_122 = arith.constant 1.280000e+02 : f32
      %302 = vector.broadcast %cst_122 : f32 to vector<128x128xf32>
      %303 = arith.select %301, %302, %299 : vector<128x128xi1>, vector<128x128xf32>
      %cst_123 = arith.constant 1.600000e+02 : f32
      %304 = vector.broadcast %cst_123 : f32 to vector<128x128xf32>
      %305 = arith.cmpf ogt, %249, %304 : vector<128x128xf32>
      %cst_124 = arith.constant 1.920000e+02 : f32
      %306 = vector.broadcast %cst_124 : f32 to vector<128x128xf32>
      %307 = arith.select %305, %306, %303 : vector<128x128xi1>, vector<128x128xf32>
      %cst_125 = arith.constant 2.240000e+02 : f32
      %308 = vector.broadcast %cst_125 : f32 to vector<128x128xf32>
      %309 = arith.cmpf ogt, %249, %308 : vector<128x128xf32>
      %cst_126 = arith.constant 2.560000e+02 : f32
      %310 = vector.broadcast %cst_126 : f32 to vector<128x128xf32>
      %311 = arith.select %309, %310, %307 : vector<128x128xi1>, vector<128x128xf32>
      %cst_127 = arith.constant 3.200000e+02 : f32
      %312 = vector.broadcast %cst_127 : f32 to vector<128x128xf32>
      %313 = arith.cmpf ogt, %249, %312 : vector<128x128xf32>
      %cst_128 = arith.constant 3.840000e+02 : f32
      %314 = vector.broadcast %cst_128 : f32 to vector<128x128xf32>
      %315 = arith.select %313, %314, %311 : vector<128x128xi1>, vector<128x128xf32>
      %316 = arith.subf %249, %315 : vector<128x128xf32>
      %317 = math.absf %316 : vector<128x128xf32>
      %318 = arith.subf %249, %262 : vector<128x128xf32>
      %319 = math.absf %318 : vector<128x128xf32>
      %320 = arith.cmpf olt, %317, %319 : vector<128x128xf32>
      %321 = arith.cmpf oeq, %317, %319 : vector<128x128xf32>
      %322 = arith.cmpf olt, %315, %262 : vector<128x128xf32>
      %323 = arith.andi %321, %322 : vector<128x128xi1>
      %324 = arith.ori %320, %323 : vector<128x128xi1>
      %325 = arith.select %324, %315, %262 : vector<128x128xi1>, vector<128x128xf32>
      %326 = math.absf %325 : vector<128x128xf32>
      %c1_i32_129 = arith.constant 1 : i32
      %327 = tpu.dynamic_rotate %326 by %c1_i32_129 dim 1 : vector<128x128xf32>, i32 -> vector<128x128xf32>
      %cst_130 = arith.constant 3.200000e+01 : f32
      %328 = vector.broadcast %cst_130 : f32 to vector<128x128xf32>
      %329 = arith.cmpf ogt, %327, %328 : vector<128x128xf32>
      %330 = arith.andi %15, %329 : vector<128x128xi1>
      %cst_131 = arith.constant 0.000000e+00 : f32
      %331 = vector.broadcast %cst_131 : f32 to vector<128x128xf32>
      %332 = arith.select %330, %331, %326 : vector<128x128xi1>, vector<128x128xf32>
      %c127_i32_132 = arith.constant 127 : i32
      %333 = tpu.dynamic_rotate %332 by %c127_i32_132 dim 1 : vector<128x128xf32>, i32 -> vector<128x128xf32>
      %cst_133 = arith.constant dense<true> : vector<128x128xi1>
      %334 = arith.xori %15, %cst_133 : vector<128x128xi1>
      %cst_134 = arith.constant 3.200000e+01 : f32
      %335 = vector.broadcast %cst_134 : f32 to vector<128x128xf32>
      %336 = arith.cmpf ogt, %333, %335 : vector<128x128xf32>
      %337 = arith.andi %334, %336 : vector<128x128xi1>
      %338 = arith.ori %330, %337 : vector<128x128xi1>
      %cst_135 = arith.constant 0.000000e+00 : f32
      %339 = vector.broadcast %cst_135 : f32 to vector<128x128xf32>
      %340 = arith.select %338, %339, %325 : vector<128x128xi1>, vector<128x128xf32>
      %341 = vector.broadcast %245 : f32 to vector<128x1xf32>
      %342 = arith.mulf %1, %341 : vector<128x1xf32>
      %343 = vector.broadcast %342 : vector<128x1xf32> to vector<128x128xf32>
      %344 = arith.mulf %340, %343 : vector<128x128xf32>
      %345 = arith.subf %344, %0 : vector<128x128xf32>
      %346 = arith.mulf %345, %345 : vector<128x128xf32>
      %cst_136 = arith.constant dense<0.000000e+00> : vector<128xf32>
      %347 = vector.multi_reduction <add>, %346, %cst_136 [1] : vector<128x128xf32> to vector<128xf32>
      %348 = vector.shape_cast %347 : vector<128xf32> to vector<128x1xf32>
      %cst_137 = arith.constant 7.812500e-03 : f32
      %349 = vector.broadcast %cst_137 : f32 to vector<128x1xf32>
      %350 = arith.mulf %348, %349 : vector<128x1xf32>
      %351 = vector.broadcast %243 : i32 to vector<128x128xi32>
      %352 = arith.cmpi eq, %10, %351 : vector<128x128xi32>
      %353 = vector.shape_cast %350 : vector<128x1xf32> to vector<128x1xf32>
      %354 = vector.broadcast %353 : vector<128x1xf32> to vector<128x128xf32>
      %355 = arith.select %352, %354, %242 : vector<128x128xi1>, vector<128x128xf32>
      scf.yield %355 : vector<128x128xf32>
    }
    %c12_i32_8 = arith.constant 12 : i32
    %c24 = arith.constant 24 : index
    %19 = memref.load %arg1[%c24] : memref<25xf32, #tpu.memory_space<smem>>
    %c24_9 = arith.constant 24 : index
    %20 = memref.load %arg2[%c24_9] : memref<25xf32, #tpu.memory_space<smem>>
    %21 = vector.broadcast %20 : f32 to vector<128x128xf32>
    %22 = arith.mulf %9, %21 : vector<128x128xf32>
    %cst_10 = arith.constant 2.500000e-01 : f32
    %23 = vector.broadcast %cst_10 : f32 to vector<128x128xf32>
    %24 = arith.mulf %22, %23 : vector<128x128xf32>
    %cst_11 = arith.constant 6.500000e+00 : f32
    %25 = vector.broadcast %cst_11 : f32 to vector<128x128xf32>
    %26 = arith.addf %24, %25 : vector<128x128xf32>
    %27 = math.ceil %26 : vector<128x128xf32>
    %cst_12 = arith.constant 0.000000e+00 : f32
    %cst_13 = arith.constant 1.400000e+01 : f32
    %28 = vector.broadcast %cst_12 : f32 to vector<128x128xf32>
    %29 = arith.maximumf %28, %27 : vector<128x128xf32>
    %30 = vector.broadcast %cst_13 : f32 to vector<128x128xf32>
    %31 = arith.minimumf %30, %29 : vector<128x128xf32>
    %cst_14 = arith.constant 4.000000e+00 : f32
    %32 = vector.broadcast %cst_14 : f32 to vector<128x128xf32>
    %33 = arith.mulf %31, %32 : vector<128x128xf32>
    %cst_15 = arith.constant -2.800000e+01 : f32
    %34 = vector.broadcast %cst_15 : f32 to vector<128x128xf32>
    %35 = arith.addf %33, %34 : vector<128x128xf32>
    %cst_16 = arith.constant -3.840000e+02 : f32
    %36 = vector.broadcast %cst_16 : f32 to vector<128x128xf32>
    %cst_17 = arith.constant -3.200000e+02 : f32
    %37 = vector.broadcast %cst_17 : f32 to vector<128x128xf32>
    %38 = arith.cmpf ogt, %22, %37 : vector<128x128xf32>
    %cst_18 = arith.constant -2.560000e+02 : f32
    %39 = vector.broadcast %cst_18 : f32 to vector<128x128xf32>
    %40 = arith.select %38, %39, %36 : vector<128x128xi1>, vector<128x128xf32>
    %cst_19 = arith.constant -2.240000e+02 : f32
    %41 = vector.broadcast %cst_19 : f32 to vector<128x128xf32>
    %42 = arith.cmpf ogt, %22, %41 : vector<128x128xf32>
    %cst_20 = arith.constant -1.920000e+02 : f32
    %43 = vector.broadcast %cst_20 : f32 to vector<128x128xf32>
    %44 = arith.select %42, %43, %40 : vector<128x128xi1>, vector<128x128xf32>
    %cst_21 = arith.constant -1.600000e+02 : f32
    %45 = vector.broadcast %cst_21 : f32 to vector<128x128xf32>
    %46 = arith.cmpf ogt, %22, %45 : vector<128x128xf32>
    %cst_22 = arith.constant -1.280000e+02 : f32
    %47 = vector.broadcast %cst_22 : f32 to vector<128x128xf32>
    %48 = arith.select %46, %47, %44 : vector<128x128xi1>, vector<128x128xf32>
    %cst_23 = arith.constant -1.120000e+02 : f32
    %49 = vector.broadcast %cst_23 : f32 to vector<128x128xf32>
    %50 = arith.cmpf ogt, %22, %49 : vector<128x128xf32>
    %cst_24 = arith.constant -9.600000e+01 : f32
    %51 = vector.broadcast %cst_24 : f32 to vector<128x128xf32>
    %52 = arith.select %50, %51, %48 : vector<128x128xi1>, vector<128x128xf32>
    %cst_25 = arith.constant -8.000000e+01 : f32
    %53 = vector.broadcast %cst_25 : f32 to vector<128x128xf32>
    %54 = arith.cmpf ogt, %22, %53 : vector<128x128xf32>
    %cst_26 = arith.constant -6.400000e+01 : f32
    %55 = vector.broadcast %cst_26 : f32 to vector<128x128xf32>
    %56 = arith.select %54, %55, %52 : vector<128x128xi1>, vector<128x128xf32>
    %cst_27 = arith.constant -5.600000e+01 : f32
    %57 = vector.broadcast %cst_27 : f32 to vector<128x128xf32>
    %58 = arith.cmpf ogt, %22, %57 : vector<128x128xf32>
    %cst_28 = arith.constant -4.800000e+01 : f32
    %59 = vector.broadcast %cst_28 : f32 to vector<128x128xf32>
    %60 = arith.select %58, %59, %56 : vector<128x128xi1>, vector<128x128xf32>
    %cst_29 = arith.constant 0.000000e+00 : f32
    %61 = vector.broadcast %cst_29 : f32 to vector<128x128xf32>
    %62 = arith.cmpf ogt, %22, %61 : vector<128x128xf32>
    %cst_30 = arith.constant 4.800000e+01 : f32
    %63 = vector.broadcast %cst_30 : f32 to vector<128x128xf32>
    %64 = arith.select %62, %63, %60 : vector<128x128xi1>, vector<128x128xf32>
    %cst_31 = arith.constant 5.600000e+01 : f32
    %65 = vector.broadcast %cst_31 : f32 to vector<128x128xf32>
    %66 = arith.cmpf ogt, %22, %65 : vector<128x128xf32>
    %cst_32 = arith.constant 6.400000e+01 : f32
    %67 = vector.broadcast %cst_32 : f32 to vector<128x128xf32>
    %68 = arith.select %66, %67, %64 : vector<128x128xi1>, vector<128x128xf32>
    %cst_33 = arith.constant 8.000000e+01 : f32
    %69 = vector.broadcast %cst_33 : f32 to vector<128x128xf32>
    %70 = arith.cmpf ogt, %22, %69 : vector<128x128xf32>
    %cst_34 = arith.constant 9.600000e+01 : f32
    %71 = vector.broadcast %cst_34 : f32 to vector<128x128xf32>
    %72 = arith.select %70, %71, %68 : vector<128x128xi1>, vector<128x128xf32>
    %cst_35 = arith.constant 1.120000e+02 : f32
    %73 = vector.broadcast %cst_35 : f32 to vector<128x128xf32>
    %74 = arith.cmpf ogt, %22, %73 : vector<128x128xf32>
    %cst_36 = arith.constant 1.280000e+02 : f32
    %75 = vector.broadcast %cst_36 : f32 to vector<128x128xf32>
    %76 = arith.select %74, %75, %72 : vector<128x128xi1>, vector<128x128xf32>
    %cst_37 = arith.constant 1.600000e+02 : f32
    %77 = vector.broadcast %cst_37 : f32 to vector<128x128xf32>
    %78 = arith.cmpf ogt, %22, %77 : vector<128x128xf32>
    %cst_38 = arith.constant 1.920000e+02 : f32
    %79 = vector.broadcast %cst_38 : f32 to vector<128x128xf32>
    %80 = arith.select %78, %79, %76 : vector<128x128xi1>, vector<128x128xf32>
    %cst_39 = arith.constant 2.240000e+02 : f32
    %81 = vector.broadcast %cst_39 : f32 to vector<128x128xf32>
    %82 = arith.cmpf ogt, %22, %81 : vector<128x128xf32>
    %cst_40 = arith.constant 2.560000e+02 : f32
    %83 = vector.broadcast %cst_40 : f32 to vector<128x128xf32>
    %84 = arith.select %82, %83, %80 : vector<128x128xi1>, vector<128x128xf32>
    %cst_41 = arith.constant 3.200000e+02 : f32
    %85 = vector.broadcast %cst_41 : f32 to vector<128x128xf32>
    %86 = arith.cmpf ogt, %22, %85 : vector<128x128xf32>
    %cst_42 = arith.constant 3.840000e+02 : f32
    %87 = vector.broadcast %cst_42 : f32 to vector<128x128xf32>
    %88 = arith.select %86, %87, %84 : vector<128x128xi1>, vector<128x128xf32>
    %89 = arith.subf %22, %88 : vector<128x128xf32>
    %90 = math.absf %89 : vector<128x128xf32>
    %91 = arith.subf %22, %35 : vector<128x128xf32>
    %92 = math.absf %91 : vector<128x128xf32>
    %93 = arith.cmpf olt, %90, %92 : vector<128x128xf32>
    %94 = arith.cmpf oeq, %90, %92 : vector<128x128xf32>
    %95 = arith.cmpf olt, %88, %35 : vector<128x128xf32>
    %96 = arith.andi %94, %95 : vector<128x128xi1>
    %97 = arith.ori %93, %96 : vector<128x128xi1>
    %98 = arith.select %97, %88, %35 : vector<128x128xi1>, vector<128x128xf32>
    %99 = math.absf %98 : vector<128x128xf32>
    %c1_i32_43 = arith.constant 1 : i32
    %100 = tpu.dynamic_rotate %99 by %c1_i32_43 dim 1 : vector<128x128xf32>, i32 -> vector<128x128xf32>
    %cst_44 = arith.constant 3.200000e+01 : f32
    %101 = vector.broadcast %cst_44 : f32 to vector<128x128xf32>
    %102 = arith.cmpf ogt, %100, %101 : vector<128x128xf32>
    %103 = arith.andi %15, %102 : vector<128x128xi1>
    %cst_45 = arith.constant 0.000000e+00 : f32
    %104 = vector.broadcast %cst_45 : f32 to vector<128x128xf32>
    %105 = arith.select %103, %104, %99 : vector<128x128xi1>, vector<128x128xf32>
    %c127_i32 = arith.constant 127 : i32
    %106 = tpu.dynamic_rotate %105 by %c127_i32 dim 1 : vector<128x128xf32>, i32 -> vector<128x128xf32>
    %cst_46 = arith.constant dense<true> : vector<128x128xi1>
    %107 = arith.xori %15, %cst_46 : vector<128x128xi1>
    %cst_47 = arith.constant 3.200000e+01 : f32
    %108 = vector.broadcast %cst_47 : f32 to vector<128x128xf32>
    %109 = arith.cmpf ogt, %106, %108 : vector<128x128xf32>
    %110 = arith.andi %107, %109 : vector<128x128xi1>
    %111 = arith.ori %103, %110 : vector<128x128xi1>
    %cst_48 = arith.constant 0.000000e+00 : f32
    %112 = vector.broadcast %cst_48 : f32 to vector<128x128xf32>
    %113 = arith.select %111, %112, %98 : vector<128x128xi1>, vector<128x128xf32>
    %114 = vector.broadcast %19 : f32 to vector<128x1xf32>
    %115 = arith.mulf %1, %114 : vector<128x1xf32>
    %116 = vector.broadcast %115 : vector<128x1xf32> to vector<128x128xf32>
    %117 = arith.mulf %113, %116 : vector<128x128xf32>
    %118 = arith.subf %117, %0 : vector<128x128xf32>
    %119 = arith.mulf %118, %118 : vector<128x128xf32>
    %cst_49 = arith.constant dense<0.000000e+00> : vector<128xf32>
    %120 = vector.multi_reduction <add>, %119, %cst_49 [1] : vector<128x128xf32> to vector<128xf32>
    %121 = vector.shape_cast %120 : vector<128xf32> to vector<128x1xf32>
    %cst_50 = arith.constant 7.812500e-03 : f32
    %122 = vector.broadcast %cst_50 : f32 to vector<128x1xf32>
    %123 = arith.mulf %121, %122 : vector<128x1xf32>
    %c24_i32 = arith.constant 24 : i32
    %124 = vector.broadcast %c24_i32 : i32 to vector<128x128xi32>
    %125 = arith.cmpi eq, %10, %124 : vector<128x128xi32>
    %126 = vector.shape_cast %123 : vector<128x1xf32> to vector<128x1xf32>
    %127 = vector.broadcast %126 : vector<128x1xf32> to vector<128x128xf32>
    %128 = arith.select %125, %127, %18 : vector<128x128xi1>, vector<128x128xf32>
    %c0_51 = arith.constant 0 : index
    %c0_52 = arith.constant 0 : index
    %129 = vector.load %arg5[%c0_51, %c0_52] : memref<128x128xf32, #tpu.memory_space<vmem>>, vector<128x128xf32>
    tpu.vector_store %arg5[%c0_51, %c0_52], %128 {strides = array<i32>} : memref<128x128xf32, #tpu.memory_space<vmem>>, vector<128x128xf32>,
    return
  }
  func.func @transform_0(%arg0: i32, %arg1: memref<25xf32, #tpu.memory_space<smem>>, %arg2: memref<25xf32, #tpu.memory_space<smem>>) -> (i32, i32) {
    %c0_i32 = arith.constant 0 : i32
    %c0_i32_0 = arith.constant 0 : i32
    return %arg0, %c0_i32 : i32, i32
  }
  func.func @transform_1(%arg0: i32, %arg1: memref<25xf32, #tpu.memory_space<smem>>, %arg2: memref<25xf32, #tpu.memory_space<smem>>) -> (i32, i32) {
    %c0_i32 = arith.constant 0 : i32
    %c0_i32_0 = arith.constant 0 : i32
    return %arg0, %c0_i32 : i32, i32
  }
  func.func @transform_2(%arg0: i32, %arg1: memref<25xf32, #tpu.memory_space<smem>>, %arg2: memref<25xf32, #tpu.memory_space<smem>>) -> (i32, i32) {
    %c0_i32 = arith.constant 0 : i32
    %c0_i32_0 = arith.constant 0 : i32
    return %arg0, %c0_i32 : i32, i32
  }
}

</mosaic_0001>

<bundles_post_ra>
// kernel: _lambda_.1
= control target key start
LH: loop header
LB: loop body
LE: loop exit
PB: predicated region body
PF: predicated region fallthrough
CT: control target
= control target key end

     0   :  { %s4573_s21 = smov [#allocation3]   ;;  %s4574_s22 = smov [#allocation4]   ;;  %s8449_s0 = inlined_call_operand.vmem [shape: f32[25], index: 0, kind: input, shape index: {}]   ;;  %s8450_s2 = inlined_call_operand.vmem [shape: f32[256,1], index: 2, kind: input, shape index: {}]   ;;  %s8451_s3 = inlined_call_operand.vmem [shape: f32[256,128], index: 3, kind: input, shape index: {}]   ;;  %s8452_s4 = inlined_call_operand.hbm [shape: f32[256,128], index: 4, kind: output, shape index: {}]   ;;  %s8453_s1 = inlined_call_operand.vmem [shape: f32[25], index: 1, kind: input, shape index: {}]  }
   0x1   :  { %s10_s17 = sshll.u32 %s8449_s0, 4  ;;  %s15_s20 = sshll.u32 %s8453_s1, 4  ;;  %s11_s17 = int_to_ptr.vmem [resolvable:$true] %s10_s17  ;;  %s16_s20 = int_to_ptr.vmem [resolvable:$true] %s15_s20 }
   0x2   :  { %13 = dma.vmem_to_smem %s11_s17, 16, %s4573_s21, [#allocation2] }
   0x3   :  { %18 = dma.vmem_to_smem %s16_s20, 16, %s4574_s22, [#allocation2] }
   0x4   :  { %4483 = dma.done.wait [#allocation2], 32 }
   0x5   :  { %4484 = vsyncadd [#allocation2], 4294967264 }
   0x6   :  { %21 = sfence }
   0x7   :  { %22 = vsyncpa [#allocation6], 0 }
   0x8   :  { %24 = vsyncpa [#allocation6 + $0x1], 0  ;;  %s4617_s23 = smov 0   ;;  %s4619_s24 = smov 0  }
   0x9   :  { %s4621_s0 = smov 0   ;;  %s4623_s25 = smov 0  }
   0xa LB: > { %s4638_s1 = sadd.s32 4294967295, %s4503_s25   ;;  %s4100_s26 = sadd.s32 4294967294, %s4503_s25   ;;  %s4503_s25 = sphi %s4623_s25, %s9248_s25   ;;  %s4499_s0 = sphi %s4621_s0, %s9247_s0   ;;  %s4495_s24 = sphi %s4619_s24, %s9246_s24   ;;  %s4491_s23 = sphi %s4617_s23, %s9245_s23  }
   0xb   : > { %s4642_s27 = sadd.s32 1, %s4503_s25   ;;  %s89_s28 = sadd.s32 1, %s4499_s0 }
   0xc   : > { %s86_s29 = ssub.s32 %s4503_s25, %s4642_s27  ;;  %p99_p0 = scmp.ne.s32.totalorder %s4499_s0, %s4495_s24 }
   0xd   : > { %p87_p1 = scmp.eq.s32.totalorder %s86_s29, 0  ;;  %p100_p2 = scmp.eq.s32.totalorder %s4638_s1, 1 }
   0xe   : > { %p105_p3 = scmp.ne.s32.totalorder %s4495_s24, %s4491_s23  ;;  %p106_p4 = scmp.eq.s32.totalorder %s4100_s26, 1 }
   0xf   : > { %s4653_s30 = scalar_select %p87_p1, %s4499_s0, %s89_s28  }
  0x10   : > { %p4655_p5 = por %p100_p2, %p99_p0  ;;  %p4659_p6 = por %p106_p4, %p105_p3 }
  0x11   : > { %p4103_p7 = scmp.ge.s32.totalorder %s4503_s25, 1  ;;  %p142_p8 = scmp.lt.s32.totalorder %s4503_s25, 3 }
  0x13   : > { %p143_p9 = pnand %p4103_p7, %p142_p8 }
  0x15   : > { %146 = sbr.rel (%p143_p9) target bundleno = 1584 (0x630), region = 28 }
  0x1a   : > { %s4105_s7 = sshll.u32 %s4638_s1, 4  ;;  %v8454_v0 = vmov 0   ;;  %s166_s12 = sand.u32 1, %s4495_s24  }
  0x1b   : > { %4308 = vset.pattern.permute.xlu2 %v8454_v0  ;;  %4307 = vset.pattern.permute.xlu1 %v8454_v0  ;;  %p170_p10 = scmp.lt.s32.totalorder %s4105_s7, 31  ;;  %s5009_s13 = sshll.u32 %s166_s12, 7 }
  0x1c   : > { %4306 = vset.pattern.permute.xlu0 %v8454_v0  ;;  %s5125_s17 = scalar_lea.vmem [#allocation5], %s5009_s13  ;;  %v5153_v0 = vmov 0.0   ;;  %s5159_s18 = smov 0  }
  0x1d   : > { %s9250_s7 = smov (!%p170_p10, %s4105_s7), 31 }
  0x1e   : > { %s4106_s8 = sshll.u32 %s9250_s7, 3 }
  0x1f   : > { %s4677_s11 = scalar_lea.vmem %s8450_s2, %s4106_s8  ;;  %s5019_s16 = scalar_lea.vmem %s8451_s3, %s4106_s8 }
  0x20   : > { %v4680_v1 = vld [vmem:[%s4677_s11 + $0x20] sm:$0xff]  ;;  %v4683_v2 = vld [vmem:[%s4677_s11 + $0x10] sm:$0xff]  ;;  %v4692_v4 = vld [vmem:[%s4677_s11 + $0x28] sm:$0xff] }
  0x21   : > { %8632 = vst [vmem:[#allocation9_spill] sm:$0xff] %v4680_v1  ;;  %v4686_v3 = vld [vmem:[%s4677_s11] sm:$0xff]  ;;  %vm218_vm0 = vcmp.eq.f32.partialorder %v4680_v1, 0.0  ;;  %vm216_vm1 = vcmp.eq.f32.partialorder %v4683_v2, 0.0  ;;  %vm219_vm3 = vcmp.eq.f32.partialorder %v4692_v4, 0.0  ;;  %v4701_v10 = vld [vmem:[%s4677_s11 + $0x18] sm:$0xff] }
  0x22   : > { %8633 = vst [vmem:[#allocation10_spill] sm:$0xff] %v4683_v2  ;;  %vm214_vm2 = vcmp.eq.f32.partialorder %v4686_v3, 0.0  ;;  %v234_v5 = vsel %vm218_vm0, 1.0, %v4680_v1  ;;  %v232_v6 = vsel %vm216_vm1, 1.0, %v4683_v2  ;;  %v4704_v11 = vld [vmem:[%s4677_s11 + $0x8] sm:$0xff]  ;;  %v4709_v15 = vld [vmem:[%s4677_s11 + $0x40] sm:$0xff] }
  0x23   : > { %8634 = vst [vmem:[#allocation11_spill] sm:$0xff] %v4686_v3  ;;  %v4697_v7 = vsel %vm214_vm2, 1.0, %v4686_v3  ;;  %4309 = vrcp.f32 %v234_v5  ;;  %v315_v8 = vand.u32 2147483647, %v234_v5  ;;  %v317_v9 = vand.u32 2147483648, %v234_v5 }
  0x24   : > { %8635 = vst [vmem:[#allocation12_spill] sm:$0xff] %v4692_v4  ;;  %4311 = vrcp.f32 %v232_v6  ;;  %v285_v12 = vand.u32 2147483647, %v232_v6  ;;  %v287_v13 = vand.u32 2147483648, %v232_v6  ;;  %vm311_vm4 = vweird.f32 %v234_v5 }
  0x25   : > { %8636 = vst [vmem:[#allocation13_spill] sm:$0xff] %v4701_v10  ;;  %4313 = vrcp.f32 %v4697_v7  ;;  %vm281_vm5 = vweird.f32 %v232_v6  ;;  %v255_v14 = vand.u32 2147483647, %v4697_v7  ;;  %v257_v16 = vand.u32 2147483648, %v4697_v7 }
  0x26   : > { %8637 = vst [vmem:[#allocation14_spill] sm:$0xff] %v4704_v11  ;;  %v4713_v17 = vsel %vm219_vm3, 1.0, %v4692_v4  ;;  %vm217_vm6 = vcmp.eq.f32.partialorder %v4701_v10, 0.0  ;;  %vm215_vm7 = vcmp.eq.f32.partialorder %v4704_v11, 0.0  ;;  %vm4717_vm8 = vcmp.eq.f32.partialorder %v315_v8, 8.507059e+37 }
  0x27   : > { %8638 = vst [vmem:[#allocation15_spill] sm:$0xff] %v4709_v15  ;;  %v318_v19 = vor.u32 1.1754944e-38, %v317_v9  ;;  %vm251_vm9 = vweird.f32 %v4697_v7  ;;  %4315 = vrcp.f32 %v4713_v17  ;;  %vm4723_vm10 = vcmp.eq.f32.partialorder %v285_v12, 8.507059e+37  ;;  %v4799_v9 = vld [vmem:[%s4677_s11 + $0x38] sm:$0xff]  ;;  %v4802_v12 = vld [vmem:[%s4677_s11 + $0x30] sm:$0xff] }
  0x28   : > { %v288_v22 = vor.u32 1.1754944e-38, %v287_v13  ;;  %v4728_v23 = vsel %vm217_vm6, 1.0, %v4701_v10  ;;  %vm222_vm11 = vcmp.eq.f32.partialorder %v4709_v15, 0.0  ;;  %vm4731_vm12 = vcmp.eq.f32.partialorder %v255_v14, 8.507059e+37  ;;  %8657 = vst [vmem:[#allocation16_spill] sm:$0xff] %v4799_v9 }
  0x29   : > { %v4310_v20 = vpop.eup %4309  ;;  %v330_v27 = vand.u32 2147483647, %v4713_v17  ;;  %4317 = vrcp.f32 %v4728_v23  ;;  %v4738_v28 = vsel %vm215_vm7, 1.0, %v4704_v11  ;;  %v258_v31 = vor.u32 1.1754944e-38, %v257_v16  ;;  %8658 = vst [vmem:[#allocation17_spill] sm:$0xff] %v4802_v12 }
  0x2a   : > { %v4312_v24 = vpop.eup %4311  ;;  %v307_v25 = vmul.f32 %v4310_v20, %v234_v5  ;;  %vm326_vm13 = vweird.f32 %v4713_v17  ;;  %v332_v32 = vand.u32 2147483648, %v4713_v17  ;;  %vm312_vm14 = vweird.f32 %v4310_v20 }
  0x2b   : > { %v4314_v29 = vpop.eup %4313  ;;  %v277_v30 = vmul.f32 %v4312_v24, %v232_v6  ;;  %v300_v35 = vand.u32 2147483647, %v4728_v23  ;;  %vm282_vm15 = vweird.f32 %v4312_v24  ;;  %4319 = vrcp.f32 %v4738_v28  ;;  %vm4751_vm3 = vmor %vm311_vm4, %vm312_vm14 }
  0x2c   : > { %v308_v33 = vsub.f32 1.0, %v307_v25  ;;  %v247_v34 = vmul.f32 %v4314_v29, %v4697_v7  ;;  %vm252_vm1 = vweird.f32 %v4314_v29  ;;  %vm4746_vm2 = vcmp.eq.f32.partialorder %v330_v27, 8.507059e+37  ;;  %vm4759_vm6 = vmor %vm281_vm5, %vm282_vm15  ;;  %v4820_v25 = vld [vmem:[%s4677_s11 + $0x58] sm:$0xff] }
  0x2d   : > { %v278_v36 = vsub.f32 1.0, %v277_v30  ;;  %v4316_v37 = vpop.eup %4315  ;;  %v333_v44 = vor.u32 1.1754944e-38, %v332_v32  ;;  %v302_v45 = vand.u32 2147483648, %v4728_v23  ;;  %vm4763_vm7 = vcmp.eq.f32.partialorder %v300_v35, 8.507059e+37  ;;  %vm4770_vm14 = vmor %vm251_vm9, %vm252_vm1  ;;  %8662 = vst [vmem:[#allocation18_spill] sm:$0xff] %v4820_v25 }
  0x2e   : > { %v309_v38 = vmul.f32 %v4310_v20, %v308_v33  ;;  %v248_v39 = vsub.f32 1.0, %v247_v34  ;;  %v322_v43 = vmul.f32 %v4316_v37, %v4713_v17  ;;  %vm266_vm4 = vweird.f32 %v4738_v28 }
  0x2f   : > { %v279_v42 = vmul.f32 %v4312_v24, %v278_v36  ;;  %v4318_v46 = vpop.eup %4317  ;;  %vm327_vm0 = vweird.f32 %v4316_v37  ;;  %v4780_v57 = vsel %vm222_vm11, 1.0, %v4709_v15  ;;  %v272_v8 = vand.u32 2147483648, %v4738_v28 }
  0x30   : > { %v310_v47 = vadd.f32 %v4310_v20, %v309_v38  ;;  %v249_v49 = vmul.f32 %v4314_v29, %v248_v39  ;;  %v323_v53 = vsub.f32 1.0, %v322_v43  ;;  %v292_v54 = vmul.f32 %v4318_v46, %v4728_v23  ;;  %vm4792_vm9 = vmor %vm326_vm13, %vm327_vm0 }
  0x31   : > { %v280_v51 = vadd.f32 %v4312_v24, %v279_v42  ;;  %vm297_vm5 = vweird.f32 %v4318_v46  ;;  %v4320_v58 = vpop.eup %4319  ;;  %4321 = vrcp.f32 %v4780_v57  ;;  %v303_v18 = vor.u32 1.1754944e-38, %v302_v45 }
  0x32   : > { %v314_v55 = vsel %vm4751_vm3, %v4310_v20, %v310_v47  ;;  %v250_v56 = vadd.f32 %v4314_v29, %v249_v49  ;;  %v324_v61 = vmul.f32 %v4316_v37, %v323_v53  ;;  %v293_v62 = vsub.f32 1.0, %v292_v54 }
  0x33   : > { %v319_v59 = vsel %vm4717_vm8, %v318_v19, %v314_v55  ;;  %v284_v60 = vsel %vm4759_vm6, %v4312_v24, %v280_v51  ;;  %v262_v7 = vmul.f32 %v4320_v58, %v4738_v28  ;;  %vm8659_vm8 = vweird.f32 %v4728_v23 }
  0x34   : > { %508 = vperm.xlu2 %4308, %v319_v59   ;;  %v289_v63 = vsel %vm4723_vm10, %v288_v22, %v284_v60  ;;  %v254_v5 = vsel %vm4770_vm14, %v4314_v29, %v250_v56  ;;  %v325_v14 = vadd.f32 %v4316_v37, %v324_v61  ;;  %v294_v16 = vmul.f32 %v4318_v46, %v293_v62  ;;  %vm4810_vm10 = vmor %vm8659_vm8, %vm297_vm5  ;;  %v4885_v62 = vld [vmem:[%s4677_s11 + $0x70] sm:$0xff] }
  0x35   : > { %498 = vperm.xlu1 %4307, %v289_v63   ;;  %v259_v13 = vsel %vm4731_vm12, %v258_v31, %v254_v5  ;;  %v263_v19 = vsub.f32 1.0, %v262_v7  ;;  %vm267_vm11 = vweird.f32 %v4320_v58  ;;  %v270_v20 = vand.u32 2147483647, %v4738_v28  ;;  %v4842_v28 = vld [vmem:[%s4677_s11 + $0x50] sm:$0xff]  ;;  %8675 = vst [vmem:[#allocation21_spill] sm:$0xff] %v4885_v62 }
  0x36   : > { %488 = vperm.xlu0 %4306, %v259_v13   ;;  %v329_v21 = vsel %vm4792_vm9, %v4316_v37, %v325_v14  ;;  %v295_v22 = vadd.f32 %v4318_v46, %v294_v16  ;;  %vm221_vm12 = vcmp.eq.f32.partialorder %v4799_v9, 0.0  ;;  %vm220_vm13 = vcmp.eq.f32.partialorder %v4802_v12, 0.0  ;;  %vm4828_vm15 = vmor %vm266_vm4, %vm267_vm11  ;;  %8665 = vst [vmem:[#allocation19_spill] sm:$0xff] %v4842_v28 }
  0x37   : > { %v264_v24 = vmul.f32 %v4320_v58, %v263_v19  ;;  %v273_v23 = vor.u32 1.1754944e-38, %v272_v8  ;;  %v334_v26 = vsel %vm4746_vm2, %v333_v44, %v329_v21  ;;  %v237_v30 = vsel %vm221_vm12, 1.0, %v4799_v9  ;;  %v4322_v34 = vpop.eup %4321  ;;  %v4854_v44 = vld [vmem:[%s4677_s11 + $0x48] sm:$0xff] }
  0x38   : > { %v299_v27 = vsel %vm4810_vm10, %v4318_v46, %v295_v22  ;;  %v4834_v31 = vsel %vm220_vm13, 1.0, %v4802_v12  ;;  %vm271_vm0 = vcmp.eq.f32.partialorder %v270_v20, 8.507059e+37  ;;  %4323 = vrcp.f32 %v237_v30  ;;  %8666 = vst [vmem:[#allocation20_spill] sm:$0xff] %v4854_v44 }
  0x39   : > { %v304_v32 = vsel %vm4763_vm7, %v303_v18, %v299_v27  ;;  %v265_v33 = vadd.f32 %v4320_v58, %v264_v24  ;;  %v375_v35 = vand.u32 2147483647, %v4780_v57  ;;  %4325 = vrcp.f32 %v4834_v31 }
  0x3a   : > { %vm225_vm1 = vcmp.eq.f32.partialorder %v4820_v25, 0.0  ;;  %v367_v37 = vmul.f32 %v4322_v34, %v4780_v57  ;;  %v377_v38 = vand.u32 2147483648, %v4780_v57  ;;  %vm371_vm2 = vweird.f32 %v4780_v57 }
  0x3b   : > { %v269_v36 = vsel %vm4828_vm15, %v4320_v58, %v265_v33  ;;  %v360_v40 = vand.u32 2147483647, %v237_v30  ;;  %v362_v41 = vand.u32 2147483648, %v237_v30  ;;  %vm372_vm3 = vweird.f32 %v4322_v34 }
  0x3c   : > { %513 = vperm.xlu2 %4308, %v334_v26   ;;  %v274_v39 = vsel %vm271_vm0, %v273_v23, %v269_v36  ;;  %v368_v42 = vsub.f32 1.0, %v367_v37  ;;  %v4850_v43 = vsel %vm225_vm1, 1.0, %v4820_v25  ;;  %vm224_vm6 = vcmp.eq.f32.partialorder %v4842_v28, 0.0  ;;  %vm4868_vm14 = vmor %vm371_vm2, %vm372_vm3 }
  0x3d   : > { %503 = vperm.xlu1 %4307, %v304_v32   ;;  %vm4856_vm7 = vcmp.eq.f32.partialorder %v375_v35, 8.507059e+37  ;;  %v345_v46 = vand.u32 2147483647, %v4834_v31  ;;  %v347_v47 = vand.u32 2147483648, %v4834_v31  ;;  %4327 = vrcp.f32 %v4850_v43  ;;  %v4922_v32 = vld [vmem:[%s4677_s11 + $0x68] sm:$0xff] }
  0x3e   : > { %493 = vperm.xlu0 %4306, %v274_v39   ;;  %v4324_v48 = vpop.eup %4323  ;;  %v369_v49 = vmul.f32 %v4322_v34, %v368_v42  ;;  %v378_v50 = vor.u32 1.1754944e-38, %v377_v38  ;;  %vm356_vm4 = vweird.f32 %v237_v30  ;;  %v4864_v51 = vsel %vm224_vm6, 1.0, %v4842_v28  ;;  %8680 = vst [vmem:[#allocation22_spill] sm:$0xff] %v4922_v32  ;;  %v5070_v38 = vld [vmem:[%s5019_s16 + $0x70] sm:$0xff] }
  0x3f   : > { %v4326_v52 = vpop.eup %4325  ;;  %v352_v54 = vmul.f32 %v4324_v48, %v237_v30  ;;  %vm341_vm5 = vweird.f32 %v4834_v31  ;;  %4329 = vrcp.f32 %v4864_v51  ;;  %vm223_vm9 = vcmp.eq.f32.partialorder %v4854_v44, 0.0  ;;  %8715 = vst [vmem:[#allocation41_spill] sm:$0xff] %v5070_v38 }
  0x40   : > { %v370_v55 = vadd.f32 %v4322_v34, %v369_v49  ;;  %vm4875_vm8 = vcmp.eq.f32.partialorder %v360_v40, 8.507059e+37  ;;  %v363_v58 = vor.u32 1.1754944e-38, %v362_v41  ;;  %v337_v59 = vmul.f32 %v4326_v52, %v4834_v31 }
  0x41   : > { %v353_v57 = vsub.f32 1.0, %v352_v54  ;;  %vm357_vm10 = vweird.f32 %v4324_v48  ;;  %vm4880_vm11 = vcmp.eq.f32.partialorder %v345_v46, 8.507059e+37  ;;  %v348_v61 = vor.u32 1.1754944e-38, %v347_v47 }
  0x42   : > { %v374_v63 = vsel %vm4868_vm14, %v4322_v34, %v370_v55  ;;  %v338_v5 = vsub.f32 1.0, %v337_v59  ;;  %vm342_vm12 = vweird.f32 %v4326_v52  ;;  %v4890_v6 = vsel %vm223_vm9, 1.0, %v4854_v44  ;;  %vm4897_vm15 = vmor %vm356_vm4, %vm357_vm10 }
  0x43   : > { %v4328_v7 = vpop.eup %4327  ;;  %v379_v8 = vsel %vm4856_vm7, %v378_v50, %v374_v63  ;;  %v354_v13 = vmul.f32 %v4324_v48, %v353_v57  ;;  %vm416_vm13 = vweird.f32 %v4850_v43  ;;  %v420_v14 = vand.u32 2147483647, %v4850_v43  ;;  %vm4907_vm1 = vmor %vm341_vm5, %vm342_vm12  ;;  %v4957_v50 = vld [vmem:[%s4677_s11 + $0x60] sm:$0xff] }
  0x44   : > { %528 = vperm.xlu2 %4308, %v379_v8   ;;  %v339_v17 = vmul.f32 %v4326_v52, %v338_v5  ;;  %v412_v18 = vmul.f32 %v4328_v7, %v4850_v43  ;;  %4331 = vrcp.f32 %v4890_v6  ;;  %vm228_vm0 = vcmp.eq.f32.partialorder %v4885_v62, 0.0  ;;  %8689 = vst [vmem:[#allocation23_spill] sm:$0xff] %v4957_v50 }
  0x45   : > { %v4330_v19 = vpop.eup %4329  ;;  %v355_v20 = vadd.f32 %v4324_v48, %v354_v13  ;;  %v422_v22 = vand.u32 2147483648, %v4850_v43  ;;  %vm401_vm2 = vweird.f32 %v4864_v51  ;;  %v405_v24 = vand.u32 2147483647, %v4864_v51 }
  0x46   : > { %v340_v23 = vadd.f32 %v4326_v52, %v339_v17  ;;  %v413_v26 = vsub.f32 1.0, %v412_v18  ;;  %vm417_vm3 = vweird.f32 %v4328_v7  ;;  %v397_v27 = vmul.f32 %v4330_v19, %v4864_v51 }
  0x47   : > { %v359_v29 = vsel %vm4897_vm15, %v4324_v48, %v355_v20  ;;  %vm402_vm6 = vweird.f32 %v4330_v19  ;;  %v407_v30 = vand.u32 2147483648, %v4864_v51  ;;  %v4919_v31 = vsel %vm228_vm0, 1.0, %v4885_v62  ;;  %vm4932_vm7 = vmor %vm416_vm13, %vm417_vm3  ;;  %v4963_v51 = vld [vmem:[%s4677_s11 + $0x78] sm:$0xff] }
  0x48   : > { %v364_v33 = vsel %vm4875_vm8, %v363_v58, %v359_v29  ;;  %v344_v34 = vsel %vm4907_vm1, %v4326_v52, %v340_v23  ;;  %v414_v35 = vmul.f32 %v4328_v7, %v413_v26  ;;  %v398_v36 = vsub.f32 1.0, %v397_v27  ;;  %vm4949_vm9 = vmor %vm401_vm2, %vm402_vm6  ;;  %8690 = vst [vmem:[#allocation24_spill] sm:$0xff] %v4963_v51 }
  0x49   : > { %523 = vperm.xlu1 %4307, %v364_v33   ;;  %v349_v37 = vsel %vm4880_vm11, %v348_v61, %v344_v34  ;;  %vm4936_vm4 = vcmp.eq.f32.partialorder %v420_v14, 8.507059e+37  ;;  %v423_v40 = vor.u32 1.1754944e-38, %v422_v22  ;;  %4333 = vrcp.f32 %v4919_v31 }
  0x4a   : > { %v4332_v41 = vpop.eup %4331  ;;  %518 = vperm.xlu0 %4306, %v349_v37   ;;  %v415_v42 = vadd.f32 %v4328_v7, %v414_v35  ;;  %v399_v45 = vmul.f32 %v4330_v19, %v398_v36  ;;  %vm4941_vm14 = vcmp.eq.f32.partialorder %v405_v24, 8.507059e+37  ;;  %vm227_vm5 = vcmp.eq.f32.partialorder %v4922_v32, 0.0 }
  0x4b   : > { %v408_v47 = vor.u32 1.1754944e-38, %v407_v30  ;;  %v382_v48 = vmul.f32 %v4332_v41, %v4890_v6  ;;  %vm386_vm8 = vweird.f32 %v4890_v6  ;;  %v243_v49 = vsel %vm227_vm5, 1.0, %v4922_v32 }
  0x4c   : > { %v419_v52 = vsel %vm4932_vm7, %v4328_v7, %v415_v42  ;;  %v400_v53 = vadd.f32 %v4330_v19, %v399_v45  ;;  %v392_v54 = vand.u32 2147483648, %v4890_v6  ;;  %4335 = vrcp.f32 %v243_v49 }
  0x4d   : > { %v424_v55 = vsel %vm4936_vm4, %v423_v40, %v419_v52  ;;  %v383_v56 = vsub.f32 1.0, %v382_v48  ;;  %vm387_vm10 = vweird.f32 %v4332_v41  ;;  %v390_v58 = vand.u32 2147483647, %v4890_v6 }
  0x4e   : > { %543 = vperm.xlu2 %4308, %v424_v55   ;;  %v404_v59 = vsel %vm4949_vm9, %v4330_v19, %v400_v53  ;;  %vm226_vm11 = vcmp.eq.f32.partialorder %v4957_v50, 0.0  ;;  %vm229_vm12 = vcmp.eq.f32.partialorder %v4963_v51, 0.0  ;;  %vm4977_vm13 = vmor %vm386_vm8, %vm387_vm10  ;;  %v393_v7 = vor.u32 1.1754944e-38, %v392_v54 }
  0x4f   : > { %v4334_v57 = vpop.eup %4333  ;;  %v409_v60 = vsel %vm4941_vm14, %v408_v47, %v404_v59  ;;  %v384_v61 = vmul.f32 %v4332_v41, %v383_v56  ;;  %v242_v63 = vsel %vm226_vm11, 1.0, %v4957_v50  ;;  %vm391_vm15 = vcmp.eq.f32.partialorder %v390_v58, 8.507059e+37 }
  0x50   : > { %v457_v8 = vmul.f32 %v4334_v57, %v4919_v31  ;;  %4337 = vrcp.f32 %v242_v63  ;;  %vm461_vm0 = vweird.f32 %v4919_v31  ;;  %v467_v14 = vand.u32 2147483648, %v4919_v31 }
  0x51   : > { %538 = vperm.xlu1 %4307, %v409_v60   ;;  %v385_v13 = vadd.f32 %v4332_v41, %v384_v61  ;;  %vm462_vm1 = vweird.f32 %v4334_v57  ;;  %v465_v6 = vand.u32 2147483647, %v4919_v31  ;;  %v245_v18 = vsel %vm229_vm12, 1.0, %v4963_v51 }
  0x52   : > { %v4336_v16 = vpop.eup %4335  ;;  %v458_v17 = vsub.f32 1.0, %v457_v8  ;;  %v450_v21 = vand.u32 2147483647, %v243_v49  ;;  %v452_v22 = vand.u32 2147483648, %v243_v49  ;;  %4339 = vrcp.f32 %v245_v18  ;;  %vm4990_vm2 = vmor %vm461_vm0, %vm462_vm1 }
  0x53   : > { %v389_v19 = vsel %vm4977_vm13, %v4332_v41, %v385_v13  ;;  %v442_v20 = vmul.f32 %v4336_v16, %v243_v49  ;;  %v468_v27 = vor.u32 1.1754944e-38, %v467_v14  ;;  %vm446_vm3 = vweird.f32 %v243_v49  ;;  %v5028_v14 = vld [vmem:[%s5019_s16 + $0x28] sm:$0xff] }
  0x54   : > { %v394_v24 = vsel %vm391_vm15, %v393_v7, %v389_v19  ;;  %v459_v23 = vmul.f32 %v4334_v57, %v458_v17  ;;  %vm447_vm6 = vweird.f32 %v4336_v16  ;;  %vm466_vm7 = vcmp.eq.f32.partialorder %v465_v6, 8.507059e+37  ;;  %v5022_v7 = vld [vmem:[%s5019_s16 + $0x20] sm:$0xff]  ;;  %8701 = vst [vmem:[#allocation27_spill] sm:$0xff] %v5028_v14 }
  0x55   : > { %533 = vperm.xlu0 %4306, %v394_v24   ;;  %v443_v29 = vsub.f32 1.0, %v442_v20  ;;  %vm4994_vm4 = vcmp.eq.f32.partialorder %v450_v21, 8.507059e+37  ;;  %v453_v36 = vor.u32 1.1754944e-38, %v452_v22  ;;  %vm5000_vm14 = vmor %vm446_vm3, %vm447_vm6  ;;  %vm431_vm5 = vweird.f32 %v242_v63  ;;  %8699 = vst [vmem:[#allocation25_spill] sm:$0xff] %v5022_v7  ;;  %v5034_v6 = vld [vmem:[%s5019_s16 + $0x40] sm:$0xff]  ;;  %v5040_v20 = vld [vmem:[%s5019_s16 + $0x10] sm:$0xff] }
  0x56   : > { %v4338_v30 = vpop.eup %4337  ;;  %v460_v33 = vadd.f32 %v4334_v57, %v459_v23  ;;  %v435_v39 = vand.u32 2147483647, %v242_v63  ;;  %v437_v40 = vand.u32 2147483648, %v242_v63  ;;  %vm476_vm11 = vweird.f32 %v245_v18  ;;  %8703 = vst [vmem:[#allocation29_spill] sm:$0xff] %v5034_v6  ;;  %v5043_v21 = vld [vmem:[%s5019_s16] sm:$0xff]  ;;  %v5046_v24 = vld [vmem:[%s5019_s16 + $0x58] sm:$0xff] }
  0x57   : > { %v444_v34 = vmul.f32 %v4336_v16, %v443_v29  ;;  %v427_v37 = vmul.f32 %v4338_v30, %v242_v63  ;;  %vm432_vm9 = vweird.f32 %v4338_v30  ;;  %v482_v55 = vand.u32 2147483648, %v245_v18  ;;  %8705 = vst [vmem:[#allocation31_spill] sm:$0xff] %v5040_v20 }
  0x58   : > { %v464_v31 = vsel %vm4990_vm2, %v4334_v57, %v460_v33  ;;  %v4340_v46 = vpop.eup %4339  ;;  %vm433_vm8 = vmor %vm431_vm5, %vm432_vm9  ;;  %vm436_vm10 = vcmp.eq.f32.partialorder %v435_v39, 8.507059e+37  ;;  %v438_v52 = vor.u32 1.1754944e-38, %v437_v40  ;;  %v480_v59 = vand.u32 2147483647, %v245_v18  ;;  %8706 = vst [vmem:[#allocation32_spill] sm:$0xff] %v5043_v21  ;;  %v5058_v33 = vld [vmem:[%s5019_s16 + $0x18] sm:$0xff] }
  0x59   : > { %v469_v41 = vsel %vm466_vm7, %v468_v27, %v464_v31  ;;  %v445_v42 = vadd.f32 %v4336_v16, %v444_v34  ;;  %v428_v45 = vsub.f32 1.0, %v427_v37  ;;  %v472_v48 = vmul.f32 %v4340_v46, %v245_v18  ;;  %8707 = vst [vmem:[#allocation33_spill] sm:$0xff] %v5046_v24  ;;  %v5061_v34 = vld [vmem:[%s5019_s16 + $0x8] sm:$0xff] }
  0x5a   : > { %558 = vperm.xlu2 %4308, %v469_v41   ;;  %vm477_vm12 = vweird.f32 %v4340_v46  ;;  %v483_v61 = vor.u32 1.1754944e-38, %v482_v55  ;;  %vm481_vm15 = vcmp.eq.f32.partialorder %v480_v59, 8.507059e+37  ;;  %8711 = vst [vmem:[#allocation37_spill] sm:$0xff] %v5058_v33  ;;  %v582_v41 = vlaneseq }
  0x5b   : > { %v449_v43 = vsel %vm5000_vm14, %v4336_v16, %v445_v42  ;;  %v429_v47 = vmul.f32 %v4338_v30, %v428_v45  ;;  %v473_v54 = vsub.f32 1.0, %v472_v48  ;;  %vm478_vm13 = vmor %vm476_vm11, %vm477_vm12  ;;  %8712 = vst [vmem:[#allocation38_spill] sm:$0xff] %v5061_v34  ;;  %v5078_v45 = vld [vmem:[%s5019_s16 + $0x38] sm:$0xff] }
  0x5c   : > { %v454_v49 = vsel %vm4994_vm4, %v453_v36, %v449_v43  ;;  %v5075_v42 = vand.u32 127, %v582_v41  ;;  %8718 = vst [vmem:[#allocation44_spill] sm:$0xff] %v5078_v45  ;;  %v5135_v41 = vmov 0.0  }
  0x5d   : > { %553 = vperm.xlu1 %4307, %v454_v49   ;;  %v430_v53 = vadd.f32 %v4338_v30, %v429_v47  ;;  %v474_v58 = vmul.f32 %v4340_v46, %v473_v54  ;;  %v5095_v54 = vld [vmem:[%s5019_s16 + $0x50] sm:$0xff] }
  0x5e   : > { %8717 = vst [vmem:[#allocation43_spill] sm:$0xff] %v5075_v42  ;;  %v584_v43 = vand.u32 1, %v5075_v42  ;;  %v5155_v42 = vmov 0.0  }
  0x5f   : > { %v434_v56 = vsel %vm433_vm8, %v4338_v30, %v430_v53  ;;  %v475_v60 = vadd.f32 %v4340_v46, %v474_v58  ;;  %8725 = vst [vmem:[#allocation49_spill] sm:$0xff] %v5095_v54  ;;  %v5101_v58 = vld [vmem:[%s5019_s16 + $0x48] sm:$0xff] }
  0x60   : > { %v439_v57 = vsel %vm436_vm10, %v438_v52, %v434_v56  ;;  %vm5087_vm0 = vcmp.eq.s32.totalorder %v584_v43, 1  ;;  %v8721_v52 = vmov 0  ;;  %8727 = vst [vmem:[#allocation51_spill] sm:$0xff] %v5101_v58  ;;  %v5137_v43 = vmov 0.0  }
  0x61   : > { %548 = vperm.xlu0 %4306, %v439_v57   ;;  %v479_v5 = vsel %vm478_vm13, %v4340_v46, %v475_v60  ;;  %v5081_v46 = vld [vmem:[%s5019_s16 + $0x30] sm:$0xff]  ;;  %v8722_v52 = vsel %vm5087_vm0, 4294967295, %v8721_v52  ;;  %v5107_v60 = vld [vmem:[%s5019_s16 + $0x68] sm:$0xff] }
  0x62   : > { %v484_v63 = vsel %vm481_vm15, %v483_v61, %v479_v5  ;;  %8719 = vst [vmem:[#allocation45_spill] sm:$0xff] %v5081_v46 }
  0x63   : > { %8723 = vst [vmem:[#allocation47_spill] sm:$0xff] %v8722_v52 }
  0x64   : > { %8729 = vst [vmem:[#allocation53_spill] sm:$0xff] %v5107_v60 }
  0x69   : > { %563 = vperm.xlu0 %4306, %v484_v63   ;;  %v5113_v63 = vld [vmem:[%s5019_s16 + $0x60] sm:$0xff] }
  0x6a   : > { %8731 = vst [vmem:[#allocation55_spill] sm:$0xff] %v5113_v63 }
  0x8e   : > { %v509_v8 = vpop.permute.xlu2 %508 }
  0x8f   : > { %v5025_v13 = vmul.f32 %v509_v8, %v5022_v7 }
  0x91   : > { %8700 = vst [vmem:[#allocation26_spill] sm:$0xff] %v5025_v13 }
  0x96   : > { %v514_v16 = vpop.permute.xlu2 %513 }
  0x97   : > { %v5031_v17 = vmul.f32 %v514_v16, %v5028_v14 }
  0x99   : > { %8702 = vst [vmem:[#allocation28_spill] sm:$0xff] %v5031_v17 }
  0x9e   : > { %v529_v18 = vpop.permute.xlu2 %528 }
  0x9f   : > { %v5037_v19 = vmul.f32 %v529_v18, %v5034_v6  ;;  %v5119_v18 = vld [vmem:[%s5019_s16 + $0x78] sm:$0xff] }
  0xa0   : > { %8733 = vst [vmem:[#allocation57_spill] sm:$0xff] %v5119_v18 }
  0xa1   : > { %8704 = vst [vmem:[#allocation30_spill] sm:$0xff] %v5037_v19 }
  0xa7   : > { %v499_v22 = vpop.permute.xlu1 %498 }
  0xa8   : > { %v5049_v23 = vmul.f32 %v499_v22, %v5040_v20  ;;  %v489_v26 = vpop.permute.xlu0 %488  ;;  %v544_v29 = vpop.permute.xlu2 %543 }
  0xa9   : > { %v5052_v27 = vmul.f32 %v489_v26, %v5043_v21  ;;  %v5055_v30 = vmul.f32 %v544_v29, %v5046_v24  ;;  %v5127_v29 = vmov 0.0  }
  0xaa   : > { %8708 = vst [vmem:[#allocation34_spill] sm:$0xff] %v5049_v23 }
  0xab   : > { %8709 = vst [vmem:[#allocation35_spill] sm:$0xff] %v5052_v27 }
  0xac   : > { %8710 = vst [vmem:[#allocation36_spill] sm:$0xff] %v5055_v30 }
  0xaf   : > { %v504_v35 = vpop.permute.xlu1 %503 }
  0xb0   : > { %v5064_v36 = vmul.f32 %v504_v35, %v5058_v33  ;;  %v494_v37 = vpop.permute.xlu0 %493  ;;  %v5129_v35 = vmov 0.0  }
  0xb1   : > { %v5067_v31 = vmul.f32 %v494_v37, %v5061_v34  ;;  %v5131_v37 = vmov 0.0  }
  0xb2   : > { %8713 = vst [vmem:[#allocation39_spill] sm:$0xff] %v5064_v36 }
  0xb3   : > { %8714 = vst [vmem:[#allocation40_spill] sm:$0xff] %v5067_v31 }
  0xb4   : > { %v559_v39 = vpop.permute.xlu2 %558 }
  0xb5   : > { %v5073_v40 = vmul.f32 %v559_v39, %v5070_v38  ;;  %v5133_v39 = vmov 0.0  }
  0xb7   : > { %8716 = vst [vmem:[#allocation42_spill] sm:$0xff] %v5073_v40 }
  0xbb   : > { %v524_v47 = vpop.permute.xlu1 %523 }
  0xbc   : > { %v5085_v48 = vmul.f32 %v524_v47, %v5078_v45  ;;  %v519_v49 = vpop.permute.xlu0 %518  ;;  %v5139_v47 = vmov 0.0  }
  0xbd   : > { %v5092_v53 = vmul.f32 %v519_v49, %v5081_v46  ;;  %v5141_v49 = vmov 0.0  }
  0xbe   : > { %8720 = vst [vmem:[#allocation46_spill] sm:$0xff] %v5085_v48 }
  0xbf   : > { %8724 = vst [vmem:[#allocation48_spill] sm:$0xff] %v5092_v53 }
  0xc3   : > { %v539_v55 = vpop.permute.xlu1 %538 }
  0xc4   : > { %v5098_v56 = vmul.f32 %v539_v55, %v5095_v54  ;;  %v5143_v55 = vmov 0.0  }
  0xc6   : > { %8726 = vst [vmem:[#allocation50_spill] sm:$0xff] %v5098_v56 }
  0xc7   : > { %v534_v59 = vpop.permute.xlu0 %533 }
  0xc8   : > { %v5104_v57 = vmul.f32 %v534_v59, %v5101_v58  ;;  %v5145_v59 = vmov 0.0  }
  0xca   : > { %8728 = vst [vmem:[#allocation52_spill] sm:$0xff] %v5104_v57 }
  0xcf   : > { %v554_v61 = vpop.permute.xlu1 %553 }
  0xd0   : > { %v5110_v5 = vmul.f32 %v554_v61, %v5107_v60  ;;  %v5147_v61 = vmov 0.0  }
  0xd2   : > { %8730 = vst [vmem:[#allocation54_spill] sm:$0xff] %v5110_v5 }
  0xd3   : > { %v549_v8 = vpop.permute.xlu0 %548 }
  0xd4   : > { %v5116_v16 = vmul.f32 %v549_v8, %v5113_v63  ;;  %v5149_v8 = vmov 0.0  }
  0xd6   : > { %8732 = vst [vmem:[#allocation56_spill] sm:$0xff] %v5116_v16 }
  0xdb   : > { %v564_v22 = vpop.permute.xlu0 %563 }
  0xdc   : > { %v5122_v26 = vmul.f32 %v564_v22, %v5119_v18  ;;  %v5151_v22 = vmov 0.0   ;;  %v5157_v18 = vmov 0.0  }
  0xde   : > { %8734 = vst [vmem:[#allocation58_spill] sm:$0xff] %v5122_v26 }
  0xdf LB: >> { %v8735_v52 = vld [vmem:[#allocation47_spill] sm:$0xff]  ;;  %v8737_v40 = vld [vmem:[#allocation42_spill] sm:$0xff]  ;;  %v8739_v57 = vld [vmem:[#allocation52_spill] sm:$0xff]  ;;  %8752 = vst [vmem:[#allocation59_spill] sm:$0xff] %v4507_v29  ;;  %s5213_s19 = sshll.u32 %s4571_s18, 1  ;;  %s4577_s21 = smov 1   ;;  %s4571_s18 = sphi %s5159_s18, %s591_s18   ;;  %v4567_v18 = vphi %v5157_v18, %v9143_v18   ;;  %v4563_v42 = vphi %v5155_v42, %v9142_v42   ;;  %v4559_v0 = vphi %v5153_v0, %v9141_v0   ;;  %v4555_v22 = vphi %v5151_v22, %v9140_v22   ;;  %v4551_v8 = vphi %v5149_v8, %v9139_v8   ;;  %v4547_v61 = vphi %v5147_v61, %v9138_v61   ;;  %v4543_v59 = vphi %v5145_v59, %v9137_v59   ;;  %v4539_v55 = vphi %v5143_v55, %v9136_v55   ;;  %v4535_v49 = vphi %v5141_v49, %v9135_v49   ;;  %v4531_v47 = vphi %v5139_v47, %v9134_v47   ;;  %v4527_v43 = vphi %v5137_v43, %v9133_v43   ;;  %v4523_v41 = vphi %v5135_v41, %v9132_v41   ;;  %v4519_v39 = vphi %v5133_v39, %v9131_v39   ;;  %v4515_v37 = vphi %v5131_v37, %v9130_v37   ;;  %v4511_v35 = vphi %v5129_v35, %v9129_v35   ;;  %v4507_v29 = vphi %v5127_v29, %v9128_v29  }
  0xe0   : >> { %v8738_v5 = vld [vmem:[#allocation54_spill] sm:$0xff]  ;;  %v8741_v16 = vld [vmem:[#allocation56_spill] sm:$0xff]  ;;  %v8750_v36 = vld [vmem:[#allocation39_spill] sm:$0xff]  ;;  %8753 = vst [vmem:[#allocation60_spill] sm:$0xff] %v4511_v35  ;;  %s610_s20 = sld [smem:[#allocation4 + %s5213_s19]]  ;;  %s5774_s26 = sadd.s32 1, %s5213_s19  ;;  %vm8791_vm0 = vnez %v8735_v52 }
  0xe1   : >> { %v8740_v56 = vld [vmem:[#allocation50_spill] sm:$0xff]  ;;  %v8742_v30 = vld [vmem:[#allocation36_spill] sm:$0xff]  ;;  %v8751_v27 = vld [vmem:[#allocation35_spill] sm:$0xff]  ;;  %8754 = vst [vmem:[#allocation61_spill] sm:$0xff] %v4515_v37  ;;  %s5691_s22 = sld [smem:[#allocation3 + %s5213_s19]]  ;;  %s4579_s29 = smov 127  }
  0xe2   : >> { %v8743_v48 = vld [vmem:[#allocation46_spill] sm:$0xff]  ;;  %v8745_v53 = vld [vmem:[#allocation48_spill] sm:$0xff]  ;;  %8755 = vst [vmem:[#allocation62_spill] sm:$0xff] %v4519_v39  ;;  %v8772_v1 = vld [vmem:[#allocation9_spill] sm:$0xff]  ;;  %s1722_s28 = sld [smem:[#allocation4 + %s5774_s26]]  ;;  %s591_s18 = sadd.s32 1, %s4571_s18  }
  0xe3   : >> { %v8744_v19 = vld [vmem:[#allocation30_spill] sm:$0xff]  ;;  %v8746_v17 = vld [vmem:[#allocation28_spill] sm:$0xff]  ;;  %8756 = vst [vmem:[#allocation63_spill] sm:$0xff] %v4523_v41  ;;  %v8776_v3 = vld [vmem:[#allocation11_spill] sm:$0xff]  ;;  %s1721_s7 = sld [smem:[#allocation3 + %s5774_s26]]  ;;  %p7388_p11 = scmp.ge.s32.totalorder %s591_s18, 12  }
  0xe4   : >> { %v8747_v31 = vld [vmem:[#allocation40_spill] sm:$0xff]  ;;  %v8748_v13 = vld [vmem:[#allocation26_spill] sm:$0xff]  ;;  %8757 = vst [vmem:[#allocation64_spill] sm:$0xff] %v4527_v43  ;;  %v8461_v43 = vmov -384.0   ;;  %v8777_v12 = vld [vmem:[#allocation17_spill] sm:$0xff]  ;;  %s4111_s9 = sld [smem:[#allocation4 + $0x18]] (%p7388_p11) }
  0xe5   : >> { %v8736_v26 = vld [vmem:[#allocation58_spill] sm:$0xff]  ;;  %8758 = vst [vmem:[#allocation65_spill] sm:$0xff] %v4531_v47  ;;  %v8773_v9 = vld [vmem:[#allocation16_spill] sm:$0xff]  ;;  %v8778_v10 = vld [vmem:[#allocation13_spill] sm:$0xff]  ;;  %s4582_s10 = smov (%p7388_p11), 1   ;;  %s7974_s11 = sld [smem:[#allocation3 + $0x18]] (%p7388_p11) }
  0xe6   : >> { %v8749_v23 = vld [vmem:[#allocation34_spill] sm:$0xff]  ;;  %8759 = vst [vmem:[#allocation66_spill] sm:$0xff] %v4535_v49  ;;  %v5216_v35 = vstv %s610_s20  ;;  %v8779_v28 = vld [vmem:[#allocation19_spill] sm:$0xff]  ;;  %v8780_v44 = vld [vmem:[#allocation20_spill] sm:$0xff]  ;;  %s4583_s13 = smov (%p7388_p11), 127   ;;  %s4117_s14 = sshll.u32 (%p7388_p11), %s4638_s1, 7 }
  0xe7   : >> { %8760 = vst [vmem:[#allocation67_spill] sm:$0xff] %v4539_v55  ;;  %v5220_v41 = vmul.f32 %v5216_v35, %v8749_v23  ;;  %v5224_v49 = vmul.f32 %v5216_v35, %v8751_v27  ;;  %v5228_v29 = vmul.f32 %v5216_v35, %v8750_v36  ;;  %v5232_v37 = vmul.f32 %v5216_v35, %v8747_v31  ;;  %v8771_v2 = vld [vmem:[#allocation10_spill] sm:$0xff]  ;;  %v8782_v50 = vld [vmem:[#allocation23_spill] sm:$0xff]  ;;  %v8785_v4 = vld [vmem:[#allocation12_spill] sm:$0xff]  ;;  %s3969_s18 = scalar_lea.hbm (%p7388_p11), %s8452_s4, %s4117_s14 }
  0xe8   : >> { %8761 = vst [vmem:[#allocation68_spill] sm:$0xff] %v4543_v59  ;;  %v8775_v11 = vld [vmem:[#allocation14_spill] sm:$0xff]  ;;  %v8787_v15 = vld [vmem:[#allocation15_spill] sm:$0xff]  ;;  %v8788_v51 = vld [vmem:[#allocation24_spill] sm:$0xff]  ;;  %s3972_s20 = sshll.u32 (%p7388_p11), %s3969_s18, 4  ;;  %s3973_s20 = int_to_ptr.hbm [resolvable:$true] %s3972_s20 }
  0xe9   : >> { %8762 = vst [vmem:[#allocation69_spill] sm:$0xff] %v4547_v61  ;;  %v5236_v61 = vmul.f32 %v5216_v35, %v8748_v13  ;;  %v630_v39 = vmul.f32 0.25, %v5220_v41  ;;  %vm742_vm1 = vcmp.gt.f32.partialorder %v5220_v41, -320.0  ;;  %vm774_vm2 = vcmp.gt.f32.partialorder %v5220_v41, -224.0  ;;  %v8781_v32 = vld [vmem:[#allocation22_spill] sm:$0xff]  ;;  %v8801_v62 = vld [vmem:[#allocation21_spill] sm:$0xff] }
  0xea   : >> { %8763 = vst [vmem:[#allocation70_spill] sm:$0xff] %v4551_v8  ;;  %vm806_vm3 = vcmp.gt.f32.partialorder %v5220_v41, -160.0  ;;  %vm838_vm6 = vcmp.gt.f32.partialorder %v5220_v41, -112.0  ;;  %vm870_vm7 = vcmp.gt.f32.partialorder %v5220_v41, -80.0  ;;  %vm902_vm4 = vcmp.gt.f32.partialorder %v5220_v41, -56.0  ;;  %v8790_v25 = vld [vmem:[#allocation18_spill] sm:$0xff] }
  0xeb   : >> { %8764 = vst [vmem:[#allocation71_spill] sm:$0xff] %v4555_v22  ;;  %v646_v47 = vadd.f32 6.5, %v630_v39  ;;  %vm934_vm14 = vcmp.gt.f32.partialorder %v5220_v41, 0.0  ;;  %vm966_vm5 = vcmp.gt.f32.partialorder %v5220_v41, 56.0  ;;  %vm998_vm9 = vcmp.gt.f32.partialorder %v5220_v41, 80.0 }
  0xec   : >> { %8765 = vst [vmem:[#allocation72_spill] sm:$0xff] %v4559_v0  ;;  %v758_v0 = vsel %vm742_vm1, -256.0, %v8461_v43  ;;  %vm1030_vm8 = vcmp.gt.f32.partialorder %v5220_v41, 112.0  ;;  %vm1062_vm10 = vcmp.gt.f32.partialorder %v5220_v41, 160.0  ;;  %vm1094_vm11 = vcmp.gt.f32.partialorder %v5220_v41, 224.0 }
  0xed   : >> { %8766 = vst [vmem:[#allocation73_spill] sm:$0xff] %v4563_v42  ;;  %v790_v55 = vsel %vm774_vm2, -192.0, %v758_v0  ;;  %v662_v43 = vceil.f32 %v646_v47  ;;  %vm1126_vm12 = vcmp.gt.f32.partialorder %v5220_v41, 320.0  ;;  %v628_v0 = vmul.f32 0.25, %v5224_v49 }
  0xee   : >> { %8767 = vst [vmem:[#allocation74_spill] sm:$0xff] %v4567_v18  ;;  %v822_v59 = vsel %vm806_vm3, -128.0, %v790_v55  ;;  %vm740_vm13 = vcmp.gt.f32.partialorder %v5224_v49, -320.0  ;;  %vm772_vm15 = vcmp.gt.f32.partialorder %v5224_v49, -224.0  ;;  %v8768_v42 = vmov -384.0  }
  0xef   : >> { %v854_v8 = vsel %vm838_vm6, -96.0, %v822_v59  ;;  %v678_v39 = vmax.f32 %v662_v43, 0.0  ;;  %v756_v18 = vsel %vm740_vm13, -256.0, %v8768_v42  ;;  %vm804_vm1 = vcmp.gt.f32.partialorder %v5224_v49, -160.0 }
  0xf0   : >> { %v886_v22 = vsel %vm870_vm7, -64.0, %v854_v8  ;;  %v644_v59 = vadd.f32 6.5, %v628_v0  ;;  %v788_v63 = vsel %vm772_vm15, -192.0, %v756_v18  ;;  %vm836_vm2 = vcmp.gt.f32.partialorder %v5224_v49, -112.0 }
  0xf1   : >> { %v918_v55 = vsel %vm902_vm4, -48.0, %v886_v22  ;;  %v694_v8 = vmin.f32 %v678_v39, 14.0  ;;  %v820_v38 = vsel %vm804_vm1, -128.0, %v788_v63  ;;  %vm868_vm3 = vcmp.gt.f32.partialorder %v5224_v49, -80.0 }
  0xf2   : >> { %v950_v47 = vsel %vm934_vm14, 48.0, %v918_v55  ;;  %v660_v22 = vceil.f32 %v644_v59  ;;  %v852_v46 = vsel %vm836_vm2, -96.0, %v820_v38  ;;  %vm900_vm6 = vcmp.gt.f32.partialorder %v5224_v49, -56.0 }
  0xf3   : >> { %v982_v58 = vsel %vm966_vm5, 64.0, %v950_v47  ;;  %v710_v24 = vmul.f32 4.0, %v694_v8  ;;  %v884_v0 = vsel %vm868_vm3, -64.0, %v852_v46  ;;  %vm932_vm7 = vcmp.gt.f32.partialorder %v5224_v49, 0.0 }
  0xf4   : >> { %v1014_v43 = vsel %vm998_vm9, 96.0, %v982_v58  ;;  %v676_v63 = vmax.f32 %v660_v22, 0.0  ;;  %v916_v55 = vsel %vm900_vm6, -48.0, %v884_v0  ;;  %vm964_vm4 = vcmp.gt.f32.partialorder %v5224_v49, 56.0 }
  0xf5   : >> { %v1046_v18 = vsel %vm1030_vm8, 128.0, %v1014_v43  ;;  %v726_v47 = vadd.f32 -28.0, %v710_v24  ;;  %v948_v58 = vsel %vm932_vm7, 48.0, %v916_v55  ;;  %vm996_vm14 = vcmp.gt.f32.partialorder %v5224_v49, 80.0 }
  0xf6   : >> { %v1078_v39 = vsel %vm1062_vm10, 192.0, %v1046_v18  ;;  %v692_v46 = vmin.f32 %v676_v63, 14.0  ;;  %v980_v8 = vsel %vm964_vm4, 64.0, %v948_v58  ;;  %vm1028_vm5 = vcmp.gt.f32.partialorder %v5224_v49, 112.0 }
  0xf7   : >> { %v1110_v38 = vsel %vm1094_vm11, 256.0, %v1078_v39  ;;  %v1190_v22 = vsub.f32 %v5220_v41, %v726_v47  ;;  %v1012_v18 = vsel %vm996_vm14, 96.0, %v980_v8  ;;  %vm1060_vm8 = vcmp.gt.f32.partialorder %v5224_v49, 160.0 }
  0xf8   : >> { %v1142_v59 = vsel %vm1126_vm12, 384.0, %v1110_v38  ;;  %v708_v24 = vmul.f32 4.0, %v692_v46  ;;  %v1044_v0 = vsel %vm1028_vm5, 128.0, %v1012_v18  ;;  %vm1092_vm10 = vcmp.gt.f32.partialorder %v5224_v49, 224.0 }
  0xf9   : >> { %v1158_v43 = vsub.f32 %v5220_v41, %v1142_v59  ;;  %vm1254_vm9 = vcmp.lt.f32.partialorder %v1142_v59, %v726_v47  ;;  %v1206_v55 = vand.u32 2147483647, %v1190_v22  ;;  %v1076_v60 = vsel %vm1060_vm8, 192.0, %v1044_v0 }
  0xfa   : >> { %vm1124_vm11 = vcmp.gt.f32.partialorder %v5224_v49, 320.0  ;;  %v724_v63 = vadd.f32 -28.0, %v708_v24  ;;  %v1108_v38 = vsel %vm1092_vm10, 256.0, %v1076_v60  ;;  %v631_v58 = vmul.f32 0.25, %v5228_v29 }
  0xfb   : >> { %v1174_v39 = vand.u32 2147483647, %v1158_v43  ;;  %vm743_vm12 = vcmp.gt.f32.partialorder %v5228_v29, -320.0  ;;  %v1140_v41 = vsel %vm1124_vm11, 384.0, %v1108_v38  ;;  %vm775_vm6 = vcmp.gt.f32.partialorder %v5228_v29, -224.0 }
  0xfc   : >> { %v759_v46 = vsel %vm743_vm12, -256.0, %v8768_v42  ;;  %v1156_v8 = vsub.f32 %v5224_v49, %v1140_v41  ;;  %v1188_v43 = vsub.f32 %v5224_v49, %v724_v63  ;;  %vm1252_vm2 = vcmp.lt.f32.partialorder %v1140_v41, %v724_v63 }
  0xfd   : >> { %vm1222_vm13 = vcmp.lt.f32.partialorder %v1174_v39, %v1206_v55  ;;  %vm1238_vm15 = vcmp.eq.f32.partialorder %v1174_v39, %v1206_v55  ;;  %v647_v22 = vadd.f32 6.5, %v631_v58  ;;  %vm807_vm7 = vcmp.gt.f32.partialorder %v5228_v29, -160.0 }
  0xfe   : >> { %vm1270_vm1 = vmand %vm1238_vm15, %vm1254_vm9  ;;  %vm839_vm4 = vcmp.gt.f32.partialorder %v5228_v29, -112.0  ;;  %vm871_vm14 = vcmp.gt.f32.partialorder %v5228_v29, -80.0  ;;  %v1172_v18 = vand.u32 2147483647, %v1156_v8  ;;  %v1204_v24 = vand.u32 2147483647, %v1188_v43 }
  0xff   : >> { %vm1286_vm3 = vmor %vm1222_vm13, %vm1270_vm1  ;;  %v663_v0 = vceil.f32 %v647_v22  ;;  %v791_v55 = vsel %vm775_vm6, -192.0, %v759_v46  ;;  %vm903_vm5 = vcmp.gt.f32.partialorder %v5228_v29, -56.0  ;;  %vm935_vm9 = vcmp.gt.f32.partialorder %v5228_v29, 0.0 }
 0x100   : >> { %v5296_v60 = vsel %vm1286_vm3, %v1142_v59, %v726_v47  ;;  %vm1220_vm8 = vcmp.lt.f32.partialorder %v1172_v18, %v1204_v24  ;;  %vm1236_vm10 = vcmp.eq.f32.partialorder %v1172_v18, %v1204_v24  ;;  %v823_v38 = vsel %vm807_vm7, -128.0, %v791_v55 }
 0x101   : >> { %v8475_v39 = vand.u32 2147483647, %v5296_v60  ;;  %v679_v49 = vmax.f32 %v663_v0, 0.0  ;;  %vm1268_vm11 = vmand %vm1236_vm10, %vm1252_vm2  ;;  %v855_v47 = vsel %vm839_vm4, -96.0, %v823_v38  ;;  %vm967_vm12 = vcmp.gt.f32.partialorder %v5228_v29, 56.0 }
 0x102   : >> { %vm999_vm13 = vcmp.gt.f32.partialorder %v5228_v29, 80.0  ;;  %vm1031_vm15 = vcmp.gt.f32.partialorder %v5228_v29, 112.0  ;;  %vm1284_vm1 = vmor %vm1220_vm8, %vm1268_vm11  ;;  %v887_v58 = vsel %vm871_vm14, -64.0, %v855_v47  ;;  %vm1063_vm3 = vcmp.gt.f32.partialorder %v5228_v29, 160.0 }
 0x103   : >> { %1336 = vrot.lane.b32.xlu1 %v8475_v39, %s4577_s21  ;;  %v695_v59 = vmin.f32 %v679_v49, 14.0  ;;  %vm1095_vm6 = vcmp.gt.f32.partialorder %v5228_v29, 224.0  ;;  %v5314_v46 = vsel %vm1284_vm1, %v1140_v41, %v724_v63  ;;  %v919_v8 = vsel %vm903_vm5, -48.0, %v887_v58 }
 0x104   : >> { %vm1127_vm2 = vcmp.gt.f32.partialorder %v5228_v29, 320.0  ;;  %v629_v43 = vmul.f32 0.25, %v5232_v37  ;;  %v8476_v22 = vand.u32 2147483647, %v5314_v46  ;;  %v951_v24 = vsel %vm935_vm9, 48.0, %v919_v8 }
 0x105   : >> { %v711_v18 = vmul.f32 4.0, %v695_v59  ;;  %vm741_vm7 = vcmp.gt.f32.partialorder %v5232_v37, -320.0  ;;  %v983_v0 = vsel %vm967_vm12, 64.0, %v951_v24  ;;  %vm773_vm4 = vcmp.gt.f32.partialorder %v5232_v37, -224.0 }
 0x106   : >> { %v645_v63 = vadd.f32 6.5, %v629_v43  ;;  %v757_v41 = vsel %vm741_vm7, -256.0, %v8768_v42  ;;  %1332 = vrot.lane.b32.xlu0 %v8476_v22, %s4577_s21  ;;  %v1015_v49 = vsel %vm999_vm13, 96.0, %v983_v0  ;;  %vm805_vm14 = vcmp.gt.f32.partialorder %v5232_v37, -160.0 }
 0x107   : >> { %v727_v55 = vadd.f32 -28.0, %v711_v18  ;;  %v789_v38 = vsel %vm773_vm4, -192.0, %v757_v41  ;;  %v1047_v47 = vsel %vm1031_vm15, 128.0, %v1015_v49  ;;  %vm837_vm5 = vcmp.gt.f32.partialorder %v5232_v37, -112.0 }
 0x108   : >> { %v661_v59 = vceil.f32 %v645_v63  ;;  %v821_v58 = vsel %vm805_vm14, -128.0, %v789_v38  ;;  %v1079_v8 = vsel %vm1063_vm3, 192.0, %v1047_v47  ;;  %vm869_vm9 = vcmp.gt.f32.partialorder %v5232_v37, -80.0 }
 0x109   : >> { %v1191_v43 = vsub.f32 %v5228_v29, %v727_v55  ;;  %v853_v24 = vsel %vm837_vm5, -96.0, %v821_v58  ;;  %v1111_v18 = vsel %vm1095_vm6, 256.0, %v1079_v8  ;;  %vm901_vm8 = vcmp.gt.f32.partialorder %v5232_v37, -56.0 }
 0x10a   : >> { %v677_v0 = vmax.f32 %v661_v59, 0.0  ;;  %v885_v41 = vsel %vm869_vm9, -64.0, %v853_v24  ;;  %v1143_v63 = vsel %vm1127_vm2, 384.0, %v1111_v18  ;;  %vm933_vm10 = vcmp.gt.f32.partialorder %v5232_v37, 0.0 }
 0x10b   : >> { %v1207_v49 = vand.u32 2147483647, %v1191_v43  ;;  %v917_v38 = vsel %vm901_vm8, -48.0, %v885_v41  ;;  %v1159_v47 = vsub.f32 %v5228_v29, %v1143_v63  ;;  %vm1255_vm11 = vcmp.lt.f32.partialorder %v1143_v63, %v727_v55 }
 0x10c   : >> { %v693_v58 = vmin.f32 %v677_v0, 14.0  ;;  %v949_v39 = vsel %vm933_vm10, 48.0, %v917_v38  ;;  %vm965_vm12 = vcmp.gt.f32.partialorder %v5232_v37, 56.0  ;;  %vm997_vm13 = vcmp.gt.f32.partialorder %v5232_v37, 80.0 }
 0x10d   : >> { %vm1029_vm15 = vcmp.gt.f32.partialorder %v5232_v37, 112.0  ;;  %vm1061_vm1 = vcmp.gt.f32.partialorder %v5232_v37, 160.0  ;;  %v1175_v59 = vand.u32 2147483647, %v1159_v47  ;;  %v981_v24 = vsel %vm965_vm12, 64.0, %v949_v39 }
 0x10e   : >> { %v709_v8 = vmul.f32 4.0, %v693_v58  ;;  %vm1093_vm3 = vcmp.gt.f32.partialorder %v5232_v37, 224.0  ;;  %v1013_v43 = vsel %vm997_vm13, 96.0, %v981_v24  ;;  %vm1125_vm6 = vcmp.gt.f32.partialorder %v5232_v37, 320.0 }
 0x10f   : >> { %v632_v29 = vmul.f32 0.25, %v5236_v61  ;;  %vm744_vm2 = vcmp.gt.f32.partialorder %v5236_v61, -320.0  ;;  %vm1223_vm7 = vcmp.lt.f32.partialorder %v1175_v59, %v1207_v49  ;;  %vm1239_vm4 = vcmp.eq.f32.partialorder %v1175_v59, %v1207_v49 }
 0x110   : >> { %v725_v18 = vadd.f32 -28.0, %v709_v8  ;;  %v1045_v0 = vsel %vm1029_vm15, 128.0, %v1013_v43  ;;  %vm1271_vm14 = vmand %vm1239_vm4, %vm1255_vm11  ;;  %v760_v47 = vsel %vm744_vm2, -256.0, %v8768_v42  ;;  %vm776_vm5 = vcmp.gt.f32.partialorder %v5236_v61, -224.0 }
 0x111   : >> { %v1077_v41 = vsel %vm1061_vm1, 192.0, %v1045_v0  ;;  %v648_v38 = vadd.f32 6.5, %v632_v29  ;;  %vm1287_vm9 = vmor %vm1223_vm7, %vm1271_vm14  ;;  %v792_v24 = vsel %vm776_vm5, -192.0, %v760_v47  ;;  %vm808_vm8 = vcmp.gt.f32.partialorder %v5236_v61, -160.0 }
 0x112   : >> { %v1109_v39 = vsel %vm1093_vm3, 256.0, %v1077_v41  ;;  %v1189_v58 = vsub.f32 %v5232_v37, %v725_v18  ;;  %v5363_v49 = vsel %vm1287_vm9, %v1143_v63, %v727_v55  ;;  %v824_v43 = vsel %vm808_vm8, -128.0, %v792_v24 }
 0x113   : >> { %v1141_v59 = vsel %vm1125_vm6, 384.0, %v1109_v39  ;;  %v664_v8 = vceil.f32 %v648_v38  ;;  %v8479_v29 = vand.u32 2147483647, %v5363_v49  ;;  %vm840_vm11 = vcmp.gt.f32.partialorder %v5236_v61, -112.0 }
 0x114   : >> { %v1157_v0 = vsub.f32 %v5232_v37, %v1141_v59  ;;  %v1205_v22 = vand.u32 2147483647, %v1189_v58  ;;  %vm1253_vm10 = vcmp.lt.f32.partialorder %v1141_v59, %v725_v18  ;;  %vm872_vm12 = vcmp.gt.f32.partialorder %v5236_v61, -80.0 }
 0x115   : >> { %v680_v20 = vmax.f32 %v664_v8, 0.0  ;;  %vm904_vm13 = vcmp.gt.f32.partialorder %v5236_v61, -56.0  ;;  %1338 = vrot.lane.b32.xlu1 %v8479_v29, %s4577_s21  ;;  %v856_v63 = vsel %vm840_vm11, -96.0, %v824_v43  ;;  %vm936_vm15 = vcmp.gt.f32.partialorder %v5236_v61, 0.0 }
 0x116   : >> { %v1173_v55 = vand.u32 2147483647, %v1157_v0  ;;  %vm968_vm1 = vcmp.gt.f32.partialorder %v5236_v61, 56.0  ;;  %v888_v41 = vsel %vm872_vm12, -64.0, %v856_v63  ;;  %vm1000_vm3 = vcmp.gt.f32.partialorder %v5236_v61, 80.0 }
 0x117   : >> { %v696_v37 = vmin.f32 %v680_v20, 14.0  ;;  %vm1032_vm6 = vcmp.gt.f32.partialorder %v5236_v61, 112.0  ;;  %v920_v38 = vsel %vm904_vm13, -48.0, %v888_v41  ;;  %vm1064_vm4 = vcmp.gt.f32.partialorder %v5236_v61, 160.0 }
 0x118   : >> { %vm1221_vm2 = vcmp.lt.f32.partialorder %v1173_v55, %v1205_v22  ;;  %vm1237_vm7 = vcmp.eq.f32.partialorder %v1173_v55, %v1205_v22  ;;  %v952_v39 = vsel %vm936_vm15, 48.0, %v920_v38  ;;  %vm1096_vm5 = vcmp.gt.f32.partialorder %v5236_v61, 224.0 }
 0x119   : >> { %vm1269_vm14 = vmand %vm1237_vm7, %vm1253_vm10  ;;  %v712_v47 = vmul.f32 4.0, %v696_v37  ;;  %vm1128_vm9 = vcmp.gt.f32.partialorder %v5236_v61, 320.0  ;;  %v984_v20 = vsel %vm968_vm1, 64.0, %v952_v39  ;;  %v5387_v58 = vmul.f32 %v5216_v35, %v8743_v48 }
 0x11a   : >> { %vm1285_vm8 = vmor %vm1221_vm2, %vm1269_vm14  ;;  %v5391_v22 = vmul.f32 %v5216_v35, %v8745_v53  ;;  %v5395_v24 = vmul.f32 %v5216_v35, %v8746_v17  ;;  %v1016_v0 = vsel %vm1000_vm3, 96.0, %v984_v20  ;;  %v5403_v55 = vmul.f32 %v5216_v35, %v8740_v56 }
 0x11b   : >> { %v5397_v8 = vsel %vm1285_vm8, %v1141_v59, %v725_v18  ;;  %v728_v43 = vadd.f32 -28.0, %v712_v47  ;;  %v1048_v37 = vsel %vm1032_vm6, 128.0, %v1016_v0  ;;  %v635_v41 = vmul.f32 0.25, %v5387_v58 }
 0x11c   : >> { %v8486_v63 = vand.u32 2147483647, %v5397_v8  ;;  %vm747_vm10 = vcmp.gt.f32.partialorder %v5387_v58, -320.0  ;;  %v1080_v18 = vsel %vm1064_vm4, 192.0, %v1048_v37  ;;  %vm779_vm11 = vcmp.gt.f32.partialorder %v5387_v58, -224.0 }
 0x11d   : >> { %v1192_v59 = vsub.f32 %v5236_v61, %v728_v43  ;;  %v763_v38 = vsel %vm747_vm10, -256.0, %v8768_v42  ;;  %v1112_v47 = vsel %vm1096_vm5, 256.0, %v1080_v18  ;;  %v651_v39 = vadd.f32 6.5, %v635_v41 }
 0x11e   : >> { %1334 = vrot.lane.b32.xlu0 %v8486_v63, %s4577_s21  ;;  %v795_v20 = vsel %vm779_vm11, -192.0, %v763_v38  ;;  %vm811_vm12 = vcmp.gt.f32.partialorder %v5387_v58, -160.0  ;;  %v1144_v0 = vsel %vm1128_vm9, 384.0, %v1112_v47  ;;  %vm843_vm13 = vcmp.gt.f32.partialorder %v5387_v58, -112.0 }
 0x11f   : >> { %v1208_v37 = vand.u32 2147483647, %v1192_v59  ;;  %v827_v29 = vsel %vm811_vm12, -128.0, %v795_v20  ;;  %v1160_v6 = vsub.f32 %v5236_v61, %v1144_v0  ;;  %vm1256_vm15 = vcmp.lt.f32.partialorder %v1144_v0, %v728_v43 }
 0x120   : >> { %v667_v54 = vceil.f32 %v651_v39  ;;  %v859_v14 = vsel %vm843_vm13, -96.0, %v827_v29  ;;  %vm875_vm1 = vcmp.gt.f32.partialorder %v5387_v58, -80.0  ;;  %vm907_vm3 = vcmp.gt.f32.partialorder %v5387_v58, -56.0 }
 0x121   : >> { %vm939_vm6 = vcmp.gt.f32.partialorder %v5387_v58, 0.0  ;;  %vm971_vm2 = vcmp.gt.f32.partialorder %v5387_v58, 56.0  ;;  %v1176_v41 = vand.u32 2147483647, %v1160_v6  ;;  %v891_v38 = vsel %vm875_vm1, -64.0, %v859_v14 }
 0x122   : >> { %v683_v18 = vmax.f32 %v667_v54, 0.0  ;;  %vm1003_vm7 = vcmp.gt.f32.partialorder %v5387_v58, 80.0  ;;  %v923_v59 = vsel %vm907_vm3, -48.0, %v891_v38  ;;  %vm1035_vm4 = vcmp.gt.f32.partialorder %v5387_v58, 112.0 }
 0x123   : >> { %vm1067_vm14 = vcmp.gt.f32.partialorder %v5387_v58, 160.0  ;;  %vm1099_vm5 = vcmp.gt.f32.partialorder %v5387_v58, 224.0  ;;  %vm1224_vm9 = vcmp.lt.f32.partialorder %v1176_v41, %v1208_v37  ;;  %vm1240_vm8 = vcmp.eq.f32.partialorder %v1176_v41, %v1208_v37 }
 0x124   : >> { %v699_v61 = vmin.f32 %v683_v18, 14.0  ;;  %v955_v29 = vsel %vm939_vm6, 48.0, %v923_v59  ;;  %vm1272_vm10 = vmand %vm1240_vm8, %vm1256_vm15  ;;  %vm1131_vm11 = vcmp.gt.f32.partialorder %v5387_v58, 320.0  ;;  %v634_v14 = vmul.f32 0.25, %v5391_v22 }
 0x125   : >> { %v987_v47 = vsel %vm971_vm2, 64.0, %v955_v29  ;;  %vm746_vm12 = vcmp.gt.f32.partialorder %v5391_v22, -320.0  ;;  %vm1288_vm13 = vmor %vm1224_vm9, %vm1272_vm10  ;;  %vm778_vm1 = vcmp.gt.f32.partialorder %v5391_v22, -224.0  ;;  %vm810_vm15 = vcmp.gt.f32.partialorder %v5391_v22, -160.0 }
 0x126   : >> { %v715_v6 = vmul.f32 4.0, %v699_v61  ;;  %v1019_v54 = vsel %vm1003_vm7, 96.0, %v987_v47  ;;  %v762_v39 = vsel %vm746_vm12, -256.0, %v8768_v42  ;;  %v5441_v20 = vsel %vm1288_vm13, %v1144_v0, %v728_v43 }
 0x127   : >> { %v1051_v37 = vsel %vm1035_vm4, 128.0, %v1019_v54  ;;  %v650_v41 = vadd.f32 6.5, %v634_v14  ;;  %v794_v18 = vsel %vm778_vm1, -192.0, %v762_v39  ;;  %v8488_v38 = vand.u32 2147483647, %v5441_v20 }
 0x128   : >> { %v731_v59 = vadd.f32 -28.0, %v715_v6  ;;  %v1083_v61 = vsel %vm1067_vm14, 192.0, %v1051_v37  ;;  %v826_v63 = vsel %vm810_vm15, -128.0, %v794_v18  ;;  %vm842_vm3 = vcmp.gt.f32.partialorder %v5391_v22, -112.0 }
 0x129   : >> { %v1115_v29 = vsel %vm1099_vm5, 256.0, %v1083_v61  ;;  %v666_v47 = vceil.f32 %v650_v41  ;;  %1340 = vrot.lane.b32.xlu2 %v8488_v38, %s4577_s21  ;;  %v858_v14 = vsel %vm842_vm3, -96.0, %v826_v63  ;;  %vm874_vm6 = vcmp.gt.f32.partialorder %v5391_v22, -80.0 }
 0x12a   : >> { %v1147_v43 = vsel %vm1131_vm11, 384.0, %v1115_v29  ;;  %v1195_v0 = vsub.f32 %v5387_v58, %v731_v59  ;;  %v890_v39 = vsel %vm874_vm6, -64.0, %v858_v14  ;;  %vm906_vm7 = vcmp.gt.f32.partialorder %v5391_v22, -56.0 }
 0x12b   : >> { %v1163_v6 = vsub.f32 %v5387_v58, %v1147_v43  ;;  %vm1259_vm2 = vcmp.lt.f32.partialorder %v1147_v43, %v731_v59  ;;  %v682_v54 = vmax.f32 %v666_v47, 0.0  ;;  %vm938_vm4 = vcmp.gt.f32.partialorder %v5391_v22, 0.0 }
 0x12c   : >> { %v1211_v37 = vand.u32 2147483647, %v1195_v0  ;;  %vm970_vm14 = vcmp.gt.f32.partialorder %v5391_v22, 56.0  ;;  %v922_v61 = vsel %vm906_vm7, -48.0, %v890_v39  ;;  %vm1002_vm5 = vcmp.gt.f32.partialorder %v5391_v22, 80.0 }
 0x12d   : >> { %v1179_v41 = vand.u32 2147483647, %v1163_v6  ;;  %v698_v18 = vmin.f32 %v682_v54, 14.0  ;;  %v954_v63 = vsel %vm938_vm4, 48.0, %v922_v61  ;;  %vm1034_vm9 = vcmp.gt.f32.partialorder %v5391_v22, 112.0 }
 0x12e   : >> { %vm1066_vm8 = vcmp.gt.f32.partialorder %v5391_v22, 160.0  ;;  %vm1098_vm10 = vcmp.gt.f32.partialorder %v5391_v22, 224.0  ;;  %v986_v29 = vsel %vm970_vm14, 64.0, %v954_v63  ;;  %vm1130_vm1 = vcmp.gt.f32.partialorder %v5391_v22, 320.0 }
 0x12f   : >> { %vm1227_vm11 = vcmp.lt.f32.partialorder %v1179_v41, %v1211_v37  ;;  %vm1243_vm12 = vcmp.eq.f32.partialorder %v1179_v41, %v1211_v37  ;;  %v714_v58 = vmul.f32 4.0, %v698_v18  ;;  %v1018_v47 = vsel %vm1002_vm5, 96.0, %v986_v29 }
 0x130   : >> { %vm1275_vm13 = vmand %vm1243_vm12, %vm1259_vm2  ;;  %v633_v0 = vmul.f32 0.25, %v5395_v24  ;;  %vm745_vm15 = vcmp.gt.f32.partialorder %v5395_v24, -320.0  ;;  %v1050_v6 = vsel %vm1034_vm9, 128.0, %v1018_v47  ;;  %vm777_vm6 = vcmp.gt.f32.partialorder %v5395_v24, -224.0 }
 0x131   : >> { %vm1291_vm3 = vmor %vm1227_vm11, %vm1275_vm13  ;;  %v730_v14 = vadd.f32 -28.0, %v714_v58  ;;  %v761_v54 = vsel %vm745_vm15, -256.0, %v8768_v42  ;;  %v1082_v37 = vsel %vm1066_vm8, 192.0, %v1050_v6  ;;  %vm809_vm2 = vcmp.gt.f32.partialorder %v5395_v24, -160.0 }
 0x132   : >> { %v5473_v39 = vsel %vm1291_vm3, %v1147_v43, %v731_v59  ;;  %v649_v41 = vadd.f32 6.5, %v633_v0  ;;  %v793_v18 = vsel %vm777_vm6, -192.0, %v761_v54  ;;  %v1114_v63 = vsel %vm1098_vm10, 256.0, %v1082_v37 }
 0x133   : >> { %v8487_v61 = vand.u32 2147483647, %v5473_v39  ;;  %v1194_v29 = vsub.f32 %v5391_v22, %v730_v14  ;;  %v1146_v58 = vsel %vm1130_vm1, 384.0, %v1114_v63  ;;  %v825_v59 = vsel %vm809_vm2, -128.0, %v793_v18 }
 0x134   : >> { %v665_v47 = vceil.f32 %v649_v41  ;;  %vm841_vm7 = vcmp.gt.f32.partialorder %v5395_v24, -112.0  ;;  %v1162_v43 = vsub.f32 %v5391_v22, %v1146_v58  ;;  %vm1258_vm4 = vcmp.lt.f32.partialorder %v1146_v58, %v730_v14 }
 0x135   : >> { %1346 = vrot.lane.b32.xlu1 %v8487_v61, %s4577_s21  ;;  %v1210_v0 = vand.u32 2147483647, %v1194_v29  ;;  %v857_v6 = vsel %vm841_vm7, -96.0, %v825_v59  ;;  %vm873_vm14 = vcmp.gt.f32.partialorder %v5395_v24, -80.0  ;;  %vm905_vm5 = vcmp.gt.f32.partialorder %v5395_v24, -56.0 }
 0x136   : >> { %v681_v54 = vmax.f32 %v665_v47, 0.0  ;;  %vm937_vm9 = vcmp.gt.f32.partialorder %v5395_v24, 0.0  ;;  %v1178_v37 = vand.u32 2147483647, %v1162_v43  ;;  %v889_v41 = vsel %vm873_vm14, -64.0, %v857_v6 }
 0x137   : >> { %vm969_vm8 = vcmp.gt.f32.partialorder %v5395_v24, 56.0  ;;  %vm1001_vm10 = vcmp.gt.f32.partialorder %v5395_v24, 80.0  ;;  %v921_v63 = vsel %vm905_vm5, -48.0, %v889_v41  ;;  %vm1033_vm11 = vcmp.gt.f32.partialorder %v5395_v24, 112.0 }
 0x138   : >> { %v697_v18 = vmin.f32 %v681_v54, 14.0  ;;  %vm1065_vm12 = vcmp.gt.f32.partialorder %v5395_v24, 160.0  ;;  %vm1226_vm13 = vcmp.lt.f32.partialorder %v1178_v37, %v1210_v0  ;;  %vm1242_vm1 = vcmp.eq.f32.partialorder %v1178_v37, %v1210_v0 }
 0x139   : >> { %v953_v22 = vsel %vm937_vm9, 48.0, %v921_v63  ;;  %vm1097_vm15 = vcmp.gt.f32.partialorder %v5395_v24, 224.0  ;;  %vm1274_vm3 = vmand %vm1242_vm1, %vm1258_vm4  ;;  %vm1129_vm6 = vcmp.gt.f32.partialorder %v5395_v24, 320.0  ;;  %v638_v59 = vmul.f32 0.25, %v5403_v55 }
 0x13a   : >> { %v713_v29 = vmul.f32 4.0, %v697_v18  ;;  %v985_v47 = vsel %vm969_vm8, 64.0, %v953_v22  ;;  %vm1290_vm2 = vmor %vm1226_vm13, %vm1274_vm3  ;;  %vm750_vm7 = vcmp.gt.f32.partialorder %v5403_v55, -320.0  ;;  %vm782_vm14 = vcmp.gt.f32.partialorder %v5403_v55, -224.0 }
 0x13b   : >> { %v1017_v43 = vsel %vm1001_vm10, 96.0, %v985_v47  ;;  %vm814_vm5 = vcmp.gt.f32.partialorder %v5403_v55, -160.0  ;;  %v5505_v0 = vsel %vm1290_vm2, %v1146_v58, %v730_v14  ;;  %v654_v37 = vadd.f32 6.5, %v638_v59 }
 0x13c   : >> { %v729_v6 = vadd.f32 -28.0, %v713_v29  ;;  %v1049_v54 = vsel %vm1033_vm11, 128.0, %v1017_v43  ;;  %v8489_v41 = vand.u32 2147483647, %v5505_v0  ;;  %v766_v63 = vsel %vm750_vm7, -256.0, %v8768_v42 }
 0x13d   : >> { %v1081_v18 = vsel %vm1065_vm12, 192.0, %v1049_v54  ;;  %vm846_vm4 = vcmp.gt.f32.partialorder %v5403_v55, -112.0  ;;  %v670_v58 = vceil.f32 %v654_v37  ;;  %v798_v29 = vsel %vm782_vm14, -192.0, %v766_v63 }
 0x13e   : >> { %v1113_v22 = vsel %vm1097_vm15, 256.0, %v1081_v18  ;;  %v1193_v14 = vsub.f32 %v5395_v24, %v729_v6  ;;  %1344 = vrot.lane.b32.xlu0 %v8489_v41, %s4577_s21  ;;  %v830_v59 = vsel %vm814_vm5, -128.0, %v798_v29  ;;  %vm878_vm9 = vcmp.gt.f32.partialorder %v5403_v55, -80.0 }
 0x13f   : >> { %v1145_v47 = vsel %vm1129_vm6, 384.0, %v1113_v22  ;;  %vm910_vm8 = vcmp.gt.f32.partialorder %v5403_v55, -56.0  ;;  %v686_v18 = vmax.f32 %v670_v58, 0.0  ;;  %v862_v61 = vsel %vm846_vm4, -96.0, %v830_v59 }
 0x140   : >> { %v1161_v43 = vsub.f32 %v5395_v24, %v1145_v47  ;;  %v1209_v54 = vand.u32 2147483647, %v1193_v14  ;;  %vm1257_vm10 = vcmp.lt.f32.partialorder %v1145_v47, %v729_v6  ;;  %vm942_vm11 = vcmp.gt.f32.partialorder %v5403_v55, 0.0 }
 0x141   : >> { %vm974_vm12 = vcmp.gt.f32.partialorder %v5403_v55, 56.0  ;;  %vm1006_vm13 = vcmp.gt.f32.partialorder %v5403_v55, 80.0  ;;  %v702_v63 = vmin.f32 %v686_v18, 14.0  ;;  %v894_v22 = vsel %vm878_vm9, -64.0, %v862_v61 }
 0x142   : >> { %v1177_v37 = vand.u32 2147483647, %v1161_v43  ;;  %vm1038_vm1 = vcmp.gt.f32.partialorder %v5403_v55, 112.0  ;;  %v926_v29 = vsel %vm910_vm8, -48.0, %v894_v22  ;;  %vm1070_vm15 = vcmp.gt.f32.partialorder %v5403_v55, 160.0 }
 0x143   : >> { %vm1102_vm3 = vcmp.gt.f32.partialorder %v5403_v55, 224.0  ;;  %vm1134_vm6 = vcmp.gt.f32.partialorder %v5403_v55, 320.0  ;;  %v718_v24 = vmul.f32 4.0, %v702_v63  ;;  %v958_v14 = vsel %vm942_vm11, 48.0, %v926_v29 }
 0x144   : >> { %vm1225_vm2 = vcmp.lt.f32.partialorder %v1177_v37, %v1209_v54  ;;  %vm1241_vm7 = vcmp.eq.f32.partialorder %v1177_v37, %v1209_v54  ;;  %v990_v58 = vsel %vm974_vm12, 64.0, %v958_v14  ;;  %v5537_v61 = vmul.f32 %v5216_v35, %v8739_v57 }
 0x145   : >> { %vm1273_vm14 = vmand %vm1241_vm7, %vm1257_vm10  ;;  %v5541_v59 = vmul.f32 %v5216_v35, %v8744_v19  ;;  %v5545_v43 = vmul.f32 %v5216_v35, %v8738_v5  ;;  %v734_v54 = vadd.f32 -28.0, %v718_v24  ;;  %v1022_v18 = vsel %vm1006_vm13, 96.0, %v990_v58 }
 0x146   : >> { %vm1289_vm5 = vmor %vm1225_vm2, %vm1273_vm14  ;;  %v5551_v37 = vmul.f32 %v5216_v35, %v8741_v16  ;;  %v5555_v63 = vmul.f32 %v5216_v35, %v8742_v30  ;;  %v1054_v29 = vsel %vm1038_vm1, 128.0, %v1022_v18  ;;  %v637_v14 = vmul.f32 0.25, %v5537_v61 }
 0x147   : >> { %v5557_v22 = vsel %vm1289_vm5, %v1145_v47, %v729_v6  ;;  %vm749_vm4 = vcmp.gt.f32.partialorder %v5537_v61, -320.0  ;;  %v1086_v58 = vsel %vm1070_vm15, 192.0, %v1054_v29  ;;  %v1198_v38 = vsub.f32 %v5403_v55, %v734_v54 }
 0x148   : >> { %v8496_v24 = vand.u32 2147483647, %v5557_v22  ;;  %v765_v41 = vsel %vm749_vm4, -256.0, %v8768_v42  ;;  %v1118_v6 = vsel %vm1102_vm3, 256.0, %v1086_v58  ;;  %v653_v47 = vadd.f32 6.5, %v637_v14 }
 0x149   : >> { %vm781_vm9 = vcmp.gt.f32.partialorder %v5537_v61, -224.0  ;;  %vm813_vm8 = vcmp.gt.f32.partialorder %v5537_v61, -160.0  ;;  %v1150_v18 = vsel %vm1134_vm6, 384.0, %v1118_v6  ;;  %v1214_v29 = vand.u32 2147483647, %v1198_v38 }
 0x14a   : >> { %1342 = vrot.lane.b32.xlu2 %v8496_v24, %s4577_s21  ;;  %v797_v45 = vsel %vm781_vm9, -192.0, %v765_v41  ;;  %vm845_vm10 = vcmp.gt.f32.partialorder %v5537_v61, -112.0  ;;  %v1166_v33 = vsub.f32 %v5403_v55, %v1150_v18  ;;  %vm1262_vm11 = vcmp.lt.f32.partialorder %v1150_v18, %v734_v54 }
 0x14b   : >> { %v669_v58 = vceil.f32 %v653_v47  ;;  %v829_v14 = vsel %vm813_vm8, -128.0, %v797_v45  ;;  %vm877_vm12 = vcmp.gt.f32.partialorder %v5537_v61, -80.0  ;;  %vm909_vm13 = vcmp.gt.f32.partialorder %v5537_v61, -56.0 }
 0x14c   : >> { %v861_v7 = vsel %vm845_vm10, -96.0, %v829_v14  ;;  %vm941_vm1 = vcmp.gt.f32.partialorder %v5537_v61, 0.0  ;;  %v1182_v24 = vand.u32 2147483647, %v1166_v33  ;;  %vm973_vm15 = vcmp.gt.f32.partialorder %v5537_v61, 56.0 }
 0x14d   : >> { %v685_v34 = vmax.f32 %v669_v58, 0.0  ;;  %v893_v21 = vsel %vm877_vm12, -64.0, %v861_v7  ;;  %vm1005_vm3 = vcmp.gt.f32.partialorder %v5537_v61, 80.0  ;;  %vm1037_vm6 = vcmp.gt.f32.partialorder %v5537_v61, 112.0 }
 0x14e   : >> { %v925_v38 = vsel %vm909_vm13, -48.0, %v893_v21  ;;  %vm1069_vm2 = vcmp.gt.f32.partialorder %v5537_v61, 160.0  ;;  %vm1230_vm7 = vcmp.lt.f32.partialorder %v1182_v24, %v1214_v29  ;;  %vm1246_vm14 = vcmp.eq.f32.partialorder %v1182_v24, %v1214_v29 }
 0x14f   : >> { %v701_v45 = vmin.f32 %v685_v34, 14.0  ;;  %v957_v55 = vsel %vm941_vm1, 48.0, %v925_v38  ;;  %vm1278_vm5 = vmand %vm1246_vm14, %vm1262_vm11  ;;  %vm1101_vm4 = vcmp.gt.f32.partialorder %v5537_v61, 224.0  ;;  %vm1133_vm9 = vcmp.gt.f32.partialorder %v5537_v61, 320.0 }
 0x150   : >> { %v989_v41 = vsel %vm973_vm15, 64.0, %v957_v55  ;;  %v636_v7 = vmul.f32 0.25, %v5541_v59  ;;  %vm1294_vm8 = vmor %vm1230_vm7, %vm1278_vm5  ;;  %vm748_vm10 = vcmp.gt.f32.partialorder %v5541_v59, -320.0  ;;  %vm780_vm12 = vcmp.gt.f32.partialorder %v5541_v59, -224.0 }
 0x151   : >> { %v717_v21 = vmul.f32 4.0, %v701_v45  ;;  %v1021_v33 = vsel %vm1005_vm3, 96.0, %v989_v41  ;;  %v5592_v6 = vsel %vm1294_vm8, %v1150_v18, %v734_v54  ;;  %v764_v47 = vsel %vm748_vm10, -256.0, %v8768_v42 }
 0x152   : >> { %v1053_v34 = vsel %vm1037_vm6, 128.0, %v1021_v33  ;;  %v652_v24 = vadd.f32 6.5, %v636_v7  ;;  %v8501_v29 = vand.u32 2147483647, %v5592_v6  ;;  %v796_v38 = vsel %vm780_vm12, -192.0, %v764_v47 }
 0x153   : >> { %v733_v58 = vadd.f32 -28.0, %v717_v21  ;;  %v1085_v14 = vsel %vm1069_vm2, 192.0, %v1053_v34  ;;  %vm812_vm11 = vcmp.gt.f32.partialorder %v5541_v59, -160.0  ;;  %vm844_vm13 = vcmp.gt.f32.partialorder %v5541_v59, -112.0 }
 0x154   : >> { %v1117_v45 = vsel %vm1101_vm4, 256.0, %v1085_v14  ;;  %v668_v55 = vceil.f32 %v652_v24  ;;  %1352 = vrot.lane.b32.xlu1 %v8501_v29, %s4577_s21  ;;  %v828_v41 = vsel %vm812_vm11, -128.0, %v796_v38  ;;  %vm876_vm1 = vcmp.gt.f32.partialorder %v5541_v59, -80.0 }
 0x155   : >> { %v1149_v54 = vsel %vm1133_vm9, 384.0, %v1117_v45  ;;  %v1197_v18 = vsub.f32 %v5537_v61, %v733_v58  ;;  %v860_v33 = vsel %vm844_vm13, -96.0, %v828_v41  ;;  %vm908_vm3 = vcmp.gt.f32.partialorder %v5541_v59, -56.0 }
 0x156   : >> { %v1165_v7 = vsub.f32 %v5537_v61, %v1149_v54  ;;  %vm1261_vm15 = vcmp.lt.f32.partialorder %v1149_v54, %v733_v58  ;;  %v684_v21 = vmax.f32 %v668_v55, 0.0  ;;  %v892_v24 = vsel %vm876_vm1, -64.0, %v860_v33 }
 0x157   : >> { %v1213_v34 = vand.u32 2147483647, %v1197_v18  ;;  %vm940_vm6 = vcmp.gt.f32.partialorder %v5541_v59, 0.0  ;;  %v924_v29 = vsel %vm908_vm3, -48.0, %v892_v24  ;;  %vm972_vm2 = vcmp.gt.f32.partialorder %v5541_v59, 56.0 }
 0x158   : >> { %v1181_v47 = vand.u32 2147483647, %v1165_v7  ;;  %v700_v14 = vmin.f32 %v684_v21, 14.0  ;;  %v956_v45 = vsel %vm940_vm6, 48.0, %v924_v29  ;;  %vm1004_vm7 = vcmp.gt.f32.partialorder %v5541_v59, 80.0 }
 0x159   : >> { %vm1036_vm14 = vcmp.gt.f32.partialorder %v5541_v59, 112.0  ;;  %vm1068_vm5 = vcmp.gt.f32.partialorder %v5541_v59, 160.0  ;;  %v988_v38 = vsel %vm972_vm2, 64.0, %v956_v45  ;;  %vm1100_vm10 = vcmp.gt.f32.partialorder %v5541_v59, 224.0 }
 0x15a   : >> { %vm1229_vm4 = vcmp.lt.f32.partialorder %v1181_v47, %v1213_v34  ;;  %vm1245_vm9 = vcmp.eq.f32.partialorder %v1181_v47, %v1213_v34  ;;  %v716_v61 = vmul.f32 4.0, %v700_v14  ;;  %v1020_v55 = vsel %vm1004_vm7, 96.0, %v988_v38 }
 0x15b   : >> { %vm1277_vm8 = vmand %vm1245_vm9, %vm1261_vm15  ;;  %vm1132_vm12 = vcmp.gt.f32.partialorder %v5541_v59, 320.0  ;;  %v641_v18 = vmul.f32 0.25, %v5545_v43  ;;  %v1052_v41 = vsel %vm1036_vm14, 128.0, %v1020_v55  ;;  %vm753_vm13 = vcmp.gt.f32.partialorder %v5545_v43, -320.0 }
 0x15c   : >> { %vm1293_vm11 = vmor %vm1229_vm4, %vm1277_vm8  ;;  %v732_v29 = vadd.f32 -28.0, %v716_v61  ;;  %vm785_vm1 = vcmp.gt.f32.partialorder %v5545_v43, -224.0  ;;  %v1084_v21 = vsel %vm1068_vm5, 192.0, %v1052_v41  ;;  %v769_v34 = vsel %vm753_vm13, -256.0, %v8768_v42 }
 0x15d   : >> { %v5624_v7 = vsel %vm1293_vm11, %v1149_v54, %v733_v58  ;;  %v657_v33 = vadd.f32 6.5, %v641_v18  ;;  %v1116_v47 = vsel %vm1100_vm10, 256.0, %v1084_v21  ;;  %v801_v45 = vsel %vm785_vm1, -192.0, %v769_v34 }
 0x15e   : >> { %8769 = vst [vmem:[#allocation75_spill] sm:$0xff] %v5624_v7  ;;  %v8502_v24 = vand.u32 2147483647, %v5624_v7  ;;  %v1196_v14 = vsub.f32 %v5541_v59, %v732_v29  ;;  %v1148_v61 = vsel %vm1132_vm12, 384.0, %v1116_v47  ;;  %vm817_vm15 = vcmp.gt.f32.partialorder %v5545_v43, -160.0 }
 0x15f   : >> { %v673_v38 = vceil.f32 %v657_v33  ;;  %vm849_vm3 = vcmp.gt.f32.partialorder %v5545_v43, -112.0  ;;  %v1164_v58 = vsub.f32 %v5541_v59, %v1148_v61  ;;  %vm1260_vm6 = vcmp.lt.f32.partialorder %v1148_v61, %v732_v29 }
 0x160   : >> { %1350 = vrot.lane.b32.xlu0 %v8502_v24, %s4577_s21  ;;  %v1212_v54 = vand.u32 2147483647, %v1196_v14  ;;  %v833_v55 = vsel %vm817_vm15, -128.0, %v801_v45  ;;  %vm881_vm2 = vcmp.gt.f32.partialorder %v5545_v43, -80.0  ;;  %vm913_vm7 = vcmp.gt.f32.partialorder %v5545_v43, -56.0 }
 0x161   : >> { %v689_v18 = vmax.f32 %v673_v38, 0.0  ;;  %v865_v41 = vsel %vm849_vm3, -96.0, %v833_v55  ;;  %v1180_v21 = vand.u32 2147483647, %v1164_v58  ;;  %vm945_vm14 = vcmp.gt.f32.partialorder %v5545_v43, 0.0 }
 0x162   : >> { %v897_v33 = vsel %vm881_vm2, -64.0, %v865_v41  ;;  %vm977_vm5 = vcmp.gt.f32.partialorder %v5545_v43, 56.0  ;;  %vm1009_vm4 = vcmp.gt.f32.partialorder %v5545_v43, 80.0  ;;  %vm1041_vm9 = vcmp.gt.f32.partialorder %v5545_v43, 112.0 }
 0x163   : >> { %v705_v34 = vmin.f32 %v689_v18, 14.0  ;;  %v929_v47 = vsel %vm913_vm7, -48.0, %v897_v33  ;;  %vm1228_vm8 = vcmp.lt.f32.partialorder %v1180_v21, %v1212_v54  ;;  %vm1244_vm10 = vcmp.eq.f32.partialorder %v1180_v21, %v1212_v54 }
 0x164   : >> { %v961_v59 = vsel %vm945_vm14, 48.0, %v929_v47  ;;  %vm1073_vm12 = vcmp.gt.f32.partialorder %v5545_v43, 160.0  ;;  %vm1276_vm11 = vmand %vm1244_vm10, %vm1260_vm6  ;;  %vm1105_vm13 = vcmp.gt.f32.partialorder %v5545_v43, 224.0  ;;  %vm1137_vm1 = vcmp.gt.f32.partialorder %v5545_v43, 320.0 }
 0x165   : >> { %v721_v14 = vmul.f32 4.0, %v705_v34  ;;  %v993_v45 = vsel %vm977_vm5, 64.0, %v961_v59  ;;  %vm1292_vm15 = vmor %vm1228_vm8, %vm1276_vm11  ;;  %v640_v58 = vmul.f32 0.25, %v5551_v37  ;;  %vm752_vm3 = vcmp.gt.f32.partialorder %v5551_v37, -320.0 }
 0x166   : >> { %v1025_v38 = vsel %vm1009_vm4, 96.0, %v993_v45  ;;  %vm784_vm2 = vcmp.gt.f32.partialorder %v5551_v37, -224.0  ;;  %v5650_v54 = vsel %vm1292_vm15, %v1148_v61, %v732_v29  ;;  %v768_v41 = vsel %vm752_vm3, -256.0, %v8768_v42 }
 0x167   : >> { %v737_v55 = vadd.f32 -28.0, %v721_v14  ;;  %v1057_v18 = vsel %vm1041_vm9, 128.0, %v1025_v38  ;;  %v8503_v21 = vand.u32 2147483647, %v5650_v54  ;;  %v656_v34 = vadd.f32 6.5, %v640_v58 }
 0x168   : >> { %v1089_v33 = vsel %vm1073_vm12, 192.0, %v1057_v18  ;;  %v800_v47 = vsel %vm784_vm2, -192.0, %v768_v41  ;;  %vm816_vm6 = vcmp.gt.f32.partialorder %v5551_v37, -160.0  ;;  %vm848_vm7 = vcmp.gt.f32.partialorder %v5551_v37, -112.0 }
 0x169   : >> { %v1121_v59 = vsel %vm1105_vm13, 256.0, %v1089_v33  ;;  %v1201_v45 = vsub.f32 %v5545_v43, %v737_v55  ;;  %1348 = vrot.lane.b32.xlu2 %v8503_v21, %s4577_s21  ;;  %v672_v61 = vceil.f32 %v656_v34  ;;  %v832_v14 = vsel %vm816_vm6, -128.0, %v800_v47 }
 0x16a   : >> { %v1153_v29 = vsel %vm1137_vm1, 384.0, %v1121_v59  ;;  %vm880_vm14 = vcmp.gt.f32.partialorder %v5551_v37, -80.0  ;;  %v864_v18 = vsel %vm848_vm7, -96.0, %v832_v14  ;;  %vm912_vm4 = vcmp.gt.f32.partialorder %v5551_v37, -56.0 }
 0x16b   : >> { %v1169_v38 = vsub.f32 %v5545_v43, %v1153_v29  ;;  %v1217_v58 = vand.u32 2147483647, %v1201_v45  ;;  %vm1265_vm5 = vcmp.lt.f32.partialorder %v1153_v29, %v737_v55  ;;  %v688_v41 = vmax.f32 %v672_v61, 0.0 }
 0x16c   : >> { %v896_v33 = vsel %vm880_vm14, -64.0, %v864_v18  ;;  %vm944_vm9 = vcmp.gt.f32.partialorder %v5551_v37, 0.0  ;;  %vm976_vm8 = vcmp.gt.f32.partialorder %v5551_v37, 56.0  ;;  %vm1008_vm10 = vcmp.gt.f32.partialorder %v5551_v37, 80.0 }
 0x16d   : >> { %v1185_v24 = vand.u32 2147483647, %v1169_v38  ;;  %v928_v21 = vsel %vm912_vm4, -48.0, %v896_v33  ;;  %v704_v34 = vmin.f32 %v688_v41, 14.0  ;;  %vm1040_vm12 = vcmp.gt.f32.partialorder %v5551_v37, 112.0 }
 0x16e   : >> { %v960_v47 = vsel %vm944_vm9, 48.0, %v928_v21  ;;  %vm1072_vm11 = vcmp.gt.f32.partialorder %v5551_v37, 160.0  ;;  %vm1104_vm15 = vcmp.gt.f32.partialorder %v5551_v37, 224.0  ;;  %vm1136_vm2 = vcmp.gt.f32.partialorder %v5551_v37, 320.0 }
 0x16f   : >> { %vm1233_vm13 = vcmp.lt.f32.partialorder %v1185_v24, %v1217_v58  ;;  %vm1249_vm1 = vcmp.eq.f32.partialorder %v1185_v24, %v1217_v58  ;;  %v992_v43 = vsel %vm976_vm8, 64.0, %v960_v47  ;;  %v720_v59 = vmul.f32 4.0, %v704_v34 }
 0x170   : >> { %vm1281_vm3 = vmand %vm1249_vm1, %vm1265_vm5  ;;  %v1024_v45 = vsel %vm1008_vm10, 96.0, %v992_v43  ;;  %v639_v61 = vmul.f32 0.25, %v5555_v63  ;;  %vm751_vm7 = vcmp.gt.f32.partialorder %v5555_v63, -320.0  ;;  %vm783_vm14 = vcmp.gt.f32.partialorder %v5555_v63, -224.0 }
 0x171   : >> { %vm1297_vm6 = vmor %vm1233_vm13, %vm1281_vm3  ;;  %v1056_v21 = vsel %vm1040_vm12, 128.0, %v1024_v45  ;;  %vm815_vm4 = vcmp.gt.f32.partialorder %v5555_v63, -160.0  ;;  %v736_v14 = vadd.f32 -28.0, %v720_v59  ;;  %v767_v33 = vsel %vm751_vm7, -256.0, %v8768_v42 }
 0x172   : >> { %v5681_v24 = vsel %vm1297_vm6, %v1153_v29, %v737_v55  ;;  %v1088_v38 = vsel %vm1072_vm11, 192.0, %v1056_v21  ;;  %v655_v58 = vadd.f32 6.5, %v639_v61  ;;  %vm847_vm5 = vcmp.gt.f32.partialorder %v5555_v63, -112.0 }
 0x173   : >> { %v8504_v18 = vand.u32 2147483647, %v5681_v24  ;;  %v1120_v41 = vsel %vm1104_vm15, 256.0, %v1088_v38  ;;  %v1200_v29 = vsub.f32 %v5551_v37, %v736_v14  ;;  %v799_v47 = vsel %vm783_vm14, -192.0, %v767_v33 }
 0x174   : >> { %v1152_v55 = vsel %vm1136_vm2, 384.0, %v1120_v41  ;;  %v671_v34 = vceil.f32 %v655_v58  ;;  %v831_v59 = vsel %vm815_vm4, -128.0, %v799_v47  ;;  %vm879_vm8 = vcmp.gt.f32.partialorder %v5555_v63, -80.0 }
 0x175   : >> { %1358 = vrot.lane.b32.xlu1 %v8504_v18, %s4577_s21  ;;  %v1168_v43 = vsub.f32 %v5551_v37, %v1152_v55  ;;  %vm1264_vm9 = vcmp.lt.f32.partialorder %v1152_v55, %v736_v14  ;;  %v1216_v45 = vand.u32 2147483647, %v1200_v29  ;;  %v863_v21 = vsel %vm847_vm5, -96.0, %v831_v59 }
 0x176   : >> { %v687_v61 = vmax.f32 %v671_v34, 0.0  ;;  %vm911_vm10 = vcmp.gt.f32.partialorder %v5555_v63, -56.0  ;;  %v895_v58 = vsel %vm879_vm8, -64.0, %v863_v21  ;;  %vm943_vm12 = vcmp.gt.f32.partialorder %v5555_v63, 0.0 }
 0x177   : >> { %v1184_v38 = vand.u32 2147483647, %v1168_v43  ;;  %vm975_vm11 = vcmp.gt.f32.partialorder %v5555_v63, 56.0  ;;  %v927_v37 = vsel %vm911_vm10, -48.0, %v895_v58  ;;  %vm1007_vm13 = vcmp.gt.f32.partialorder %v5555_v63, 80.0 }
 0x178   : >> { %v703_v41 = vmin.f32 %v687_v61, 14.0  ;;  %vm1039_vm1 = vcmp.gt.f32.partialorder %v5555_v63, 112.0  ;;  %v959_v33 = vsel %vm943_vm12, 48.0, %v927_v37  ;;  %vm1071_vm2 = vcmp.gt.f32.partialorder %v5555_v63, 160.0 }
 0x179   : >> { %vm1232_vm15 = vcmp.lt.f32.partialorder %v1184_v38, %v1216_v45  ;;  %vm1248_vm3 = vcmp.eq.f32.partialorder %v1184_v38, %v1216_v45  ;;  %v991_v34 = vsel %vm975_vm11, 64.0, %v959_v33  ;;  %vm1103_vm7 = vcmp.gt.f32.partialorder %v5555_v63, 224.0 }
 0x17a   : >> { %vm1280_vm6 = vmand %vm1248_vm3, %vm1264_vm9  ;;  %v719_v29 = vmul.f32 4.0, %v703_v41  ;;  %vm1135_vm14 = vcmp.gt.f32.partialorder %v5555_v63, 320.0  ;;  %v1023_v47 = vsel %vm1007_vm13, 96.0, %v991_v34  ;;  %v5714_v43 = vmul.f32 %v5216_v35, %v8736_v26 }
 0x17b   : >> { %vm1296_vm4 = vmor %vm1232_vm15, %vm1280_vm6  ;;  %v5717_v59 = vstv %s5691_s22  ;;  %v1055_v21 = vsel %vm1039_vm1, 128.0, %v1023_v47  ;;  %v4578_v38 = vmov 0   ;;  %s4385_s22 = sshra.s32 (%p7388_p11), %s3973_s20, 4  ;;  %s4386_s22 = int_to_ptr.hbm [resolvable:$true] %s4385_s22 }
 0x17c   : >> { %v5719_v45 = vsel %vm1296_vm4, %v1152_v55, %v736_v14  ;;  %v735_v61 = vadd.f32 -28.0, %v719_v29  ;;  %4343 = vset.pattern.permute.xlu1 %v4578_v38  ;;  %v1512_v58 = vmul.f32 %v5717_v59, %v8771_v2  ;;  %4342 = vset.pattern.permute.xlu0 %v4578_v38  ;;  %v1087_v37 = vsel %vm1071_vm2, 192.0, %v1055_v21  ;;  %s4387_s1 = scalar_lea.hbm (%p7388_p11), %s4386_s22, 128  ;;  %p4392_p1 = scmp.lt.s32.totalorder (%p7388_p11), %s4386_s22, %s8452_s4 }
 0x17d   : >> { %8770 = vst [vmem:[#allocation76_spill] sm:$0xff] %v5719_v45  ;;  %v8506_v41 = vand.u32 2147483647, %v5719_v45  ;;  %v643_v33 = vmul.f32 0.25, %v5714_v43  ;;  %vm755_vm5 = vcmp.gt.f32.partialorder %v5714_v43, -320.0  ;;  %4341 = vset.pattern.permute.xlu2 %v4578_v38  ;;  %v1119_v14 = vsel %vm1103_vm7, 256.0, %v1087_v37  ;;  %p4388_p12 = scmp.ne.s32.totalorder (%p7388_p11), %s4386_s22, %s4387_s1 }
 0x17e   : >> { %v1199_v55 = vsub.f32 %v5555_v63, %v735_v61  ;;  %v771_v29 = vsel %vm755_vm5, -256.0, %v8768_v42  ;;  %vm787_vm9 = vcmp.gt.f32.partialorder %v5714_v43, -224.0  ;;  %1538 = vperm.xlu1 %4343, %v1512_v58   ;;  %v1151_v34 = vsel %vm1135_vm14, 384.0, %v1119_v14 }
 0x17f   : >> { %1356 = vrot.lane.b32.xlu0 %v8506_v41, %s4577_s21  ;;  %v659_v47 = vadd.f32 6.5, %v643_v33  ;;  %v803_v21 = vsel %vm787_vm9, -192.0, %v771_v29  ;;  %vm819_vm8 = vcmp.gt.f32.partialorder %v5714_v43, -160.0  ;;  %v1167_v38 = vsub.f32 %v5555_v63, %v1151_v34  ;;  %p4389_p13 = pnand (%p7388_p11), %p4388_p12, %p4655_p5 }
 0x180   : >> { %v1215_v37 = vand.u32 2147483647, %v1199_v55  ;;  %v835_v18 = vsel %vm819_vm8, -128.0, %v803_v21  ;;  %vm851_vm10 = vcmp.gt.f32.partialorder %v5714_v43, -112.0  ;;  %vm883_vm12 = vcmp.gt.f32.partialorder %v5714_v43, -80.0 }
 0x181   : >> { %v675_v2 = vceil.f32 %v659_v47  ;;  %vm915_vm11 = vcmp.gt.f32.partialorder %v5714_v43, -56.0  ;;  %v1183_v58 = vand.u32 2147483647, %v1167_v38  ;;  %vm1263_vm13 = vcmp.lt.f32.partialorder %v1151_v34, %v735_v61  ;;  %p4390_p0 = pneg (%p7388_p11), %p4389_p13 }
 0x182   : >> { %v867_v41 = vsel %vm851_vm10, -96.0, %v835_v18  ;;  %vm947_vm1 = vcmp.gt.f32.partialorder %v5714_v43, 0.0  ;;  %vm979_vm15 = vcmp.gt.f32.partialorder %v5714_v43, 56.0  ;;  %vm1011_vm6 = vcmp.gt.f32.partialorder %v5714_v43, 80.0 }
 0x183   : >> { %v691_v33 = vmax.f32 %v675_v2, 0.0  ;;  %v899_v14 = vsel %vm883_vm12, -64.0, %v867_v41  ;;  %vm1231_vm3 = vcmp.lt.f32.partialorder %v1183_v58, %v1215_v37  ;;  %vm1247_vm2 = vcmp.eq.f32.partialorder %v1183_v58, %v1215_v37 }
 0x184   : >> { %v931_v63 = vsel %vm915_vm11, -48.0, %v899_v14  ;;  %vm1279_vm7 = vmand %vm1247_vm2, %vm1263_vm13  ;;  %vm1043_vm14 = vcmp.gt.f32.partialorder %v5714_v43, 112.0  ;;  %vm1075_vm4 = vcmp.gt.f32.partialorder %v5714_v43, 160.0  ;;  %vm1107_vm9 = vcmp.gt.f32.partialorder %v5714_v43, 224.0 }
 0x185   : >> { %v707_v55 = vmin.f32 %v691_v33, 14.0  ;;  %v963_v29 = vsel %vm947_vm1, 48.0, %v931_v63  ;;  %vm1295_vm5 = vmor %vm1231_vm3, %vm1279_vm7  ;;  %v5753_v2 = vmul.f32 %v5216_v35, %v8737_v40  ;;  %v1514_v41 = vmul.f32 %v5717_v59, %v8772_v1 }
 0x186   : >> { %v995_v18 = vsel %vm979_vm15, 64.0, %v963_v29  ;;  %v5757_v47 = vsel %vm1295_vm5, %v1151_v34, %v735_v61  ;;  %vm1139_vm8 = vcmp.gt.f32.partialorder %v5714_v43, 320.0 }
 0x187   : >> { %v723_v21 = vmul.f32 4.0, %v707_v55  ;;  %v1027_v38 = vsel %vm1011_vm6, 96.0, %v995_v18  ;;  %v8508_v37 = vand.u32 2147483647, %v5757_v47  ;;  %v642_v33 = vmul.f32 0.25, %v5753_v2  ;;  %1548 = vperm.xlu1 %4343, %v1514_v41  }
 0x188   : >> { %v1059_v58 = vsel %vm1043_vm14, 128.0, %v1027_v38  ;;  %vm754_vm10 = vcmp.gt.f32.partialorder %v5753_v2, -320.0  ;;  %vm786_vm12 = vcmp.gt.f32.partialorder %v5753_v2, -224.0  ;;  %vm818_vm11 = vcmp.gt.f32.partialorder %v5753_v2, -160.0 }
 0x189   : >> { %v739_v35 = vadd.f32 -28.0, %v723_v21  ;;  %v1091_v14 = vsel %vm1075_vm4, 192.0, %v1059_v58  ;;  %v770_v61 = vsel %vm754_vm10, -256.0, %v8768_v42  ;;  %1354 = vrot.lane.b32.xlu2 %v8508_v37, %s4577_s21  ;;  %v658_v63 = vadd.f32 6.5, %v642_v33 }
 0x18a   : >> { %v1123_v34 = vsel %vm1107_vm9, 256.0, %v1091_v14  ;;  %v802_v55 = vsel %vm786_vm12, -192.0, %v770_v61  ;;  %vm850_vm13 = vcmp.gt.f32.partialorder %v5753_v2, -112.0  ;;  %vm882_vm15 = vcmp.gt.f32.partialorder %v5753_v2, -80.0 }
 0x18b   : >> { %v1155_v29 = vsel %vm1139_vm8, 384.0, %v1123_v34  ;;  %v1203_v18 = vsub.f32 %v5714_v43, %v739_v35  ;;  %v834_v41 = vsel %vm818_vm11, -128.0, %v802_v55  ;;  %v674_v38 = vceil.f32 %v658_v63 }
 0x18c   : >> { %v1171_v21 = vsub.f32 %v5714_v43, %v1155_v29  ;;  %vm1267_vm1 = vcmp.lt.f32.partialorder %v1155_v29, %v739_v35  ;;  %v866_v58 = vsel %vm850_vm13, -96.0, %v834_v41  ;;  %vm914_vm3 = vcmp.gt.f32.partialorder %v5753_v2, -56.0 }
 0x18d   : >> { %v1219_v33 = vand.u32 2147483647, %v1203_v18  ;;  %vm946_vm2 = vcmp.gt.f32.partialorder %v5753_v2, 0.0  ;;  %v690_v61 = vmax.f32 %v674_v38, 0.0  ;;  %v898_v34 = vsel %vm882_vm15, -64.0, %v866_v58 }
 0x18e   : >> { %v1187_v14 = vand.u32 2147483647, %v1171_v21  ;;  %vm978_vm6 = vcmp.gt.f32.partialorder %v5753_v2, 56.0  ;;  %v930_v55 = vsel %vm914_vm3, -48.0, %v898_v34  ;;  %vm1010_vm7 = vcmp.gt.f32.partialorder %v5753_v2, 80.0 }
 0x18f   : >> { %vm1042_vm14 = vcmp.gt.f32.partialorder %v5753_v2, 112.0  ;;  %v706_v43 = vmin.f32 %v690_v61, 14.0  ;;  %v962_v63 = vsel %vm946_vm2, 48.0, %v930_v55  ;;  %vm1074_vm8 = vcmp.gt.f32.partialorder %v5753_v2, 160.0 }
 0x190   : >> { %vm1235_vm4 = vcmp.lt.f32.partialorder %v1187_v14, %v1219_v33  ;;  %vm1251_vm5 = vcmp.eq.f32.partialorder %v1187_v14, %v1219_v33  ;;  %v994_v18 = vsel %vm978_vm6, 64.0, %v962_v63  ;;  %v1517_v41 = vmul.f32 %v5717_v59, %v8773_v9 }
 0x191   : >> { %vm1283_vm9 = vmand %vm1251_vm5, %vm1267_vm1  ;;  %v722_v21 = vmul.f32 4.0, %v706_v43  ;;  %v1026_v38 = vsel %vm1010_vm7, 96.0, %v994_v18  ;;  %vm1106_vm12 = vcmp.gt.f32.partialorder %v5753_v2, 224.0  ;;  %vm1138_vm11 = vcmp.gt.f32.partialorder %v5753_v2, 320.0 }
 0x192   : >> { %vm1299_vm10 = vmor %vm1235_vm4, %vm1283_vm9  ;;  %v1058_v34 = vsel %vm1042_vm14, 128.0, %v1026_v38  ;;  %1563 = vperm.xlu1 %4343, %v1517_v41   ;;  %v1511_v63 = vmul.f32 %v5717_v59, %v8775_v11  ;;  %v5801_v43 = vmul.f32 %v5717_v59, %v8776_v3  ;;  %v5803_v18 = vstv %s1722_s28 }
 0x193   : >> { %v5793_v58 = vsel %vm1299_vm10, %v1155_v29, %v739_v35  ;;  %v738_v14 = vadd.f32 -28.0, %v722_v21  ;;  %v1090_v61 = vsel %vm1074_vm8, 192.0, %v1058_v34  ;;  %v5811_v41 = vmul.f32 %v5717_v59, %v8777_v12 }
 0x194   : >> { %8774 = vst [vmem:[#allocation77_spill] sm:$0xff] %v5793_v58  ;;  %v8507_v33 = vand.u32 2147483647, %v5793_v58  ;;  %v1122_v55 = vsel %vm1106_vm12, 256.0, %v1090_v61  ;;  %v5815_v21 = vmul.f32 %v5803_v18, %v8751_v27  ;;  %v5820_v34 = vmul.f32 %v5717_v59, %v8778_v10 }
 0x195   : >> { %v1154_v35 = vsel %vm1138_vm11, 384.0, %v1122_v55  ;;  %v1202_v29 = vsub.f32 %v5753_v2, %v738_v14  ;;  %v1520_v61 = vmul.f32 %v5717_v59, %v8779_v28  ;;  %v5826_v55 = vmul.f32 %v5717_v59, %v8780_v44 }
 0x196   : >> { %1362 = vrot.lane.b32.xlu0 %v8507_v33, %s4577_s21  ;;  %v1170_v38 = vsub.f32 %v5753_v2, %v1154_v35  ;;  %v1740_v37 = vmul.f32 0.25, %v5815_v21  ;;  %vm1852_vm13 = vcmp.gt.f32.partialorder %v5815_v21, -320.0  ;;  %vm1884_vm1 = vcmp.gt.f32.partialorder %v5815_v21, -224.0 }
 0x197   : >> { %v1218_v33 = vand.u32 2147483647, %v1202_v29  ;;  %vm1266_vm15 = vcmp.lt.f32.partialorder %v1154_v35, %v738_v14  ;;  %v5833_v2 = vmul.f32 %v5803_v18, %v8750_v36  ;;  %v5837_v12 = vmul.f32 %v5803_v18, %v8749_v23 }
 0x198   : >> { %v1186_v27 = vand.u32 2147483647, %v1170_v38  ;;  %v1756_v28 = vadd.f32 6.5, %v1740_v37  ;;  %v1868_v44 = vsel %vm1852_vm13, -256.0, %v8768_v42  ;;  %vm1916_vm3 = vcmp.gt.f32.partialorder %v5815_v21, -160.0 }
 0x199   : >> { %vm1948_vm2 = vcmp.gt.f32.partialorder %v5815_v21, -112.0  ;;  %v1900_v29 = vsel %vm1884_vm1, -192.0, %v1868_v44  ;;  %vm1980_vm14 = vcmp.gt.f32.partialorder %v5815_v21, -80.0  ;;  %v1523_v38 = vmul.f32 %v5717_v59, %v8781_v32 }
 0x19a   : >> { %vm1234_vm6 = vcmp.lt.f32.partialorder %v1186_v27, %v1218_v33  ;;  %vm1250_vm7 = vcmp.eq.f32.partialorder %v1186_v27, %v1218_v33  ;;  %1578 = vperm.xlu1 %4343, %v1520_v61   ;;  %v1772_v36 = vceil.f32 %v1756_v28  ;;  %v1932_v23 = vsel %vm1916_vm3, -128.0, %v1900_v29 }
 0x19b   : >> { %vm1282_vm4 = vmand %vm1250_vm7, %vm1266_vm15  ;;  %vm2012_vm5 = vcmp.gt.f32.partialorder %v5815_v21, -56.0  ;;  %v5848_v37 = vmul.f32 %v5717_v59, %v8782_v50  ;;  %v1964_v10 = vsel %vm1948_vm2, -96.0, %v1932_v23  ;;  %vm2044_vm8 = vcmp.gt.f32.partialorder %v5815_v21, 0.0 }
 0x19c   : >> { %vm1298_vm9 = vmor %vm1234_vm6, %vm1282_vm4  ;;  %vm2076_vm10 = vcmp.gt.f32.partialorder %v5815_v21, 56.0  ;;  %v1788_v27 = vmax.f32 %v1772_v36, 0.0  ;;  %v1996_v33 = vsel %vm1980_vm14, -64.0, %v1964_v10  ;;  %vm2108_vm12 = vcmp.gt.f32.partialorder %v5815_v21, 80.0 }
 0x19d   : >> { %v5852_v44 = vsel %vm1298_vm9, %v1154_v35, %v738_v14  ;;  %v2028_v61 = vsel %vm2012_vm5, -48.0, %v1996_v33  ;;  %vm2140_vm11 = vcmp.gt.f32.partialorder %v5815_v21, 112.0  ;;  %vm2172_vm13 = vcmp.gt.f32.partialorder %v5815_v21, 160.0 }
 0x19e   : >> { %8783 = vst [vmem:[#allocation78_spill] sm:$0xff] %v5852_v44  ;;  %1533 = vperm.xlu0 %4342, %v1511_v63   ;;  %v8517_v28 = vand.u32 2147483647, %v5852_v44  ;;  %v1804_v29 = vmin.f32 %v1788_v27, 14.0  ;;  %v2060_v23 = vsel %vm2044_vm8, 48.0, %v2028_v61  ;;  %v1743_v50 = vmul.f32 0.25, %v5833_v2 }
 0x19f   : >> { %vm1855_vm1 = vcmp.gt.f32.partialorder %v5833_v2, -320.0  ;;  %v2092_v10 = vsel %vm2076_vm10, 64.0, %v2060_v23  ;;  %vm2204_vm15 = vcmp.gt.f32.partialorder %v5815_v21, 224.0  ;;  %vm2236_vm3 = vcmp.gt.f32.partialorder %v5815_v21, 320.0 }
 0x1a0   : >> { %1360 = vrot.lane.b32.xlu2 %v8517_v28, %s4577_s21  ;;  %v1871_v36 = vsel %vm1855_vm1, -256.0, %v8768_v42  ;;  %v1820_v14 = vmul.f32 4.0, %v1804_v29  ;;  %v2124_v63 = vsel %vm2108_vm12, 96.0, %v2092_v10  ;;  %v1759_v35 = vadd.f32 6.5, %v1743_v50 }
 0x1a1   : >> { %vm1887_vm2 = vcmp.gt.f32.partialorder %v5833_v2, -224.0  ;;  %v2156_v27 = vsel %vm2140_vm11, 128.0, %v2124_v63  ;;  %vm1919_vm6 = vcmp.gt.f32.partialorder %v5833_v2, -160.0  ;;  %vm1951_vm7 = vcmp.gt.f32.partialorder %v5833_v2, -112.0 }
 0x1a2   : >> { %1593 = vperm.xlu1 %4343, %v1523_v38   ;;  %v1903_v33 = vsel %vm1887_vm2, -192.0, %v1871_v36  ;;  %v1836_v61 = vadd.f32 -28.0, %v1820_v14  ;;  %v2188_v23 = vsel %vm2172_vm13, 192.0, %v2156_v27  ;;  %v1775_v28 = vceil.f32 %v1759_v35 }
 0x1a3   : >> { %v1935_v32 = vsel %vm1919_vm6, -128.0, %v1903_v33  ;;  %v2220_v50 = vsel %vm2204_vm15, 256.0, %v2188_v23  ;;  %vm1983_vm14 = vcmp.gt.f32.partialorder %v5833_v2, -80.0  ;;  %vm2015_vm4 = vcmp.gt.f32.partialorder %v5833_v2, -56.0 }
 0x1a4   : >> { %v1967_v29 = vsel %vm1951_vm7, -96.0, %v1935_v32  ;;  %v2252_v38 = vsel %vm2236_vm3, 384.0, %v2220_v50  ;;  %v2300_v10 = vsub.f32 %v5815_v21, %v1836_v61  ;;  %v1791_v36 = vmax.f32 %v1775_v28, 0.0 }
 0x1a5   : >> { %v1999_v14 = vsel %vm1983_vm14, -64.0, %v1967_v29  ;;  %v2268_v63 = vsub.f32 %v5815_v21, %v2252_v38  ;;  %vm2364_vm5 = vcmp.lt.f32.partialorder %v2252_v38, %v1836_v61  ;;  %vm2047_vm9 = vcmp.gt.f32.partialorder %v5833_v2, 0.0 }
 0x1a6   : >> { %1558 = vperm.xlu0 %4342, %v5811_v41   ;;  %v2031_v35 = vsel %vm2015_vm4, -48.0, %v1999_v14  ;;  %v2316_v32 = vand.u32 2147483647, %v2300_v10  ;;  %v1807_v27 = vmin.f32 %v1791_v36, 14.0  ;;  %vm2079_vm8 = vcmp.gt.f32.partialorder %v5833_v2, 56.0 }
 0x1a7   : >> { %v2063_v33 = vsel %vm2047_vm9, 48.0, %v2031_v35  ;;  %v2284_v41 = vand.u32 2147483647, %v2268_v63  ;;  %vm2111_vm10 = vcmp.gt.f32.partialorder %v5833_v2, 80.0  ;;  %vm2143_vm12 = vcmp.gt.f32.partialorder %v5833_v2, 112.0 }
 0x1a8   : >> { %1528 = vperm.xlu2 %4341, %v5801_v43   ;;  %v2095_v23 = vsel %vm2079_vm8, 64.0, %v2063_v33  ;;  %v1823_v28 = vmul.f32 4.0, %v1807_v27  ;;  %vm2175_vm11 = vcmp.gt.f32.partialorder %v5833_v2, 160.0  ;;  %vm2207_vm13 = vcmp.gt.f32.partialorder %v5833_v2, 224.0 }
 0x1a9   : >> { %v2127_v50 = vsel %vm2111_vm10, 96.0, %v2095_v23  ;;  %vm2332_vm1 = vcmp.lt.f32.partialorder %v2284_v41, %v2316_v32  ;;  %vm2348_vm15 = vcmp.eq.f32.partialorder %v2284_v41, %v2316_v32  ;;  %vm2239_vm3 = vcmp.gt.f32.partialorder %v5833_v2, 320.0 }
 0x1aa   : >> { %v2159_v21 = vsel %vm2143_vm12, 128.0, %v2127_v50  ;;  %vm2380_vm2 = vmand %vm2348_vm15, %vm2364_vm5  ;;  %v1839_v43 = vadd.f32 -28.0, %v1823_v28  ;;  %v1742_v10 = vmul.f32 0.25, %v5837_v12  ;;  %vm1854_vm6 = vcmp.gt.f32.partialorder %v5837_v12, -320.0 }
 0x1ab   : >> { %v2191_v29 = vsel %vm2175_vm11, 192.0, %v2159_v21  ;;  %vm2396_vm7 = vmor %vm2332_vm1, %vm2380_vm2  ;;  %v1870_v14 = vsel %vm1854_vm6, -256.0, %v8768_v42  ;;  %vm1886_vm14 = vcmp.gt.f32.partialorder %v5837_v12, -224.0  ;;  %vm1918_vm4 = vcmp.gt.f32.partialorder %v5837_v12, -160.0 }
 0x1ac   : >> { %v2223_v36 = vsel %vm2207_vm13, 256.0, %v2191_v29  ;;  %v5897_v63 = vsel %vm2396_vm7, %v2252_v38, %v1836_v61  ;;  %v2303_v32 = vsub.f32 %v5833_v2, %v1839_v43  ;;  %v1758_v27 = vadd.f32 6.5, %v1742_v10 }
 0x1ad   : >> { %8784 = vst [vmem:[#allocation79_spill] sm:$0xff] %v5897_v63  ;;  %v2255_v35 = vsel %vm2239_vm3, 384.0, %v2223_v36  ;;  %v8522_v33 = vand.u32 2147483647, %v5897_v63  ;;  %v1902_v23 = vsel %vm1886_vm14, -192.0, %v1870_v14  ;;  %vm1950_vm9 = vcmp.gt.f32.partialorder %v5837_v12, -112.0 }
 0x1ae   : >> { %1573 = vperm.xlu0 %4342, %v5826_v55   ;;  %v2271_v41 = vsub.f32 %v5833_v2, %v2255_v35  ;;  %vm2367_vm5 = vcmp.lt.f32.partialorder %v2255_v35, %v1839_v43  ;;  %v2319_v28 = vand.u32 2147483647, %v2303_v32  ;;  %v1774_v50 = vceil.f32 %v1758_v27 }
 0x1af   : >> { %v1934_v21 = vsel %vm1918_vm4, -128.0, %v1902_v23  ;;  %2444 = vrot.lane.b32.xlu1 %v8522_v33, %s4577_s21  ;;  %vm1982_vm8 = vcmp.gt.f32.partialorder %v5837_v12, -80.0  ;;  %vm2014_vm10 = vcmp.gt.f32.partialorder %v5837_v12, -56.0  ;;  %vm2046_vm12 = vcmp.gt.f32.partialorder %v5837_v12, 0.0 }
 0x1b0   : >> { %1543 = vperm.xlu2 %4341, %v5820_v34   ;;  %v2287_v55 = vand.u32 2147483647, %v2271_v41  ;;  %v1966_v61 = vsel %vm1950_vm9, -96.0, %v1934_v21  ;;  %v1790_v2 = vmax.f32 %v1774_v50, 0.0  ;;  %vm2078_vm11 = vcmp.gt.f32.partialorder %v5837_v12, 56.0 }
 0x1b1   : >> { %v1998_v38 = vsel %vm1982_vm8, -64.0, %v1966_v61  ;;  %vm2110_vm15 = vcmp.gt.f32.partialorder %v5837_v12, 80.0  ;;  %vm2142_vm2 = vcmp.gt.f32.partialorder %v5837_v12, 112.0  ;;  %v1515_v36 = vmul.f32 %v5717_v59, %v8785_v4 }
 0x1b2   : >> { %vm2335_vm13 = vcmp.lt.f32.partialorder %v2287_v55, %v2319_v28  ;;  %vm2351_vm1 = vcmp.eq.f32.partialorder %v2287_v55, %v2319_v28  ;;  %v2030_v29 = vsel %vm2014_vm10, -48.0, %v1998_v38  ;;  %v1806_v34 = vmin.f32 %v1790_v2, 14.0  ;;  %v1337_v2 = vpop.permute.xlu1 %1336 }
 0x1b3   : >> { %vm2383_vm3 = vmand %vm2351_vm1, %vm2367_vm5  ;;  %v2062_v10 = vsel %vm2046_vm12, 48.0, %v2030_v29  ;;  %vm2174_vm7 = vcmp.gt.f32.partialorder %v5837_v12, 160.0  ;;  %vm2206_vm14 = vcmp.gt.f32.partialorder %v5837_v12, 224.0  ;;  %vm2238_vm4 = vcmp.gt.f32.partialorder %v5837_v12, 320.0 }
 0x1b4   : >> { %vm2399_vm6 = vmor %vm2335_vm13, %vm2383_vm3  ;;  %v2094_v14 = vsel %vm2078_vm11, 64.0, %v2062_v10  ;;  %v1822_v27 = vmul.f32 4.0, %v1806_v34  ;;  %v5925_v50 = vmul.f32 %v5803_v18, %v8747_v31  ;;  %v1518_v21 = vmul.f32 %v5717_v59, %v8787_v15 }
 0x1b5   : >> { %v5918_v32 = vsel %vm2399_vm6, %v2255_v35, %v1839_v43  ;;  %v2126_v41 = vsel %vm2110_vm15, 96.0, %v2094_v14 }
 0x1b6   : >> { %1588 = vperm.xlu0 %4342, %v5848_v37   ;;  %8786 = vst [vmem:[#allocation80_spill] sm:$0xff] %v5918_v32  ;;  %v8519_v23 = vand.u32 2147483647, %v5918_v32  ;;  %v2158_v28 = vsel %vm2142_vm2, 128.0, %v2126_v41  ;;  %v1525_v37 = vmul.f32 %v5717_v59, %v8788_v51  ;;  %v1838_v43 = vadd.f32 -28.0, %v1822_v27 }
 0x1b7   : >> { %v2190_v35 = vsel %vm2174_vm7, 192.0, %v2158_v28  ;;  %v1741_v61 = vmul.f32 0.25, %v5925_v50  ;;  %vm1853_vm5 = vcmp.gt.f32.partialorder %v5925_v50, -320.0  ;;  %vm1885_vm9 = vcmp.gt.f32.partialorder %v5925_v50, -224.0 }
 0x1b8   : >> { %1553 = vperm.xlu2 %4341, %v1515_v36   ;;  %2450 = vrot.lane.b32.xlu1 %v8519_v23, %s4577_s21  ;;  %v2222_v55 = vsel %vm2206_vm14, 256.0, %v2190_v35  ;;  %v2302_v29 = vsub.f32 %v5837_v12, %v1838_v43  ;;  %v1869_v34 = vsel %vm1853_vm5, -256.0, %v8768_v42  ;;  %vm1917_vm8 = vcmp.gt.f32.partialorder %v5925_v50, -160.0 }
 0x1b9   : >> { %v2254_v38 = vsel %vm2238_vm4, 384.0, %v2222_v55  ;;  %v1757_v36 = vadd.f32 6.5, %v1741_v61  ;;  %v1901_v14 = vsel %vm1885_vm9, -192.0, %v1869_v34  ;;  %vm1949_vm12 = vcmp.gt.f32.partialorder %v5925_v50, -112.0 }
 0x1ba   : >> { %v2270_v10 = vsub.f32 %v5837_v12, %v2254_v38  ;;  %vm2366_vm10 = vcmp.lt.f32.partialorder %v2254_v38, %v1838_v43  ;;  %v2318_v27 = vand.u32 2147483647, %v2302_v29  ;;  %v1933_v41 = vsel %vm1917_vm8, -128.0, %v1901_v14  ;;  %v1333_v29 = vpop.permute.xlu0 %1332 }
 0x1bb   : >> { %vm1981_vm11 = vcmp.gt.f32.partialorder %v5925_v50, -80.0  ;;  %v1773_v35 = vceil.f32 %v1757_v36  ;;  %v1965_v55 = vsel %vm1949_vm12, -96.0, %v1933_v41  ;;  %vm2013_vm13 = vcmp.gt.f32.partialorder %v5925_v50, -56.0 }
 0x1bc   : >> { %v2286_v28 = vand.u32 2147483647, %v2270_v10  ;;  %v1997_v23 = vsel %vm1981_vm11, -64.0, %v1965_v55  ;;  %vm2045_vm1 = vcmp.gt.f32.partialorder %v5925_v50, 0.0  ;;  %vm2077_vm15 = vcmp.gt.f32.partialorder %v5925_v50, 56.0 }
 0x1bd   : >> { %vm2109_vm3 = vcmp.gt.f32.partialorder %v5925_v50, 80.0  ;;  %v1789_v12 = vmax.f32 %v1773_v35, 0.0  ;;  %v2029_v61 = vsel %vm2013_vm13, -48.0, %v1997_v23  ;;  %vm2141_vm14 = vcmp.gt.f32.partialorder %v5925_v50, 112.0  ;;  %v1339_v23 = vpop.permute.xlu1 %1338 }
 0x1be   : >> { %1603 = vperm.xlu0 %4342, %v1525_v37   ;;  %vm2334_vm2 = vcmp.lt.f32.partialorder %v2286_v28, %v2318_v27  ;;  %vm2350_vm6 = vcmp.eq.f32.partialorder %v2286_v28, %v2318_v27  ;;  %v2061_v34 = vsel %vm2045_vm1, 48.0, %v2029_v61  ;;  %v5949_v37 = vpop.permute.xlu2 %1340  ;;  %vm2173_vm5 = vcmp.gt.f32.partialorder %v5925_v50, 160.0 }
 0x1bf   : >> { %vm2382_vm7 = vmand %vm2350_vm6, %vm2366_vm10  ;;  %v1805_v10 = vmin.f32 %v1789_v12, 14.0  ;;  %v2093_v36 = vsel %vm2077_vm15, 64.0, %v2061_v34  ;;  %vm2205_vm9 = vcmp.gt.f32.partialorder %v5925_v50, 224.0  ;;  %vm1364_vm8 = vcmp.gt.f32.partialorder %v1333_v29, 32.0 }
 0x1c0   : >> { %1568 = vperm.xlu2 %4341, %v1518_v21   ;;  %vm2398_vm4 = vmor %vm2334_vm2, %vm2382_vm7  ;;  %v2125_v27 = vsel %vm2109_vm3, 96.0, %v2093_v36  ;;  %vm2237_vm10 = vcmp.gt.f32.partialorder %v5925_v50, 320.0  ;;  %v1521_v35 = vmul.f32 %v5717_v59, %v8790_v25  ;;  %vm1366_vm12 = vcmp.gt.f32.partialorder %v1337_v2, 32.0 }
 0x1c1   : >> { %v5952_v14 = vsel %vm2398_vm4, %v2254_v38, %v1838_v43  ;;  %v1821_v28 = vmul.f32 4.0, %v1805_v10  ;;  %v2157_v21 = vsel %vm2141_vm14, 128.0, %v2125_v27  ;;  %vm5963_vm11 = vmand %vm8791_vm0, %vm1364_vm8  ;;  %v8794_v61 = vand.u32 2147483647, %v5314_v46 }
 0x1c2   : >> { %8789 = vst [vmem:[#allocation81_spill] sm:$0xff] %v5952_v14  ;;  %v8520_v41 = vand.u32 2147483647, %v5952_v14  ;;  %v2189_v55 = vsel %vm2173_vm5, 192.0, %v2157_v21  ;;  %vm1367_vm13 = vcmp.gt.f32.partialorder %v1339_v23, 32.0  ;;  %vm5979_vm1 = vmand %vm8791_vm0, %vm1366_vm12  ;;  %v8795_v36 = vmov 0  ;;  %v1335_v21 = vpop.permute.xlu0 %1334 }
 0x1c3   : >> { %v1837_v38 = vadd.f32 -28.0, %v1821_v28  ;;  %v2221_v12 = vsel %vm2205_vm9, 256.0, %v2189_v55  ;;  %v1396_v29 = vsel %vm5963_vm11, 0.0, %v8794_v61  ;;  %v8796_v36 = vsel %vm5979_vm1, 4294967295, %v8795_v36  ;;  %vm5985_vm15 = vmand %vm8791_vm0, %vm1367_vm13 }
 0x1c4   : >> { %v2253_v34 = vsel %vm2237_vm10, 384.0, %v2221_v12  ;;  %1412 = vrot.lane.b32.xlu1 %v1396_v29, %s4579_s29  ;;  %v8797_v27 = vmov 0  ;;  %v8800_v61 = vand.u32 2147483647, %v5363_v49  ;;  %vm1365_vm10 = vcmp.gt.f32.partialorder %v1335_v21, 32.0 }
 0x1c5   : >> { %v2269_v2 = vsub.f32 %v5925_v50, %v2253_v34  ;;  %v2301_v10 = vsub.f32 %v5925_v50, %v1837_v38  ;;  %v8798_v27 = vsel %vm5985_vm15, 4294967295, %v8797_v27  ;;  %vm2365_vm3 = vcmp.lt.f32.partialorder %v2253_v34, %v1837_v38 }
 0x1c6   : >> { %2448 = vrot.lane.b32.xlu0 %v8520_v41, %s4577_s21  ;;  %v1343_v55 = vpop.permute.xlu2 %1342  ;;  %v8799_v50 = vand.u32 2147483647, %v5296_v60  ;;  %v1399_v29 = vsel %vm5985_vm15, 0.0, %v8800_v61  ;;  %v6039_v61 = vmul.f32 %v5803_v18, %v8748_v13 }
 0x1c7   : >> { %v2285_v23 = vand.u32 2147483647, %v2269_v2  ;;  %v2317_v28 = vand.u32 2147483647, %v2301_v10  ;;  %vm1369_vm14 = vcmp.gt.f32.partialorder %v1343_v55, 32.0  ;;  %v8802_v2 = vmov 0 }
 0x1c8   : >> { %1583 = vperm.xlu2 %4341, %v1521_v35   ;;  %v1398_v12 = vsel %vm5979_vm1, 0.0, %v8799_v50  ;;  %v1524_v35 = vmul.f32 %v5717_v59, %v8801_v62  ;;  %vm6003_vm5 = vmand %vm8791_vm0, %vm1369_vm14 }
 0x1c9   : >> { %vm2349_vm2 = vcmp.eq.f32.partialorder %v2285_v23, %v2317_v28  ;;  %vm2333_vm6 = vcmp.lt.f32.partialorder %v2285_v23, %v2317_v28  ;;  %v8803_v2 = vsel %vm6003_vm5, 4294967295, %v8802_v2  ;;  %v8804_v23 = vand.u32 2147483647, %v5557_v22  ;;  %v1347_v28 = vpop.permute.xlu1 %1346 }
 0x1ca   : >> { %vm2381_vm7 = vmand %vm2349_vm2, %vm2365_vm3  ;;  %v1345_v55 = vpop.permute.xlu0 %1344  ;;  %vm1368_vm3 = vcmp.gt.f32.partialorder %v5949_v37, 32.0 }
 0x1cb   : >> { %vm2397_vm4 = vmor %vm2333_vm6, %vm2381_vm7  ;;  %v1401_v59 = vsel %vm6003_vm5, 0.0, %v8804_v23  ;;  %vm1370_vm8 = vcmp.gt.f32.partialorder %v1345_v55, 32.0  ;;  %vm1371_vm6 = vcmp.gt.f32.partialorder %v1347_v28, 32.0  ;;  %v8812_v23 = vand.u32 2147483647, %v5650_v54 }
 0x1cc   : >> { %1418 = vrot.lane.b32.xlu1 %v1399_v29, %s4579_s29  ;;  %v6007_v10 = vsel %vm2397_vm4, %v2253_v34, %v1837_v38  ;;  %v8805_v38 = vmov 0  ;;  %vm6026_vm13 = vmand %vm8791_vm0, %vm1370_vm8  ;;  %v8807_v34 = vmov 0  ;;  %v8811_v29 = vand.u32 2147483647, %v5505_v0 }
 0x1cd   : >> { %v8521_v50 = vand.u32 2147483647, %v6007_v10  ;;  %v8808_v34 = vsel %vm6026_vm13, 4294967295, %v8807_v34  ;;  %vm6033_vm2 = vmand %vm8791_vm0, %vm1365_vm10  ;;  %v8813_v28 = vmov 0  ;;  %vm1856_vm4 = vcmp.gt.f32.partialorder %v6039_v61, -320.0 }
 0x1ce   : >> { %1416 = vrot.lane.b32.xlu0 %v1398_v12, %s4579_s29  ;;  %v1349_v12 = vpop.permute.xlu2 %1348  ;;  %vm6051_vm7 = vmand %vm8791_vm0, %vm1368_vm3  ;;  %vm1888_vm8 = vcmp.gt.f32.partialorder %v6039_v61, -224.0  ;;  %vm1920_vm3 = vcmp.gt.f32.partialorder %v6039_v61, -160.0 }
 0x1cf   : >> { %vm1372_vm9 = vcmp.gt.f32.partialorder %v1349_v12, 32.0  ;;  %v8814_v28 = vsel %vm6051_vm7, 4294967295, %v8813_v28  ;;  %v8815_v12 = vand.u32 2147483647, %v5397_v8 }
 0x1d0   : >> { %1598 = vperm.xlu2 %4341, %v1524_v35   ;;  %vm6020_vm12 = vmand %vm8791_vm0, %vm1372_vm9  ;;  %v1402_v35 = vsel %vm6026_vm13, 0.0, %v8811_v29  ;;  %v1744_v29 = vmul.f32 0.25, %v6039_v61 }
 0x1d1   : >> { %v8806_v38 = vsel %vm6020_vm12, 4294967295, %v8805_v38  ;;  %v1404_v37 = vsel %vm6020_vm12, 0.0, %v8812_v23  ;;  %v1397_v41 = vsel %vm6033_vm2, 0.0, %v8815_v12  ;;  %vm6065_vm9 = vmand %vm8791_vm0, %vm1371_vm6  ;;  %v8816_v23 = vmov 0 }
 0x1d2   : >> { %v1351_v55 = vpop.permute.xlu0 %1350  ;;  %v8817_v23 = vsel %vm6065_vm9, 4294967295, %v8816_v23  ;;  %v8821_v12 = vand.u32 2147483647, %v5441_v20  ;;  %vm1952_vm6 = vcmp.gt.f32.partialorder %v6039_v61, -112.0 }
 0x1d3   : >> { %vm1373_vm14 = vcmp.gt.f32.partialorder %v1351_v55, 32.0 }
 0x1d4   : >> { %1424 = vrot.lane.b32.xlu1 %v1402_v35, %s4579_s29  ;;  %vm6073_vm10 = vmand %vm8791_vm0, %vm1373_vm14  ;;  %v8818_v35 = vmov 0  ;;  %v1400_v33 = vsel %vm6051_vm7, 0.0, %v8821_v12  ;;  %vm1984_vm14 = vcmp.gt.f32.partialorder %v6039_v61, -80.0 }
 0x1d5   : >> { %v8819_v35 = vsel %vm6073_vm10, 4294967295, %v8818_v35 }
 0x1d6   : >> { %1422 = vrot.lane.b32.xlu0 %v1401_v59, %s4579_s29  ;;  %v1353_v59 = vpop.permute.xlu1 %1352  ;;  %8820 = vst [vmem:[#allocation82_spill] sm:$0xff] %v8819_v35 }
 0x1d8   : >> { %2446 = vrot.lane.b32.xlu2 %v8521_v50, %s4577_s21  ;;  %v1872_v50 = vsel %vm1856_vm4, -256.0, %v8768_v42  ;;  %vm2080_vm4 = vcmp.gt.f32.partialorder %v6039_v61, 56.0 }
 0x1d9   : >> { %v1904_v55 = vsel %vm1888_vm8, -192.0, %v1872_v50  ;;  %vm2016_vm8 = vcmp.gt.f32.partialorder %v6039_v61, -56.0 }
 0x1da   : >> { %v1936_v13 = vsel %vm1920_vm3, -128.0, %v1904_v55  ;;  %vm2048_vm3 = vcmp.gt.f32.partialorder %v6039_v61, 0.0 }
 0x1db   : >> { %v1968_v62 = vsel %vm1952_vm6, -96.0, %v1936_v13  ;;  %v6097_v13 = vmul.f32 %v5803_v18, %v8745_v53 }
 0x1dc   : >> { %v2000_v25 = vsel %vm1984_vm14, -64.0, %v1968_v62  ;;  %v8824_v62 = vmov 0 }
 0x1dd   : >> { %v2032_v15 = vsel %vm2016_vm8, -48.0, %v2000_v25  ;;  %vm2112_vm8 = vcmp.gt.f32.partialorder %v6039_v61, 80.0  ;;  %vm1890_vm12 = vcmp.gt.f32.partialorder %v6097_v13, -224.0  ;;  %vm2210_vm7 = vcmp.gt.f32.partialorder %v6097_v13, 224.0 }
 0x1de   : >> { %1428 = vrot.lane.b32.xlu0 %v1404_v37, %s4579_s29  ;;  %v1760_v37 = vadd.f32 6.5, %v1744_v29  ;;  %v8822_v29 = vand.u32 2147483647, %v5624_v7 }
 0x1e0   : >> { %1414 = vrot.lane.b32.xlu2 %v1397_v41, %s4579_s29  ;;  %v1776_v31 = vceil.f32 %v1760_v37  ;;  %v1405_v50 = vsel %vm6073_vm10, 0.0, %v8822_v29  ;;  %v8823_v41 = vand.u32 2147483647, %v5473_v39  ;;  %v2064_v37 = vsel %vm2048_vm3, 48.0, %v2032_v15 }
 0x1e1   : >> { %v6102_v29 = vmul.f32 %v5803_v18, %v8746_v17  ;;  %1430 = vrot.lane.b32.xlu1 %v1405_v50, %s4579_s29  ;;  %v1746_v15 = vmul.f32 0.25, %v6097_v13  ;;  %vm2144_vm3 = vcmp.gt.f32.partialorder %v6039_v61, 112.0  ;;  %vm8827_vm10 = vcmp.gt.f32.partialorder %v1353_v59, 32.0 }
 0x1e2   : >> { %v1403_v51 = vsel %vm6065_vm9, 0.0, %v8823_v41  ;;  %v1792_v12 = vmax.f32 %v1776_v31, 0.0  ;;  %v2096_v31 = vsel %vm2080_vm4, 64.0, %v2064_v37  ;;  %v8826_v41 = vand.u32 2147483647, %v5757_v47  ;;  %vm6122_vm13 = vmand %vm8791_vm0, %vm8827_vm10 }
 0x1e3   : >> { %v1355_v55 = vpop.permute.xlu2 %1354  ;;  %v2128_v53 = vsel %vm2112_vm8, 96.0, %v2096_v31  ;;  %v8828_v50 = vmov 0  ;;  %vm2208_vm8 = vcmp.gt.f32.partialorder %v6039_v61, 224.0  ;;  %vm2240_vm10 = vcmp.gt.f32.partialorder %v6039_v61, 320.0 }
 0x1e4   : >> { %vm1375_vm6 = vcmp.gt.f32.partialorder %v1355_v55, 32.0  ;;  %v1808_v25 = vmin.f32 %v1792_v12, 14.0  ;;  %v8829_v50 = vsel %vm6122_vm13, 4294967295, %v8828_v50  ;;  %v2160_v37 = vsel %vm2144_vm3, 128.0, %v2128_v53 }
 0x1e5   : >> { %vm6106_vm14 = vmand %vm8791_vm0, %vm1375_vm6  ;;  %vm1858_vm6 = vcmp.gt.f32.partialorder %v6097_v13, -320.0  ;;  %vm1954_vm3 = vcmp.gt.f32.partialorder %v6097_v13, -112.0  ;;  %vm2178_vm4 = vcmp.gt.f32.partialorder %v6097_v13, 160.0 }
 0x1e6   : >> { %v8825_v62 = vsel %vm6106_vm14, 4294967295, %v8824_v62  ;;  %v1407_v55 = vsel %vm6106_vm14, 0.0, %v8826_v41  ;;  %v1824_v12 = vmul.f32 4.0, %v1808_v25  ;;  %vm2176_vm14 = vcmp.gt.f32.partialorder %v6039_v61, 160.0 }
 0x1e7   : >> { %v1359_v17 = vpop.permute.xlu1 %1358  ;;  %1434 = vrot.lane.b32.xlu0 %v1407_v55, %s4579_s29  ;;  %v2192_v31 = vsel %vm2176_vm14, 192.0, %v2160_v37  ;;  %v1762_v41 = vadd.f32 6.5, %v1746_v15  ;;  %v1874_v59 = vsel %vm1858_vm6, -256.0, %v8768_v42  ;;  %v8830_v55 = vand.u32 2147483647, %v5592_v6 }
 0x1e8   : >> { %1420 = vrot.lane.b32.xlu2 %v1400_v33, %s4579_s29  ;;  %v1840_v4 = vadd.f32 -28.0, %v1824_v12  ;;  %v2224_v9 = vsel %vm2208_vm8, 256.0, %v2192_v31  ;;  %v1906_v37 = vsel %vm1890_vm12, -192.0, %v1874_v59  ;;  %vm1922_vm14 = vcmp.gt.f32.partialorder %v6097_v13, -160.0 }
 0x1e9   : >> { %v6137_v53 = vsel %vm6122_vm13, 0.0, %v8830_v55  ;;  %v2256_v25 = vsel %vm2240_vm10, 384.0, %v2224_v9  ;;  %v1778_v33 = vceil.f32 %v1762_v41  ;;  %v1938_v31 = vsel %vm1922_vm14, -128.0, %v1906_v37 }
 0x1ea   : >> { %v2272_v3 = vsub.f32 %v6039_v61, %v2256_v25  ;;  %v2304_v15 = vsub.f32 %v6039_v61, %v1840_v4  ;;  %vm1986_vm6 = vcmp.gt.f32.partialorder %v6097_v13, -80.0  ;;  %vm2018_vm8 = vcmp.gt.f32.partialorder %v6097_v13, -56.0 }
 0x1eb   : >> { %v1794_v12 = vmax.f32 %v1778_v33, 0.0  ;;  %v1970_v11 = vsel %vm1954_vm3, -96.0, %v1938_v31  ;;  %vm2050_vm10 = vcmp.gt.f32.partialorder %v6097_v13, 0.0  ;;  %vm8831_vm1 = vcmp.gt.f32.partialorder %v1359_v17, 32.0 }
 0x1ec   : >> { %v2288_v1 = vand.u32 2147483647, %v2272_v3  ;;  %v2320_v55 = vand.u32 2147483647, %v2304_v15  ;;  %v2002_v41 = vsel %vm1986_vm6, -64.0, %v1970_v11  ;;  %vm6151_vm13 = vmand %vm8791_vm0, %vm8831_vm1  ;;  %v8832_v61 = vmov 0 }
 0x1ed   : >> { %v1810_v9 = vmin.f32 %v1794_v12, 14.0  ;;  %v8833_v61 = vsel %vm6151_vm13, 4294967295, %v8832_v61  ;;  %vm2368_vm5 = vcmp.lt.f32.partialorder %v2256_v25, %v1840_v4  ;;  %v2034_v3 = vsel %vm2018_vm8, -48.0, %v2002_v41 }
 0x1ee   : >> { %vm2352_vm14 = vcmp.eq.f32.partialorder %v2288_v1, %v2320_v55  ;;  %vm2336_vm6 = vcmp.lt.f32.partialorder %v2288_v1, %v2320_v55  ;;  %v2066_v33 = vsel %vm2050_vm10, 48.0, %v2034_v3  ;;  %vm8834_vm1 = vcmp.gt.f32.partialorder %v6097_v13, 56.0 }
 0x1ef   : >> { %vm2384_vm9 = vmand %vm2352_vm14, %vm2368_vm5  ;;  %v1826_v11 = vmul.f32 4.0, %v1810_v9  ;;  %v2098_v17 = vsel %vm8834_vm1, 64.0, %v2066_v33  ;;  %vm2242_vm8 = vcmp.gt.f32.partialorder %v6097_v13, 320.0  ;;  %v8838_v37 = vand.u32 2147483647, %v5681_v24 }
 0x1f0   : >> { %1426 = vrot.lane.b32.xlu2 %v1403_v51, %s4579_s29  ;;  %vm2400_vm15 = vmor %vm2336_vm6, %vm2384_vm9  ;;  %v8835_v51 = vmov 0  ;;  %vm8839_vm5 = vcmp.gt.f32.partialorder %v6097_v13, 80.0  ;;  %v8840_v55 = vand.u32 2147483647, %v5719_v45  ;;  %vm8841_vm9 = vcmp.gt.f32.partialorder %v6097_v13, 112.0 }
 0x1f1   : >> { %v1357_v59 = vpop.permute.xlu0 %1356  ;;  %v6168_v1 = vsel %vm2400_vm15, %v2256_v25, %v1840_v4  ;;  %v1409_v15 = vsel %vm6151_vm13, 0.0, %v8838_v37  ;;  %v1842_v12 = vadd.f32 -28.0, %v1826_v11  ;;  %v2130_v31 = vsel %vm8839_vm5, 96.0, %v2098_v17 }
 0x1f2   : >> { %vm1376_vm12 = vcmp.gt.f32.partialorder %v1357_v59, 32.0  ;;  %v2162_v4 = vsel %vm8841_vm9, 128.0, %v2130_v31  ;;  %v1745_v25 = vmul.f32 0.25, %v6102_v29  ;;  %vm1857_vm15 = vcmp.gt.f32.partialorder %v6102_v29, -320.0 }
 0x1f3   : >> { %vm6164_vm3 = vmand %vm8791_vm0, %vm1376_vm12  ;;  %v2194_v3 = vsel %vm2178_vm4, 192.0, %v2162_v4  ;;  %v2306_v59 = vsub.f32 %v6097_v13, %v1842_v12  ;;  %vm1889_vm10 = vcmp.gt.f32.partialorder %v6102_v29, -224.0  ;;  %v1873_v17 = vsel %vm1857_vm15, -256.0, %v8768_v42 }
 0x1f4   : >> { %v8836_v51 = vsel %vm6164_vm3, 4294967295, %v8835_v51  ;;  %v1408_v9 = vsel %vm6164_vm3, 0.0, %v8840_v55  ;;  %v2226_v11 = vsel %vm2210_vm7, 256.0, %v2194_v3  ;;  %v1761_v33 = vadd.f32 6.5, %v1745_v25 }
 0x1f5   : >> { %8837 = vst [vmem:[#allocation83_spill] sm:$0xff] %v8836_v51  ;;  %1436 = vrot.lane.b32.xlu1 %v1408_v9, %s4579_s29  ;;  %vm1921_vm12 = vcmp.gt.f32.partialorder %v6102_v29, -160.0  ;;  %v2258_v37 = vsel %vm2242_vm8, 384.0, %v2226_v11  ;;  %v2322_v31 = vand.u32 2147483647, %v2306_v59  ;;  %v1905_v55 = vsel %vm1889_vm10, -192.0, %v1873_v17 }
 0x1f6   : >> { %vm1953_vm4 = vcmp.gt.f32.partialorder %v6102_v29, -112.0  ;;  %v2274_v9 = vsub.f32 %v6097_v13, %v2258_v37  ;;  %v1777_v4 = vceil.f32 %v1761_v33  ;;  %v1937_v41 = vsel %vm1921_vm12, -128.0, %v1905_v55 }
 0x1f7   : >> { %v1969_v25 = vsel %vm1953_vm4, -96.0, %v1937_v41  ;;  %vm1985_vm7 = vcmp.gt.f32.partialorder %v6102_v29, -80.0  ;;  %vm2017_vm6 = vcmp.gt.f32.partialorder %v6102_v29, -56.0  ;;  %vm2049_vm1 = vcmp.gt.f32.partialorder %v6102_v29, 0.0 }
 0x1f8   : >> { %1432 = vrot.lane.b32.xlu2 %v6137_v53, %s4579_s29  ;;  %v2290_v3 = vand.u32 2147483647, %v2274_v9  ;;  %v1793_v59 = vmax.f32 %v1777_v4, 0.0  ;;  %v2001_v11 = vsel %vm1985_vm7, -64.0, %v1969_v25  ;;  %vm2081_vm8 = vcmp.gt.f32.partialorder %v6102_v29, 56.0 }
 0x1f9   : >> { %v2033_v13 = vsel %vm2017_vm6, -48.0, %v2001_v11  ;;  %vm2113_vm5 = vcmp.gt.f32.partialorder %v6102_v29, 80.0  ;;  %vm2145_vm9 = vcmp.gt.f32.partialorder %v6102_v29, 112.0  ;;  %v8842_v41 = vmov 0 }
 0x1fa   : >> { %v1361_v17 = vpop.permute.xlu2 %1360  ;;  %vm2338_vm12 = vcmp.lt.f32.partialorder %v2290_v3, %v2322_v31  ;;  %vm2354_vm4 = vcmp.eq.f32.partialorder %v2290_v3, %v2322_v31  ;;  %v1809_v53 = vmin.f32 %v1793_v59, 14.0  ;;  %v2065_v33 = vsel %vm2049_vm1, 48.0, %v2033_v13 }
 0x1fb   : >> { %vm1378_vm10 = vcmp.gt.f32.partialorder %v1361_v17, 32.0  ;;  %vm2209_vm7 = vcmp.gt.f32.partialorder %v6102_v29, 224.0  ;;  %v6219_v55 = vmul.f32 %v5803_v18, %v8743_v48  ;;  %v8845_v31 = vand.u32 2147483647, %v5852_v44 }
 0x1fc   : >> { %vm6209_vm14 = vmand %vm8791_vm0, %vm1378_vm10  ;;  %vm8846_vm10 = vcmp.lt.f32.partialorder %v2258_v37, %v1842_v12  ;;  %v1825_v4 = vmul.f32 4.0, %v1809_v53  ;;  %v2097_v25 = vsel %vm2081_vm8, 64.0, %v2065_v33  ;;  %v6230_v3 = vmul.f32 %v5803_v18, %v8744_v19 }
 0x1fd   : >> { %v8843_v41 = vsel %vm6209_vm14, 4294967295, %v8842_v41  ;;  %v1410_v9 = vsel %vm6209_vm14, 0.0, %v8845_v31  ;;  %vm2386_vm15 = vmand %vm2354_vm4, %vm8846_vm10  ;;  %v2129_v59 = vsel %vm2113_vm5, 96.0, %v2097_v25  ;;  %v1747_v11 = vmul.f32 0.25, %v6219_v55 }
 0x1fe   : >> { %8844 = vst [vmem:[#allocation84_spill] sm:$0xff] %v8843_v41  ;;  %1440 = vrot.lane.b32.xlu0 %v1410_v9, %s4579_s29  ;;  %vm2402_vm1 = vmor %vm2338_vm12, %vm2386_vm15  ;;  %vm1859_vm6 = vcmp.gt.f32.partialorder %v6219_v55, -320.0  ;;  %vm1891_vm4 = vcmp.gt.f32.partialorder %v6219_v55, -224.0  ;;  %v1841_v13 = vadd.f32 -28.0, %v1825_v4  ;;  %v2161_v53 = vsel %vm2145_vm9, 128.0, %v2129_v59 }
 0x1ff   : >> { %v6238_v17 = vsel %vm2402_vm1, %v2258_v37, %v1842_v12  ;;  %v1875_v33 = vsel %vm1859_vm6, -256.0, %v8768_v42  ;;  %vm8847_vm8 = vcmp.gt.f32.partialorder %v6102_v29, 160.0  ;;  %v1763_v25 = vadd.f32 6.5, %v1747_v11 }
 0x200   : >> { %1438 = vrot.lane.b32.xlu2 %v1409_v15, %s4579_s29  ;;  %v2193_v9 = vsel %vm8847_vm8, 192.0, %v2161_v53  ;;  %v1907_v19 = vsel %vm1891_vm4, -192.0, %v1875_v33  ;;  %v2305_v12 = vsub.f32 %v6102_v29, %v1841_v13  ;;  %vm1923_vm5 = vcmp.gt.f32.partialorder %v6219_v55, -160.0 }
 0x201   : >> { %v2225_v48 = vsel %vm2209_vm7, 256.0, %v2193_v9  ;;  %vm1955_vm9 = vcmp.gt.f32.partialorder %v6219_v55, -112.0  ;;  %vm8848_vm15 = vcmp.gt.f32.partialorder %v6102_v29, 320.0  ;;  %v1779_v15 = vceil.f32 %v1763_v25 }
 0x202   : >> { %v2257_v37 = vsel %vm8848_vm15, 384.0, %v2225_v48  ;;  %v1939_v4 = vsel %vm1923_vm5, -128.0, %v1907_v19  ;;  %vm1987_vm12 = vcmp.gt.f32.partialorder %v6219_v55, -80.0  ;;  %v2321_v11 = vand.u32 2147483647, %v2305_v12 }
 0x203   : >> { %v2273_v59 = vsub.f32 %v6102_v29, %v2257_v37  ;;  %vm2369_vm6 = vcmp.lt.f32.partialorder %v2257_v37, %v1841_v13  ;;  %v1971_v53 = vsel %vm1955_vm9, -96.0, %v1939_v4  ;;  %v1795_v33 = vmax.f32 %v1779_v15, 0.0 }
 0x204   : >> { %v2003_v9 = vsel %vm1987_vm12, -64.0, %v1971_v53  ;;  %vm2019_vm7 = vcmp.gt.f32.partialorder %v6219_v55, -56.0  ;;  %vm2051_vm10 = vcmp.gt.f32.partialorder %v6219_v55, 0.0  ;;  %vm2083_vm1 = vcmp.gt.f32.partialorder %v6219_v55, 56.0 }
 0x205   : >> { %v2289_v31 = vand.u32 2147483647, %v2273_v59  ;;  %v2035_v45 = vsel %vm2019_vm7, -48.0, %v2003_v9  ;;  %vm2115_vm4 = vcmp.gt.f32.partialorder %v6219_v55, 80.0  ;;  %v8849_v19 = vand.u32 2147483647, %v6168_v1 }
 0x206   : >> { %v1811_v48 = vmin.f32 %v1795_v33, 14.0  ;;  %v2067_v29 = vsel %vm2051_vm10, 48.0, %v2035_v45  ;;  %vm2147_vm8 = vcmp.gt.f32.partialorder %v6219_v55, 112.0  ;;  %vm2179_vm5 = vcmp.gt.f32.partialorder %v6219_v55, 160.0 }
 0x207   : >> { %2452 = vrot.lane.b32.xlu0 %v8849_v19, %s4577_s21  ;;  %vm2337_vm9 = vcmp.lt.f32.partialorder %v2289_v31, %v2321_v11  ;;  %vm2353_vm15 = vcmp.eq.f32.partialorder %v2289_v31, %v2321_v11  ;;  %v2099_v12 = vsel %vm2083_vm1, 64.0, %v2067_v29  ;;  %vm2243_vm14 = vcmp.gt.f32.partialorder %v6219_v55, 320.0 }
 0x208   : >> { %v1363_v25 = vpop.permute.xlu0 %1362  ;;  %vm2385_vm3 = vmand %vm2353_vm15, %vm2369_vm6  ;;  %v1827_v15 = vmul.f32 4.0, %v1811_v48  ;;  %v2131_v4 = vsel %vm2115_vm4, 96.0, %v2099_v12  ;;  %v8850_v45 = vmov 0  ;;  %v1748_v53 = vmul.f32 0.25, %v6230_v3 }
 0x209   : >> { %vm1379_vm7 = vcmp.gt.f32.partialorder %v1363_v25, 32.0  ;;  %v2163_v59 = vsel %vm2147_vm8, 128.0, %v2131_v4  ;;  %vm1860_vm1 = vcmp.gt.f32.partialorder %v6230_v3, -320.0  ;;  %vm1892_vm12 = vcmp.gt.f32.partialorder %v6230_v3, -224.0  ;;  %vm2401_vm6 = vmor %vm2337_vm9, %vm2385_vm3 }
 0x20a   : >> { %vm6270_vm10 = vmand %vm8791_vm0, %vm1379_vm7  ;;  %v8853_v33 = vand.u32 2147483647, %v5793_v58  ;;  %v1843_v19 = vadd.f32 -28.0, %v1827_v15  ;;  %v2195_v48 = vsel %vm2179_vm5, 192.0, %v2163_v59  ;;  %v1876_v29 = vsel %vm1860_vm1, -256.0, %v8768_v42 }
 0x20b   : >> { %v8851_v45 = vsel %vm6270_vm10, 4294967295, %v8850_v45  ;;  %v6286_v25 = vsel %vm2401_vm6, %v2257_v37, %v1841_v13  ;;  %vm8855_vm4 = vcmp.gt.f32.partialorder %v6219_v55, 224.0  ;;  %v1764_v4 = vadd.f32 6.5, %v1748_v53 }
 0x20c   : >> { %8852 = vst [vmem:[#allocation85_spill] sm:$0xff] %v8851_v45  ;;  %v1411_v9 = vsel %vm6270_vm10, 0.0, %v8853_v33  ;;  %v2227_v12 = vsel %vm8855_vm4, 256.0, %v2195_v48  ;;  %v1908_v58 = vsel %vm1892_vm12, -192.0, %v1876_v29  ;;  %v8555_v45 = vand.u32 2147483647, %v6286_v25 }
 0x20d   : >> { %1442 = vrot.lane.b32.xlu1 %v1411_v9, %s4579_s29  ;;  %8854 = vst [vmem:[#allocation86_spill] sm:$0xff] %v6286_v25  ;;  %v2259_v31 = vsel %vm2243_vm14, 384.0, %v2227_v12  ;;  %v2307_v11 = vsub.f32 %v6219_v55, %v1843_v19  ;;  %vm1924_vm3 = vcmp.gt.f32.partialorder %v6230_v3, -160.0  ;;  %v1780_v59 = vceil.f32 %v1764_v4 }
 0x20e   : >> { %v2275_v15 = vsub.f32 %v6219_v55, %v2259_v31  ;;  %vm2371_vm8 = vcmp.lt.f32.partialorder %v2259_v31, %v1843_v19  ;;  %v1940_v13 = vsel %vm1924_vm3, -128.0, %v1908_v58  ;;  %2454 = vrot.lane.b32.xlu2 %v8555_v45, %s4577_s21  ;;  %vm1956_vm5 = vcmp.gt.f32.partialorder %v6230_v3, -112.0 }
 0x20f   : >> { %v2323_v37 = vand.u32 2147483647, %v2307_v11  ;;  %vm1988_vm9 = vcmp.gt.f32.partialorder %v6230_v3, -80.0  ;;  %vm2020_vm14 = vcmp.gt.f32.partialorder %v6230_v3, -56.0  ;;  %v1796_v33 = vmax.f32 %v1780_v59, 0.0 }
 0x210   : >> { %v2291_v53 = vand.u32 2147483647, %v2275_v15  ;;  %v1972_v9 = vsel %vm1956_vm5, -96.0, %v1940_v13  ;;  %vm2052_vm15 = vcmp.gt.f32.partialorder %v6230_v3, 0.0  ;;  %vm2084_vm12 = vcmp.gt.f32.partialorder %v6230_v3, 56.0 }
 0x211   : >> { %v2004_v55 = vsel %vm1988_vm9, -64.0, %v1972_v9  ;;  %vm2116_vm7 = vcmp.gt.f32.partialorder %v6230_v3, 80.0  ;;  %vm2148_vm1 = vcmp.gt.f32.partialorder %v6230_v3, 112.0  ;;  %v1812_v58 = vmin.f32 %v1796_v33, 14.0 }
 0x212   : >> { %vm2339_vm6 = vcmp.lt.f32.partialorder %v2291_v53, %v2323_v37  ;;  %vm2355_vm4 = vcmp.eq.f32.partialorder %v2291_v53, %v2323_v37  ;;  %v2036_v48 = vsel %vm2020_vm14, -48.0, %v2004_v55  ;;  %vm2180_vm10 = vcmp.gt.f32.partialorder %v6230_v3, 160.0 }
 0x213   : >> { %vm2387_vm3 = vmand %vm2355_vm4, %vm2371_vm8  ;;  %v2068_v29 = vsel %vm2052_vm15, 48.0, %v2036_v48  ;;  %vm2212_vm5 = vcmp.gt.f32.partialorder %v6230_v3, 224.0  ;;  %vm2244_vm13 = vcmp.gt.f32.partialorder %v6230_v3, 320.0  ;;  %v8856_v12 = vand.u32 2147483647, %v6238_v17  ;;  %v6339_v48 = vpop.permute.xlu1 %1538 }
 0x214   : >> { %vm2403_vm9 = vmor %vm2339_vm6, %vm2387_vm3  ;;  %v1828_v4 = vmul.f32 4.0, %v1812_v58  ;;  %v2100_v11 = vsel %vm2084_vm12, 64.0, %v2068_v29  ;;  %v6315_v15 = vmul.f32 %v5803_v18, %v8739_v57  ;;  %v6319_v59 = vmul.f32 %v5803_v18, %v8740_v56 }
 0x215   : >> { %2456 = vrot.lane.b32.xlu1 %v8856_v12, %s4577_s21  ;;  %v6321_v13 = vsel %vm2403_vm9, %v2259_v31, %v1843_v19  ;;  %v2132_v37 = vsel %vm2116_vm7, 96.0, %v2100_v11  ;;  %v6327_v53 = vmul.f32 %v5803_v18, %v8742_v30  ;;  %v6331_v33 = vmul.f32 %v5803_v18, %v8741_v16  ;;  %v6337_v31 = vpop.permute.xlu2 %1528 }
 0x216   : >> { %8857 = vst [vmem:[#allocation87_spill] sm:$0xff] %v6321_v13  ;;  %v8558_v9 = vand.u32 2147483647, %v6321_v13  ;;  %v1844_v55 = vadd.f32 -28.0, %v1828_v4  ;;  %v2164_v58 = vsel %vm2148_vm1, 128.0, %v2132_v37  ;;  %v1749_v19 = vmul.f32 0.25, %v6315_v15 }
 0x217   : >> { %v2196_v29 = vsel %vm2180_vm10, 192.0, %v2164_v58  ;;  %vm1861_vm8 = vcmp.gt.f32.partialorder %v6315_v15, -320.0  ;;  %vm1893_vm14 = vcmp.gt.f32.partialorder %v6315_v15, -224.0  ;;  %vm1925_vm15 = vcmp.gt.f32.partialorder %v6315_v15, -160.0 }
 0x218   : >> { %2458 = vrot.lane.b32.xlu0 %v8558_v9, %s4577_s21  ;;  %v2228_v12 = vsel %vm2212_vm5, 256.0, %v2196_v29  ;;  %v2308_v4 = vsub.f32 %v6230_v3, %v1844_v55  ;;  %v1765_v11 = vadd.f32 6.5, %v1749_v19  ;;  %v1877_v37 = vsel %vm1861_vm8, -256.0, %v8768_v42 }
 0x219   : >> { %v2260_v58 = vsel %vm2244_vm13, 384.0, %v2228_v12  ;;  %v1909_v45 = vsel %vm1893_vm14, -192.0, %v1877_v37  ;;  %vm1957_vm10 = vcmp.gt.f32.partialorder %v6315_v15, -112.0  ;;  %vm1989_vm12 = vcmp.gt.f32.partialorder %v6315_v15, -80.0 }
 0x21a   : >> { %v2276_v30 = vsub.f32 %v6230_v3, %v2260_v58  ;;  %v2324_v16 = vand.u32 2147483647, %v2308_v4  ;;  %vm2372_vm7 = vcmp.lt.f32.partialorder %v2260_v58, %v1844_v55  ;;  %v1781_v9 = vceil.f32 %v1765_v11 }
 0x21b   : >> { %v1941_v56 = vsel %vm1925_vm15, -128.0, %v1909_v45  ;;  %vm2021_vm1 = vcmp.gt.f32.partialorder %v6315_v15, -56.0  ;;  %vm2053_vm6 = vcmp.gt.f32.partialorder %v6315_v15, 0.0  ;;  %vm2085_vm4 = vcmp.gt.f32.partialorder %v6315_v15, 56.0 }
 0x21c   : >> { %v2292_v19 = vand.u32 2147483647, %v2276_v30  ;;  %v1797_v29 = vmax.f32 %v1781_v9, 0.0  ;;  %v1973_v12 = vsel %vm1957_vm10, -96.0, %v1941_v56  ;;  %vm2117_vm13 = vcmp.gt.f32.partialorder %v6315_v15, 80.0  ;;  %v6371_v9 = vpop.permute.xlu0 %1533 }
 0x21d   : >> { %v2005_v37 = vsel %vm1989_vm12, -64.0, %v1973_v12  ;;  %vm2149_vm3 = vcmp.gt.f32.partialorder %v6315_v15, 112.0  ;;  %vm2213_vm9 = vcmp.gt.f32.partialorder %v6315_v15, 224.0  ;;  %vm2245_vm10 = vcmp.gt.f32.partialorder %v6315_v15, 320.0 }
 0x21e   : >> { %vm2340_vm8 = vcmp.lt.f32.partialorder %v2292_v19, %v2324_v16  ;;  %vm2356_vm14 = vcmp.eq.f32.partialorder %v2292_v19, %v2324_v16  ;;  %v1813_v3 = vmin.f32 %v1797_v29, 14.0  ;;  %v2037_v45 = vsel %vm2021_vm1, -48.0, %v2005_v37  ;;  %v6377_v19 = vpop.permute.xlu2 %1543  ;;  %v6379_v29 = vpop.permute.xlu1 %1548 }
 0x21f   : >> { %vm2388_vm15 = vmand %vm2356_vm14, %vm2372_vm7  ;;  %v2069_v30 = vsel %vm2053_vm6, 48.0, %v2037_v45  ;;  %v1750_v56 = vmul.f32 0.25, %v6319_v59  ;;  %vm1862_vm12 = vcmp.gt.f32.partialorder %v6319_v59, -320.0  ;;  %vm1894_vm7 = vcmp.gt.f32.partialorder %v6319_v59, -224.0 }
 0x220   : >> { %vm2404_vm5 = vmor %vm2340_vm8, %vm2388_vm15  ;;  %v1829_v4 = vmul.f32 4.0, %v1813_v3  ;;  %v2101_v16 = vsel %vm2085_vm4, 64.0, %v2069_v30  ;;  %v1878_v11 = vsel %vm1862_vm12, -256.0, %v8768_v42  ;;  %vm1926_vm1 = vcmp.gt.f32.partialorder %v6319_v59, -160.0 }
 0x221   : >> { %v6381_v12 = vsel %vm2404_vm5, %v2260_v58, %v1844_v55  ;;  %v2133_v37 = vsel %vm2117_vm13, 96.0, %v2101_v16  ;;  %v1766_v45 = vadd.f32 6.5, %v1750_v56  ;;  %v1910_v57 = vsel %vm1894_vm7, -192.0, %v1878_v11 }
 0x222   : >> { %8858 = vst [vmem:[#allocation88_spill] sm:$0xff] %v6381_v12  ;;  %v8566_v3 = vand.u32 2147483647, %v6381_v12  ;;  %v1845_v13 = vadd.f32 -28.0, %v1829_v4  ;;  %v2165_v30 = vsel %vm2149_vm3, 128.0, %v2133_v37  ;;  %vm8859_vm6 = vcmp.gt.f32.partialorder %v6315_v15, 160.0 }
 0x223   : >> { %v2197_v51 = vsel %vm8859_vm6, 192.0, %v2165_v30  ;;  %v1782_v7 = vceil.f32 %v1766_v45  ;;  %v1942_v44 = vsel %vm1926_vm1, -128.0, %v1910_v57  ;;  %vm1958_vm4 = vcmp.gt.f32.partialorder %v6319_v59, -112.0 }
 0x224   : >> { %2460 = vrot.lane.b32.xlu2 %v8566_v3, %s4577_s21  ;;  %v2229_v55 = vsel %vm2213_vm9, 256.0, %v2197_v51  ;;  %v2309_v58 = vsub.f32 %v6315_v15, %v1845_v13  ;;  %v1974_v56 = vsel %vm1958_vm4, -96.0, %v1942_v44  ;;  %vm1990_vm13 = vcmp.gt.f32.partialorder %v6319_v59, -80.0 }
 0x225   : >> { %v2261_v4 = vsel %vm2245_vm10, 384.0, %v2229_v55  ;;  %v1798_v16 = vmax.f32 %v1782_v7, 0.0  ;;  %v2006_v11 = vsel %vm1990_vm13, -64.0, %v1974_v56  ;;  %vm2022_vm3 = vcmp.gt.f32.partialorder %v6319_v59, -56.0 }
 0x226   : >> { %v2277_v57 = vsub.f32 %v6315_v15, %v2261_v4  ;;  %v2325_v37 = vand.u32 2147483647, %v2309_v58  ;;  %vm2373_vm5 = vcmp.lt.f32.partialorder %v2261_v4, %v1845_v13  ;;  %v2038_v45 = vsel %vm2022_vm3, -48.0, %v2006_v11  ;;  %v6410_v15 = vpop.permute.xlu0 %1558  ;;  %v6415_v11 = vpop.permute.xlu1 %1563 }
 0x227   : >> { %v1814_v30 = vmin.f32 %v1798_v16, 14.0  ;;  %vm2054_vm9 = vcmp.gt.f32.partialorder %v6319_v59, 0.0  ;;  %vm2086_vm8 = vcmp.gt.f32.partialorder %v6319_v59, 56.0  ;;  %vm2118_vm14 = vcmp.gt.f32.partialorder %v6319_v59, 80.0  ;;  %8860 = vst [vmem:[#allocation89_spill] sm:$0xff] %v6410_v15  ;;  %v6413_v16 = vpop.permute.xlu2 %1553 }
 0x228   : >> { %v2293_v44 = vand.u32 2147483647, %v2277_v57  ;;  %v2070_v51 = vsel %vm2054_vm9, 48.0, %v2038_v45  ;;  %vm2150_vm15 = vcmp.gt.f32.partialorder %v6319_v59, 112.0  ;;  %vm2182_vm10 = vcmp.gt.f32.partialorder %v6319_v59, 160.0 }
 0x229   : >> { %v1830_v7 = vmul.f32 4.0, %v1814_v30  ;;  %v2102_v55 = vsel %vm2086_vm8, 64.0, %v2070_v51  ;;  %vm2214_vm12 = vcmp.gt.f32.partialorder %v6319_v59, 224.0  ;;  %vm2246_vm7 = vcmp.gt.f32.partialorder %v6319_v59, 320.0 }
 0x22a   : >> { %vm2341_vm1 = vcmp.lt.f32.partialorder %v2293_v44, %v2325_v37  ;;  %vm2357_vm6 = vcmp.eq.f32.partialorder %v2293_v44, %v2325_v37  ;;  %v2134_v58 = vsel %vm2118_vm14, 96.0, %v2102_v55  ;;  %v1751_v56 = vmul.f32 0.25, %v6327_v53 }
 0x22b   : >> { %vm2389_vm4 = vmand %vm2357_vm6, %vm2373_vm5  ;;  %v1846_v57 = vadd.f32 -28.0, %v1830_v7  ;;  %v2166_v45 = vsel %vm2150_vm15, 128.0, %v2134_v58  ;;  %vm1863_vm13 = vcmp.gt.f32.partialorder %v6327_v53, -320.0  ;;  %vm1895_vm3 = vcmp.gt.f32.partialorder %v6327_v53, -224.0 }
 0x22c   : >> { %vm2405_vm9 = vmor %vm2341_vm1, %vm2389_vm4  ;;  %v2198_v30 = vsel %vm2182_vm10, 192.0, %v2166_v45  ;;  %v1767_v37 = vadd.f32 6.5, %v1751_v56  ;;  %v1879_v44 = vsel %vm1863_vm13, -256.0, %v8768_v42  ;;  %vm1927_vm8 = vcmp.gt.f32.partialorder %v6327_v53, -160.0 }
 0x22d   : >> { %v6424_v51 = vsel %vm2405_vm9, %v2261_v4, %v1845_v13  ;;  %v2230_v55 = vsel %vm2214_vm12, 256.0, %v2198_v30  ;;  %v2310_v7 = vsub.f32 %v6319_v59, %v1846_v57  ;;  %v1911_v58 = vsel %vm1895_vm3, -192.0, %v1879_v44 }
 0x22e   : >> { %8861 = vst [vmem:[#allocation90_spill] sm:$0xff] %v6424_v51  ;;  %v8571_v3 = vand.u32 2147483647, %v6424_v51  ;;  %v2262_v12 = vsel %vm2246_vm7, 384.0, %v2230_v55  ;;  %v1783_v35 = vceil.f32 %v1767_v37  ;;  %v1943_v45 = vsel %vm1927_vm8, -128.0, %v1911_v58  ;;  %v6444_v55 = vpop.permute.xlu0 %1573 }
 0x22f   : >> { %v2278_v56 = vsub.f32 %v6319_v59, %v2262_v12  ;;  %v2326_v41 = vand.u32 2147483647, %v2310_v7  ;;  %vm2374_vm5 = vcmp.lt.f32.partialorder %v2262_v12, %v1846_v57  ;;  %vm1959_vm14 = vcmp.gt.f32.partialorder %v6327_v53, -112.0  ;;  %8862 = vst [vmem:[#allocation91_spill] sm:$0xff] %v6444_v55 }
 0x230   : >> { %2462 = vrot.lane.b32.xlu1 %v8571_v3, %s4577_s21  ;;  %v1799_v13 = vmax.f32 %v1783_v35, 0.0  ;;  %v1975_v4 = vsel %vm1959_vm14, -96.0, %v1943_v45  ;;  %vm1991_vm15 = vcmp.gt.f32.partialorder %v6327_v53, -80.0  ;;  %vm2023_vm10 = vcmp.gt.f32.partialorder %v6327_v53, -56.0  ;;  %v6449_v45 = vpop.permute.xlu2 %1568 }
 0x231   : >> { %v2294_v30 = vand.u32 2147483647, %v2278_v56  ;;  %v2007_v44 = vsel %vm1991_vm15, -64.0, %v1975_v4  ;;  %vm2055_vm12 = vcmp.gt.f32.partialorder %v6327_v53, 0.0  ;;  %vm2087_vm7 = vcmp.gt.f32.partialorder %v6327_v53, 56.0  ;;  %v6451_v56 = vpop.permute.xlu1 %1578 }
 0x232   : >> { %v1815_v59 = vmin.f32 %v1799_v13, 14.0  ;;  %v2039_v37 = vsel %vm2023_vm10, -48.0, %v2007_v44  ;;  %vm2119_vm1 = vcmp.gt.f32.partialorder %v6327_v53, 80.0  ;;  %vm2151_vm6 = vcmp.gt.f32.partialorder %v6327_v53, 112.0 }
 0x233   : >> { %vm2342_vm4 = vcmp.lt.f32.partialorder %v2294_v30, %v2326_v41  ;;  %vm2358_vm13 = vcmp.eq.f32.partialorder %v2294_v30, %v2326_v41  ;;  %v2071_v35 = vsel %vm2055_vm12, 48.0, %v2039_v37  ;;  %vm2183_vm3 = vcmp.gt.f32.partialorder %v6327_v53, 160.0 }
 0x234   : >> { %vm2390_vm9 = vmand %vm2358_vm13, %vm2374_vm5  ;;  %v1831_v7 = vmul.f32 4.0, %v1815_v59  ;;  %v2103_v58 = vsel %vm2087_vm7, 64.0, %v2071_v35  ;;  %vm2215_vm8 = vcmp.gt.f32.partialorder %v6327_v53, 224.0  ;;  %vm2247_vm14 = vcmp.gt.f32.partialorder %v6327_v53, 320.0 }
 0x235   : >> { %vm2406_vm15 = vmor %vm2342_vm4, %vm2390_vm9  ;;  %v2135_v41 = vsel %vm2119_vm1, 96.0, %v2103_v58  ;;  %v1752_v13 = vmul.f32 0.25, %v6331_v33  ;;  %vm1864_vm10 = vcmp.gt.f32.partialorder %v6331_v33, -320.0  ;;  %vm1896_vm5 = vcmp.gt.f32.partialorder %v6331_v33, -224.0 }
 0x236   : >> { %v6458_v4 = vsel %vm2406_vm15, %v2262_v12, %v1846_v57  ;;  %v1847_v30 = vadd.f32 -28.0, %v1831_v7  ;;  %v2167_v44 = vsel %vm2151_vm6, 128.0, %v2135_v41  ;;  %v1880_v59 = vsel %vm1864_vm10, -256.0, %v8768_v42 }
 0x237   : >> { %8863 = vst [vmem:[#allocation92_spill] sm:$0xff] %v6458_v4  ;;  %v8576_v37 = vand.u32 2147483647, %v6458_v4  ;;  %v2199_v35 = vsel %vm2183_vm3, 192.0, %v2167_v44  ;;  %v1768_v58 = vadd.f32 6.5, %v1752_v13  ;;  %v1912_v3 = vsel %vm1896_vm5, -192.0, %v1880_v59 }
 0x238   : >> { %v2231_v51 = vsel %vm2215_vm8, 256.0, %v2199_v35  ;;  %v2311_v55 = vsub.f32 %v6327_v53, %v1847_v30  ;;  %vm1928_vm12 = vcmp.gt.f32.partialorder %v6331_v33, -160.0  ;;  %vm1960_vm7 = vcmp.gt.f32.partialorder %v6331_v33, -112.0 }
 0x239   : >> { %2464 = vrot.lane.b32.xlu0 %v8576_v37, %s4577_s21  ;;  %v2263_v12 = vsel %vm2247_vm14, 384.0, %v2231_v51  ;;  %v1784_v57 = vceil.f32 %v1768_v58  ;;  %v1944_v7 = vsel %vm1928_vm12, -128.0, %v1912_v3  ;;  %vm1992_vm1 = vcmp.gt.f32.partialorder %v6331_v33, -80.0  ;;  %v6486_v58 = vpop.permute.xlu2 %1583 }
 0x23a   : >> { %v2279_v41 = vsub.f32 %v6327_v53, %v2263_v12  ;;  %v2327_v13 = vand.u32 2147483647, %v2311_v55  ;;  %vm2375_vm6 = vcmp.lt.f32.partialorder %v2263_v12, %v1847_v30  ;;  %v1976_v44 = vsel %vm1960_vm7, -96.0, %v1944_v7  ;;  %v6483_v53 = vpop.permute.xlu0 %1588  ;;  %8865 = vst [vmem:[#allocation94_spill] sm:$0xff] %v6486_v58 }
 0x23b   : >> { %v1800_v59 = vmax.f32 %v1784_v57, 0.0  ;;  %v2008_v35 = vsel %vm1992_vm1, -64.0, %v1976_v44  ;;  %vm2024_vm4 = vcmp.gt.f32.partialorder %v6331_v33, -56.0  ;;  %vm2056_vm13 = vcmp.gt.f32.partialorder %v6331_v33, 0.0  ;;  %8864 = vst [vmem:[#allocation93_spill] sm:$0xff] %v6483_v53  ;;  %v6489_v57 = vpop.permute.xlu1 %1593 }
 0x23c   : >> { %v2295_v4 = vand.u32 2147483647, %v2279_v41  ;;  %v2040_v37 = vsel %vm2024_vm4, -48.0, %v2008_v35  ;;  %vm2088_vm3 = vcmp.gt.f32.partialorder %v6331_v33, 56.0  ;;  %vm2120_vm9 = vcmp.gt.f32.partialorder %v6331_v33, 80.0 }
 0x23d   : >> { %v1816_v3 = vmin.f32 %v1800_v59, 14.0  ;;  %v2072_v51 = vsel %vm2056_vm13, 48.0, %v2040_v37  ;;  %vm2152_vm8 = vcmp.gt.f32.partialorder %v6331_v33, 112.0  ;;  %vm2184_vm10 = vcmp.gt.f32.partialorder %v6331_v33, 160.0 }
 0x23e   : >> { %vm2343_vm14 = vcmp.lt.f32.partialorder %v2295_v4, %v2327_v13  ;;  %vm2359_vm15 = vcmp.eq.f32.partialorder %v2295_v4, %v2327_v13  ;;  %v2104_v55 = vsel %vm2088_vm3, 64.0, %v2072_v51  ;;  %vm2216_vm12 = vcmp.gt.f32.partialorder %v6331_v33, 224.0 }
 0x23f   : >> { %vm2391_vm5 = vmand %vm2359_vm15, %vm2375_vm6  ;;  %v1832_v7 = vmul.f32 4.0, %v1816_v3  ;;  %v2136_v41 = vsel %vm2120_vm9, 96.0, %v2104_v55  ;;  %v6494_v37 = vmul.f32 %v5803_v18, %v8738_v5  ;;  %vm2248_vm1 = vcmp.gt.f32.partialorder %v6331_v33, 320.0 }
 0x240   : >> { %vm2407_vm7 = vmor %vm2343_vm14, %vm2391_vm5  ;;  %v2168_v4 = vsel %vm2152_vm8, 128.0, %v2136_v41  ;;  %v6499_v13 = vmul.f32 %v5803_v18, %v8737_v40  ;;  %v6503_v44 = vmul.f32 %v5803_v18, %v8736_v26 }
 0x241   : >> { %v6505_v59 = vsel %vm2407_vm7, %v2263_v12, %v1847_v30  ;;  %v1848_v35 = vadd.f32 -28.0, %v1832_v7  ;;  %v2200_v3 = vsel %vm2184_vm10, 192.0, %v2168_v4  ;;  %v1753_v51 = vmul.f32 0.25, %v6494_v37 }
 0x242   : >> { %8866 = vst [vmem:[#allocation95_spill] sm:$0xff] %v6505_v59  ;;  %v8582_v55 = vand.u32 2147483647, %v6505_v59  ;;  %v2232_v5 = vsel %vm2216_vm12, 256.0, %v2200_v3  ;;  %vm1865_vm6 = vcmp.gt.f32.partialorder %v6494_v37, -320.0  ;;  %vm1897_vm4 = vcmp.gt.f32.partialorder %v6494_v37, -224.0 }
 0x243   : >> { %v2264_v41 = vsel %vm2248_vm1, 384.0, %v2232_v5  ;;  %v2312_v40 = vsub.f32 %v6331_v33, %v1848_v35  ;;  %v1769_v53 = vadd.f32 6.5, %v1753_v51  ;;  %v1881_v18 = vsel %vm1865_vm6, -256.0, %v8768_v42 }
 0x244   : >> { %2466 = vrot.lane.b32.xlu2 %v8582_v55, %s4577_s21  ;;  %v2280_v30 = vsub.f32 %v6331_v33, %v2264_v41  ;;  %vm2376_vm13 = vcmp.lt.f32.partialorder %v2264_v41, %v1848_v35  ;;  %v1913_v12 = vsel %vm1897_vm4, -192.0, %v1881_v18  ;;  %vm1929_vm3 = vcmp.gt.f32.partialorder %v6494_v37, -160.0 }
 0x245   : >> { %v2328_v7 = vand.u32 2147483647, %v2312_v40  ;;  %v1785_v4 = vceil.f32 %v1769_v53  ;;  %v1945_v3 = vsel %vm1929_vm3, -128.0, %v1913_v12  ;;  %vm1961_vm9 = vcmp.gt.f32.partialorder %v6494_v37, -112.0  ;;  %v6524_v40 = vpop.permute.xlu0 %1603  ;;  %v6526_v53 = vpop.permute.xlu2 %1598 }
 0x246   : >> { %v2296_v5 = vand.u32 2147483647, %v2280_v30  ;;  %v1977_v26 = vsel %vm1961_vm9, -96.0, %v1945_v3  ;;  %vm1993_vm8 = vcmp.gt.f32.partialorder %v6494_v37, -80.0  ;;  %vm2025_vm14 = vcmp.gt.f32.partialorder %v6494_v37, -56.0  ;;  %8867 = vst [vmem:[#allocation96_spill] sm:$0xff] %v6524_v40 }
 0x247   : >> { %v1801_v51 = vmax.f32 %v1785_v4, 0.0  ;;  %v2009_v59 = vsel %vm1993_vm8, -64.0, %v1977_v26  ;;  %vm2057_vm15 = vcmp.gt.f32.partialorder %v6494_v37, 0.0  ;;  %vm2089_vm10 = vcmp.gt.f32.partialorder %v6494_v37, 56.0  ;;  %8868 = vst [vmem:[#allocation97_spill] sm:$0xff] %v6526_v53  ;;  %v6531_v26 = vpop.permute.xlu1 %2444 }
 0x248   : >> { %vm2344_vm5 = vcmp.lt.f32.partialorder %v2296_v5, %v2328_v7  ;;  %vm2360_vm12 = vcmp.eq.f32.partialorder %v2296_v5, %v2328_v7  ;;  %v2041_v33 = vsel %vm2025_vm14, -48.0, %v2009_v59  ;;  %vm2121_vm7 = vcmp.gt.f32.partialorder %v6494_v37, 80.0 }
 0x249   : >> { %vm2392_vm1 = vmand %vm2360_vm12, %vm2376_vm13  ;;  %v1817_v18 = vmin.f32 %v1801_v51, 14.0  ;;  %v2073_v30 = vsel %vm2057_vm15, 48.0, %v2041_v33  ;;  %vm2153_vm6 = vcmp.gt.f32.partialorder %v6494_v37, 112.0  ;;  %vm2185_vm4 = vcmp.gt.f32.partialorder %v6494_v37, 160.0 }
 0x24a   : >> { %vm2408_vm3 = vmor %vm2344_vm5, %vm2392_vm1  ;;  %v2105_v12 = vsel %vm2089_vm10, 64.0, %v2073_v30  ;;  %vm2217_vm9 = vcmp.gt.f32.partialorder %v6494_v37, 224.0  ;;  %vm2249_vm8 = vcmp.gt.f32.partialorder %v6494_v37, 320.0  ;;  %v1754_v59 = vmul.f32 0.25, %v6499_v13 }
 0x24b   : >> { %v6536_v7 = vsel %vm2408_vm3, %v2264_v41, %v1848_v35  ;;  %v1833_v4 = vmul.f32 4.0, %v1817_v18  ;;  %v2137_v3 = vsel %vm2121_vm7, 96.0, %v2105_v12  ;;  %vm1866_vm13 = vcmp.gt.f32.partialorder %v6499_v13, -320.0 }
 0x24c   : >> { %8869 = vst [vmem:[#allocation98_spill] sm:$0xff] %v6536_v7  ;;  %v8583_v5 = vand.u32 2147483647, %v6536_v7  ;;  %v2169_v51 = vsel %vm2153_vm6, 128.0, %v2137_v3  ;;  %v1770_v33 = vadd.f32 6.5, %v1754_v59  ;;  %v1882_v30 = vsel %vm1866_vm13, -256.0, %v8768_v42 }
 0x24d   : >> { %v1849_v55 = vadd.f32 -28.0, %v1833_v4  ;;  %v2201_v40 = vsel %vm2185_vm4, 192.0, %v2169_v51  ;;  %vm1898_vm14 = vcmp.gt.f32.partialorder %v6499_v13, -224.0  ;;  %vm1930_vm15 = vcmp.gt.f32.partialorder %v6499_v13, -160.0 }
 0x24e   : >> { %2468 = vrot.lane.b32.xlu1 %v8583_v5, %s4577_s21  ;;  %v2233_v35 = vsel %vm2217_vm9, 256.0, %v2201_v40  ;;  %v1786_v41 = vceil.f32 %v1770_v33  ;;  %v1914_v18 = vsel %vm1898_vm14, -192.0, %v1882_v30  ;;  %vm1962_vm10 = vcmp.gt.f32.partialorder %v6499_v13, -112.0  ;;  %v6560_v40 = vpop.permute.xlu2 %2446 }
 0x24f   : >> { %v2265_v12 = vsel %vm2249_vm8, 384.0, %v2233_v35  ;;  %v2313_v59 = vsub.f32 %v6494_v37, %v1849_v55  ;;  %v1946_v4 = vsel %vm1930_vm15, -128.0, %v1914_v18  ;;  %vm1994_vm5 = vcmp.gt.f32.partialorder %v6499_v13, -80.0  ;;  %v6563_v18 = vpop.permute.xlu0 %2448 }
 0x250   : >> { %v2281_v3 = vsub.f32 %v6494_v37, %v2265_v12  ;;  %vm2377_vm12 = vcmp.lt.f32.partialorder %v2265_v12, %v1849_v55  ;;  %v1802_v51 = vmax.f32 %v1786_v41, 0.0  ;;  %v1978_v5 = vsel %vm1962_vm10, -96.0, %v1946_v4  ;;  %v6568_v37 = vpop.permute.xlu1 %2450 }
 0x251   : >> { %v2329_v7 = vand.u32 2147483647, %v2313_v59  ;;  %v2010_v53 = vsel %vm1994_vm5, -64.0, %v1978_v5  ;;  %vm2026_vm7 = vcmp.gt.f32.partialorder %v6499_v13, -56.0  ;;  %vm2058_vm1 = vcmp.gt.f32.partialorder %v6499_v13, 0.0 }
 0x252   : >> { %v2297_v33 = vand.u32 2147483647, %v2281_v3  ;;  %v1818_v30 = vmin.f32 %v1802_v51, 14.0  ;;  %v2042_v35 = vsel %vm2026_vm7, -48.0, %v2010_v53  ;;  %vm2090_vm6 = vcmp.gt.f32.partialorder %v6499_v13, 56.0 }
 0x253   : >> { %v2074_v15 = vsel %vm2058_vm1, 48.0, %v2042_v35  ;;  %vm2122_vm4 = vcmp.gt.f32.partialorder %v6499_v13, 80.0  ;;  %vm2154_vm3 = vcmp.gt.f32.partialorder %v6499_v13, 112.0  ;;  %vm2186_vm9 = vcmp.gt.f32.partialorder %v6499_v13, 160.0 }
 0x254   : >> { %vm2345_vm8 = vcmp.lt.f32.partialorder %v2297_v33, %v2329_v7  ;;  %vm2361_vm13 = vcmp.eq.f32.partialorder %v2297_v33, %v2329_v7  ;;  %v1834_v5 = vmul.f32 4.0, %v1818_v30  ;;  %v2106_v41 = vsel %vm2090_vm6, 64.0, %v2074_v15 }
 0x255   : >> { %vm2393_vm14 = vmand %vm2361_vm13, %vm2377_vm12  ;;  %v2138_v53 = vsel %vm2122_vm4, 96.0, %v2106_v41  ;;  %vm2218_vm15 = vcmp.gt.f32.partialorder %v6499_v13, 224.0  ;;  %vm2250_vm5 = vcmp.gt.f32.partialorder %v6499_v13, 320.0  ;;  %v1755_v3 = vmul.f32 0.25, %v6503_v44 }
 0x256   : >> { %vm2409_vm10 = vmor %vm2345_vm8, %vm2393_vm14  ;;  %v1850_v59 = vadd.f32 -28.0, %v1834_v5  ;;  %v2170_v4 = vsel %vm2154_vm3, 128.0, %v2138_v53  ;;  %vm1867_vm7 = vcmp.gt.f32.partialorder %v6503_v44, -320.0  ;;  %vm1899_vm1 = vcmp.gt.f32.partialorder %v6503_v44, -224.0 }
 0x257   : >> { %v6574_v51 = vsel %vm2409_vm10, %v2265_v12, %v1849_v55  ;;  %v2202_v35 = vsel %vm2186_vm9, 192.0, %v2170_v4  ;;  %v1771_v30 = vadd.f32 6.5, %v1755_v3  ;;  %vm2476_vm12 = vcmp.gt.f32.partialorder %v6531_v26, 32.0  ;;  %v6583_v55 = vpop.permute.xlu2 %1414  ;;  %v6590_v3 = vpop.permute.xlu0 %1416 }
 0x258   : >> { %8870 = vst [vmem:[#allocation99_spill] sm:$0xff] %v6574_v51  ;;  %v8586_v15 = vand.u32 2147483647, %v6574_v51  ;;  %v2234_v7 = vsel %vm2218_vm15, 256.0, %v2202_v35  ;;  %v2314_v33 = vsub.f32 %v6499_v13, %v1850_v59  ;;  %v1883_v5 = vsel %vm1867_vm7, -256.0, %v8768_v42  ;;  %v6595_v35 = vpop.permute.xlu1 %1412  ;;  %vm6601_vm8 = vmand %vm8791_vm0, %vm2476_vm12 }
 0x259   : >> { %v2266_v41 = vsel %vm2250_vm5, 384.0, %v2234_v7  ;;  %vm1931_vm6 = vcmp.gt.f32.partialorder %v6503_v44, -160.0  ;;  %v1787_v4 = vceil.f32 %v1771_v30  ;;  %vm1963_vm4 = vcmp.gt.f32.partialorder %v6503_v44, -112.0 }
 0x25a   : >> { %2470 = vrot.lane.b32.xlu0 %v8586_v15, %s4577_s21  ;;  %v2282_v12 = vsub.f32 %v6499_v13, %v2266_v41  ;;  %v2330_v53 = vand.u32 2147483647, %v2314_v33  ;;  %vm2378_vm3 = vcmp.lt.f32.partialorder %v2266_v41, %v1850_v59  ;;  %v1915_v42 = vsel %vm1899_vm1, -192.0, %v1883_v5 }
 0x25b   : >> { %vm1995_vm9 = vcmp.gt.f32.partialorder %v6503_v44, -80.0  ;;  %v8871_v13 = vmov 0  ;;  %v1803_v33 = vmax.f32 %v1787_v4, 0.0  ;;  %v1947_v30 = vsel %vm1931_vm6, -128.0, %v1915_v42 }
 0x25c   : >> { %v2298_v7 = vand.u32 2147483647, %v2282_v12  ;;  %v8872_v13 = vsel %vm6601_vm8, 4294967295, %v8871_v13  ;;  %vm2027_vm13 = vcmp.gt.f32.partialorder %v6503_v44, -56.0  ;;  %v1979_v15 = vsel %vm1963_vm4, -96.0, %v1947_v30 }
 0x25d   : >> { %8873 = vst [vmem:[#allocation100_spill] sm:$0xff] %v8872_v13  ;;  %vm2059_vm14 = vcmp.gt.f32.partialorder %v6503_v44, 0.0  ;;  %vm2091_vm15 = vcmp.gt.f32.partialorder %v6503_v44, 56.0  ;;  %v1819_v5 = vmin.f32 %v1803_v33, 14.0  ;;  %v2011_v12 = vsel %vm1995_vm9, -64.0, %v1979_v15 }
 0x25e   : >> { %vm2346_vm10 = vcmp.lt.f32.partialorder %v2298_v7, %v2330_v53  ;;  %vm2362_vm5 = vcmp.eq.f32.partialorder %v2298_v7, %v2330_v53  ;;  %v2043_v26 = vsel %vm2027_vm13, -48.0, %v2011_v12  ;;  %vm2123_vm1 = vcmp.gt.f32.partialorder %v6503_v44, 80.0 }
 0x25f   : >> { %vm2394_vm7 = vmand %vm2362_vm5, %vm2378_vm3  ;;  %v8874_v51 = vand.u32 2147483647, %v5897_v63  ;;  %v1835_v42 = vmul.f32 4.0, %v1819_v5  ;;  %v2075_v30 = vsel %vm2059_vm14, 48.0, %v2043_v26  ;;  %vm2155_vm6 = vcmp.gt.f32.partialorder %v6503_v44, 112.0  ;;  %v6619_v15 = vpop.permute.xlu2 %1420 }
 0x260   : >> { %vm2410_vm12 = vmor %vm2346_vm10, %vm2394_vm7  ;;  %v2107_v53 = vsel %vm2091_vm15, 64.0, %v2075_v30  ;;  %vm2187_vm4 = vcmp.gt.f32.partialorder %v6503_v44, 160.0  ;;  %vm2479_vm3 = vcmp.gt.f32.partialorder %v6568_v37, 32.0  ;;  %vm2219_vm9 = vcmp.gt.f32.partialorder %v6503_v44, 224.0 }
 0x261   : >> { %v2508_v4 = vsel %vm6601_vm8, 0.0, %v8874_v51  ;;  %v6615_v58 = vsel %vm2410_vm12, %v2266_v41, %v1850_v59  ;;  %v1851_v33 = vadd.f32 -28.0, %v1835_v42  ;;  %v2139_v12 = vsel %vm2123_vm1, 96.0, %v2107_v53  ;;  %v6624_v51 = vpop.permute.xlu0 %1422  ;;  %vm6634_vm15 = vmand %vm8791_vm0, %vm2479_vm3 }
 0x262   : >> { %8875 = vst [vmem:[#allocation101_spill] sm:$0xff] %v6615_v58  ;;  %v8589_v7 = vand.u32 2147483647, %v6615_v58  ;;  %2524 = vrot.lane.b32.xlu0 %v2508_v4, %s4579_s29  ;;  %vm2477_vm13 = vcmp.gt.f32.partialorder %v6560_v40, 32.0  ;;  %v2171_v59 = vsel %vm2155_vm6, 128.0, %v2139_v12  ;;  %vm2251_vm14 = vcmp.gt.f32.partialorder %v6503_v44, 320.0  ;;  %v1419_v4 = vpop.permute.xlu1 %1418 }
 0x263   : >> { %v2203_v37 = vsel %vm2187_vm4, 192.0, %v2171_v59  ;;  %v2315_v41 = vsub.f32 %v6503_v44, %v1851_v33  ;;  %vm6640_vm10 = vmand %vm8791_vm0, %vm2477_vm13  ;;  %v8880_v12 = vand.u32 2147483647, %v5918_v32  ;;  %vm2478_vm4 = vcmp.gt.f32.partialorder %v6563_v18, 32.0 }
 0x264   : >> { %2472 = vrot.lane.b32.xlu2 %v8589_v7, %s4577_s21  ;;  %v2235_v26 = vsel %vm2219_vm9, 256.0, %v2203_v37  ;;  %v8881_v37 = vand.u32 2147483647, %v6007_v10  ;;  %vm6672_vm3 = vmand %vm8791_vm0, %vm2478_vm4  ;;  %vm1446_vm4 = vcmp.gt.f32.partialorder %v6583_v55, 32.0 }
 0x265   : >> { %v2267_v42 = vsel %vm2251_vm14, 384.0, %v2235_v26  ;;  %v2331_v53 = vand.u32 2147483647, %v2315_v41  ;;  %v2511_v59 = vsel %vm6634_vm15, 0.0, %v8880_v12 }
 0x266   : >> { %v2283_v30 = vsub.f32 %v6503_v44, %v2267_v42  ;;  %vm2379_vm5 = vcmp.lt.f32.partialorder %v2267_v42, %v1851_v33  ;;  %v2509_v63 = vsel %vm6640_vm10, 0.0, %v8881_v37 }
 0x267   : >> { %v1427_v13 = vpop.permute.xlu2 %1426 }
 0x268   : >> { %v2299_v7 = vand.u32 2147483647, %v2283_v30 }
 0x269   : >> { %v6654_v58 = vpop.permute.xlu0 %1428 }
 0x26a   : >> { %2530 = vrot.lane.b32.xlu0 %v2511_v59, %s4579_s29  ;;  %vm2347_vm7 = vcmp.lt.f32.partialorder %v2299_v7, %v2331_v53  ;;  %vm2363_vm1 = vcmp.eq.f32.partialorder %v2299_v7, %v2331_v53  ;;  %v6660_v26 = vpop.permute.xlu1 %1424  ;;  %v8885_v7 = vand.u32 2147483647, %v5952_v14 }
 0x26b   : >> { %vm2395_vm12 = vmand %vm2363_vm1, %vm2379_vm5 }
 0x26c   : >> { %2526 = vrot.lane.b32.xlu2 %v2509_v63, %s4579_s29  ;;  %vm2411_vm6 = vmor %vm2347_vm7, %vm2395_vm12  ;;  %v8882_v63 = vmov 0  ;;  %vm1445_vm7 = vcmp.gt.f32.partialorder %v6595_v35, 32.0  ;;  %vm4580_vm12 = vmmov 1   ;;  %v8898_v35 = vand.u32 2147483647, %v6238_v17 }
 0x26d   : >> { %v6657_v44 = vsel %vm2411_vm6, %v2267_v42, %v1851_v33  ;;  %v8883_v63 = vsel %vm6672_vm3, 4294967295, %v8882_v63  ;;  %v2510_v33 = vsel %vm6672_vm3, 0.0, %v8885_v7  ;;  %v8889_v7 = vand.u32 2147483647, %v6286_v25  ;;  %vm6716_vm6 = vmxor %vm8791_vm0, %vm4580_vm12 }
 0x26e   : >> { %v8594_v41 = vand.u32 2147483647, %v6657_v44  ;;  %8884 = vst [vmem:[#allocation102_spill] sm:$0xff] %v8883_v63  ;;  %v8892_v63 = vand.u32 2147483647, %v6168_v1  ;;  %vm1449_vm3 = vcmp.gt.f32.partialorder %v6619_v15, 32.0 }
 0x26f   : >> { %v6666_v30 = vpop.permute.xlu2 %1432 }
 0x270   : >> { %2474 = vrot.lane.b32.xlu1 %v8594_v41, %s4577_s21  ;;  %v8886_v41 = vmov 0  ;;  %s3958_s21 = scalar_lea.sflag (%p7388_p11), [#allocation6], %s166_s12 }
 0x271   : >> { %v6668_v12 = vpop.permute.xlu0 %1434 }
 0x272   : >> { %v6683_v42 = vpop.permute.xlu1 %1430 }
 0x277   : >> { %v6681_v18 = vpop.permute.xlu2 %1438 }
 0x278   : >> { %2528 = vrot.lane.b32.xlu1 %v2510_v33, %s4579_s29 }
 0x279   : >> { %v6685_v53 = vpop.permute.xlu0 %1440 }
 0x27a   : >> { %v6693_v14 = vpop.permute.xlu1 %1436 }
 0x27f   : >> { %v2455_v59 = vpop.permute.xlu2 %2454 }
 0x280   : >> { %vm2481_vm9 = vcmp.gt.f32.partialorder %v2455_v59, 32.0  ;;  %v8890_v59 = vmov 0 }
 0x281   : >> { %v2453_v37 = vpop.permute.xlu0 %2452  ;;  %vm6689_vm13 = vmand %vm8791_vm0, %vm2481_vm9 }
 0x282   : >> { %v8887_v41 = vsel %vm6689_vm13, 4294967295, %v8886_v41  ;;  %v2513_v33 = vsel %vm6689_vm13, 0.0, %v8889_v7  ;;  %vm2480_vm14 = vcmp.gt.f32.partialorder %v2453_v37, 32.0  ;;  %v6711_v25 = vpop.permute.xlu1 %1442  ;;  %vm1461_vm9 = vmand %vm6716_vm6, %vm1445_vm7 }
 0x283   : >> { %8888 = vst [vmem:[#allocation103_spill] sm:$0xff] %v8887_v41  ;;  %2534 = vrot.lane.b32.xlu1 %v2513_v33, %s4579_s29  ;;  %vm6702_vm5 = vmand %vm8791_vm0, %vm2480_vm14 }
 0x284   : >> { %v8891_v59 = vsel %vm6702_vm5, 4294967295, %v8890_v59  ;;  %v2512_v32 = vsel %vm6702_vm5, 0.0, %v8892_v63  ;;  %vm1462_vm13 = vmand %vm6716_vm6, %vm1446_vm4  ;;  %vm1448_vm4 = vcmp.gt.f32.partialorder %v1419_v4, 32.0  ;;  %vm1452_vm5 = vcmp.gt.f32.partialorder %v1427_v13, 32.0  ;;  %v8900_v63 = vld [vmem:[#allocation32_spill] sm:$0xff] }
 0x285   : >> { %2532 = vrot.lane.b32.xlu2 %v2512_v32, %s4579_s29  ;;  %v8896_v32 = vmov 0  ;;  %vm1477_vm12 = vmor %vm5963_vm11, %vm1461_vm9  ;;  %vm8899_vm11 = vnez %v8814_v28  ;;  %v8904_v28 = vld [vmem:[#allocation38_spill] sm:$0xff] }
 0x286   : >> { %vm1478_vm7 = vmor %vm6033_vm2, %vm1462_vm13  ;;  %vm8901_vm2 = vnez %v8798_v27 }
 0x287   : >> { %v1494_v15 = vsel %vm1478_vm7, 0.0, %v5397_v8 }
 0x288   : >> { %v1607_v21 = vmul.f32 %v6371_v9, %v1494_v15 }
 0x28a   : >> { %v2457_v41 = vpop.permute.xlu1 %2456 }
 0x28b   : >> { %vm2482_vm1 = vcmp.gt.f32.partialorder %v2457_v41, 32.0  ;;  %v1493_v41 = vsel %vm1477_vm12, 0.0, %v5314_v46  ;;  %vm1450_vm12 = vcmp.gt.f32.partialorder %v6624_v51, 32.0 }
 0x28c   : >> { %vm6725_vm14 = vmand %vm8791_vm0, %vm2482_vm1  ;;  %v1606_v43 = vmul.f32 %v6337_v31, %v1493_v41  ;;  %v1623_v31 = vsub.f32 %v1607_v21, %v8904_v28  ;;  %v8929_v21 = vld [vmem:[#allocation49_spill] sm:$0xff] }
 0x28d   : >> { %v8897_v32 = vsel %vm6725_vm14, 4294967295, %v8896_v32  ;;  %v2514_v55 = vsel %vm6725_vm14, 0.0, %v8898_v35  ;;  %vm1465_vm1 = vmand %vm6716_vm6, %vm1449_vm3 }
 0x28e   : >> { %2536 = vrot.lane.b32.xlu0 %v2514_v55, %s4579_s29  ;;  %vm1481_vm9 = vmor %vm8899_vm11, %vm1465_vm1  ;;  %v1622_v33 = vsub.f32 %v1606_v43, %v8900_v63  ;;  %vm1455_vm1 = vcmp.gt.f32.partialorder %v6666_v30, 32.0  ;;  %v1639_v27 = vmul.f32 %v1623_v31, %v1623_v31  ;;  %vm8909_vm11 = vnez %v8803_v2 }
 0x28f   : >> { %vm1464_vm14 = vmand %vm6716_vm6, %vm1448_vm4  ;;  %v1497_v46 = vsel %vm1481_vm9, 0.0, %v5441_v20  ;;  %vm1447_vm4 = vcmp.gt.f32.partialorder %v6590_v3, 32.0 }
 0x290   : >> { %vm1480_vm13 = vmor %vm8901_vm2, %vm1464_vm14  ;;  %v1638_v13 = vmul.f32 %v1622_v33, %v1622_v33  ;;  %v1610_v9 = vmul.f32 %v6379_v29, %v1497_v46  ;;  %vm8905_vm14 = vnez %v8817_v23  ;;  %v8908_v29 = vld [vmem:[#allocation25_spill] sm:$0xff]  ;;  %v8933_v46 = vld [vmem:[#allocation31_spill] sm:$0xff] }
 0x291   : >> { %vm6757_vm3 = vmand %vm6716_vm6, %vm1452_vm5  ;;  %v1496_v4 = vsel %vm1480_vm13, 0.0, %v5363_v49  ;;  %vm1453_vm13 = vcmp.gt.f32.partialorder %v6654_v58, 32.0  ;;  %v8948_v58 = vld [vmem:[#allocation75_spill] sm:$0xff] }
 0x292   : >> { %vm1484_vm7 = vmor %vm8905_vm14, %vm6757_vm3  ;;  %v1609_v51 = vmul.f32 %v6377_v19, %v1496_v4  ;;  %v1626_v37 = vsub.f32 %v1610_v9, %v8908_v29  ;;  %v8912_v19 = vld [vmem:[#allocation37_spill] sm:$0xff]  ;;  %v8938_v9 = vld [vmem:[#allocation94_spill] sm:$0xff] }
 0x293   : >> { %vm6771_vm5 = vmand %vm6716_vm6, %vm1450_vm12  ;;  %v1500_v49 = vsel %vm1484_vm7, 0.0, %v5473_v39  ;;  %vm8915_vm12 = vnez %v8829_v50 }
 0x294   : >> { %vm1482_vm9 = vmor %vm8909_vm11, %vm6771_vm5  ;;  %v1625_v30 = vsub.f32 %v1609_v51, %v8912_v19  ;;  %v1642_v2 = vmul.f32 %v1626_v37, %v1626_v37  ;;  %v1613_v35 = vmul.f32 %v6415_v11, %v1500_v49  ;;  %vm1458_vm5 = vcmp.gt.f32.partialorder %v6681_v18, 32.0  ;;  %v8941_v51 = vld [vmem:[#allocation84_spill] sm:$0xff]  ;;  %v8943_v37 = vld [vmem:[#allocation82_spill] sm:$0xff] }
 0x295   : >> { %vm6786_vm2 = vmand %vm6716_vm6, %vm1455_vm1  ;;  %v1498_v39 = vsel %vm1482_vm9, 0.0, %v5557_v22  ;;  %vm8918_vm1 = vnez %v8796_v36  ;;  %v8919_v22 = vld [vmem:[#allocation44_spill] sm:$0xff]  ;;  %vm8920_vm11 = vnez %v8806_v38  ;;  %v8923_v36 = vld [vmem:[#allocation27_spill] sm:$0xff] }
 0x296   : >> { %vm6794_vm3 = vmand %vm6716_vm6, %vm1447_vm4  ;;  %v1641_v55 = vmul.f32 %v1625_v30, %v1625_v30  ;;  %v1611_v41 = vmul.f32 %v6413_v16, %v1498_v39  ;;  %v1629_v50 = vsub.f32 %v1613_v35, %v8919_v22  ;;  %v8945_v49 = vld [vmem:[#allocation33_spill] sm:$0xff]  ;;  %v8947_v35 = vld [vmem:[#allocation78_spill] sm:$0xff] }
 0x297   : >> { %vm1487_vm14 = vmor %vm8915_vm12, %vm6786_vm2  ;;  %vm8924_vm12 = vnez %v8833_v61  ;;  %v8946_v30 = vld [vmem:[#allocation45_spill] sm:$0xff] }
 0x298   : >> { %vm6806_vm7 = vmand %vm6716_vm6, %vm1453_vm13  ;;  %v1503_v11 = vsel %vm1487_vm14, 0.0, %v5592_v6  ;;  %vm1456_vm13 = vcmp.gt.f32.partialorder %v6668_v12, 32.0  ;;  %v1627_v16 = vsub.f32 %v1611_v41, %v8923_v36  ;;  %v1645_v43 = vmul.f32 %v1629_v50, %v1629_v50  ;;  %v8949_v50 = vld [vmem:[#allocation97_spill] sm:$0xff] }
 0x299   : >> { %vm1479_vm4 = vmor %vm8918_vm1, %vm6794_vm3  ;;  %vm1451_vm3 = vcmp.gt.f32.partialorder %v6660_v26, 32.0  ;;  %v1616_v15 = vmul.f32 %v6451_v56, %v1503_v11  ;;  %vm8930_vm1 = vnez %v8825_v62  ;;  %v8955_v56 = vld [vmem:[#allocation76_spill] sm:$0xff] }
 0x29a   : >> { %vm1485_vm9 = vmor %vm8920_vm11, %vm6806_vm7  ;;  %v1495_v6 = vsel %vm1479_vm4, 0.0, %v5296_v60  ;;  %vm8931_vm11 = vnez %v8808_v34  ;;  %v8961_v34 = vld [vmem:[#allocation96_spill] sm:$0xff] }
 0x29b   : >> { %vm6824_vm2 = vmand %vm6716_vm6, %vm1458_vm5  ;;  %v1501_v38 = vsel %vm1485_vm9, 0.0, %v5650_v54  ;;  %v1643_v54 = vmul.f32 %v1627_v16, %v1627_v16  ;;  %v1608_v61 = vmul.f32 %v6339_v48, %v1495_v6  ;;  %v1632_v60 = vsub.f32 %v1616_v15, %v8929_v21  ;;  %v8932_v48 = vld [vmem:[#allocation29_spill] sm:$0xff]  ;;  %v8954_v6 = vld [vmem:[#allocation51_spill] sm:$0xff] }
 0x29c   : >> { %vm1490_vm14 = vmor %vm8924_vm12, %vm6824_vm2  ;;  %v1614_v26 = vmul.f32 %v6449_v45, %v1501_v38  ;;  %vm1454_vm2 = vcmp.gt.f32.partialorder %v6683_v42, 32.0  ;;  %v8950_v16 = vld [vmem:[#allocation91_spill] sm:$0xff] }
 0x29d   : >> { %vm6840_vm7 = vmand %vm6716_vm6, %vm1456_vm13  ;;  %v1506_v33 = vsel %vm1490_vm14, 0.0, %v5681_v24  ;;  %vm1459_vm13 = vcmp.gt.f32.partialorder %v6685_v53, 32.0  ;;  %v1624_v8 = vsub.f32 %v1608_v61, %v8933_v46  ;;  %v1648_v31 = vmul.f32 %v1632_v60, %v1632_v60  ;;  %v8951_v15 = vld [vmem:[#allocation83_spill] sm:$0xff]  ;;  %v8956_v60 = vld [vmem:[#allocation93_spill] sm:$0xff] }
 0x29e   : >> { %vm6846_vm5 = vmand %vm6716_vm6, %vm1451_vm3  ;;  %v1630_v45 = vsub.f32 %v1614_v26, %v8932_v48  ;;  %v1619_v62 = vmul.f32 %v6489_v57, %v1506_v33  ;;  %vm8942_vm14 = vnez %v8941_v51 }
 0x29f   : >> { %vm1488_vm4 = vmor %vm8930_vm1, %vm6840_vm7  ;;  %v1640_v4 = vmul.f32 %v1624_v8, %v1624_v8  ;;  %v2461_v8 = vpop.permute.xlu2 %2460 }
 0x2a0   : >> { %vm1483_vm9 = vmor %vm8931_vm11, %vm6846_vm5  ;;  %v1646_v53 = vmul.f32 %v1630_v45, %v1630_v45  ;;  %vm8944_vm5 = vnez %v8943_v37  ;;  %v8957_v45 = vld [vmem:[#allocation85_spill] sm:$0xff] }
 0x2a1   : >> { %v1499_v24 = vsel %vm1483_vm9, 0.0, %v5505_v0  ;;  %vm6871_vm3 = vmand %vm6716_vm6, %vm1459_vm13  ;;  %v8940_v0 = vld [vmem:[#allocation53_spill] sm:$0xff]  ;;  %vm8952_vm9 = vnez %v8951_v15  ;;  %vm1460_vm13 = vcmp.gt.f32.partialorder %v6711_v25, 32.0  ;;  %v8960_v25 = vld [vmem:[#allocation77_spill] sm:$0xff] }
 0x2a2   : >> { %vm6877_vm12 = vmand %vm6716_vm6, %vm1454_vm2  ;;  %v8979_v15 = vld [vmem:[#allocation101_spill] sm:$0xff] }
 0x2a3   : >> { %vm1491_vm7 = vmor %vm8942_vm14, %vm6871_vm3 }
 0x2a4   : >> { %vm1486_vm1 = vmor %vm8944_vm5, %vm6877_vm12  ;;  %v1507_v39 = vsel %vm1491_vm7, 0.0, %v8947_v35  ;;  %vm8958_vm12 = vnez %v8957_v45  ;;  %vm2484_vm7 = vcmp.gt.f32.partialorder %v2461_v8, 32.0  ;;  %v8985_v45 = vld [vmem:[#allocation14_spill] sm:$0xff] }
 0x2a5   : >> { %v1620_v11 = vmul.f32 %v8949_v50, %v1507_v39  ;;  %vm1476_vm3 = vmand %vm6716_vm6, %vm1460_vm13 }
 0x2a6   : >> { %vm1492_vm14 = vmor %vm8958_vm12, %vm1476_vm3 }
 0x2a7   : >> { %vm6917_vm5 = vmand %vm8791_vm0, %vm2484_vm7 }
 0x2ad   : >> { %1654 = vadd.xlane.f32.xlu1 %v1638_v13  ;;  %v1504_v13 = vsel %vm1488_vm4, 0.0, %v5757_v47  ;;  %v8939_v47 = vld [vmem:[#allocation89_spill] sm:$0xff]  ;;  %vm1457_vm4 = vcmp.gt.f32.partialorder %v6693_v14, 32.0  ;;  %v8953_v14 = vld [vmem:[#allocation41_spill] sm:$0xff] }
 0x2ae   : >> { %1656 = vadd.xlane.f32.xlu2 %v1639_v27  ;;  %v1617_v57 = vmul.f32 %v8938_v9, %v1504_v13  ;;  %v1612_v20 = vmul.f32 %v8939_v47, %v1499_v24  ;;  %v1635_v27 = vsub.f32 %v1619_v62, %v8940_v0  ;;  %vm1473_vm11 = vmand %vm6716_vm6, %vm1457_vm4  ;;  %v1636_v38 = vsub.f32 %v1620_v11, %v8953_v14  ;;  %v8964_v9 = vld [vmem:[#allocation57_spill] sm:$0xff]  ;;  %v2459_v47 = vpop.permute.xlu0 %2458 }
 0x2af   : >> { %vm1489_vm2 = vmor %vm8952_vm9, %vm1473_vm11  ;;  %v1508_v13 = vsel %vm1492_vm14, 0.0, %v8960_v25  ;;  %vm2483_vm4 = vcmp.gt.f32.partialorder %v2459_v47, 32.0  ;;  %v8986_v25 = vmov 0 }
 0x2b0   : >> { %v1633_v23 = vsub.f32 %v1617_v57, %v8945_v49  ;;  %v1628_v3 = vsub.f32 %v1612_v20, %v8946_v30  ;;  %v1652_v26 = vmul.f32 %v1636_v38, %v1636_v38  ;;  %v1621_v42 = vmul.f32 %v8961_v34, %v1508_v13  ;;  %v8965_v20 = vld [vmem:[#allocation88_spill] sm:$0xff]  ;;  %vm6935_vm9 = vmand %vm8791_vm0, %vm2483_vm4  ;;  %v8988_v13 = vld [vmem:[#allocation90_spill] sm:$0xff] }
 0x2b1   : >> { %v8980_v38 = vand.u32 2147483647, %v8979_v15 }
 0x2b2   : >> { %v1649_v41 = vmul.f32 %v1633_v23, %v1633_v23  ;;  %v1644_v18 = vmul.f32 %v1628_v3, %v1628_v3  ;;  %v1637_v57 = vsub.f32 %v1621_v42, %v8964_v9  ;;  %v8967_v23 = vmov 0  ;;  %v8990_v42 = vld [vmem:[#allocation99_spill] sm:$0xff] }
 0x2b4   : >> { %v1653_v37 = vmul.f32 %v1637_v57, %v1637_v57  ;;  %v8991_v57 = vand.u32 2147483647, %v8990_v42 }
 0x2b5   : >> { %1662 = vadd.xlane.f32.xlu1 %v1642_v2  ;;  %v1651_v2 = vmul.f32 %v1635_v27, %v1635_v27  ;;  %v8966_v27 = vand.u32 2147483647, %v8965_v20 }
 0x2b6   : >> { %1660 = vadd.xlane.f32.xlu2 %v1641_v55  ;;  %v1502_v55 = vsel %vm1486_vm1, 0.0, %v8948_v58 }
 0x2b7   : >> { %v2516_v51 = vsel %vm6917_vm5, 0.0, %v8966_v27  ;;  %v8994_v27 = vld [vmem:[#allocation9_spill] sm:$0xff] }
 0x2b8   : >> { %1658 = vadd.xlane.f32.xlu0 %v1640_v4  ;;  %v2467_v4 = vpop.permute.xlu2 %2466 }
 0x2b9   : >> { %vm2487_vm1 = vcmp.gt.f32.partialorder %v2467_v4, 32.0 }
 0x2ba   : >> { %vm6929_vm11 = vmand %vm8791_vm0, %vm2487_vm1 }
 0x2bb   : >> { %v8968_v23 = vsel %vm6929_vm11, 4294967295, %v8967_v23 }
 0x2bd   : >> { %1668 = vadd.xlane.f32.xlu1 %v1645_v43  ;;  %v1615_v43 = vmul.f32 %v8950_v16, %v1502_v55  ;;  %v2465_v55 = vpop.permute.xlu0 %2464  ;;  %v8975_v16 = vmov 0 }
 0x2be   : >> { %1664 = vadd.xlane.f32.xlu2 %v1643_v54  ;;  %v1505_v54 = vsel %vm1489_vm2, 0.0, %v8955_v56  ;;  %vm2486_vm13 = vcmp.gt.f32.partialorder %v2465_v55, 32.0  ;;  %v2620_v56 = vstv %s1721_s7 }
 0x2bf   : >> { %v1631_v12 = vsub.f32 %v1615_v43, %v8954_v6  ;;  %v1618_v33 = vmul.f32 %v8956_v60, %v1505_v54  ;;  %vm6958_vm12 = vmand %vm8791_vm0, %vm2486_vm13  ;;  %v8981_v54 = vld [vmem:[#allocation92_spill] sm:$0xff]  ;;  %v2622_v8 = vmul.f32 %v2620_v56, %v8985_v45  ;;  %v9051_v43 = vld [vmem:[#allocation81_spill] sm:$0xff] }
 0x2c0   : >> { %1666 = vadd.xlane.f32.xlu0 %v1644_v18  ;;  %v2473_v58 = vpop.permute.xlu2 %2472  ;;  %v2463_v18 = vpop.permute.xlu1 %2462  ;;  %v9003_v45 = vld [vmem:[#allocation10_spill] sm:$0xff] }
 0x2c1   : >> { %v1647_v61 = vmul.f32 %v1631_v12, %v1631_v12  ;;  %vm2490_vm2 = vcmp.gt.f32.partialorder %v2473_v58, 32.0  ;;  %vm2485_vm14 = vcmp.gt.f32.partialorder %v2463_v18, 32.0  ;;  %v8997_v58 = vld [vmem:[#allocation11_spill] sm:$0xff]  ;;  %v9000_v18 = vld [vmem:[#allocation16_spill] sm:$0xff] }
 0x2c2   : >> { %vm6952_vm3 = vmand %vm8791_vm0, %vm2490_vm2  ;;  %v2621_v55 = vmul.f32 %v2620_v56, %v8997_v58 }
 0x2c3   : >> { %v8976_v16 = vsel %vm6952_vm3, 4294967295, %v8975_v16  ;;  %v2522_v12 = vsel %vm6952_vm3, 0.0, %v8980_v38  ;;  %vm6974_vm7 = vmand %vm8791_vm0, %vm2485_vm14  ;;  %v2628_v38 = vmul.f32 %v2620_v56, %v9000_v18 }
 0x2c5   : >> { %1674 = vadd.xlane.f32.xlu1 %v1648_v31  ;;  %v8959_v31 = vld [vmem:[#allocation55_spill] sm:$0xff] }
 0x2c6   : >> { %1670 = vadd.xlane.f32.xlu2 %v1646_v53  ;;  %v1634_v62 = vsub.f32 %v1618_v33, %v8959_v31  ;;  %v8962_v53 = vmov 0 }
 0x2c7   : >> { %v8963_v53 = vsel %vm6917_vm5, 4294967295, %v8962_v53 }
 0x2c8   : >> { %1672 = vadd.xlane.f32.xlu0 %v1647_v61  ;;  %v1650_v24 = vmul.f32 %v1634_v62, %v1634_v62  ;;  %v2469_v62 = vpop.permute.xlu1 %2468 }
 0x2c9   : >> { %vm2488_vm2 = vcmp.gt.f32.partialorder %v2469_v62, 32.0  ;;  %v9004_v62 = vld [vmem:[#allocation19_spill] sm:$0xff] }
 0x2ca   : >> { %vm6997_vm13 = vmand %vm8791_vm0, %vm2488_vm2 }
 0x2cc   : >> { %v2471_v60 = vpop.permute.xlu0 %2470 }
 0x2cd   : >> { %1680 = vadd.xlane.f32.xlu1 %v1651_v2  ;;  %v8971_v2 = vld [vmem:[#allocation95_spill] sm:$0xff]  ;;  %vm2489_vm1 = vcmp.gt.f32.partialorder %v2471_v60, 32.0 }
 0x2ce   : >> { %1676 = vadd.xlane.f32.xlu2 %v1649_v41  ;;  %v8972_v35 = vand.u32 2147483647, %v8971_v2  ;;  %v8973_v41 = vld [vmem:[#allocation87_spill] sm:$0xff]  ;;  %vm6981_vm4 = vmand %vm8791_vm0, %vm2489_vm1 }
 0x2cf   : >> { %v8974_v50 = vand.u32 2147483647, %v8973_v41  ;;  %v8987_v25 = vsel %vm6981_vm4, 4294967295, %v8986_v25  ;;  %v2521_v4 = vsel %vm6981_vm4, 0.0, %v8991_v57  ;;  %v9005_v57 = vld [vmem:[#allocation17_spill] sm:$0xff] }
 0x2d0   : >> { %1678 = vadd.xlane.f32.xlu0 %v1650_v24  ;;  %v2519_v39 = vsel %vm6929_vm11, 0.0, %v8972_v35  ;;  %v8989_v24 = vand.u32 2147483647, %v8988_v13 }
 0x2d1   : >> { %v2515_v11 = vsel %vm6935_vm9, 0.0, %v8974_v50 }
 0x2d2   : >> { %v2517_v34 = vsel %vm6974_vm7, 0.0, %v8989_v24  ;;  %v2631_v24 = vmul.f32 %v2620_v56, %v9004_v62 }
 0x2d6   : >> { %1682 = vadd.xlane.f32.xlu2 %v1652_v26  ;;  %v8982_v26 = vand.u32 2147483647, %v8981_v54 }
 0x2d8   : >> { %1684 = vadd.xlane.f32.xlu0 %v1653_v37  ;;  %v2518_v61 = vsel %vm6958_vm12, 0.0, %v8982_v26  ;;  %v8995_v37 = vld [vmem:[#allocation98_spill] sm:$0xff] }
 0x2d9   : >> { %v8996_v35 = vand.u32 2147483647, %v8995_v37 }
 0x2e2   : >> { %v2475_v50 = vpop.permute.xlu1 %2474 }
 0x2e3   : >> { %vm2491_vm14 = vcmp.gt.f32.partialorder %v2475_v50, 32.0  ;;  %v9008_v50 = vld [vmem:[#allocation20_spill] sm:$0xff] }
 0x2e4   : >> { %vm7010_vm1 = vmand %vm8791_vm0, %vm2491_vm14  ;;  %v2630_v18 = vmul.f32 %v2620_v56, %v9008_v50 }
 0x2e6   : >> { %2540 = vrot.lane.b32.xlu1 %v2516_v51, %s4579_s29  ;;  %v2625_v51 = vmul.f32 %v2620_v56, %v8994_v27 }
 0x2ea   : >> { %v7024_v27 = vpop.permute.xlu1 %2528 }
 0x2ec   : >> { %2542 = vrot.lane.b32.xlu0 %v2517_v34, %s4579_s29  ;;  %v2527_v34 = vpop.permute.xlu2 %2526 }
 0x2ed   : >> { %vm2557_vm0 = vcmp.gt.f32.partialorder %v2527_v34, 32.0 }
 0x2ee   : >> { %2546 = vrot.lane.b32.xlu1 %v2519_v39, %s4579_s29  ;;  %2538 = vrot.lane.b32.xlu2 %v2515_v11, %s4579_s29  ;;  %v2520_v39 = vsel %vm6997_vm13, 0.0, %v8996_v35  ;;  %v8998_v11 = vmov 0  ;;  %vm2573_vm11 = vmand %vm6716_vm6, %vm2557_vm0 }
 0x2ef   : >> { %v8999_v11 = vsel %vm7010_vm1, 4294967295, %v8998_v11 }
 0x2f4   : >> { %2548 = vrot.lane.b32.xlu0 %v2520_v39, %s4579_s29  ;;  %v9007_v39 = vld [vmem:[#allocation22_spill] sm:$0xff] }
 0x2f5   : >> { %v2634_v58 = vmul.f32 %v2620_v56, %v9007_v39 }
 0x2f6   : >> { %2552 = vrot.lane.b32.xlu1 %v2522_v12, %s4579_s29  ;;  %2544 = vrot.lane.b32.xlu2 %v2518_v61, %s4579_s29  ;;  %v9001_v12 = vand.u32 2147483647, %v6657_v44  ;;  %v9002_v61 = vld [vmem:[#allocation13_spill] sm:$0xff] }
 0x2f7   : >> { %v2624_v60 = vmul.f32 %v2620_v56, %v9002_v61 }
 0x2f8   : >> { %v2523_v26 = vsel %vm7010_vm1, 0.0, %v9001_v12  ;;  %v9009_v12 = vld [vmem:[#allocation15_spill] sm:$0xff]  ;;  %vm2589_vm1 = vmor %vm6640_vm10, %vm2573_vm11 }
 0x2fc   : >> { %2554 = vrot.lane.b32.xlu0 %v2523_v26, %s4579_s29  ;;  %v2629_v26 = vmul.f32 %v2620_v56, %v9009_v12 }
 0x2fe   : >> { %2644 = vperm.xlu1 %4343, %v2622_v8   ;;  %2550 = vrot.lane.b32.xlu2 %v2521_v4, %s4579_s29  ;;  %v2623_v8 = vmul.f32 %v2620_v56, %v9003_v45  ;;  %v2627_v4 = vmul.f32 %v2620_v56, %v9005_v57  ;;  %s4391_s29 = scalar_lea.hbm (%p7388_p11), %s8452_s4, 256 }
 0x2ff   : > { %p4393_p2 = scmp.lt.s32.totalorder (%p7388_p11), %s4391_s29, %s4387_s1 }
 0x301   : > { %p4394_p3 = por (%p7388_p11), %p4393_p2, %p4392_p1 }
 0x303   : > { %p4395_p4 = pnand (%p7388_p11), %p4394_p3, %p4390_p0 }
 0x304   : >> { %2649 = vperm.xlu0 %4342, %v2623_v8   ;;  %v2525_v8 = vpop.permute.xlu0 %2524 }
 0x305   : >> { %vm2556_vm2 = vcmp.gt.f32.partialorder %v2525_v8, 32.0 }
 0x306   : >> { %2659 = vperm.xlu1 %4343, %v2625_v51   ;;  %2639 = vperm.xlu2 %4341, %v2621_v55   ;;  %v9006_v51 = vld [vmem:[#allocation12_spill] sm:$0xff]  ;;  %v2533_v55 = vpop.permute.xlu2 %2532  ;;  %vm2572_vm14 = vmand %vm6716_vm6, %vm2556_vm2 }
 0x307   : >> { %v2626_v35 = vmul.f32 %v2620_v56, %v9006_v51  ;;  %v9013_v51 = vld [vmem:[#allocation24_spill] sm:$0xff]  ;;  %vm2588_vm3 = vmor %vm6601_vm8, %vm2572_vm14  ;;  %vm2560_vm4 = vcmp.gt.f32.partialorder %v2533_v55, 32.0 }
 0x308   : >> { %vm7095_vm8 = vmand %vm6716_vm6, %vm2560_vm4  ;;  %vm9036_vm4 = vnez %v8897_v32 }
 0x30c   : >> { %2664 = vperm.xlu0 %4342, %v2626_v35   ;;  %v2636_v35 = vmul.f32 %v2620_v56, %v9013_v51  ;;  %v2531_v39 = vpop.permute.xlu0 %2530 }
 0x30d   : >> { %vm2559_vm5 = vcmp.gt.f32.partialorder %v2531_v39, 32.0 }
 0x30e   : >> { %2674 = vperm.xlu1 %4343, %v2628_v38   ;;  %2654 = vperm.xlu2 %4341, %v2624_v60   ;;  %v7029_v38 = vpop.permute.xlu1 %2534  ;;  %v9010_v60 = vld [vmem:[#allocation23_spill] sm:$0xff]  ;;  %vm2575_vm2 = vmand %vm6716_vm6, %vm2559_vm5  ;;  %vm9033_vm5 = vnez %v8891_v59 }
 0x30f   : >> { %v2633_v45 = vmul.f32 %v2620_v56, %v9010_v60  ;;  %vm2591_vm0 = vmor %vm6634_vm15, %vm2575_vm2 }
 0x310   : >> { %vm2592_vm11 = vmor %vm9033_vm5, %vm7095_vm8 }
 0x314   : >> { %2679 = vperm.xlu0 %4342, %v2629_v26   ;;  %v2537_v26 = vpop.permute.xlu0 %2536 }
 0x315   : >> { %vm2562_vm10 = vcmp.gt.f32.partialorder %v2537_v26, 32.0 }
 0x316   : >> { %2689 = vperm.xlu1 %4343, %v2631_v24   ;;  %2669 = vperm.xlu2 %4341, %v2627_v4   ;;  %v9011_v24 = vld [vmem:[#allocation18_spill] sm:$0xff]  ;;  %vm7107_vm15 = vmand %vm6716_vm6, %vm2562_vm10 }
 0x317   : >> { %v2632_v57 = vmul.f32 %v2620_v56, %v9011_v24 }
 0x31c   : >> { %2694 = vperm.xlu0 %4342, %v2632_v57  }
 0x31e   : >> { %2704 = vperm.xlu1 %4343, %v2634_v58   ;;  %2684 = vperm.xlu2 %4341, %v2630_v18   ;;  %v9014_v58 = vld [vmem:[#allocation21_spill] sm:$0xff] }
 0x31f   : >> { %v2635_v50 = vmul.f32 %v2620_v56, %v9014_v58 }
 0x320   : >> { %v7035_v62 = vpop.xlane.xlu1 %1654 }
 0x321   : >> { %v7032_v61 = vpop.xlane.xlu2 %1656 }
 0x324   : >> { %2709 = vperm.xlu0 %4342, %v2635_v50  }
 0x326   : >> { %2699 = vperm.xlu2 %4341, %v2633_v45  }
 0x328   : >> { %v7042_v18 = vpop.xlane.xlu1 %1662 }
 0x329   : >> { %v7038_v4 = vpop.xlane.xlu2 %1660  ;;  %9015 = vst [vmem:[#allocation89_spill] sm:$0xff] %v7042_v18  ;;  %v2605_v18 = vsel %vm2589_vm1, 0.0, %v6007_v10  ;;  %vm2594_vm1 = vmor %vm9036_vm4, %vm7107_vm15 }
 0x32a   : >> { %9012 = vst [vmem:[#allocation94_spill] sm:$0xff] %v7038_v4 }
 0x32b   : >> { %v7050_v24 = vpop.xlane.xlu0 %1658 }
 0x32c   : >> { %9019 = vst [vmem:[#allocation75_spill] sm:$0xff] %v7050_v24 }
 0x32e   : >> { %2714 = vperm.xlu2 %4341, %v2636_v35  }
 0x330   : >> { %v7048_v45 = vpop.xlane.xlu1 %1668 }
 0x331   : >> { %v7044_v12 = vpop.xlane.xlu2 %1664  ;;  %9018 = vst [vmem:[#allocation78_spill] sm:$0xff] %v7048_v45 }
 0x332   : >> { %9016 = vst [vmem:[#allocation84_spill] sm:$0xff] %v7044_v12 }
 0x333   : >> { %v7056_v57 = vpop.xlane.xlu0 %1666 }
 0x334   : >> { %9022 = vst [vmem:[#allocation83_spill] sm:$0xff] %v7056_v57 }
 0x338   : >> { %v7054_v51 = vpop.xlane.xlu1 %1674 }
 0x339   : >> { %v7046_v60 = vpop.xlane.xlu2 %1670  ;;  %9021 = vst [vmem:[#allocation91_spill] sm:$0xff] %v7054_v51 }
 0x33a   : >> { %9017 = vst [vmem:[#allocation82_spill] sm:$0xff] %v7046_v60 }
 0x33b   : >> { %v7062_v58 = vpop.xlane.xlu0 %1672 }
 0x33c   : >> { %9025 = vst [vmem:[#allocation85_spill] sm:$0xff] %v7062_v58 }
 0x340   : >> { %v7060_v56 = vpop.xlane.xlu1 %1680 }
 0x341   : >> { %v7052_v52 = vpop.xlane.xlu2 %1676  ;;  %9024 = vst [vmem:[#allocation93_spill] sm:$0xff] %v7060_v56 }
 0x342   : >> { %9020 = vst [vmem:[#allocation97_spill] sm:$0xff] %v7052_v52 }
 0x343   : >> { %v7068_v45 = vpop.xlane.xlu0 %1678 }
 0x344   : >> { %9026 = vst [vmem:[#allocation77_spill] sm:$0xff] %v7068_v45  ;;  %v9029_v45 = vld [vmem:[#allocation79_spill] sm:$0xff] }
 0x345   : >> { %v2604_v58 = vsel %vm2588_vm3, 0.0, %v9029_v45 }
 0x349   : >> { %v7058_v35 = vpop.xlane.xlu2 %1682 }
 0x34a   : >> { %9023 = vst [vmem:[#allocation76_spill] sm:$0xff] %v7058_v35 }
 0x34b   : >> { %v7076_v35 = vpop.xlane.xlu0 %1684 }
 0x34c   : >> { %9027 = vst [vmem:[#allocation96_spill] sm:$0xff] %v7076_v35 }
 0x351   : >> { %v2539_v50 = vpop.permute.xlu2 %2538 }
 0x352   : >> { %vm2563_vm3 = vcmp.gt.f32.partialorder %v2539_v50, 32.0 }
 0x353   : >> { %vm7119_vm14 = vmand %vm6716_vm6, %vm2563_vm3 }
 0x354   : >> { %vm2595_vm8 = vmor %vm6935_vm9, %vm7119_vm14 }
 0x355   : >> { %v2611_v40 = vsel %vm2595_vm8, 0.0, %v8973_v41  ;;  %v9045_v41 = vld [vmem:[#allocation102_spill] sm:$0xff] }
 0x356   : >> { %vm9046_vm4 = vnez %v9045_v41 }
 0x358   : >> { %v7064_v12 = vpop.permute.xlu1 %2540 }
 0x359   : >> { %v7066_v60 = vpop.permute.xlu2 %2544 }
 0x35a   : >> { %vm2566_vm5 = vcmp.gt.f32.partialorder %v7066_v60, 32.0 }
 0x35b   : >> { %vm7151_vm15 = vmand %vm6716_vm6, %vm2566_vm5 }
 0x35c   : >> { %vm2598_vm14 = vmor %vm6958_vm12, %vm7151_vm15 }
 0x35e   : >> { %v2543_v35 = vpop.permute.xlu0 %2542 }
 0x35f   : >> { %vm2565_vm2 = vcmp.gt.f32.partialorder %v2543_v35, 32.0 }
 0x360   : >> { %v7070_v24 = vpop.permute.xlu1 %2546  ;;  %vm7132_vm10 = vmand %vm6716_vm6, %vm2565_vm2 }
 0x361   : >> { %v7072_v52 = vpop.permute.xlu2 %2550  ;;  %vm2597_vm9 = vmor %vm6974_vm7, %vm7132_vm10  ;;  %vm2561_vm7 = vcmp.gt.f32.partialorder %v7029_v38, 32.0 }
 0x362   : >> { %vm7176_vm8 = vmand %vm6716_vm6, %vm2561_vm7 }
 0x368   : >> { %v7078_v56 = vpop.permute.xlu1 %2552 }
 0x369   : >> { %v2640_v8 = vpop.permute.xlu2 %2639 }
 0x36a   : >> { %v2717_v57 = vmul.f32 %v2640_v8, %v2604_v58  ;;  %v2608_v58 = vsel %vm2592_vm11, 0.0, %v6168_v1 }
 0x36c   : >> { %v2733_v34 = vsub.f32 %v2717_v57, %v8900_v63  ;;  %v9032_v63 = vld [vmem:[#allocation80_spill] sm:$0xff] }
 0x36d   : >> { %v2607_v45 = vsel %vm2591_vm0, 0.0, %v9032_v63  ;;  %vm2558_vm0 = vcmp.gt.f32.partialorder %v7024_v27, 32.0  ;;  %v2613_v63 = vsel %vm2597_vm9, 0.0, %v8988_v13 }
 0x36e   : >> { %v2749_v4 = vmul.f32 %v2733_v34, %v2733_v34  ;;  %v2610_v34 = vsel %vm2594_vm1, 0.0, %v6238_v17  ;;  %vm7140_vm11 = vmand %vm6716_vm6, %vm2558_vm0  ;;  %vm2569_vm0 = vcmp.gt.f32.partialorder %v7072_v52, 32.0  ;;  %v9074_v52 = vld [vmem:[#allocation73_spill] sm:$0xff] }
 0x36f   : >> { %vm2590_vm1 = vmor %vm9046_vm4, %vm7140_vm11  ;;  %vm2564_vm4 = vcmp.gt.f32.partialorder %v7064_v12, 32.0  ;;  %v9083_v12 = vld [vmem:[#allocation78_spill] sm:$0xff] }
 0x370   : >> { %v2645_v51 = vpop.permute.xlu1 %2644  ;;  %2765 = vadd.xlane.f32.xlu1 %v2749_v4  ;;  %vm7188_vm10 = vmand %vm6716_vm6, %vm2569_vm0 }
 0x371   : >> { %v2718_v39 = vmul.f32 %v2645_v51, %v2605_v18  ;;  %v2655_v57 = vpop.permute.xlu2 %2654 }
 0x372   : >> { %v2720_v10 = vmul.f32 %v2655_v57, %v2607_v45 }
 0x373   : >> { %v2734_v55 = vsub.f32 %v2718_v39, %v8904_v28  ;;  %v2549_v28 = vpop.permute.xlu0 %2548 }
 0x374   : >> { %v2736_v4 = vsub.f32 %v2720_v10, %v8912_v19  ;;  %vm2568_vm3 = vcmp.gt.f32.partialorder %v2549_v28, 32.0  ;;  %v2606_v10 = vsel %vm2590_vm1, 0.0, %v9051_v43  ;;  %v2614_v28 = vsel %vm2598_vm14, 0.0, %v8981_v54  ;;  %v9054_v54 = vld [vmem:[#allocation103_spill] sm:$0xff]  ;;  %vm7219_vm14 = vmand %vm6716_vm6, %vm2564_vm4  ;;  %v9069_v43 = vld [vmem:[#allocation74_spill] sm:$0xff] }
 0x375   : >> { %v2750_v18 = vmul.f32 %v2734_v55, %v2734_v55  ;;  %vm7168_vm2 = vmand %vm6716_vm6, %vm2568_vm3  ;;  %vm9055_vm11 = vnez %v9054_v54  ;;  %vm9060_vm1 = vnez %v8999_v11 }
 0x376   : >> { %v2752_v8 = vmul.f32 %v2736_v4, %v2736_v4  ;;  %vm2600_vm12 = vmor %vm6997_vm13, %vm7168_vm2  ;;  %vm9056_vm13 = vnez %v8987_v25  ;;  %vm9063_vm2 = vnez %v8963_v53 }
 0x377   : >> { %2767 = vadd.xlane.f32.xlu0 %v2750_v18  ;;  %vm2593_vm9 = vmor %vm9055_vm11, %vm7176_vm8  ;;  %v2616_v47 = vsel %vm2600_vm12, 0.0, %v8995_v37  ;;  %vm2567_vm8 = vcmp.gt.f32.partialorder %v7070_v24, 32.0  ;;  %vm2570_vm11 = vcmp.gt.f32.partialorder %v7078_v56, 32.0 }
 0x378   : >> { %v2660_v26 = vpop.permute.xlu1 %2659  ;;  %2771 = vadd.xlane.f32.xlu1 %v2752_v8  ;;  %vm2601_vm15 = vmor %vm9056_vm13, %vm7188_vm10  ;;  %vm9064_vm10 = vnez %v8968_v23  ;;  %vm9065_vm13 = vnez %v8976_v16 }
 0x379   : >> { %v2721_v50 = vmul.f32 %v2660_v26, %v2608_v58  ;;  %v2670_v1 = vpop.permute.xlu2 %2669  ;;  %vm2596_vm0 = vmor %vm9063_vm2, %vm7219_vm14 }
 0x37a   : >> { %v2723_v32 = vmul.f32 %v2670_v1, %v2610_v34  ;;  %v9059_v1 = vld [vmem:[#allocation86_spill] sm:$0xff]  ;;  %vm2583_vm12 = vmand %vm6716_vm6, %vm2567_vm8 }
 0x37b   : >> { %v2737_v19 = vsub.f32 %v2721_v50, %v8908_v29  ;;  %v2555_v3 = vpop.permute.xlu0 %2554 }
 0x37c   : >> { %v2739_v17 = vsub.f32 %v2723_v32, %v8946_v30  ;;  %vm2571_vm5 = vcmp.gt.f32.partialorder %v2555_v3, 32.0  ;;  %v2609_v32 = vsel %vm2593_vm9, 0.0, %v9059_v1  ;;  %vm2586_vm9 = vmand %vm6716_vm6, %vm2570_vm11 }
 0x37d   : >> { %v2753_v35 = vmul.f32 %v2737_v19, %v2737_v19  ;;  %vm7205_vm3 = vmand %vm6716_vm6, %vm2571_vm5 }
 0x37e   : >> { %v2755_v39 = vmul.f32 %v2739_v17, %v2739_v17  ;;  %vm2603_vm7 = vmor %vm9060_vm1, %vm7205_vm3 }
 0x37f   : >> { %2773 = vadd.xlane.f32.xlu0 %v2753_v35  ;;  %v2617_v35 = vsel %vm2601_vm15, 0.0, %v8990_v42  ;;  %v2619_v42 = vsel %vm2603_vm7, 0.0, %v6657_v44  ;;  %vm2599_vm5 = vmor %vm9064_vm10, %vm2583_vm12 }
 0x380   : >> { %v2675_v27 = vpop.permute.xlu1 %2674  ;;  %2777 = vadd.xlane.f32.xlu1 %v2755_v39  ;;  %vm2602_vm15 = vmor %vm9065_vm13, %vm2586_vm9 }
 0x381   : >> { %v2724_v60 = vmul.f32 %v2675_v27, %v2611_v40  ;;  %v2685_v33 = vpop.permute.xlu2 %2684  ;;  %v2618_v56 = vsel %vm2602_vm15, 0.0, %v8979_v15 }
 0x382   : >> { %v2726_v45 = vmul.f32 %v2685_v33, %v2613_v63 }
 0x383   : >> { %v2740_v55 = vsub.f32 %v2724_v60, %v8919_v22  ;;  %v2650_v5 = vpop.permute.xlu0 %2649  ;;  %v2612_v60 = vsel %vm2596_vm0, 0.0, %v8965_v20  ;;  %v2615_v20 = vsel %vm2599_vm5, 0.0, %v8971_v2  ;;  %v1702_v2 = vstv %s5213_s19  ;;  %s3970_s19 = sshll.u32 (%p7388_p11), %s5125_s17, 4  ;;  %s3971_s19 = int_to_ptr.vmem [resolvable:$true] %s3970_s19 }
 0x384   : >> { %v2742_v13 = vsub.f32 %v2726_v45, %v8954_v6  ;;  %v2719_v18 = vmul.f32 %v2650_v5, %v2606_v10  ;;  %v1686_v22 = vmul.f32 0.0078125, %v7035_v62  ;;  %v1687_v10 = vmul.f32 0.0078125, %v7032_v61 }
 0x385   : >> { %v2756_v57 = vmul.f32 %v2740_v55, %v2740_v55 }
 0x386   : >> { %v2758_v26 = vmul.f32 %v2742_v13, %v2742_v13  ;;  %v2735_v58 = vsub.f32 %v2719_v18, %v8933_v46  ;;  %v9079_v46 = vld [vmem:[#allocation83_spill] sm:$0xff]  ;;  %v9144_v13 = vmov (%p7388_p11), 0  }
 0x387   : >> { %2779 = vadd.xlane.f32.xlu0 %v2756_v57  ;;  %v9066_v57 = vld [vmem:[#allocation43_spill] sm:$0xff]  ;;  %4346 = vset.pattern.permute.xlu1 (%p7388_p11), %v9144_v13 }
 0x388   : >> { %v2690_v4 = vpop.permute.xlu1 %2689  ;;  %2783 = vadd.xlane.f32.xlu1 %v2758_v26  ;;  %v2751_v50 = vmul.f32 %v2735_v58, %v2735_v58  ;;  %vm7250_vm3 = vcmp.eq.s32.totalorder %v9066_v57, %v1702_v2  ;;  %4345 = vset.pattern.permute.xlu0 (%p7388_p11), %v9144_v13 }
 0x389   : >> { %v2727_v6 = vmul.f32 %v2690_v4, %v2614_v28  ;;  %v2700_v59 = vpop.permute.xlu2 %2699  ;;  %v1704_v15 = vsel %vm7250_vm3, %v1686_v22, %v9069_v43  ;;  %v9073_v4 = vld [vmem:[#allocation94_spill] sm:$0xff]  ;;  %4344 = vset.pattern.permute.xlu2 (%p7388_p11), %v9144_v13 }
 0x38a   : >> { %v2729_v19 = vmul.f32 %v2700_v59, %v2616_v47  ;;  %2769 = vadd.xlane.f32.xlu2 %v2751_v50  ;;  %v1689_v28 = vmul.f32 0.0078125, %v9073_v4  ;;  %v9076_v47 = vld [vmem:[#allocation71_spill] sm:$0xff]  ;;  %v9077_v59 = vld [vmem:[#allocation89_spill] sm:$0xff]  ;;  %v9101_v4 = vld [vmem:[#allocation62_spill] sm:$0xff] }
 0x38b   : >> { %v2743_v8 = vsub.f32 %v2727_v6, %v8929_v21  ;;  %v2665_v34 = vpop.permute.xlu0 %2664  ;;  %v1705_v6 = vsel %vm7250_vm3, %v1687_v10, %v9074_v52  ;;  %v9100_v10 = vld [vmem:[#allocation84_spill] sm:$0xff] }
 0x38c   : >> { %v2745_v37 = vsub.f32 %v2729_v19, %v8959_v31  ;;  %v2722_v51 = vmul.f32 %v2665_v34, %v2609_v32  ;;  %v1707_v61 = vsel %vm7250_vm3, %v1689_v28, %v9076_v47  ;;  %v9080_v34 = vld [vmem:[#allocation70_spill] sm:$0xff] }
 0x38d   : >> { %v2759_v21 = vmul.f32 %v2743_v8, %v2743_v8 }
 0x38e   : >> { %v2761_v17 = vmul.f32 %v2745_v37, %v2745_v37  ;;  %v2738_v29 = vsub.f32 %v2722_v51, %v8923_v36 }
 0x38f   : >> { %2785 = vadd.xlane.f32.xlu0 %v2759_v21  ;;  %v1692_v21 = vmul.f32 0.0078125, %v9079_v46  ;;  %v9107_v46 = vld [vmem:[#allocation61_spill] sm:$0xff] }
 0x390   : >> { %v2705_v25 = vpop.permute.xlu1 %2704  ;;  %2789 = vadd.xlane.f32.xlu1 %v2761_v17  ;;  %v2754_v40 = vmul.f32 %v2738_v29, %v2738_v29 }
 0x391   : >> { %v2730_v31 = vmul.f32 %v2705_v25, %v2617_v35  ;;  %v2715_v27 = vpop.permute.xlu2 %2714  ;;  %v9082_v35 = vld [vmem:[#allocation68_spill] sm:$0xff] }
 0x392   : >> { %v2732_v11 = vmul.f32 %v2715_v27, %v2619_v42  ;;  %2775 = vadd.xlane.f32.xlu2 %v2754_v40  ;;  %v1710_v17 = vsel %vm7250_vm3, %v1692_v21, %v9082_v35  ;;  %v9112_v35 = vld [vmem:[#allocation82_spill] sm:$0xff] }
 0x393   : >> { %v2746_v3 = vsub.f32 %v2730_v31, %v8940_v0  ;;  %v2680_v36 = vpop.permute.xlu0 %2679  ;;  %v1693_v31 = vmul.f32 0.0078125, %v9083_v12  ;;  %v9113_v12 = vld [vmem:[#allocation59_spill] sm:$0xff] }
 0x394   : >> { %v2748_v30 = vsub.f32 %v2732_v11, %v8964_v9  ;;  %v2725_v0 = vmul.f32 %v2680_v36, %v2612_v60  ;;  %v9086_v11 = vld [vmem:[#allocation67_spill] sm:$0xff] }
 0x395   : >> { %v2762_v39 = vmul.f32 %v2746_v3, %v2746_v3 }
 0x396   : >> { %v2764_v44 = vmul.f32 %v2748_v30, %v2748_v30  ;;  %v2741_v55 = vsub.f32 %v2725_v0, %v8932_v48  ;;  %v9089_v0 = vld [vmem:[#allocation75_spill] sm:$0xff] }
 0x397   : >> { %2791 = vadd.xlane.f32.xlu0 %v2762_v39  ;;  %v1711_v39 = vsel %vm7250_vm3, %v1693_v31, %v9086_v11  ;;  %v9116_v11 = vld [vmem:[#allocation66_spill] sm:$0xff] }
 0x398   : >> { %2795 = vadd.xlane.f32.xlu1 %v2764_v44  ;;  %v2757_v53 = vmul.f32 %v2741_v55, %v2741_v55  ;;  %v1688_v44 = vmul.f32 0.0078125, %v9089_v0 }
 0x39a   : >> { %2781 = vadd.xlane.f32.xlu2 %v2757_v53  ;;  %v9090_v53 = vld [vmem:[#allocation65_spill] sm:$0xff] }
 0x39b   : >> { %v2695_v9 = vpop.permute.xlu0 %2694 }
 0x39c   : >> { %v2728_v24 = vmul.f32 %v2695_v9, %v2615_v20  ;;  %v9091_v20 = vld [vmem:[#allocation91_spill] sm:$0xff] }
 0x39e   : >> { %v2744_v41 = vsub.f32 %v2728_v24, %v8945_v49  ;;  %v2813_v49 = vstv %s5774_s26  ;;  %v1696_v24 = vmul.f32 0.0078125, %v9091_v20 }
 0x39f   : >> { %vm7259_vm4 = vcmp.eq.s32.totalorder %v9066_v57, %v2813_v49 }
 0x3a0   : >> { %v2760_v48 = vmul.f32 %v2744_v41, %v2744_v41 }
 0x3a2   : >> { %2787 = vadd.xlane.f32.xlu2 %v2760_v48 }
 0x3a3   : >> { %v2710_v23 = vpop.permute.xlu0 %2709 }
 0x3a4   : >> { %v2731_v63 = vmul.f32 %v2710_v23, %v2618_v56 }
 0x3a6   : >> { %v2747_v33 = vsub.f32 %v2731_v63, %v8953_v14  ;;  %v9094_v63 = vld [vmem:[#allocation72_spill] sm:$0xff]  ;;  %v7447_v14 = vstv (%p7388_p11), %s4111_s9 }
 0x3a8   : >> { %v2763_v45 = vmul.f32 %v2747_v33, %v2747_v33  ;;  %v9095_v33 = vld [vmem:[#allocation77_spill] sm:$0xff] }
 0x3aa   : >> { %2793 = vadd.xlane.f32.xlu2 %v2763_v45  ;;  %v1698_v45 = vmul.f32 0.0078125, %v9095_v33 }
 0x3ac   : >> { %v1716_v28 = vsel %vm7250_vm3, %v1698_v45, %v9101_v4  ;;  %v9145_v45 = vld [vmem:[#allocation34_spill] sm:$0xff] (%p7388_p11)  ;;  %v4581_v4 = vmov (%p7388_p11), -384.0  }
 0x3e3   : >> { %v2766_v16 = vpop.xlane.xlu1 %2765 }
 0x3e4   : >> { %v2797_v38 = vmul.f32 0.0078125, %v2766_v16 }
 0x3e6   : >> { %v7266_v18 = vsel %vm7259_vm4, %v2797_v38, %v1704_v15  }
 0x3e7   : >> { %v9072_v62 = vmov %v7266_v18  ;;  %v1690_v18 = vmul.f32 0.0078125, %v9077_v59 }
 0x3e9   : >> { %v1708_v1 = vsel %vm7250_vm3, %v1690_v18, %v9080_v34 }
 0x3ea   : >> { %v2768_v5 = vpop.xlane.xlu0 %2767 }
 0x3eb   : >> { %v2798_v26 = vmul.f32 0.0078125, %v2768_v5  ;;  %v2772_v8 = vpop.xlane.xlu1 %2771  ;;  %v1691_v5 = vmul.f32 0.0078125, %v9100_v10  ;;  %v9147_v10 = vld [vmem:[#allocation39_spill] sm:$0xff] (%p7388_p11) }
 0x3ec   : >> { %v2800_v54 = vmul.f32 0.0078125, %v2772_v8 }
 0x3ed   : >> { %v7274_v42 = vsel %vm7259_vm4, %v2798_v26, %v1705_v6   ;;  %v9102_v26 = vld [vmem:[#allocation93_spill] sm:$0xff] }
 0x3ee   : >> { %v9075_v58 = vmov %v7274_v42  ;;  %v7282_v22 = vsel %vm7259_vm4, %v2800_v54, %v1707_v61   ;;  %v9085_v42 = vld [vmem:[#allocation85_spill] sm:$0xff]  ;;  %v1699_v52 = vmul.f32 0.0078125, %v9102_v26 }
 0x3ef   : >> { %v9078_v50 = vmov %v7282_v22  ;;  %v1695_v27 = vmul.f32 0.0078125, %v9085_v42  ;;  %v9096_v22 = vld [vmem:[#allocation64_spill] sm:$0xff]  ;;  %v9105_v61 = vld [vmem:[#allocation69_spill] sm:$0xff] }
 0x3f0   : >> { %v1714_v57 = vsel %vm7250_vm3, %v1696_v24, %v9096_v22  ;;  %v1717_v21 = vsel %vm7250_vm3, %v1699_v52, %v9107_v46  ;;  %v9140_v22 = vmov %v9078_v50 }
 0x3f1   : >> { %v1713_v9 = vsel %vm7250_vm3, %v1695_v27, %v9090_v53  ;;  %v9120_v53 = vld [vmem:[#allocation63_spill] sm:$0xff] }
 0x3f2   : >> { %v2774_v19 = vpop.xlane.xlu0 %2773 }
 0x3f3   : >> { %v2801_v37 = vmul.f32 0.0078125, %v2774_v19  ;;  %v2778_v51 = vpop.xlane.xlu1 %2777 }
 0x3f4   : >> { %v2803_v25 = vmul.f32 0.0078125, %v2778_v51 }
 0x3f5   : >> { %v7290_v8 = vsel %vm7259_vm4, %v2801_v37, %v1708_v1  }
 0x3f6   : >> { %v9081_v32 = vmov %v7290_v8  ;;  %v7298_v59 = vsel %vm7259_vm4, %v2803_v25, %v1710_v17   ;;  %v1694_v17 = vmul.f32 0.0078125, %v9112_v35 }
 0x3f7   : >> { %v9084_v3 = vmov %v7298_v59  ;;  %v9106_v59 = vld [vmem:[#allocation96_spill] sm:$0xff] }
 0x3f8   : >> { %v1701_v18 = vmul.f32 0.0078125, %v9106_v59  ;;  %v9137_v59 = vmov %v9084_v3 }
 0x3fa   : >> { %v2780_v29 = vpop.xlane.xlu0 %2779  ;;  %v1719_v31 = vsel %vm7250_vm3, %v1701_v18, %v9113_v12  ;;  %v9143_v18 = vmov %v9072_v62 }
 0x3fb   : >> { %v2804_v40 = vmul.f32 0.0078125, %v2780_v29  ;;  %v2784_v36 = vpop.xlane.xlu1 %2783 }
 0x3fc   : >> { %v2806_v60 = vmul.f32 0.0078125, %v2784_v36 }
 0x3fd   : >> { %v7306_v55 = vsel %vm7259_vm4, %v2804_v40, %v1711_v39   ;;  %v2770_v41 = vpop.xlane.xlu2 %2769 }
 0x3fe   : >> { %9087 = vst [vmem:[#allocation104_spill] sm:$0xff] %v7306_v55  ;;  %v9088_v30 = vmov %v7306_v55  ;;  %v7315_v47 = vsel %vm7259_vm4, %v2806_v60, %v1713_v9   ;;  %v2799_v23 = vmul.f32 0.0078125, %v2770_v41  ;;  %v1706_v55 = vsel %vm7250_vm3, %v1688_v44, %v9094_v63  ;;  %v9124_v63 = vld [vmem:[#allocation60_spill] sm:$0xff] }
 0x3ff   : >> { %9092 = vst [vmem:[#allocation105_spill] sm:$0xff] %v7315_v47  ;;  %v9093_v48 = vmov %v7315_v47 }
 0x400   : >> { %v7326_v0 = vsel %vm7259_vm4, %v2799_v23, %v1706_v55  }
 0x401   : >> { %v9097_v16 = vmov %v7326_v0 }
 0x402   : >> { %v2786_v56 = vpop.xlane.xlu0 %2785 }
 0x403   : >> { %v2807_v2 = vmul.f32 0.0078125, %v2786_v56  ;;  %v2790_v49 = vpop.xlane.xlu1 %2789 }
 0x404   : >> { %v2809_v15 = vmul.f32 0.0078125, %v2790_v49 }
 0x405   : >> { %v7330_v43 = vsel %vm7259_vm4, %v2807_v2, %v1714_v57   ;;  %v2776_v8 = vpop.xlane.xlu2 %2775  ;;  %v7451_v2 = vmul.f32 (%p7388_p11), %v7447_v14, %v9145_v45  ;;  %v9146_v57 = vld [vmem:[#allocation35_spill] sm:$0xff] (%p7388_p11) }
 0x406   : >> { %9098 = vst [vmem:[#allocation106_spill] sm:$0xff] %v7330_v43  ;;  %v9099_v38 = vmov %v7330_v43  ;;  %v7339_v39 = vsel %vm7259_vm4, %v2809_v15, %v1716_v28   ;;  %v2802_v54 = vmul.f32 0.0078125, %v2776_v8  ;;  %v1709_v43 = vsel %vm7250_vm3, %v1691_v5, %v9105_v61 }
 0x407   : >> { %9103 = vst [vmem:[#allocation107_spill] sm:$0xff] %v7339_v39  ;;  %v9104_v6 = vmov %v7339_v39  ;;  %v1712_v39 = vsel %vm7250_vm3, %v1694_v17, %v9116_v11  ;;  %v9139_v8 = vmov %v9081_v32  ;;  %v7455_v15 = vmul.f32 (%p7388_p11), %v7447_v14, %v9146_v57 }
 0x408   : >> { %v7350_v61 = vsel %vm7259_vm4, %v2802_v54, %v1709_v43   ;;  %v9133_v43 = vmov %v9099_v38  ;;  %v7459_v5 = vmul.f32 (%p7388_p11), %v7447_v14, %v9147_v10  ;;  %vm2964_vm1 = vcmp.gt.f32.partialorder (%p7388_p11), %v7451_v2, -320.0 }
 0x409   : >> { %9108 = vst [vmem:[#allocation108_spill] sm:$0xff] %v7350_v61  ;;  %v9109_v34 = vmov %v7350_v61  ;;  %vm2996_vm7 = vcmp.gt.f32.partialorder (%p7388_p11), %v7451_v2, -224.0  ;;  %vm3028_vm14 = vcmp.gt.f32.partialorder (%p7388_p11), %v7451_v2, -160.0  ;;  %v2980_v28 = vsel (%p7388_p11), %vm2964_vm1, -256.0, %v4581_v4 }
 0x40a   : >> { %v2792_v47 = vpop.xlane.xlu0 %2791  ;;  %v9138_v61 = vmov %v9109_v34  ;;  %vm3060_vm2 = vcmp.gt.f32.partialorder (%p7388_p11), %v7451_v2, -112.0  ;;  %vm3092_vm0 = vcmp.gt.f32.partialorder (%p7388_p11), %v7451_v2, -80.0  ;;  %vm3124_vm8 = vcmp.gt.f32.partialorder (%p7388_p11), %v7451_v2, -56.0 }
 0x40b   : >> { %v2810_v19 = vmul.f32 0.0078125, %v2792_v47  ;;  %v2796_v51 = vpop.xlane.xlu1 %2795  ;;  %v9134_v47 = vmov %v9093_v48  ;;  %v3012_v52 = vsel (%p7388_p11), %vm2996_vm7, -192.0, %v2980_v28  ;;  %vm3156_vm12 = vcmp.gt.f32.partialorder (%p7388_p11), %v7451_v2, 0.0 }
 0x40c   : >> { %v2812_v25 = vmul.f32 0.0078125, %v2796_v51  ;;  %vm3188_vm10 = vcmp.gt.f32.partialorder (%p7388_p11), %v7451_v2, 56.0  ;;  %v3044_v8 = vsel (%p7388_p11), %vm3028_vm14, -128.0, %v3012_v52  ;;  %vm3220_vm5 = vcmp.gt.f32.partialorder (%p7388_p11), %v7451_v2, 80.0 }
 0x40d   : >> { %v7354_v37 = vsel %vm7259_vm4, %v2810_v19, %v1717_v21   ;;  %v2782_v42 = vpop.xlane.xlu2 %2781  ;;  %vm3252_vm11 = vcmp.gt.f32.partialorder (%p7388_p11), %v7451_v2, 112.0  ;;  %vm3284_vm9 = vcmp.gt.f32.partialorder (%p7388_p11), %v7451_v2, 160.0  ;;  %v3076_v47 = vsel (%p7388_p11), %vm3060_vm2, -96.0, %v3044_v8 }
 0x40e   : >> { %9110 = vst [vmem:[#allocation109_spill] sm:$0xff] %v7354_v37  ;;  %v9111_v1 = vmov %v7354_v37  ;;  %v7362_v29 = vsel %vm7259_vm4, %v2812_v25, %v1719_v31   ;;  %v2805_v40 = vmul.f32 0.0078125, %v2782_v42  ;;  %v9119_v37 = vld [vmem:[#allocation97_spill] sm:$0xff]  ;;  %v9142_v42 = vmov %v9075_v58 }
 0x40f   : >> { %9114 = vst [vmem:[#allocation110_spill] sm:$0xff] %v7362_v29  ;;  %v9115_v27 = vmov %v7362_v29  ;;  %v1697_v60 = vmul.f32 0.0078125, %v9119_v37  ;;  %v9123_v29 = vld [vmem:[#allocation76_spill] sm:$0xff]  ;;  %v9130_v37 = vmov %v9111_v1  ;;  %vm3316_vm13 = vcmp.gt.f32.partialorder (%p7388_p11), %v7451_v2, 224.0 }
 0x410   : >> { %v7369_v49 = vsel %vm7259_vm4, %v2805_v40, %v1712_v39   ;;  %v1700_v24 = vmul.f32 0.0078125, %v9123_v29  ;;  %v9128_v29 = vmov %v9115_v27  ;;  %v9131_v39 = vmov %v9104_v6 }
 0x411   : >> { %9117 = vst [vmem:[#allocation111_spill] sm:$0xff] %v7369_v49  ;;  %v9118_v36 = vmov %v7369_v49  ;;  %v1715_v9 = vsel %vm7250_vm3, %v1697_v60, %v9120_v53  ;;  %vm3348_vm15 = vcmp.gt.f32.partialorder (%p7388_p11), %v7451_v2, 320.0  ;;  %v3108_v61 = vsel (%p7388_p11), %vm3092_vm0, -64.0, %v3076_v47 }
 0x412   : >> { %v1718_v55 = vsel %vm7250_vm3, %v1700_v24, %v9124_v63  ;;  %v9135_v49 = vmov %v9118_v36  ;;  %v2850_v43 = vmul.f32 (%p7388_p11), 0.25, %v7455_v15  ;;  %vm2962_vm3 = vcmp.gt.f32.partialorder (%p7388_p11), %v7455_v15, -320.0 }
 0x413   : > { %v2852_v49 = vmul.f32 (%p7388_p11), 0.25, %v7451_v2  ;;  %v3140_v18 = vsel (%p7388_p11), %vm3124_vm8, -48.0, %v3108_v61  ;;  %v2978_v19 = vsel (%p7388_p11), %vm2962_vm3, -256.0, %v4581_v4  ;;  %vm3026_vm1 = vcmp.gt.f32.partialorder (%p7388_p11), %v7455_v15, -160.0 }
 0x414   : > { %v3172_v46 = vsel (%p7388_p11), %vm3156_vm12, 48.0, %v3140_v18  ;;  %v2866_v21 = vadd.f32 (%p7388_p11), 6.5, %v2850_v43  ;;  %vm3058_vm7 = vcmp.gt.f32.partialorder (%p7388_p11), %v7455_v15, -112.0  ;;  %vm3090_vm14 = vcmp.gt.f32.partialorder (%p7388_p11), %v7455_v15, -80.0 }
 0x415   : >> { %v2788_v0 = vpop.xlane.xlu2 %2787  ;;  %v2868_v26 = vadd.f32 (%p7388_p11), 6.5, %v2852_v49  ;;  %vm3122_vm2 = vcmp.gt.f32.partialorder (%p7388_p11), %v7455_v15, -56.0  ;;  %vm3154_vm0 = vcmp.gt.f32.partialorder (%p7388_p11), %v7455_v15, 0.0  ;;  %vm3186_vm8 = vcmp.gt.f32.partialorder (%p7388_p11), %v7455_v15, 56.0 }
 0x416   : >> { %v2808_v44 = vmul.f32 0.0078125, %v2788_v0  ;;  %v9141_v0 = vmov %v9097_v16  ;;  %v2882_v31 = vceil.f32 (%p7388_p11), %v2866_v21  ;;  %vm3218_vm12 = vcmp.gt.f32.partialorder (%p7388_p11), %v7455_v15, 80.0 }
 0x417   : > { %v2884_v54 = vceil.f32 (%p7388_p11), %v2868_v26  ;;  %v2853_v26 = vmul.f32 (%p7388_p11), 0.25, %v7459_v5 }
 0x418   : >> { %v7377_v41 = vsel %vm7259_vm4, %v2808_v44, %v1715_v9   ;;  %v2898_v60 = vmax.f32 (%p7388_p11), %v2882_v31, 0.0 }
 0x419   : >> { %9121 = vst [vmem:[#allocation112_spill] sm:$0xff] %v7377_v41  ;;  %v9122_v20 = vmov %v7377_v41  ;;  %v2900_v59 = vmax.f32 (%p7388_p11), %v2884_v54, 0.0  ;;  %v2869_v47 = vadd.f32 (%p7388_p11), 6.5, %v2853_v26 }
 0x41a   : >> { %v9132_v41 = vmov %v9122_v20  ;;  %v2914_v24 = vmin.f32 (%p7388_p11), %v2898_v60, 14.0 }
 0x41b   : > { %v9148_v41 = vld [vmem:[#allocation40_spill] sm:$0xff] (%p7388_p11)  ;;  %v2916_v25 = vmin.f32 (%p7388_p11), %v2900_v59, 14.0  ;;  %v2885_v18 = vceil.f32 (%p7388_p11), %v2869_v47 }
 0x41c   : > { %v7463_v22 = vmul.f32 (%p7388_p11), %v7447_v14, %v9148_v41  ;;  %v2930_v13 = vmul.f32 (%p7388_p11), 4.0, %v2914_v24 }
 0x41d   : >> { %v2794_v23 = vpop.xlane.xlu2 %2793  ;;  %v2932_v40 = vmul.f32 (%p7388_p11), 4.0, %v2916_v25 }
 0x41e   : >> { %v2811_v56 = vmul.f32 0.0078125, %v2794_v23  ;;  %590 = sbr.rel (!%p7388_p11) target bundleno = 223 (0xdf), region = 73  ;;  %v2946_v49 = vadd.f32 (%p7388_p11), -28.0, %v2930_v13  ;;  %v2851_v31 = vmul.f32 (%p7388_p11), 0.25, %v7463_v22 }
 0x41f   : > { %v2948_v44 = vadd.f32 (%p7388_p11), -28.0, %v2932_v40 }
 0x420   : >> { %v7385_v35 = vsel %vm7259_vm4, %v2811_v56, %v1718_v55   ;;  %v9136_v55 = vmov %v9088_v30  ;;  %vm2994_vm4 = vcmp.gt.f32.partialorder (%p7388_p11), %v7455_v15, -224.0  ;;  %v3410_v54 = vsub.f32 (%p7388_p11), %v7455_v15, %v2946_v49 }
 0x421   : >> { %9125 = vst [vmem:[#allocation113_spill] sm:$0xff] %v7385_v35  ;;  %v9126_v33 = vmov %v7385_v35  ;;  %v3010_v51 = vsel (%p7388_p11), %vm2994_vm4, -192.0, %v2978_v19  ;;  %v3412_v63 = vsub.f32 (%p7388_p11), %v7451_v2, %v2948_v44 }
 0x422   : >> { %v9129_v35 = vmov %v9126_v33  ;;  %v3042_v17 = vsel (%p7388_p11), %vm3026_vm1, -128.0, %v3010_v51  ;;  %v3426_v59 = vand.u32 (%p7388_p11), 2147483647, %v3410_v54 }
 0x423   : > { %v3204_v35 = vsel %vm3188_vm10, 64.0, %v3172_v46  ;;  %v3074_v42 = vsel %vm3058_vm7, -96.0, %v3042_v17  ;;  %vm3250_vm10 = vcmp.gt.f32.partialorder %v7455_v15, 112.0  ;;  %v3428_v10 = vand.u32 2147483647, %v3412_v63 }
 0x424   : > { %v3236_v12 = vsel %vm3220_vm5, 96.0, %v3204_v35  ;;  %v3106_v39 = vsel %vm3090_vm14, -64.0, %v3074_v42 }
 0x425   : > { %v3268_v11 = vsel %vm3252_vm11, 128.0, %v3236_v12  ;;  %v3138_v0 = vsel %vm3122_vm2, -48.0, %v3106_v39  ;;  %vm3282_vm11 = vcmp.gt.f32.partialorder %v7455_v15, 160.0  ;;  %vm2997_vm2 = vcmp.gt.f32.partialorder %v7459_v5, -224.0 }
 0x426   : > { %v3300_v37 = vsel %vm3284_vm9, 192.0, %v3268_v11  ;;  %v3170_v9 = vsel %vm3154_vm0, 48.0, %v3138_v0  ;;  %vm3314_vm9 = vcmp.gt.f32.partialorder %v7455_v15, 224.0  ;;  %vm3029_vm0 = vcmp.gt.f32.partialorder %v7459_v5, -160.0 }
 0x427   : > { %v3332_v53 = vsel %vm3316_vm13, 256.0, %v3300_v37  ;;  %v3202_v23 = vsel %vm3186_vm8, 64.0, %v3170_v9  ;;  %vm3346_vm13 = vcmp.gt.f32.partialorder %v7455_v15, 320.0  ;;  %vm3061_vm8 = vcmp.gt.f32.partialorder %v7459_v5, -112.0 }
 0x428   : > { %v3364_v29 = vsel %vm3348_vm15, 384.0, %v3332_v53  ;;  %v3234_v55 = vsel %vm3218_vm12, 96.0, %v3202_v23  ;;  %vm2965_vm15 = vcmp.gt.f32.partialorder %v7459_v5, -320.0  ;;  %vm3093_vm12 = vcmp.gt.f32.partialorder %v7459_v5, -80.0 }
 0x429   : > { %v3380_v56 = vsub.f32 %v7451_v2, %v3364_v29  ;;  %vm3476_vm5 = vcmp.lt.f32.partialorder %v3364_v29, %v2948_v44  ;;  %v3266_v45 = vsel %vm3250_vm10, 128.0, %v3234_v55  ;;  %v2981_v52 = vsel %vm2965_vm15, -256.0, %v4581_v4 }
 0x42a   : > { %v3298_v41 = vsel %vm3282_vm11, 192.0, %v3266_v45  ;;  %v3013_v46 = vsel %vm2997_vm2, -192.0, %v2981_v52  ;;  %vm3125_vm10 = vcmp.gt.f32.partialorder %v7459_v5, -56.0  ;;  %vm3189_vm15 = vcmp.gt.f32.partialorder %v7459_v5, 56.0 }
 0x42b   : > { %v3396_v57 = vand.u32 2147483647, %v3380_v56  ;;  %v3330_v28 = vsel %vm3314_vm9, 256.0, %v3298_v41  ;;  %v3045_v21 = vsel %vm3029_vm0, -128.0, %v3013_v46  ;;  %vm3317_vm2 = vcmp.gt.f32.partialorder %v7459_v5, 224.0 }
 0x42c   : > { %v3362_v2 = vsel %vm3346_vm13, 384.0, %v3330_v28  ;;  %v3077_v51 = vsel %vm3061_vm8, -96.0, %v3045_v21  ;;  %vm2963_vm0 = vcmp.gt.f32.partialorder %v7463_v22, -320.0  ;;  %v2867_v37 = vadd.f32 6.5, %v2851_v31 }
 0x42d   : > { %vm3444_vm3 = vcmp.lt.f32.partialorder %v3396_v57, %v3428_v10  ;;  %vm3460_vm4 = vcmp.eq.f32.partialorder %v3396_v57, %v3428_v10  ;;  %v3378_v8 = vsub.f32 %v7455_v15, %v3362_v2  ;;  %vm3474_vm7 = vcmp.lt.f32.partialorder %v3362_v2, %v2946_v49 }
 0x42e   : > { %vm3492_vm1 = vmand %vm3460_vm4, %vm3476_vm5  ;;  %vm3157_vm5 = vcmp.gt.f32.partialorder %v7459_v5, 0.0  ;;  %v2901_v15 = vmax.f32 %v2885_v18, 0.0  ;;  %vm3253_vm4 = vcmp.gt.f32.partialorder %v7459_v5, 112.0  ;;  %v3109_v35 = vsel %vm3093_vm12, -64.0, %v3077_v51 }
 0x42f   : > { %vm3508_vm14 = vmor %vm3444_vm3, %vm3492_vm1  ;;  %v3394_v43 = vand.u32 2147483647, %v3378_v8  ;;  %vm3221_vm3 = vcmp.gt.f32.partialorder %v7459_v5, 80.0  ;;  %v3141_v12 = vsel %vm3125_vm10, -48.0, %v3109_v35  ;;  %v2979_v60 = vsel %vm2963_vm0, -256.0, %v4581_v4 }
 0x430   : > { %v7523_v61 = vsel %vm3508_vm14, %v3364_v29, %v2948_v44  ;;  %v2917_v25 = vmin.f32 %v2901_v15, 14.0  ;;  %vm3285_vm14 = vcmp.gt.f32.partialorder %v7459_v5, 160.0  ;;  %v3173_v11 = vsel %vm3157_vm5, 48.0, %v3141_v12 }
 0x431   : > { %v3540_v19 = vand.u32 2147483647, %v7523_v61  ;;  %vm3442_vm11 = vcmp.lt.f32.partialorder %v3394_v43, %v3426_v59  ;;  %vm3458_vm9 = vcmp.eq.f32.partialorder %v3394_v43, %v3426_v59  ;;  %v3205_v39 = vsel %vm3189_vm15, 64.0, %v3173_v11  ;;  %v9150_v43 = vld [vmem:[#allocation48_spill] sm:$0xff] }
 0x432   : > { %vm3490_vm13 = vmand %vm3458_vm9, %vm3474_vm7  ;;  %vm3349_vm7 = vcmp.gt.f32.partialorder %v7459_v5, 320.0  ;;  %v2933_v40 = vmul.f32 4.0, %v2917_v25  ;;  %vm2995_vm8 = vcmp.gt.f32.partialorder %v7463_v22, -224.0  ;;  %v3237_v44 = vsel %vm3221_vm3, 96.0, %v3205_v39 }
 0x433   : > { %3558 = vrot.lane.b32.xlu1 %v3540_v19, %s4582_s10  ;;  %vm3506_vm1 = vmor %vm3442_vm11, %vm3490_vm13  ;;  %v3011_v53 = vsel %vm2995_vm8, -192.0, %v2979_v60  ;;  %vm3027_vm12 = vcmp.gt.f32.partialorder %v7463_v22, -160.0  ;;  %v3269_v9 = vsel %vm3253_vm4, 128.0, %v3237_v44  ;;  %v2883_v29 = vceil.f32 %v2867_v37 }
 0x434   : > { %v7541_v17 = vsel %vm3506_vm1, %v3362_v2, %v2946_v49  ;;  %v2949_v0 = vadd.f32 -28.0, %v2933_v40  ;;  %v3043_v24 = vsel %vm3027_vm12, -128.0, %v3011_v53  ;;  %vm3059_vm10 = vcmp.gt.f32.partialorder %v7463_v22, -112.0 }
 0x435   : > { %v3538_v42 = vand.u32 2147483647, %v7541_v17  ;;  %v3301_v23 = vsel %vm3285_vm14, 192.0, %v3269_v9  ;;  %v3075_v63 = vsel %vm3059_vm10, -96.0, %v3043_v24  ;;  %vm3091_vm5 = vcmp.gt.f32.partialorder %v7463_v22, -80.0 }
 0x436   : > { %v3413_v56 = vsub.f32 %v7459_v5, %v2949_v0  ;;  %v3333_v55 = vsel %vm3317_vm2, 256.0, %v3301_v23  ;;  %v2899_v13 = vmax.f32 %v2883_v29, 0.0  ;;  %v3107_v45 = vsel %vm3091_vm5, -64.0, %v3075_v63 }
 0x437   : > { %3554 = vrot.lane.b32.xlu0 %v3538_v42, %s4582_s10  ;;  %vm3123_vm11 = vcmp.gt.f32.partialorder %v7463_v22, -56.0  ;;  %v3365_v57 = vsel %vm3349_vm7, 384.0, %v3333_v55  ;;  %vm3155_vm9 = vcmp.gt.f32.partialorder %v7463_v22, 0.0  ;;  %vm3187_vm15 = vcmp.gt.f32.partialorder %v7463_v22, 56.0 }
 0x438   : > { %v3429_v10 = vand.u32 2147483647, %v3413_v56  ;;  %v3139_v41 = vsel %vm3123_vm11, -48.0, %v3107_v45  ;;  %v3381_v49 = vsub.f32 %v7459_v5, %v3365_v57  ;;  %vm3477_vm13 = vcmp.lt.f32.partialorder %v3365_v57, %v2949_v0  ;;  %v9149_v5 = vld [vmem:[#allocation26_spill] sm:$0xff] }
 0x439   : > { %v2915_v28 = vmin.f32 %v2899_v13, 14.0  ;;  %v3171_v26 = vsel %vm3155_vm9, 48.0, %v3139_v41  ;;  %vm3219_vm3 = vcmp.gt.f32.partialorder %v7463_v22, 80.0  ;;  %vm3251_vm4 = vcmp.gt.f32.partialorder %v7463_v22, 112.0 }
 0x43a   : > { %vm3283_vm1 = vcmp.gt.f32.partialorder %v7463_v22, 160.0  ;;  %v3397_v2 = vand.u32 2147483647, %v3381_v49  ;;  %v3203_v8 = vsel %vm3187_vm15, 64.0, %v3171_v26  ;;  %vm3315_vm14 = vcmp.gt.f32.partialorder %v7463_v22, 224.0 }
 0x43b   : > { %v2931_v52 = vmul.f32 4.0, %v2915_v28  ;;  %v3235_v54 = vsel %vm3219_vm3, 96.0, %v3203_v8  ;;  %vm3347_vm2 = vcmp.gt.f32.partialorder %v7463_v22, 320.0  ;;  %v7583_v47 = vmul.f32 %v7447_v14, %v9149_v5 }
 0x43c   : > { %v7587_v59 = vmul.f32 %v7447_v14, %v9150_v43  ;;  %vm3445_vm7 = vcmp.lt.f32.partialorder %v3397_v2, %v3429_v10  ;;  %vm3461_vm0 = vcmp.eq.f32.partialorder %v3397_v2, %v3429_v10  ;;  %v3267_v46 = vsel %vm3251_vm4, 128.0, %v3235_v54 }
 0x43d   : > { %v2947_v18 = vadd.f32 -28.0, %v2931_v52  ;;  %vm3493_vm8 = vmand %vm3461_vm0, %vm3477_vm13  ;;  %v3299_v15 = vsel %vm3283_vm1, 192.0, %v3267_v46  ;;  %v2854_v21 = vmul.f32 0.25, %v7583_v47  ;;  %vm2966_vm12 = vcmp.gt.f32.partialorder %v7583_v47, -320.0 }
 0x43e   : > { %vm2998_vm10 = vcmp.gt.f32.partialorder %v7583_v47, -224.0  ;;  %vm3509_vm5 = vmor %vm3445_vm7, %vm3493_vm8  ;;  %v3331_v51 = vsel %vm3315_vm14, 256.0, %v3299_v15  ;;  %v2982_v35 = vsel %vm2966_vm12, -256.0, %v4581_v4  ;;  %vm3030_vm11 = vcmp.gt.f32.partialorder %v7583_v47, -160.0 }
 0x43f   : > { %v3411_v25 = vsub.f32 %v7463_v22, %v2947_v18  ;;  %v7598_v12 = vsel %vm3509_vm5, %v3365_v57, %v2949_v0  ;;  %v3363_v31 = vsel %vm3347_vm2, 384.0, %v3331_v51  ;;  %v2870_v40 = vadd.f32 6.5, %v2854_v21 }
 0x440   : > { %v3014_v11 = vsel %vm2998_vm10, -192.0, %v2982_v35  ;;  %v3541_v39 = vand.u32 2147483647, %v7598_v12  ;;  %v3379_v37 = vsub.f32 %v7463_v22, %v3363_v31  ;;  %vm3475_vm9 = vcmp.lt.f32.partialorder %v3363_v31, %v2947_v18 }
 0x441   : > { %v3427_v60 = vand.u32 2147483647, %v3411_v25  ;;  %v2886_v44 = vceil.f32 %v2870_v40  ;;  %v3046_v53 = vsel %vm3030_vm11, -128.0, %v3014_v11  ;;  %vm3062_vm13 = vcmp.gt.f32.partialorder %v7583_v47, -112.0 }
 0x442   : > { %vm3094_vm15 = vcmp.gt.f32.partialorder %v7583_v47, -80.0  ;;  %3560 = vrot.lane.b32.xlu1 %v3541_v39, %s4582_s10  ;;  %v3395_v0 = vand.u32 2147483647, %v3379_v37  ;;  %v3078_v9 = vsel %vm3062_vm13, -96.0, %v3046_v53  ;;  %vm3126_vm3 = vcmp.gt.f32.partialorder %v7583_v47, -56.0 }
 0x443   : > { %vm3158_vm4 = vcmp.gt.f32.partialorder %v7583_v47, 0.0  ;;  %v2902_v29 = vmax.f32 %v2886_v44, 0.0  ;;  %v3110_v22 = vsel %vm3094_vm15, -64.0, %v3078_v9  ;;  %vm3190_vm1 = vcmp.gt.f32.partialorder %v7583_v47, 56.0  ;;  %v9151_v44 = vld [vmem:[#allocation28_spill] sm:$0xff] }
 0x444   : > { %vm3222_vm14 = vcmp.gt.f32.partialorder %v7583_v47, 80.0  ;;  %vm3443_vm2 = vcmp.lt.f32.partialorder %v3395_v0, %v3427_v60  ;;  %vm3459_vm7 = vcmp.eq.f32.partialorder %v3395_v0, %v3427_v60  ;;  %v3142_v24 = vsel %vm3126_vm3, -48.0, %v3110_v22  ;;  %v9152_v0 = vld [vmem:[#allocation46_spill] sm:$0xff] }
 0x445   : > { %vm3254_vm0 = vcmp.gt.f32.partialorder %v7583_v47, 112.0  ;;  %vm3491_vm8 = vmand %vm3459_vm7, %vm3475_vm9  ;;  %v2918_v23 = vmin.f32 %v2902_v29, 14.0  ;;  %v3174_v56 = vsel %vm3158_vm4, 48.0, %v3142_v24  ;;  %vm3286_vm12 = vcmp.gt.f32.partialorder %v7583_v47, 160.0  ;;  %v9153_v24 = vld [vmem:[#allocation52_spill] sm:$0xff] }
 0x446   : > { %vm3318_vm10 = vcmp.gt.f32.partialorder %v7583_v47, 224.0  ;;  %vm3507_vm5 = vmor %vm3443_vm2, %vm3491_vm8  ;;  %v3206_v63 = vsel %vm3190_vm1, 64.0, %v3174_v56  ;;  %vm3350_vm11 = vcmp.gt.f32.partialorder %v7583_v47, 320.0  ;;  %v2856_v55 = vmul.f32 0.25, %v7587_v59  ;;  %v9154_v56 = vld [vmem:[#allocation30_spill] sm:$0xff] }
 0x447   : > { %vm2968_vm13 = vcmp.gt.f32.partialorder %v7587_v59, -320.0  ;;  %v7620_v13 = vsel %vm3507_vm5, %v3363_v31, %v2947_v18  ;;  %v2934_v45 = vmul.f32 4.0, %v2918_v23  ;;  %v3238_v57 = vsel %vm3222_vm14, 96.0, %v3206_v63 }
 0x448   : > { %v2984_v10 = vsel %vm2968_vm13, -256.0, %v4581_v4  ;;  %v3539_v41 = vand.u32 2147483647, %v7620_v13  ;;  %v3270_v49 = vsel %vm3254_vm0, 128.0, %v3238_v57  ;;  %v2872_v28 = vadd.f32 6.5, %v2856_v55 }
 0x449   : > { %vm3000_vm9 = vcmp.gt.f32.partialorder %v7587_v59, -224.0  ;;  %v2950_v26 = vadd.f32 -28.0, %v2934_v45  ;;  %v3302_v2 = vsel %vm3286_vm12, 192.0, %v3270_v49  ;;  %vm3032_vm15 = vcmp.gt.f32.partialorder %v7587_v59, -160.0 }
 0x44a   : > { %v3016_v52 = vsel %vm3000_vm9, -192.0, %v2984_v10  ;;  %3556 = vrot.lane.b32.xlu0 %v3539_v41, %s4582_s10  ;;  %v3334_v8 = vsel %vm3318_vm10, 256.0, %v3302_v2  ;;  %v2888_v54 = vceil.f32 %v2872_v28  ;;  %vm3064_vm3 = vcmp.gt.f32.partialorder %v7587_v59, -112.0 }
 0x44b   : > { %v3048_v5 = vsel %vm3032_vm15, -128.0, %v3016_v52  ;;  %v3366_v43 = vsel %vm3350_vm11, 384.0, %v3334_v8  ;;  %v3414_v18 = vsub.f32 %v7583_v47, %v2950_v26  ;;  %vm3096_vm4 = vcmp.gt.f32.partialorder %v7587_v59, -80.0 }
 0x44c   : > { %v3080_v46 = vsel %vm3064_vm3, -96.0, %v3048_v5  ;;  %v3382_v15 = vsub.f32 %v7583_v47, %v3366_v43  ;;  %vm3478_vm1 = vcmp.lt.f32.partialorder %v3366_v43, %v2950_v26  ;;  %v2904_v21 = vmax.f32 %v2888_v54, 0.0 }
 0x44d   : > { %v3112_v51 = vsel %vm3096_vm4, -64.0, %v3080_v46  ;;  %v3430_v25 = vand.u32 2147483647, %v3414_v18  ;;  %vm3128_vm14 = vcmp.gt.f32.partialorder %v7587_v59, -56.0  ;;  %vm3160_vm2 = vcmp.gt.f32.partialorder %v7587_v59, 0.0 }
 0x44e   : > { %vm3192_vm7 = vcmp.gt.f32.partialorder %v7587_v59, 56.0  ;;  %v3398_v35 = vand.u32 2147483647, %v3382_v15  ;;  %v2920_v31 = vmin.f32 %v2904_v21, 14.0  ;;  %v3144_v40 = vsel %vm3128_vm14, -48.0, %v3112_v51 }
 0x44f   : > { %vm3224_vm0 = vcmp.gt.f32.partialorder %v7587_v59, 80.0  ;;  %v3176_v11 = vsel %vm3160_vm2, 48.0, %v3144_v40  ;;  %vm3256_vm8 = vcmp.gt.f32.partialorder %v7587_v59, 112.0  ;;  %vm3288_vm12 = vcmp.gt.f32.partialorder %v7587_v59, 160.0 }
 0x450   : > { %vm3320_vm10 = vcmp.gt.f32.partialorder %v7587_v59, 224.0  ;;  %vm3446_vm5 = vcmp.lt.f32.partialorder %v3398_v35, %v3430_v25  ;;  %vm3462_vm11 = vcmp.eq.f32.partialorder %v3398_v35, %v3430_v25  ;;  %v2936_v47 = vmul.f32 4.0, %v2920_v31 }
 0x451   : > { %v3208_v37 = vsel %vm3192_vm7, 64.0, %v3176_v11  ;;  %vm3494_vm13 = vmand %vm3462_vm11, %vm3478_vm1  ;;  %vm3352_vm9 = vcmp.gt.f32.partialorder %v7587_v59, 320.0  ;;  %v7654_v53 = vmul.f32 %v7447_v14, %v9151_v44  ;;  %v7658_v9 = vmul.f32 %v7447_v14, %v9152_v0 }
 0x452   : > { %v3240_v60 = vsel %vm3224_vm0, 96.0, %v3208_v37  ;;  %vm3510_vm15 = vmor %vm3446_vm5, %vm3494_vm13  ;;  %v2952_v29 = vadd.f32 -28.0, %v2936_v47  ;;  %v7662_v23 = vmul.f32 %v7447_v14, %v9153_v24  ;;  %v7666_v63 = vmul.f32 %v7447_v14, %v9154_v56 }
 0x453   : > { %v3272_v22 = vsel %vm3256_vm8, 128.0, %v3240_v60  ;;  %v7668_v55 = vsel %vm3510_vm15, %v3366_v43, %v2950_v26  ;;  %v2855_v57 = vmul.f32 0.25, %v7654_v53  ;;  %vm2967_vm3 = vcmp.gt.f32.partialorder %v7654_v53, -320.0 }
 0x454   : > { %v3304_v45 = vsel %vm3288_vm12, 192.0, %v3272_v22  ;;  %v3542_v10 = vand.u32 2147483647, %v7668_v55  ;;  %v3416_v28 = vsub.f32 %v7587_v59, %v2952_v29  ;;  %v2983_v2 = vsel %vm2967_vm3, -256.0, %v4581_v4 }
 0x455   : > { %v3336_v49 = vsel %vm3320_vm10, 256.0, %v3304_v45  ;;  %v2871_v52 = vadd.f32 6.5, %v2855_v57  ;;  %vm2999_vm4 = vcmp.gt.f32.partialorder %v7654_v53, -224.0  ;;  %vm3031_vm1 = vcmp.gt.f32.partialorder %v7654_v53, -160.0 }
 0x456   : > { %v3368_v26 = vsel %vm3352_vm9, 384.0, %v3336_v49  ;;  %3562 = vrot.lane.b32.xlu2 %v3542_v10, %s4582_s10  ;;  %v3432_v54 = vand.u32 2147483647, %v3416_v28  ;;  %v3015_v5 = vsel %vm2999_vm4, -192.0, %v2983_v2  ;;  %vm3063_vm2 = vcmp.gt.f32.partialorder %v7654_v53, -112.0 }
 0x457   : > { %v3384_v8 = vsub.f32 %v7587_v59, %v3368_v26  ;;  %vm3480_vm14 = vcmp.lt.f32.partialorder %v3368_v26, %v2952_v29  ;;  %v2887_v43 = vceil.f32 %v2871_v52  ;;  %v3047_v18 = vsel %vm3031_vm1, -128.0, %v3015_v5 }
 0x458   : > { %vm3095_vm7 = vcmp.gt.f32.partialorder %v7654_v53, -80.0  ;;  %v3079_v15 = vsel %vm3063_vm2, -96.0, %v3047_v18  ;;  %vm3127_vm0 = vcmp.gt.f32.partialorder %v7654_v53, -56.0  ;;  %vm3159_vm8 = vcmp.gt.f32.partialorder %v7654_v53, 0.0 }
 0x459   : > { %v3400_v46 = vand.u32 2147483647, %v3384_v8  ;;  %v2903_v21 = vmax.f32 %v2887_v43, 0.0  ;;  %v3111_v51 = vsel %vm3095_vm7, -64.0, %v3079_v15  ;;  %vm3191_vm12 = vcmp.gt.f32.partialorder %v7654_v53, 56.0 }
 0x45a   : > { %vm3223_vm10 = vcmp.gt.f32.partialorder %v7654_v53, 80.0  ;;  %v3143_v59 = vsel %vm3127_vm0, -48.0, %v3111_v51  ;;  %vm3255_vm13 = vcmp.gt.f32.partialorder %v7654_v53, 112.0  ;;  %vm3287_vm15 = vcmp.gt.f32.partialorder %v7654_v53, 160.0 }
 0x45b   : > { %vm3448_vm5 = vcmp.lt.f32.partialorder %v3400_v46, %v3432_v54  ;;  %vm3464_vm11 = vcmp.eq.f32.partialorder %v3400_v46, %v3432_v54  ;;  %v2919_v25 = vmin.f32 %v2903_v21, 14.0  ;;  %v3175_v35 = vsel %vm3159_vm8, 48.0, %v3143_v59 }
 0x45c   : > { %vm3496_vm9 = vmand %vm3464_vm11, %vm3480_vm14  ;;  %vm3319_vm3 = vcmp.gt.f32.partialorder %v7654_v53, 224.0  ;;  %v3207_v31 = vsel %vm3191_vm12, 64.0, %v3175_v35  ;;  %vm3351_vm1 = vcmp.gt.f32.partialorder %v7654_v53, 320.0  ;;  %v2857_v40 = vmul.f32 0.25, %v7658_v9 }
 0x45d   : > { %vm3512_vm4 = vmor %vm3448_vm5, %vm3496_vm9  ;;  %vm2969_vm2 = vcmp.gt.f32.partialorder %v7658_v9, -320.0  ;;  %v2935_v47 = vmul.f32 4.0, %v2919_v25  ;;  %v3239_v37 = vsel %vm3223_vm10, 96.0, %v3207_v31  ;;  %vm3001_vm14 = vcmp.gt.f32.partialorder %v7658_v9, -224.0 }
 0x45e   : > { %v7700_v11 = vsel %vm3512_vm4, %v3368_v26, %v2952_v29  ;;  %v2985_v60 = vsel %vm2969_vm2, -256.0, %v4581_v4  ;;  %v3271_v0 = vsel %vm3255_vm13, 128.0, %v3239_v37  ;;  %v2873_v22 = vadd.f32 6.5, %v2857_v40 }
 0x45f   : > { %v3544_v44 = vand.u32 2147483647, %v7700_v11  ;;  %v2951_v24 = vadd.f32 -28.0, %v2935_v47  ;;  %v3303_v56 = vsel %vm3287_vm15, 192.0, %v3271_v0  ;;  %v3017_v29 = vsel %vm3001_vm14, -192.0, %v2985_v60 }
 0x460   : > { %vm3033_vm7 = vcmp.gt.f32.partialorder %v7658_v9, -160.0  ;;  %v3335_v45 = vsel %vm3319_vm3, 256.0, %v3303_v56  ;;  %v2889_v57 = vceil.f32 %v2873_v22  ;;  %vm3065_vm0 = vcmp.gt.f32.partialorder %v7658_v9, -112.0 }
 0x461   : > { %3566 = vrot.lane.b32.xlu0 %v3544_v44, %s4582_s10  ;;  %v3049_v49 = vsel %vm3033_vm7, -128.0, %v3017_v29  ;;  %v3367_v28 = vsel %vm3351_vm1, 384.0, %v3335_v45  ;;  %v3415_v2 = vsub.f32 %v7654_v53, %v2951_v24  ;;  %vm3097_vm8 = vcmp.gt.f32.partialorder %v7658_v9, -80.0 }
 0x462   : > { %v3081_v26 = vsel %vm3065_vm0, -96.0, %v3049_v49  ;;  %v3383_v52 = vsub.f32 %v7654_v53, %v3367_v28  ;;  %vm3479_vm12 = vcmp.lt.f32.partialorder %v3367_v28, %v2951_v24  ;;  %v2905_v8 = vmax.f32 %v2889_v57, 0.0 }
 0x463   : > { %v3113_v54 = vsel %vm3097_vm8, -64.0, %v3081_v26  ;;  %v3431_v5 = vand.u32 2147483647, %v3415_v2  ;;  %vm3129_vm10 = vcmp.gt.f32.partialorder %v7658_v9, -56.0  ;;  %vm3161_vm5 = vcmp.gt.f32.partialorder %v7658_v9, 0.0 }
 0x464   : > { %vm3193_vm11 = vcmp.gt.f32.partialorder %v7658_v9, 56.0  ;;  %v3399_v43 = vand.u32 2147483647, %v3383_v52  ;;  %v2921_v18 = vmin.f32 %v2905_v8, 14.0  ;;  %v3145_v46 = vsel %vm3129_vm10, -48.0, %v3113_v54 }
 0x465   : > { %vm3225_vm13 = vcmp.gt.f32.partialorder %v7658_v9, 80.0  ;;  %v3177_v15 = vsel %vm3161_vm5, 48.0, %v3145_v46  ;;  %vm3257_vm9 = vcmp.gt.f32.partialorder %v7658_v9, 112.0  ;;  %vm3289_vm15 = vcmp.gt.f32.partialorder %v7658_v9, 160.0 }
 0x466   : > { %vm3321_vm3 = vcmp.gt.f32.partialorder %v7658_v9, 224.0  ;;  %vm3447_vm4 = vcmp.lt.f32.partialorder %v3399_v43, %v3431_v5  ;;  %vm3463_vm1 = vcmp.eq.f32.partialorder %v3399_v43, %v3431_v5  ;;  %v2937_v53 = vmul.f32 4.0, %v2921_v18 }
 0x467   : > { %v3209_v21 = vsel %vm3193_vm11, 64.0, %v3177_v15  ;;  %vm3495_vm2 = vmand %vm3463_vm1, %vm3479_vm12  ;;  %vm3353_vm14 = vcmp.gt.f32.partialorder %v7658_v9, 320.0  ;;  %v2859_v59 = vmul.f32 0.25, %v7662_v23  ;;  %vm2971_vm7 = vcmp.gt.f32.partialorder %v7662_v23, -320.0 }
 0x468   : > { %v3241_v51 = vsel %vm3225_vm13, 96.0, %v3209_v21  ;;  %vm3511_vm0 = vmor %vm3447_vm4, %vm3495_vm2  ;;  %v2953_v25 = vadd.f32 -28.0, %v2937_v53  ;;  %v2987_v31 = vsel %vm2971_vm7, -256.0, %v4581_v4  ;;  %vm3003_vm8 = vcmp.gt.f32.partialorder %v7662_v23, -224.0 }
 0x469   : > { %v3273_v35 = vsel %vm3257_vm9, 128.0, %v3241_v51  ;;  %v7736_v40 = vsel %vm3511_vm0, %v3367_v28, %v2951_v24  ;;  %v2875_v37 = vadd.f32 6.5, %v2859_v59  ;;  %v3019_v60 = vsel %vm3003_vm8, -192.0, %v2987_v31 }
 0x46a   : > { %v3305_v47 = vsel %vm3289_vm15, 192.0, %v3273_v35  ;;  %v3543_v0 = vand.u32 2147483647, %v7736_v40  ;;  %v3417_v56 = vsub.f32 %v7658_v9, %v2953_v25  ;;  %vm3035_vm12 = vcmp.gt.f32.partialorder %v7662_v23, -160.0 }
 0x46b   : > { %v3337_v22 = vsel %vm3321_vm3, 256.0, %v3305_v47  ;;  %v2891_v45 = vceil.f32 %v2875_v37  ;;  %v3051_v24 = vsel %vm3035_vm12, -128.0, %v3019_v60  ;;  %vm3067_vm10 = vcmp.gt.f32.partialorder %v7662_v23, -112.0 }
 0x46c   : > { %v3369_v29 = vsel %vm3353_vm14, 384.0, %v3337_v22  ;;  %3564 = vrot.lane.b32.xlu2 %v3543_v0, %s4582_s10  ;;  %v3433_v49 = vand.u32 2147483647, %v3417_v56  ;;  %v3083_v28 = vsel %vm3067_vm10, -96.0, %v3051_v24  ;;  %vm3099_vm11 = vcmp.gt.f32.partialorder %v7662_v23, -80.0 }
 0x46d   : > { %v3385_v57 = vsub.f32 %v7658_v9, %v3369_v29  ;;  %vm3481_vm5 = vcmp.lt.f32.partialorder %v3369_v29, %v2953_v25  ;;  %v2907_v2 = vmax.f32 %v2891_v45, 0.0  ;;  %vm3131_vm13 = vcmp.gt.f32.partialorder %v7662_v23, -56.0 }
 0x46e   : > { %vm3163_vm9 = vcmp.gt.f32.partialorder %v7662_v23, 0.0  ;;  %v3115_v52 = vsel %vm3099_vm11, -64.0, %v3083_v28  ;;  %vm3195_vm15 = vcmp.gt.f32.partialorder %v7662_v23, 56.0  ;;  %vm3227_vm3 = vcmp.gt.f32.partialorder %v7662_v23, 80.0 }
 0x46f   : > { %v3401_v26 = vand.u32 2147483647, %v3385_v57  ;;  %v2923_v8 = vmin.f32 %v2907_v2, 14.0  ;;  %v3147_v54 = vsel %vm3131_vm13, -48.0, %v3115_v52  ;;  %vm3259_vm4 = vcmp.gt.f32.partialorder %v7662_v23, 112.0 }
 0x470   : > { %vm3291_vm1 = vcmp.gt.f32.partialorder %v7662_v23, 160.0  ;;  %v3179_v9 = vsel %vm3163_vm9, 48.0, %v3147_v54  ;;  %vm3323_vm7 = vcmp.gt.f32.partialorder %v7662_v23, 224.0  ;;  %vm3355_vm8 = vcmp.gt.f32.partialorder %v7662_v23, 320.0  ;;  %v9155_v54 = vld [vmem:[#allocation50_spill] sm:$0xff] }
 0x471   : > { %vm3449_vm2 = vcmp.lt.f32.partialorder %v3401_v26, %v3433_v49  ;;  %vm3465_vm14 = vcmp.eq.f32.partialorder %v3401_v26, %v3433_v49  ;;  %v2939_v5 = vmul.f32 4.0, %v2923_v8  ;;  %v3211_v43 = vsel %vm3195_vm15, 64.0, %v3179_v9 }
 0x472   : > { %vm3497_vm0 = vmand %vm3465_vm14, %vm3481_vm5  ;;  %v2858_v18 = vmul.f32 0.25, %v7666_v63  ;;  %v3243_v46 = vsel %vm3227_vm3, 96.0, %v3211_v43  ;;  %vm2970_vm10 = vcmp.gt.f32.partialorder %v7666_v63, -320.0  ;;  %vm3002_vm11 = vcmp.gt.f32.partialorder %v7666_v63, -224.0 }
 0x473   : > { %vm3513_vm12 = vmor %vm3449_vm2, %vm3497_vm0  ;;  %vm3034_vm13 = vcmp.gt.f32.partialorder %v7666_v63, -160.0  ;;  %v2955_v53 = vadd.f32 -28.0, %v2939_v5  ;;  %v3275_v21 = vsel %vm3259_vm4, 128.0, %v3243_v46  ;;  %v2986_v31 = vsel %vm2970_vm10, -256.0, %v4581_v4  ;;  %v9156_v5 = vld [vmem:[#allocation56_spill] sm:$0xff] }
 0x474   : > { %v7768_v15 = vsel %vm3513_vm12, %v3369_v29, %v2953_v25  ;;  %v2874_v51 = vadd.f32 6.5, %v2858_v18  ;;  %v3307_v35 = vsel %vm3291_vm1, 192.0, %v3275_v21  ;;  %vm3066_vm5 = vcmp.gt.f32.partialorder %v7666_v63, -112.0  ;;  %v9157_v21 = vld [vmem:[#allocation36_spill] sm:$0xff] }
 0x475   : > { %v3545_v59 = vand.u32 2147483647, %v7768_v15  ;;  %v3339_v47 = vsel %vm3323_vm7, 256.0, %v3307_v35  ;;  %v3419_v25 = vsub.f32 %v7662_v23, %v2955_v53  ;;  %v3018_v60 = vsel %vm3002_vm11, -192.0, %v2986_v31  ;;  %v9158_v35 = vld [vmem:[#allocation54_spill] sm:$0xff] }
 0x476   : > { %v2890_v37 = vceil.f32 %v2874_v51  ;;  %v3371_v22 = vsel %vm3355_vm8, 384.0, %v3339_v47  ;;  %v3050_v56 = vsel %vm3034_vm13, -128.0, %v3018_v60  ;;  %vm3098_vm9 = vcmp.gt.f32.partialorder %v7666_v63, -80.0 }
 0x477   : > { %3568 = vrot.lane.b32.xlu1 %v3545_v59, %s4582_s10  ;;  %v3387_v29 = vsub.f32 %v7662_v23, %v3371_v22  ;;  %v3435_v45 = vand.u32 2147483647, %v3419_v25  ;;  %vm3130_vm15 = vcmp.gt.f32.partialorder %v7666_v63, -56.0  ;;  %vm3483_vm3 = vcmp.lt.f32.partialorder %v3371_v22, %v2955_v53 }
 0x478   : > { %v2906_v24 = vmax.f32 %v2890_v37, 0.0  ;;  %v3082_v57 = vsel %vm3066_vm5, -96.0, %v3050_v56  ;;  %vm3162_vm4 = vcmp.gt.f32.partialorder %v7666_v63, 0.0  ;;  %vm3194_vm1 = vcmp.gt.f32.partialorder %v7666_v63, 56.0 }
 0x479   : > { %v3403_v49 = vand.u32 2147483647, %v3387_v29  ;;  %v3114_v2 = vsel %vm3098_vm9, -64.0, %v3082_v57  ;;  %vm3226_vm2 = vcmp.gt.f32.partialorder %v7666_v63, 80.0  ;;  %vm3258_vm14 = vcmp.gt.f32.partialorder %v7666_v63, 112.0 }
 0x47a   : > { %v2922_v28 = vmin.f32 %v2906_v24, 14.0  ;;  %v3146_v26 = vsel %vm3130_vm15, -48.0, %v3114_v2  ;;  %vm3290_vm7 = vcmp.gt.f32.partialorder %v7666_v63, 160.0  ;;  %vm3322_vm0 = vcmp.gt.f32.partialorder %v7666_v63, 224.0 }
 0x47b   : > { %vm3451_vm8 = vcmp.lt.f32.partialorder %v3403_v49, %v3435_v45  ;;  %vm3467_vm12 = vcmp.eq.f32.partialorder %v3403_v49, %v3435_v45  ;;  %v3178_v52 = vsel %vm3162_vm4, 48.0, %v3146_v26  ;;  %vm3354_vm11 = vcmp.gt.f32.partialorder %v7666_v63, 320.0 }
 0x47c   : > { %v2938_v23 = vmul.f32 4.0, %v2922_v28  ;;  %vm3499_vm10 = vmand %vm3467_vm12, %vm3483_vm3  ;;  %v3210_v8 = vsel %vm3194_vm1, 64.0, %v3178_v52  ;;  %v7798_v9 = vmul.f32 %v7447_v14, %v9155_v54  ;;  %v7802_v43 = vmul.f32 %v7447_v14, %v9156_v5 }
 0x47d   : > { %vm3515_vm13 = vmor %vm3451_vm8, %vm3499_vm10  ;;  %v3242_v46 = vsel %vm3226_vm2, 96.0, %v3210_v8  ;;  %v7808_v51 = vmul.f32 %v7447_v14, %v9157_v21  ;;  %v7812_v31 = vmul.f32 %v7447_v14, %v9158_v35 }
 0x47e   : > { %v2954_v18 = vadd.f32 -28.0, %v2938_v23  ;;  %v7814_v47 = vsel %vm3515_vm13, %v3371_v22, %v2955_v53  ;;  %v3274_v25 = vsel %vm3258_vm14, 128.0, %v3242_v46  ;;  %v2860_v37 = vmul.f32 0.25, %v7798_v9 }
 0x47f   : > { %vm2972_vm5 = vcmp.gt.f32.partialorder %v7798_v9, -320.0  ;;  %v3547_v60 = vand.u32 2147483647, %v7814_v47  ;;  %v3306_v56 = vsel %vm3290_vm7, 192.0, %v3274_v25  ;;  %vm3004_vm9 = vcmp.gt.f32.partialorder %v7798_v9, -224.0 }
 0x480   : > { %v3418_v29 = vsub.f32 %v7666_v63, %v2954_v18  ;;  %v2988_v45 = vsel %vm2972_vm5, -256.0, %v4581_v4  ;;  %v3338_v53 = vsel %vm3322_vm0, 256.0, %v3306_v56  ;;  %v2876_v22 = vadd.f32 6.5, %v2860_v37 }
 0x481   : > { %vm3036_vm15 = vcmp.gt.f32.partialorder %v7798_v9, -160.0  ;;  %3572 = vrot.lane.b32.xlu0 %v3547_v60, %s4582_s10  ;;  %v3370_v24 = vsel %vm3354_vm11, 384.0, %v3338_v53  ;;  %v3020_v49 = vsel %vm3004_vm9, -192.0, %v2988_v45  ;;  %vm3068_vm3 = vcmp.gt.f32.partialorder %v7798_v9, -112.0 }
 0x482   : > { %v3434_v57 = vand.u32 2147483647, %v3418_v29  ;;  %v3386_v28 = vsub.f32 %v7666_v63, %v3370_v24  ;;  %vm3482_vm4 = vcmp.lt.f32.partialorder %v3370_v24, %v2954_v18  ;;  %v2892_v2 = vceil.f32 %v2876_v22 }
 0x483   : > { %v3052_v26 = vsel %vm3036_vm15, -128.0, %v3020_v49  ;;  %vm3100_vm1 = vcmp.gt.f32.partialorder %v7798_v9, -80.0  ;;  %vm3132_vm2 = vcmp.gt.f32.partialorder %v7798_v9, -56.0  ;;  %vm3164_vm14 = vcmp.gt.f32.partialorder %v7798_v9, 0.0 }
 0x484   : > { %v3084_v23 = vsel %vm3068_vm3, -96.0, %v3052_v26  ;;  %v3402_v52 = vand.u32 2147483647, %v3386_v28  ;;  %v2908_v8 = vmax.f32 %v2892_v2, 0.0  ;;  %vm3196_vm7 = vcmp.gt.f32.partialorder %v7798_v9, 56.0 }
 0x485   : > { %v3116_v54 = vsel %vm3100_vm1, -64.0, %v3084_v23  ;;  %vm3228_vm0 = vcmp.gt.f32.partialorder %v7798_v9, 80.0  ;;  %vm3260_vm8 = vcmp.gt.f32.partialorder %v7798_v9, 112.0  ;;  %vm3292_vm12 = vcmp.gt.f32.partialorder %v7798_v9, 160.0 }
 0x486   : > { %v3148_v5 = vsel %vm3132_vm2, -48.0, %v3116_v54  ;;  %vm3450_vm10 = vcmp.lt.f32.partialorder %v3402_v52, %v3434_v57  ;;  %vm3466_vm11 = vcmp.eq.f32.partialorder %v3402_v52, %v3434_v57  ;;  %v2924_v63 = vmin.f32 %v2908_v8, 14.0 }
 0x487   : > { %v3180_v46 = vsel %vm3164_vm14, 48.0, %v3148_v5  ;;  %vm3498_vm13 = vmand %vm3466_vm11, %vm3482_vm4  ;;  %vm3324_vm5 = vcmp.gt.f32.partialorder %v7798_v9, 224.0  ;;  %vm3356_vm9 = vcmp.gt.f32.partialorder %v7798_v9, 320.0  ;;  %v2862_v35 = vmul.f32 0.25, %v7802_v43 }
 0x488   : > { %v3212_v21 = vsel %vm3196_vm7, 64.0, %v3180_v46  ;;  %vm3514_vm15 = vmor %vm3450_vm10, %vm3498_vm13  ;;  %v2940_v25 = vmul.f32 4.0, %v2924_v63  ;;  %vm2974_vm3 = vcmp.gt.f32.partialorder %v7802_v43, -320.0  ;;  %vm3006_vm1 = vcmp.gt.f32.partialorder %v7802_v43, -224.0 }
 0x489   : > { %v3244_v37 = vsel %vm3228_vm0, 96.0, %v3212_v21  ;;  %v7849_v56 = vsel %vm3514_vm15, %v3370_v24, %v2954_v18  ;;  %v2878_v45 = vadd.f32 6.5, %v2862_v35  ;;  %v2990_v53 = vsel %vm2974_vm3, -256.0, %v4581_v4 }
 0x48a   : > { %v3276_v29 = vsel %vm3260_vm8, 128.0, %v3244_v37  ;;  %v3546_v22 = vand.u32 2147483647, %v7849_v56  ;;  %v2956_v57 = vadd.f32 -28.0, %v2940_v25  ;;  %v3022_v28 = vsel %vm3006_vm1, -192.0, %v2990_v53 }
 0x48b   : > { %v3308_v49 = vsel %vm3292_vm12, 192.0, %v3276_v29  ;;  %v2894_v26 = vceil.f32 %v2878_v45  ;;  %vm3038_vm4 = vcmp.gt.f32.partialorder %v7802_v43, -160.0  ;;  %vm3070_vm2 = vcmp.gt.f32.partialorder %v7802_v43, -112.0 }
 0x48c   : > { %v3340_v2 = vsel %vm3324_vm5, 256.0, %v3308_v49  ;;  %3570 = vrot.lane.b32.xlu2 %v3546_v22, %s4582_s10  ;;  %v3420_v24 = vsub.f32 %v7798_v9, %v2956_v57  ;;  %v3054_v23 = vsel %vm3038_vm4, -128.0, %v3022_v28  ;;  %vm3102_vm14 = vcmp.gt.f32.partialorder %v7802_v43, -80.0 }
 0x48d   : > { %v3372_v18 = vsel %vm3356_vm9, 384.0, %v3340_v2  ;;  %v2910_v8 = vmax.f32 %v2894_v26, 0.0  ;;  %v3086_v54 = vsel %vm3070_vm2, -96.0, %v3054_v23  ;;  %vm3134_vm0 = vcmp.gt.f32.partialorder %v7802_v43, -56.0 }
 0x48e   : > { %v3388_v52 = vsub.f32 %v7798_v9, %v3372_v18  ;;  %vm3484_vm7 = vcmp.lt.f32.partialorder %v3372_v18, %v2956_v57  ;;  %v3436_v5 = vand.u32 2147483647, %v3420_v24  ;;  %v3118_v63 = vsel %vm3102_vm14, -64.0, %v3086_v54 }
 0x48f   : > { %vm3166_vm8 = vcmp.gt.f32.partialorder %v7802_v43, 0.0  ;;  %v2926_v21 = vmin.f32 %v2910_v8, 14.0  ;;  %v3150_v35 = vsel %vm3134_vm0, -48.0, %v3118_v63  ;;  %vm3198_vm12 = vcmp.gt.f32.partialorder %v7802_v43, 56.0 }
 0x490   : > { %v3404_v46 = vand.u32 2147483647, %v3388_v52  ;;  %v3182_v25 = vsel %vm3166_vm8, 48.0, %v3150_v35  ;;  %vm3230_vm10 = vcmp.gt.f32.partialorder %v7802_v43, 80.0  ;;  %vm3262_vm11 = vcmp.gt.f32.partialorder %v7802_v43, 112.0 }
 0x491   : > { %vm3294_vm13 = vcmp.gt.f32.partialorder %v7802_v43, 160.0  ;;  %v2942_v9 = vmul.f32 4.0, %v2926_v21  ;;  %v3214_v37 = vsel %vm3198_vm12, 64.0, %v3182_v25  ;;  %vm3326_vm3 = vcmp.gt.f32.partialorder %v7802_v43, 224.0 }
 0x492   : > { %vm3452_vm5 = vcmp.lt.f32.partialorder %v3404_v46, %v3436_v5  ;;  %vm3468_vm9 = vcmp.eq.f32.partialorder %v3404_v46, %v3436_v5  ;;  %v3246_v29 = vsel %vm3230_vm10, 96.0, %v3214_v37  ;;  %vm3358_vm1 = vcmp.gt.f32.partialorder %v7802_v43, 320.0 }
 0x493   : > { %vm3500_vm15 = vmand %vm3468_vm9, %vm3484_vm7  ;;  %v2861_v45 = vmul.f32 0.25, %v7808_v51  ;;  %v2958_v53 = vadd.f32 -28.0, %v2942_v9  ;;  %v3278_v49 = vsel %vm3262_vm11, 128.0, %v3246_v29  ;;  %vm2973_vm2 = vcmp.gt.f32.partialorder %v7808_v51, -320.0 }
 0x494   : > { %vm3516_vm4 = vmor %vm3452_vm5, %vm3500_vm15  ;;  %vm3005_vm14 = vcmp.gt.f32.partialorder %v7808_v51, -224.0  ;;  %v3310_v2 = vsel %vm3294_vm13, 192.0, %v3278_v49  ;;  %v2989_v24 = vsel %vm2973_vm2, -256.0, %v4581_v4  ;;  %vm3037_vm7 = vcmp.gt.f32.partialorder %v7808_v51, -160.0 }
 0x495   : > { %v7881_v28 = vsel %vm3516_vm4, %v3372_v18, %v2956_v57  ;;  %v2877_v26 = vadd.f32 6.5, %v2861_v45  ;;  %v3342_v52 = vsel %vm3326_vm3, 256.0, %v3310_v2  ;;  %v3422_v8 = vsub.f32 %v7802_v43, %v2958_v53 }
 0x496   : > { %v3548_v23 = vand.u32 2147483647, %v7881_v28  ;;  %v3021_v54 = vsel %vm3005_vm14, -192.0, %v2989_v24  ;;  %v3374_v5 = vsel %vm3358_vm1, 384.0, %v3342_v52  ;;  %vm3069_vm0 = vcmp.gt.f32.partialorder %v7808_v51, -112.0 }
 0x497   : > { %v2893_v63 = vceil.f32 %v2877_v26  ;;  %v3390_v57 = vsub.f32 %v7802_v43, %v3374_v5  ;;  %v3438_v18 = vand.u32 2147483647, %v3422_v8  ;;  %vm3486_vm8 = vcmp.lt.f32.partialorder %v3374_v5, %v2958_v53 }
 0x498   : > { %3574 = vrot.lane.b32.xlu1 %v3548_v23, %s4582_s10  ;;  %v3053_v46 = vsel %vm3037_vm7, -128.0, %v3021_v54  ;;  %vm3101_vm12 = vcmp.gt.f32.partialorder %v7808_v51, -80.0  ;;  %vm3133_vm10 = vcmp.gt.f32.partialorder %v7808_v51, -56.0  ;;  %vm3165_vm11 = vcmp.gt.f32.partialorder %v7808_v51, 0.0 }
 0x499   : > { %v2909_v21 = vmax.f32 %v2893_v63, 0.0  ;;  %v3085_v35 = vsel %vm3069_vm0, -96.0, %v3053_v46  ;;  %v3406_v25 = vand.u32 2147483647, %v3390_v57  ;;  %vm3197_vm13 = vcmp.gt.f32.partialorder %v7808_v51, 56.0 }
 0x49a   : > { %v3117_v9 = vsel %vm3101_vm12, -64.0, %v3085_v35  ;;  %vm3229_vm5 = vcmp.gt.f32.partialorder %v7808_v51, 80.0  ;;  %vm3261_vm9 = vcmp.gt.f32.partialorder %v7808_v51, 112.0  ;;  %vm3293_vm1 = vcmp.gt.f32.partialorder %v7808_v51, 160.0 }
 0x49b   : > { %v2925_v37 = vmin.f32 %v2909_v21, 14.0  ;;  %v3149_v29 = vsel %vm3133_vm10, -48.0, %v3117_v9  ;;  %vm3454_vm15 = vcmp.lt.f32.partialorder %v3406_v25, %v3438_v18  ;;  %vm3470_vm3 = vcmp.eq.f32.partialorder %v3406_v25, %v3438_v18 }
 0x49c   : > { %v3181_v43 = vsel %vm3165_vm11, 48.0, %v3149_v29  ;;  %vm3502_vm4 = vmand %vm3470_vm3, %vm3486_vm8  ;;  %vm3325_vm2 = vcmp.gt.f32.partialorder %v7808_v51, 224.0  ;;  %vm3357_vm14 = vcmp.gt.f32.partialorder %v7808_v51, 320.0  ;;  %v2863_v26 = vmul.f32 0.25, %v7812_v31 }
 0x49d   : > { %v2941_v45 = vmul.f32 4.0, %v2925_v37  ;;  %v3213_v49 = vsel %vm3197_vm13, 64.0, %v3181_v43  ;;  %vm3518_vm7 = vmor %vm3454_vm15, %vm3502_vm4  ;;  %vm2975_vm0 = vcmp.gt.f32.partialorder %v7812_v31, -320.0  ;;  %vm3007_vm12 = vcmp.gt.f32.partialorder %v7812_v31, -224.0 }
 0x49e   : > { %v3245_v2 = vsel %vm3229_vm5, 96.0, %v3213_v49  ;;  %v7907_v24 = vsel %vm3518_vm7, %v3374_v5, %v2958_v53  ;;  %v2991_v54 = vsel %vm2975_vm0, -256.0, %v4581_v4  ;;  %v2879_v18 = vadd.f32 6.5, %v2863_v26 }
 0x49f   : > { %v2957_v52 = vadd.f32 -28.0, %v2941_v45  ;;  %v3277_v8 = vsel %vm3261_vm9, 128.0, %v3245_v2  ;;  %v3550_v63 = vand.u32 2147483647, %v7907_v24  ;;  %v3023_v46 = vsel %vm3007_vm12, -192.0, %v2991_v54 }
 0x4a0   : > { %v3309_v57 = vsel %vm3293_vm1, 192.0, %v3277_v8  ;;  %vm3039_vm8 = vcmp.gt.f32.partialorder %v7812_v31, -160.0  ;;  %vm3071_vm10 = vcmp.gt.f32.partialorder %v7812_v31, -112.0  ;;  %v2895_v5 = vceil.f32 %v2879_v18  ;;  %v9159_v18 = vld [vmem:[#allocation58_spill] sm:$0xff] }
 0x4a1   : > { %v3341_v21 = vsel %vm3325_vm2, 256.0, %v3309_v57  ;;  %v3421_v35 = vsub.f32 %v7808_v51, %v2957_v52  ;;  %3578 = vrot.lane.b32.xlu0 %v3550_v63, %s4582_s10  ;;  %v3055_v25 = vsel %vm3039_vm8, -128.0, %v3023_v46  ;;  %vm3103_vm11 = vcmp.gt.f32.partialorder %v7812_v31, -80.0 }
 0x4a2   : > { %v3373_v53 = vsel %vm3357_vm14, 384.0, %v3341_v21  ;;  %v3087_v29 = vsel %vm3071_vm10, -96.0, %v3055_v25  ;;  %v2911_v43 = vmax.f32 %v2895_v5, 0.0  ;;  %vm3135_vm5 = vcmp.gt.f32.partialorder %v7812_v31, -56.0 }
 0x4a3   : > { %v3389_v9 = vsub.f32 %v7808_v51, %v3373_v53  ;;  %v3437_v37 = vand.u32 2147483647, %v3421_v35  ;;  %vm3485_vm13 = vcmp.lt.f32.partialorder %v3373_v53, %v2957_v52  ;;  %v3119_v45 = vsel %vm3103_vm11, -64.0, %v3087_v29  ;;  %v9160_v35 = vld [vmem:[#allocation42_spill] sm:$0xff] }
 0x4a4   : > { %vm3167_vm9 = vcmp.gt.f32.partialorder %v7812_v31, 0.0  ;;  %v3151_v2 = vsel %vm3135_vm5, -48.0, %v3119_v45  ;;  %vm3199_vm15 = vcmp.gt.f32.partialorder %v7812_v31, 56.0  ;;  %vm3231_vm3 = vcmp.gt.f32.partialorder %v7812_v31, 80.0 }
 0x4a5   : > { %v3405_v49 = vand.u32 2147483647, %v3389_v9  ;;  %v2927_v26 = vmin.f32 %v2911_v43, 14.0  ;;  %v3183_v8 = vsel %vm3167_vm9, 48.0, %v3151_v2  ;;  %vm3263_vm1 = vcmp.gt.f32.partialorder %v7812_v31, 112.0 }
 0x4a6   : > { %v3215_v51 = vsel %vm3199_vm15, 64.0, %v3183_v8  ;;  %vm3295_vm14 = vcmp.gt.f32.partialorder %v7812_v31, 160.0  ;;  %vm3327_vm0 = vcmp.gt.f32.partialorder %v7812_v31, 224.0  ;;  %v7935_v46 = vmul.f32 %v7447_v14, %v9159_v18 }
 0x4a7   : > { %vm3453_vm4 = vcmp.lt.f32.partialorder %v3405_v49, %v3437_v37  ;;  %vm3469_vm2 = vcmp.eq.f32.partialorder %v3405_v49, %v3437_v37  ;;  %v2943_v54 = vmul.f32 4.0, %v2927_v26  ;;  %v3247_v57 = vsel %vm3231_vm3, 96.0, %v3215_v51 }
 0x4a8   : > { %vm3501_vm7 = vmand %vm3469_vm2, %vm3485_vm13  ;;  %v3279_v21 = vsel %vm3263_vm1, 128.0, %v3247_v57  ;;  %vm3359_vm8 = vcmp.gt.f32.partialorder %v7812_v31, 320.0  ;;  %v7940_v5 = vmul.f32 %v7447_v14, %v9160_v35  ;;  %v2865_v29 = vmul.f32 0.25, %v7935_v46 }
 0x4a9   : > { %vm3517_vm12 = vmor %vm3453_vm4, %vm3501_vm7  ;;  %v2959_v9 = vadd.f32 -28.0, %v2943_v54  ;;  %v3311_v37 = vsel %vm3295_vm14, 192.0, %v3279_v21  ;;  %vm2977_vm10 = vcmp.gt.f32.partialorder %v7935_v46, -320.0  ;;  %vm3009_vm11 = vcmp.gt.f32.partialorder %v7935_v46, -224.0 }
 0x4aa   : > { %v7942_v25 = vsel %vm3517_vm12, %v3373_v53, %v2957_v52  ;;  %v3343_v45 = vsel %vm3327_vm0, 256.0, %v3311_v37  ;;  %v2881_v26 = vadd.f32 6.5, %v2865_v29  ;;  %v2993_v14 = vsel %vm2977_vm10, -256.0, %v4581_v4 }
 0x4ab   : > { %v3549_v43 = vand.u32 2147483647, %v7942_v25  ;;  %v3375_v49 = vsel %vm3359_vm8, 384.0, %v3343_v45  ;;  %v3423_v2 = vsub.f32 %v7812_v31, %v2959_v9  ;;  %v3025_v53 = vsel %vm3009_vm11, -192.0, %v2993_v14 }
 0x4ac   : > { %v3391_v52 = vsub.f32 %v7812_v31, %v3375_v49  ;;  %vm3487_vm13 = vcmp.lt.f32.partialorder %v3375_v49, %v2959_v9  ;;  %vm3041_vm5 = vcmp.gt.f32.partialorder %v7935_v46, -160.0  ;;  %v2897_v51 = vceil.f32 %v2881_v26 }
 0x4ad   : > { %3576 = vrot.lane.b32.xlu2 %v3549_v43, %s4582_s10  ;;  %v3439_v8 = vand.u32 2147483647, %v3423_v2  ;;  %v3057_v54 = vsel %vm3041_vm5, -128.0, %v3025_v53  ;;  %vm3073_vm9 = vcmp.gt.f32.partialorder %v7935_v46, -112.0  ;;  %vm3105_vm15 = vcmp.gt.f32.partialorder %v7935_v46, -80.0 }
 0x4ae   : > { %v3407_v57 = vand.u32 2147483647, %v3391_v52  ;;  %v3089_v18 = vsel %vm3073_vm9, -96.0, %v3057_v54  ;;  %vm3137_vm3 = vcmp.gt.f32.partialorder %v7935_v46, -56.0  ;;  %v2913_v21 = vmax.f32 %v2897_v51, 0.0 }
 0x4af   : > { %v3121_v35 = vsel %vm3105_vm15, -64.0, %v3089_v18  ;;  %vm3169_vm1 = vcmp.gt.f32.partialorder %v7935_v46, 0.0  ;;  %vm3201_vm4 = vcmp.gt.f32.partialorder %v7935_v46, 56.0  ;;  %vm3233_vm7 = vcmp.gt.f32.partialorder %v7935_v46, 80.0 }
 0x4b0   : > { %vm3455_vm2 = vcmp.lt.f32.partialorder %v3407_v57, %v3439_v8  ;;  %vm3471_vm14 = vcmp.eq.f32.partialorder %v3407_v57, %v3439_v8  ;;  %v3153_v31 = vsel %vm3137_vm3, -48.0, %v3121_v35  ;;  %v2929_v37 = vmin.f32 %v2913_v21, 14.0 }
 0x4b1   : > { %vm3503_vm0 = vmand %vm3471_vm14, %vm3487_vm13  ;;  %v3185_v29 = vsel %vm3169_vm1, 48.0, %v3153_v31  ;;  %vm3265_vm12 = vcmp.gt.f32.partialorder %v7935_v46, 112.0  ;;  %vm3297_vm8 = vcmp.gt.f32.partialorder %v7935_v46, 160.0  ;;  %vm3329_vm11 = vcmp.gt.f32.partialorder %v7935_v46, 224.0 }
 0x4b2   : > { %vm3519_vm10 = vmor %vm3455_vm2, %vm3503_vm0  ;;  %v3217_v45 = vsel %vm3201_vm4, 64.0, %v3185_v29  ;;  %vm3361_vm5 = vcmp.gt.f32.partialorder %v7935_v46, 320.0  ;;  %v2864_v2 = vmul.f32 0.25, %v7940_v5  ;;  %v2945_v14 = vmul.f32 4.0, %v2929_v37 }
 0x4b3   : > { %v7967_v26 = vsel %vm3519_vm10, %v3375_v49, %v2959_v9  ;;  %v3249_v52 = vsel %vm3233_vm7, 96.0, %v3217_v45  ;;  %vm2976_vm13 = vcmp.gt.f32.partialorder %v7940_v5, -320.0  ;;  %vm3008_vm9 = vcmp.gt.f32.partialorder %v7940_v5, -224.0 }
 0x4b4   : > { %v3551_v53 = vand.u32 2147483647, %v7967_v26  ;;  %v3281_v8 = vsel %vm3265_vm12, 128.0, %v3249_v52  ;;  %v2880_v51 = vadd.f32 6.5, %v2864_v2  ;;  %v2992_v54 = vsel %vm2976_vm13, -256.0, %v4581_v4 }
 0x4b5   : > { %v2961_v57 = vadd.f32 -28.0, %v2945_v14  ;;  %v3313_v18 = vsel %vm3297_vm8, 192.0, %v3281_v8  ;;  %vm3040_vm15 = vcmp.gt.f32.partialorder %v7940_v5, -160.0  ;;  %v3024_v21 = vsel %vm3008_vm9, -192.0, %v2992_v54 }
 0x4b6   : > { %3580 = vrot.lane.b32.xlu1 %v3551_v53, %s4582_s10  ;;  %v3345_v9 = vsel %vm3329_vm11, 256.0, %v3313_v18  ;;  %v2896_v49 = vceil.f32 %v2880_v51  ;;  %vm3072_vm3 = vcmp.gt.f32.partialorder %v7940_v5, -112.0  ;;  %v3056_v31 = vsel %vm3040_vm15, -128.0, %v3024_v21 }
 0x4b7   : > { %v3377_v4 = vsel %vm3361_vm5, 384.0, %v3345_v9  ;;  %v3425_v35 = vsub.f32 %v7935_v46, %v2961_v57  ;;  %vm3104_vm1 = vcmp.gt.f32.partialorder %v7940_v5, -80.0  ;;  %v3088_v45 = vsel %vm3072_vm3, -96.0, %v3056_v31  ;;  %v9161_v31 = vld [vmem:[#allocation10_spill] sm:$0xff] }
 0x4b8   : > { %v3393_v37 = vsub.f32 %v7935_v46, %v3377_v4  ;;  %vm3489_vm4 = vcmp.lt.f32.partialorder %v3377_v4, %v2961_v57  ;;  %v2912_v29 = vmax.f32 %v2896_v49, 0.0  ;;  %v3120_v14 = vsel %vm3104_vm1, -64.0, %v3088_v45 }
 0x4b9   : > { %v3441_v2 = vand.u32 2147483647, %v3425_v35  ;;  %vm3136_vm2 = vcmp.gt.f32.partialorder %v7940_v5, -56.0  ;;  %vm3168_vm14 = vcmp.gt.f32.partialorder %v7940_v5, 0.0  ;;  %vm3200_vm7 = vcmp.gt.f32.partialorder %v7940_v5, 56.0 }
 0x4ba   : > { %v3409_v52 = vand.u32 2147483647, %v3393_v37  ;;  %v2928_v8 = vmin.f32 %v2912_v29, 14.0  ;;  %v3152_v51 = vsel %vm3136_vm2, -48.0, %v3120_v14  ;;  %vm3232_vm0 = vcmp.gt.f32.partialorder %v7940_v5, 80.0 }
 0x4bb   : > { %v3184_v54 = vsel %vm3168_vm14, 48.0, %v3152_v51  ;;  %vm3264_vm12 = vcmp.gt.f32.partialorder %v7940_v5, 112.0  ;;  %vm3296_vm8 = vcmp.gt.f32.partialorder %v7940_v5, 160.0  ;;  %vm3328_vm13 = vcmp.gt.f32.partialorder %v7940_v5, 224.0 }
 0x4bc   : > { %vm3457_vm10 = vcmp.lt.f32.partialorder %v3409_v52, %v3441_v2  ;;  %vm3473_vm11 = vcmp.eq.f32.partialorder %v3409_v52, %v3441_v2  ;;  %v2944_v46 = vmul.f32 4.0, %v2928_v8  ;;  %v3216_v18 = vsel %vm3200_vm7, 64.0, %v3184_v54 }
 0x4bd   : > { %vm3505_vm5 = vmand %vm3473_vm11, %vm3489_vm4  ;;  %v3248_v9 = vsel %vm3232_vm0, 96.0, %v3216_v18  ;;  %v7996_v49 = vstv %s7974_s11  ;;  %vm3360_vm15 = vcmp.gt.f32.partialorder %v7940_v5, 320.0  ;;  %v9162_v18 = vld [vmem:[#allocation9_spill] sm:$0xff] }
 0x4be   : > { %vm3521_vm9 = vmor %vm3457_vm10, %vm3505_vm5  ;;  %v2960_v21 = vadd.f32 -28.0, %v2944_v46  ;;  %v3280_v35 = vsel %vm3264_vm12, 128.0, %v3248_v9  ;;  %v3734_v37 = vmul.f32 %v7996_v49, %v9161_v31 }
 0x4bf   : > { %v8001_v29 = vsel %vm3521_vm9, %v3377_v4, %v2961_v57  ;;  %v3312_v45 = vsel %vm3296_vm8, 192.0, %v3280_v35  ;;  %v3736_v57 = vmul.f32 %v7996_v49, %v9162_v18  ;;  %v9163_v4 = vld [vmem:[#allocation14_spill] sm:$0xff]  ;;  %v9169_v18 = vld [vmem:[#allocation13_spill] sm:$0xff] }
 0x4c0   : > { %v3553_v2 = vand.u32 2147483647, %v8001_v29  ;;  %v3344_v14 = vsel %vm3328_vm13, 256.0, %v3312_v45  ;;  %v3424_v52 = vsub.f32 %v7940_v5, %v2960_v21  ;;  %3760 = vperm.xlu1 %4346, %v3734_v37   ;;  %v3733_v9 = vmul.f32 %v7996_v49, %v9163_v4  ;;  %v9165_v45 = vld [vmem:[#allocation17_spill] sm:$0xff]  ;;  %v9170_v4 = vld [vmem:[#allocation22_spill] sm:$0xff] }
 0x4c1   : > { %v3376_v8 = vsel %vm3360_vm15, 384.0, %v3344_v14  ;;  %v3738_v14 = vmul.f32 %v7996_v49, %v9165_v45  ;;  %v3555_v45 = vpop.permute.xlu0 %3554 }
 0x4c2   : > { %3584 = vrot.lane.b32.xlu0 %v3553_v2, %s4582_s10  ;;  %v3392_v51 = vsub.f32 %v7940_v5, %v3376_v8  ;;  %v3440_v54 = vand.u32 2147483647, %v3424_v52  ;;  %vm3488_vm3 = vcmp.lt.f32.partialorder %v3376_v8, %v2960_v21  ;;  %v9164_v5 = vld [vmem:[#allocation16_spill] sm:$0xff]  ;;  %v9166_v52 = vld [vmem:[#allocation11_spill] sm:$0xff]  ;;  %vm3586_vm7 = vcmp.gt.f32.partialorder %v3555_v45, 32.0 }
 0x4c3   : > { %v3739_v37 = vmul.f32 %v7996_v49, %v9164_v5  ;;  %v3559_v5 = vpop.permute.xlu1 %3558 }
 0x4c4   : > { %v3408_v46 = vand.u32 2147483647, %v3392_v51  ;;  %v3732_v51 = vmul.f32 %v7996_v49, %v9166_v52  ;;  %v9172_v52 = vld [vmem:[#allocation12_spill] sm:$0xff]  ;;  %vm3588_vm10 = vcmp.gt.f32.partialorder %v3559_v5, 32.0 }
 0x4c6   : > { %vm3456_vm1 = vcmp.lt.f32.partialorder %v3408_v46, %v3440_v54  ;;  %vm3472_vm4 = vcmp.eq.f32.partialorder %v3408_v46, %v3440_v54  ;;  %v9168_v54 = vld [vmem:[#allocation20_spill] sm:$0xff] }
 0x4c7   : > { %vm3504_vm2 = vmand %vm3472_vm4, %vm3488_vm3  ;;  %v3741_v46 = vmul.f32 %v7996_v49, %v9168_v54  ;;  %v3563_v54 = vpop.permute.xlu2 %3562 }
 0x4c8   : > { %vm3520_vm14 = vmor %vm3456_vm1, %vm3504_vm2  ;;  %3770 = vperm.xlu1 %4346, %v3736_v57   ;;  %v3735_v57 = vmul.f32 %v7996_v49, %v9169_v18 }
 0x4c9   : > { %v8013_v35 = vsel %vm3520_vm14, %v3376_v8, %v2960_v21  ;;  %v9167_v21 = vld [vmem:[#allocation19_spill] sm:$0xff] }
 0x4ca   : > { %v3552_v31 = vand.u32 2147483647, %v8013_v35  ;;  %3755 = vperm.xlu0 %4345, %v3733_v9   ;;  %v3742_v8 = vmul.f32 %v7996_v49, %v9167_v21  ;;  %v3745_v9 = vmul.f32 %v7996_v49, %v9170_v4  ;;  %v9173_v21 = vld [vmem:[#allocation47_spill] sm:$0xff]  ;;  %v9177_v4 = vld [vmem:[#allocation24_spill] sm:$0xff] }
 0x4cb   : > { %vm9174_vm0 = vnez %v9173_v21  ;;  %v3747_v45 = vmul.f32 %v7996_v49, %v9177_v4 }
 0x4cc   : > { %3582 = vrot.lane.b32.xlu2 %v3552_v31, %s4582_s10  ;;  %vm8039_vm12 = vmand %vm9174_vm0, %vm3586_vm7  ;;  %vm3590_vm7 = vcmp.gt.f32.partialorder %v3563_v54, 32.0 }
 0x4cd   : > { %v3618_v18 = vsel %vm8039_vm12, 0.0, %v3538_v42  ;;  %vm8060_vm5 = vmand %vm9174_vm0, %vm3588_vm10 }
 0x4d0   : > { %3785 = vperm.xlu1 %4346, %v3739_v37   ;;  %v9171_v37 = vld [vmem:[#allocation23_spill] sm:$0xff] }
 0x4d2   : > { %3780 = vperm.xlu0 %4345, %v3738_v14   ;;  %v3744_v14 = vmul.f32 %v7996_v49, %v9171_v37 }
 0x4d4   : > { %3750 = vperm.xlu2 %4344, %v3732_v51   ;;  %v3737_v51 = vmul.f32 %v7996_v49, %v9172_v52 }
 0x4d8   : > { %3800 = vperm.xlu1 %4346, %v3742_v8  }
 0x4da   : > { %3795 = vperm.xlu0 %4345, %v3741_v46   ;;  %v3561_v46 = vpop.permute.xlu1 %3560 }
 0x4db   : > { %vm3589_vm8 = vcmp.gt.f32.partialorder %v3561_v46, 32.0  ;;  %v3620_v46 = vsel %vm8060_vm5, 0.0, %v3540_v19 }
 0x4dc   : > { %3765 = vperm.xlu2 %4344, %v3735_v57   ;;  %v3557_v57 = vpop.permute.xlu0 %3556  ;;  %vm8054_vm11 = vmand %vm9174_vm0, %vm3589_vm8 }
 0x4dd   : > { %v3621_v52 = vsel %vm8054_vm11, 0.0, %v3541_v39  ;;  %vm3587_vm4 = vcmp.gt.f32.partialorder %v3557_v57, 32.0  ;;  %vm8124_vm8 = vmand %vm9174_vm0, %vm3590_vm7 }
 0x4de   : > { %vm8108_vm14 = vmand %vm9174_vm0, %vm3587_vm4 }
 0x4df   : > { %v3619_v57 = vsel %vm8108_vm14, 0.0, %v3539_v41 }
 0x4e0   : > { %3815 = vperm.xlu1 %4346, %v3745_v9   ;;  %v9178_v9 = vld [vmem:[#allocation15_spill] sm:$0xff] }
 0x4e1   : > { %v3740_v37 = vmul.f32 %v7996_v49, %v9178_v9 }
 0x4e2   : > { %3810 = vperm.xlu0 %4345, %v3744_v14   ;;  %v9213_v14 = vld [vmem:[#allocation31_spill] sm:$0xff] }
 0x4e4   : > { %3775 = vperm.xlu2 %4344, %v3737_v51   ;;  %v3567_v5 = vpop.permute.xlu0 %3566  ;;  %v3565_v51 = vpop.permute.xlu2 %3564 }
 0x4e5   : > { %vm3592_vm13 = vcmp.gt.f32.partialorder %v3567_v5, 32.0  ;;  %vm3591_vm9 = vcmp.gt.f32.partialorder %v3565_v51, 32.0 }
 0x4e6   : > { %vm8078_vm15 = vmand %vm9174_vm0, %vm3592_vm13 }
 0x4e7   : > { %vm8084_vm3 = vmand %vm9174_vm0, %vm3591_vm9 }
 0x4e8   : > { %3634 = vrot.lane.b32.xlu1 %v3618_v18, %s4583_s13  ;;  %v9183_v18 = vld [vmem:[#allocation18_spill] sm:$0xff]  ;;  %v3623_v9 = vsel %vm8084_vm3, 0.0, %v3543_v0 }
 0x4e9   : > { %v3743_v4 = vmul.f32 %v7996_v49, %v9183_v18  ;;  %v3569_v41 = vpop.permute.xlu1 %3568 }
 0x4ea   : > { %3825 = vperm.xlu0 %4345, %v3747_v45   ;;  %v3624_v45 = vsel %vm8078_vm15, 0.0, %v3544_v44  ;;  %vm3593_vm4 = vcmp.gt.f32.partialorder %v3569_v41, 32.0 }
 0x4eb   : > { %vm8157_vm7 = vmand %vm9174_vm0, %vm3593_vm4 }
 0x4ec   : > { %3790 = vperm.xlu2 %4344, %v3740_v37   ;;  %v9188_v37 = vld [vmem:[#allocation21_spill] sm:$0xff]  ;;  %v3571_v5 = vpop.permute.xlu2 %3570 }
 0x4ed   : > { %vm3594_vm1 = vcmp.gt.f32.partialorder %v3571_v5, 32.0  ;;  %v9203_v5 = vmov 0 }
 0x4ee   : > { %vm8102_vm2 = vmand %vm9174_vm0, %vm3594_vm1 }
 0x4f0   : > { %3640 = vrot.lane.b32.xlu1 %v3621_v52, %s4583_s13  ;;  %v3746_v52 = vmul.f32 %v7996_v49, %v9188_v37  ;;  %v3626_v49 = vsel %vm8102_vm2, 0.0, %v3546_v22  ;;  %v9195_v22 = vmov 0 }
 0x4f2   : > { %3638 = vrot.lane.b32.xlu0 %v3620_v46, %s4583_s13  ;;  %v9215_v46 = vld [vmem:[#allocation25_spill] sm:$0xff] }
 0x4f3   : > { %v3573_v18 = vpop.permute.xlu0 %3572 }
 0x4f4   : > { %3805 = vperm.xlu2 %4344, %v3743_v4   ;;  %vm3595_vm9 = vcmp.gt.f32.partialorder %v3573_v18, 32.0  ;;  %v9197_v4 = vmov 0 }
 0x4f5   : > { %vm8140_vm1 = vmand %vm9174_vm0, %vm3595_vm9 }
 0x4f6   : > { %v9198_v4 = vsel %vm8140_vm1, 4294967295, %v9197_v4 }
 0x4f8   : > { %3646 = vrot.lane.b32.xlu1 %v3624_v45, %s4583_s13  ;;  %v3622_v45 = vsel %vm8124_vm8, 0.0, %v3542_v10  ;;  %v3625_v10 = vsel %vm8157_vm7, 0.0, %v3545_v59 }
 0x4fa   : > { %3644 = vrot.lane.b32.xlu0 %v3623_v9, %s4583_s13  ;;  %v3627_v9 = vsel %vm8140_vm1, 0.0, %v3547_v60  ;;  %v9201_v60 = vmov 0 }
 0x4fc   : > { %3820 = vperm.xlu2 %4344, %v3746_v52  }
 0x500   : > { %3652 = vrot.lane.b32.xlu1 %v3627_v9, %s4583_s13 }
 0x502   : > { %3650 = vrot.lane.b32.xlu0 %v3626_v49, %s4583_s13 }
 0x504   : > { %3636 = vrot.lane.b32.xlu2 %v3619_v57, %s4583_s13 }
 0x507   : > { %v3577_v51 = vpop.permute.xlu2 %3576 }
 0x508   : > { %vm3597_vm10 = vcmp.gt.f32.partialorder %v3577_v51, 32.0  ;;  %v9205_v51 = vmov 0 }
 0x509   : > { %vm8130_vm13 = vmand %vm9174_vm0, %vm3597_vm10 }
 0x50a   : > { %v9196_v22 = vsel %vm8130_vm13, 4294967295, %v9195_v22  ;;  %v3629_v54 = vsel %vm8130_vm13, 0.0, %v3549_v43  ;;  %v3575_v37 = vpop.permute.xlu1 %3574 }
 0x50b   : > { %3656 = vrot.lane.b32.xlu0 %v3629_v54, %s4583_s13  ;;  %vm3596_vm10 = vcmp.gt.f32.partialorder %v3575_v37, 32.0 }
 0x50c   : > { %3642 = vrot.lane.b32.xlu2 %v3622_v45, %s4583_s13  ;;  %vm8174_vm4 = vmand %vm9174_vm0, %vm3596_vm10 }
 0x50d   : > { %v9204_v5 = vsel %vm8174_vm4, 4294967295, %v9203_v5  ;;  %v3628_v49 = vsel %vm8174_vm4, 0.0, %v3548_v23  ;;  %v9207_v23 = vmov 0 }
 0x513   : > { %v3579_v52 = vpop.permute.xlu0 %3578 }
 0x514   : > { %3648 = vrot.lane.b32.xlu2 %v3625_v10, %s4583_s13  ;;  %vm3598_vm9 = vcmp.gt.f32.partialorder %v3579_v52, 32.0  ;;  %v9209_v10 = vmov 0 }
 0x515   : > { %vm8168_vm1 = vmand %vm9174_vm0, %vm3598_vm9 }
 0x516   : > { %v9202_v60 = vsel %vm8168_vm1, 4294967295, %v9201_v60  ;;  %v3630_v59 = vsel %vm8168_vm1, 0.0, %v3550_v63 }
 0x517   : > { %3658 = vrot.lane.b32.xlu1 %v3630_v59, %s4583_s13 }
 0x51c   : > { %3654 = vrot.lane.b32.xlu2 %v3628_v49, %s4583_s13 }
 0x526   : > { %v3583_v57 = vpop.permute.xlu2 %3582 }
 0x527   : > { %vm3600_vm9 = vcmp.gt.f32.partialorder %v3583_v57, 32.0 }
 0x528   : > { %vm8190_vm10 = vmand %vm9174_vm0, %vm3600_vm9  ;;  %v3581_v41 = vpop.permute.xlu1 %3580 }
 0x529   : > { %v9206_v51 = vsel %vm8190_vm10, 4294967295, %v9205_v51  ;;  %v3632_v63 = vsel %vm8190_vm10, 0.0, %v3552_v31  ;;  %vm3599_vm1 = vcmp.gt.f32.partialorder %v3581_v41, 32.0 }
 0x52a   : > { %3662 = vrot.lane.b32.xlu0 %v3632_v63, %s4583_s13  ;;  %vm8201_vm13 = vmand %vm9174_vm0, %vm3599_vm1 }
 0x52b   : > { %v9208_v23 = vsel %vm8201_vm13, 4294967295, %v9207_v23  ;;  %v3631_v18 = vsel %vm8201_vm13, 0.0, %v3551_v53 }
 0x52c   : > { %3660 = vrot.lane.b32.xlu2 %v3631_v18, %s4583_s13 }
 0x52e   : > { %v3751_v54 = vpop.permute.xlu2 %3750 }
 0x532   : > { %v3761_v45 = vpop.permute.xlu1 %3760 }
 0x534   : > { %v3585_v9 = vpop.permute.xlu0 %3584 }
 0x535   : > { %vm3601_vm9 = vcmp.gt.f32.partialorder %v3585_v9, 32.0 }
 0x536   : > { %v3766_v31 = vpop.permute.xlu2 %3765  ;;  %vm8212_vm10 = vmand %vm9174_vm0, %vm3601_vm9 }
 0x537   : > { %v9210_v10 = vsel %vm8212_vm10, 4294967295, %v9209_v10  ;;  %v3633_v37 = vsel %vm8212_vm10, 0.0, %v3553_v2 }
 0x538   : > { %3664 = vrot.lane.b32.xlu1 %v3633_v37, %s4583_s13 }
 0x53a   : > { %v3771_v53 = vpop.permute.xlu1 %3770 }
 0x53c   : > { %v3756_v52 = vpop.permute.xlu0 %3755 }
 0x53e   : > { %v8221_v59 = vpop.permute.xlu2 %3775 }
 0x542   : > { %v8223_v49 = vpop.permute.xlu1 %3785 }
 0x544   : > { %v8225_v57 = vpop.permute.xlu0 %3780 }
 0x546   : > { %v8227_v21 = vpop.permute.xlu2 %3790 }
 0x54a   : > { %v8229_v41 = vpop.permute.xlu1 %3800 }
 0x54c   : > { %v8231_v63 = vpop.permute.xlu0 %3795 }
 0x54e   : > { %v8233_v18 = vpop.permute.xlu2 %3805 }
 0x552   : > { %v8235_v9 = vpop.permute.xlu1 %3815 }
 0x554   : > { %v8237_v2 = vpop.permute.xlu0 %3810 }
 0x556   : > { %v8239_v37 = vpop.permute.xlu2 %3820 }
 0x55a   : > { %v3635_v27 = vpop.permute.xlu1 %3634 }
 0x55b   : > { %vm3667_vm0 = vcmp.gt.f32.partialorder %v3635_v27, 32.0  ;;  %v9211_v27 = vld [vmem:[#allocation32_spill] sm:$0xff] }
 0x55c   : > { %v8241_v33 = vpop.permute.xlu0 %3825  ;;  %vm3683_vm1 = vmand %vm6716_vm6, %vm3667_vm0 }
 0x55d   : > { %vm3699_vm9 = vmor %vm8039_vm12, %vm3683_vm1 }
 0x55e   : > { %v3637_v6 = vpop.permute.xlu2 %3636  ;;  %v3715_v1 = vsel %vm3699_vm9, 0.0, %v7541_v17 }
 0x55f   : > { %vm3668_vm10 = vcmp.gt.f32.partialorder %v3637_v6, 32.0  ;;  %v3828_v20 = vmul.f32 %v3751_v54, %v3715_v1  ;;  %v9212_v6 = vld [vmem:[#allocation38_spill] sm:$0xff] }
 0x560   : > { %vm3684_vm13 = vmand %vm6716_vm6, %vm3668_vm10 }
 0x561   : > { %vm3700_vm4 = vmor %vm8108_vm14, %vm3684_vm13  ;;  %v3844_v48 = vsub.f32 %v3828_v20, %v9211_v27 }
 0x562   : > { %v3716_v36 = vsel %vm3700_vm4, 0.0, %v7620_v13  ;;  %v3641_v38 = vpop.permute.xlu1 %3640 }
 0x563   : > { %v3829_v34 = vmul.f32 %v3756_v52, %v3716_v36  ;;  %vm3670_vm0 = vcmp.gt.f32.partialorder %v3641_v38, 32.0  ;;  %v3860_v8 = vmul.f32 %v3844_v48, %v3844_v48 }
 0x564   : > { %v3639_v30 = vpop.permute.xlu0 %3638  ;;  %vm3686_vm12 = vmand %vm6716_vm6, %vm3670_vm0 }
 0x565   : > { %v3845_v1 = vsub.f32 %v3829_v34, %v9212_v6  ;;  %vm3669_vm1 = vcmp.gt.f32.partialorder %v3639_v30, 32.0  ;;  %vm3702_vm10 = vmor %vm8054_vm11, %vm3686_vm12  ;;  %3876 = vadd.xlane.f32.xlu1 %v3860_v8 }
 0x566   : > { %v3643_v17 = vpop.permute.xlu2 %3642  ;;  %vm3685_vm14 = vmand %vm6716_vm6, %vm3669_vm1  ;;  %v3718_v48 = vsel %vm3702_vm10, 0.0, %v7598_v12  ;;  %v9214_v12 = vld [vmem:[#allocation37_spill] sm:$0xff] }
 0x567   : > { %vm3671_vm13 = vcmp.gt.f32.partialorder %v3643_v17, 32.0  ;;  %v3861_v20 = vmul.f32 %v3845_v1, %v3845_v1  ;;  %vm3701_vm4 = vmor %vm8060_vm5, %vm3685_vm14  ;;  %v3831_v13 = vmul.f32 %v3766_v31, %v3718_v48 }
 0x568   : > { %vm3687_vm9 = vmand %vm6716_vm6, %vm3671_vm13  ;;  %v3717_v30 = vsel %vm3701_vm4, 0.0, %v7523_v61 }
 0x569   : > { %vm3703_vm11 = vmor %vm8124_vm8, %vm3687_vm9  ;;  %3878 = vadd.xlane.f32.xlu2 %v3861_v20  ;;  %v3830_v38 = vmul.f32 %v3761_v45, %v3717_v30  ;;  %v3847_v52 = vsub.f32 %v3831_v13, %v9214_v12  ;;  %v9217_v20 = vld [vmem:[#allocation27_spill] sm:$0xff] }
 0x56a   : > { %v3719_v34 = vsel %vm3703_vm11, 0.0, %v7668_v55  ;;  %v3647_v36 = vpop.permute.xlu1 %3646 }
 0x56b   : > { %v3846_v0 = vsub.f32 %v3830_v38, %v9213_v14  ;;  %vm3673_vm0 = vcmp.gt.f32.partialorder %v3647_v36, 32.0  ;;  %v3832_v42 = vmul.f32 %v3771_v53, %v3719_v34  ;;  %v3863_v53 = vmul.f32 %v3847_v52, %v3847_v52  ;;  %v9218_v38 = vld [vmem:[#allocation44_spill] sm:$0xff]  ;;  %v9220_v14 = vld [vmem:[#allocation29_spill] sm:$0xff] }
 0x56c   : > { %v3645_v54 = vpop.permute.xlu0 %3644  ;;  %vm3689_vm5 = vmand %vm6716_vm6, %vm3673_vm0  ;;  %vm9219_vm0 = vnez %v9204_v5 }
 0x56d   : > { %vm3672_vm12 = vcmp.gt.f32.partialorder %v3645_v54, 32.0  ;;  %v3862_v61 = vmul.f32 %v3846_v0, %v3846_v0  ;;  %vm3705_vm8 = vmor %vm8078_vm15, %vm3689_vm5  ;;  %v3848_v45 = vsub.f32 %v3832_v42, %v9215_v46  ;;  %v9221_v42 = vld [vmem:[#allocation49_spill] sm:$0xff] }
 0x56e   : > { %v3649_v55 = vpop.permute.xlu2 %3648  ;;  %vm3688_vm1 = vmand %vm6716_vm6, %vm3672_vm12  ;;  %v3721_v31 = vsel %vm3705_vm8, 0.0, %v7700_v11  ;;  %v9216_v11 = vld [vmem:[#allocation45_spill] sm:$0xff] }
 0x56f   : > { %vm3674_vm10 = vcmp.gt.f32.partialorder %v3649_v55, 32.0  ;;  %vm3704_vm14 = vmor %vm8084_vm3, %vm3688_vm1  ;;  %3880 = vadd.xlane.f32.xlu0 %v3862_v61  ;;  %v3864_v27 = vmul.f32 %v3848_v45, %v3848_v45  ;;  %v3834_v8 = vmul.f32 %v8225_v57, %v3721_v31  ;;  %vm9222_vm1 = vnez %v9196_v22  ;;  %v9224_v22 = vld [vmem:[#allocation51_spill] sm:$0xff]  ;;  %v9225_v46 = vld [vmem:[#allocation33_spill] sm:$0xff] }
 0x570   : > { %vm3690_vm15 = vmand %vm6716_vm6, %vm3674_vm10  ;;  %v3720_v39 = vsel %vm3704_vm14, 0.0, %v7736_v40 }
 0x571   : > { %vm3706_vm13 = vmor %vm8157_vm7, %vm3690_vm15  ;;  %3882 = vadd.xlane.f32.xlu2 %v3863_v53  ;;  %3884 = vadd.xlane.f32.xlu1 %v3864_v27  ;;  %v3850_v6 = vsub.f32 %v3834_v8, %v9216_v11  ;;  %v3833_v1 = vmul.f32 %v8221_v59, %v3720_v39  ;;  %vm9223_vm15 = vnez %v9198_v4  ;;  %v9229_v39 = vld [vmem:[#allocation55_spill] sm:$0xff] }
 0x572   : > { %v3722_v19 = vsel %vm3706_vm13, 0.0, %v7768_v15  ;;  %v3653_v12 = vpop.permute.xlu1 %3652 }
 0x573   : > { %v3866_v17 = vmul.f32 %v3850_v6, %v3850_v6  ;;  %v3849_v48 = vsub.f32 %v3833_v1, %v9217_v20  ;;  %v3835_v57 = vmul.f32 %v8223_v49, %v3722_v19  ;;  %vm3676_vm8 = vcmp.gt.f32.partialorder %v3653_v12, 32.0 }
 0x574   : > { %v3651_v30 = vpop.permute.xlu0 %3650  ;;  %vm3692_vm14 = vmand %vm6716_vm6, %vm3676_vm8 }
 0x575   : > { %vm3675_vm3 = vcmp.gt.f32.partialorder %v3651_v30, 32.0  ;;  %v3851_v40 = vsub.f32 %v3835_v57, %v9218_v38  ;;  %v3865_v43 = vmul.f32 %v3849_v48, %v3849_v48  ;;  %vm3708_vm13 = vmor %vm9223_vm15, %vm3692_vm14  ;;  %v9234_v30 = vld [vmem:[#allocation43_spill] sm:$0xff] }
 0x576   : > { %v3655_v34 = vpop.permute.xlu2 %3654  ;;  %vm3691_vm7 = vmand %vm6716_vm6, %vm3675_vm3 }
 0x577   : > { %vm3677_vm4 = vcmp.gt.f32.partialorder %v3655_v34, 32.0  ;;  %vm3707_vm9 = vmor %vm8102_vm2, %vm3691_vm7  ;;  %3888 = vadd.xlane.f32.xlu0 %v3866_v17  ;;  %v3867_v15 = vmul.f32 %v3851_v40, %v3851_v40  ;;  %v9233_v17 = vld [vmem:[#allocation57_spill] sm:$0xff] }
 0x578   : > { %vm3693_vm11 = vmand %vm6716_vm6, %vm3677_vm4  ;;  %v3723_v59 = vsel %vm3707_vm9, 0.0, %v7849_v56  ;;  %vm9226_vm4 = vnez %v9208_v23 }
 0x579   : > { %vm3709_vm5 = vmor %vm9219_vm0, %vm3693_vm11  ;;  %3886 = vadd.xlane.f32.xlu2 %v3865_v43  ;;  %3890 = vadd.xlane.f32.xlu1 %v3867_v15  ;;  %v3836_v36 = vmul.f32 %v8227_v21, %v3723_v59  ;;  %v3724_v21 = vsel %vm3708_vm13, 0.0, %v7814_v47  ;;  %vm9232_vm13 = vnez %v9210_v10 }
 0x57a   : > { %v3725_v49 = vsel %vm3709_vm5, 0.0, %v7881_v28  ;;  %vm9227_vm5 = vnez %v9202_v60 }
 0x57b   : > { %v3838_v44 = vmul.f32 %v8229_v41, %v3725_v49  ;;  %v3852_v0 = vsub.f32 %v3836_v36, %v9220_v14  ;;  %v3837_v41 = vmul.f32 %v8231_v63, %v3724_v21 }
 0x57d   : > { %v3657_v13 = vpop.permute.xlu0 %3656  ;;  %v3854_v54 = vsub.f32 %v3838_v44, %v9221_v42  ;;  %v3868_v56 = vmul.f32 %v3852_v0, %v3852_v0  ;;  %v3853_v61 = vsub.f32 %v3837_v41, %v9224_v22 }
 0x57e   : > { %vm3678_vm2 = vcmp.gt.f32.partialorder %v3657_v13, 32.0 }
 0x57f   : > { %vm3694_vm12 = vmand %vm6716_vm6, %vm3678_vm2  ;;  %v3870_v28 = vmul.f32 %v3854_v54, %v3854_v54  ;;  %v3869_v31 = vmul.f32 %v3853_v61, %v3853_v61 }
 0x580   : > { %vm3710_vm10 = vmor %vm9222_vm1, %vm3694_vm12  ;;  %vm9230_vm1 = vnez %v9206_v51 }
 0x581   : > { %v3726_v5 = vsel %vm3710_vm10, 0.0, %v7942_v25  ;;  %3892 = vadd.xlane.f32.xlu2 %v3868_v56  ;;  %3896 = vadd.xlane.f32.xlu1 %v3870_v28 }
 0x582   : > { %v3839_v52 = vmul.f32 %v8233_v18, %v3726_v5  ;;  %3894 = vadd.xlane.f32.xlu0 %v3869_v31  ;;  %v9228_v18 = vld [vmem:[#allocation53_spill] sm:$0xff]  ;;  %v9239_v31 = vld [vmem:[#allocation105_spill] sm:$0xff] }
 0x584   : > { %v3855_v45 = vsub.f32 %v3839_v52, %v9225_v46  ;;  %v9238_v52 = vld [vmem:[#allocation111_spill] sm:$0xff] }
 0x586   : > { %v3661_v55 = vpop.permute.xlu2 %3660  ;;  %v3871_v53 = vmul.f32 %v3855_v45, %v3855_v45 }
 0x587   : > { %vm3680_vm3 = vcmp.gt.f32.partialorder %v3661_v55, 32.0 }
 0x588   : > { %vm3696_vm7 = vmand %vm6716_vm6, %vm3680_vm3 }
 0x589   : > { %vm3712_vm9 = vmor %vm9226_vm4, %vm3696_vm7  ;;  %v3659_v25 = vpop.permute.xlu1 %3658  ;;  %3898 = vadd.xlane.f32.xlu2 %v3871_v53  ;;  %vm3924_vm7 = vcmp.eq.s32.totalorder %v9234_v30, 24 }
 0x58a   : > { %v3728_v47 = vsel %vm3712_vm9, 0.0, %v7967_v26  ;;  %vm3679_vm11 = vcmp.gt.f32.partialorder %v3659_v25, 32.0  ;;  %v9240_v25 = vld [vmem:[#allocation112_spill] sm:$0xff] }
 0x58b   : > { %vm3695_vm0 = vmand %vm6716_vm6, %vm3679_vm11  ;;  %v3841_v4 = vmul.f32 %v8235_v9, %v3728_v47  ;;  %v9231_v9 = vld [vmem:[#allocation41_spill] sm:$0xff] }
 0x58c   : > { %vm3711_vm2 = vmor %vm9227_vm5, %vm3695_vm0 }
 0x58d   : > { %v3727_v63 = vsel %vm3711_vm2, 0.0, %v7907_v24  ;;  %v3857_v27 = vsub.f32 %v3841_v4, %v9228_v18 }
 0x58e   : > { %v3840_v23 = vmul.f32 %v8237_v2, %v3727_v63 }
 0x58f   : > { %v3873_v8 = vmul.f32 %v3857_v27, %v3857_v27  ;;  %v9241_v27 = vld [vmem:[#allocation109_spill] sm:$0xff] }
 0x590   : > { %v3856_v11 = vsub.f32 %v3840_v23, %v9229_v39  ;;  %v9242_v39 = vld [vmem:[#allocation107_spill] sm:$0xff] }
 0x591   : > { %3902 = vadd.xlane.f32.xlu1 %v3873_v8 }
 0x592   : > { %v3872_v26 = vmul.f32 %v3856_v11, %v3856_v11 }
 0x594   : > { %3900 = vadd.xlane.f32.xlu0 %v3872_v26 }
 0x59c   : > { %v3663_v6 = vpop.permute.xlu0 %3662 }
 0x59d   : > { %vm3681_vm12 = vcmp.gt.f32.partialorder %v3663_v6, 32.0 }
 0x59e   : > { %vm3697_vm8 = vmand %vm6716_vm6, %vm3681_vm12 }
 0x59f   : > { %vm3713_vm10 = vmor %vm9230_vm1, %vm3697_vm8 }
 0x5a0   : > { %v3729_v24 = vsel %vm3713_vm10, 0.0, %v8013_v35 }
 0x5a1   : > { %v3842_v60 = vmul.f32 %v8239_v37, %v3729_v24  ;;  %v9243_v24 = vld [vmem:[#allocation113_spill] sm:$0xff] }
 0x5a3   : > { %v3858_v2 = vsub.f32 %v3842_v60, %v9231_v9 }
 0x5a5   : > { %v3874_v1 = vmul.f32 %v3858_v2, %v3858_v2 }
 0x5a7   : > { %3904 = vadd.xlane.f32.xlu2 %v3874_v1  ;;  %v9244_v1 = vld [vmem:[#allocation110_spill] sm:$0xff] }
 0x5aa   : > { %v3665_v19 = vpop.permute.xlu1 %3664 }
 0x5ab   : > { %vm3682_vm14 = vcmp.gt.f32.partialorder %v3665_v19, 32.0 }
 0x5ac   : > { %vm3698_vm15 = vmand %vm6716_vm6, %vm3682_vm14 }
 0x5ad   : > { %vm3714_vm3 = vmor %vm9232_vm13, %vm3698_vm15 }
 0x5ae   : > { %v3730_v51 = vsel %vm3714_vm3, 0.0, %v8001_v29 }
 0x5af   : > { %v3843_v35 = vmul.f32 %v8241_v33, %v3730_v51 }
 0x5b1   : > { %v3859_v37 = vsub.f32 %v3843_v35, %v9233_v17 }
 0x5b3   : > { %v3875_v20 = vmul.f32 %v3859_v37, %v3859_v37 }
 0x5b5   : > { %3906 = vadd.xlane.f32.xlu0 %v3875_v20 }
 0x5d8   : > { %v3877_v48 = vpop.xlane.xlu1 %3876 }
 0x5d9   : > { %v3908_v57 = vmul.f32 0.0078125, %v3877_v48 }
 0x5db   : > { %v3925_v7 = vsel %vm3924_vm7, %v3908_v57, %v9072_v62 }
 0x5dc   : > { %v3879_v10 = vpop.xlane.xlu2 %3878  ;;  %3941 = vst [vmem:[%s5125_s17] sm:$0xff] %v3925_v7 }
 0x5dd   : > { %v3909_v29 = vmul.f32 0.0078125, %v3879_v10 }
 0x5df   : > { %v3926_v33 = vsel %vm3924_vm7, %v3909_v29, %v9075_v58 }
 0x5e0   : > { %3942 = vst [vmem:[%s5125_s17 + $0x8] sm:$0xff] %v3926_v33 }
 0x5e2   : > { %v3881_v38 = vpop.xlane.xlu0 %3880 }
 0x5e3   : > { %v3910_v40 = vmul.f32 0.0078125, %v3881_v38 }
 0x5e4   : > { %v3885_v34 = vpop.xlane.xlu1 %3884  ;;  %v3883_v43 = vpop.xlane.xlu2 %3882 }
 0x5e5   : > { %v3927_v15 = vsel %vm3924_vm7, %v3910_v40, %v9097_v16  ;;  %v3912_v62 = vmul.f32 0.0078125, %v3885_v34  ;;  %v3911_v59 = vmul.f32 0.0078125, %v3883_v43 }
 0x5e6   : > { %3943 = vst [vmem:[%s5125_s17 + $0x10] sm:$0xff] %v3927_v15 }
 0x5e7   : > { %v3929_v49 = vsel %vm3924_vm7, %v3912_v62, %v9081_v32  ;;  %v3928_v58 = vsel %vm3924_vm7, %v3911_v59, %v9078_v50  ;;  %v9235_v32 = vld [vmem:[#allocation104_spill] sm:$0xff] }
 0x5e8   : > { %3945 = vst [vmem:[%s5125_s17 + $0x20] sm:$0xff] %v3929_v49  ;;  %v9236_v50 = vld [vmem:[#allocation108_spill] sm:$0xff] }
 0x5e9   : > { %3944 = vst [vmem:[%s5125_s17 + $0x18] sm:$0xff] %v3928_v58 }
 0x5ea   : > { %v3889_v36 = vpop.xlane.xlu0 %3888 }
 0x5eb   : > { %v3914_v44 = vmul.f32 0.0078125, %v3889_v36 }
 0x5ec   : > { %v3891_v13 = vpop.xlane.xlu1 %3890  ;;  %v3887_v16 = vpop.xlane.xlu2 %3886 }
 0x5ed   : > { %v3931_v14 = vsel %vm3924_vm7, %v3914_v44, %v9084_v3  ;;  %v3915_v0 = vmul.f32 0.0078125, %v3891_v13  ;;  %v3913_v42 = vmul.f32 0.0078125, %v3887_v16  ;;  %v9237_v3 = vld [vmem:[#allocation106_spill] sm:$0xff] }
 0x5ee   : > { %3947 = vst [vmem:[%s5125_s17 + $0x30] sm:$0xff] %v3931_v14 }
 0x5ef   : > { %v3932_v54 = vsel %vm3924_vm7, %v3915_v0, %v9235_v32  ;;  %v3930_v12 = vsel %vm3924_vm7, %v3913_v42, %v9236_v50 }
 0x5f0   : > { %3948 = vst [vmem:[%s5125_s17 + $0x38] sm:$0xff] %v3932_v54 }
 0x5f1   : > { %3946 = vst [vmem:[%s5125_s17 + $0x28] sm:$0xff] %v3930_v12 }
 0x5f4   : > { %v3897_v56 = vpop.xlane.xlu1 %3896  ;;  %v3893_v28 = vpop.xlane.xlu2 %3892 }
 0x5f5   : > { %v3918_v5 = vmul.f32 0.0078125, %v3897_v56  ;;  %v3916_v21 = vmul.f32 0.0078125, %v3893_v28  ;;  %v3895_v61 = vpop.xlane.xlu0 %3894 }
 0x5f6   : > { %v3917_v45 = vmul.f32 0.0078125, %v3895_v61 }
 0x5f7   : > { %v3935_v41 = vsel %vm3924_vm7, %v3918_v5, %v9237_v3  ;;  %v3933_v22 = vsel %vm3924_vm7, %v3916_v21, %v9238_v52 }
 0x5f8   : > { %3951 = vst [vmem:[%s5125_s17 + $0x50] sm:$0xff] %v3935_v41  ;;  %v3934_v53 = vsel %vm3924_vm7, %v3917_v45, %v9239_v31 }
 0x5f9   : > { %3949 = vst [vmem:[%s5125_s17 + $0x40] sm:$0xff] %v3933_v22 }
 0x5fa   : > { %3950 = vst [vmem:[%s5125_s17 + $0x48] sm:$0xff] %v3934_v53 }
 0x5fc   : > { %v3899_v46 = vpop.xlane.xlu2 %3898 }
 0x5fd   : > { %v3919_v55 = vmul.f32 0.0078125, %v3899_v46 }
 0x5ff   : > { %v3936_v47 = vsel %vm3924_vm7, %v3919_v55, %v9240_v25 }
 0x600   : > { %3952 = vst [vmem:[%s5125_s17 + $0x58] sm:$0xff] %v3936_v47 }
 0x604   : > { %v3903_v4 = vpop.xlane.xlu1 %3902 }
 0x605   : > { %v3921_v63 = vmul.f32 0.0078125, %v3903_v4 }
 0x607   : > { %v3901_v18 = vpop.xlane.xlu0 %3900  ;;  %v3938_v23 = vsel %vm3924_vm7, %v3921_v63, %v9241_v27 }
 0x608   : > { %v3920_v8 = vmul.f32 0.0078125, %v3901_v18  ;;  %3954 = vst [vmem:[%s5125_s17 + $0x68] sm:$0xff] %v3938_v23 }
 0x60a   : > { %v3937_v11 = vsel %vm3924_vm7, %v3920_v8, %v9242_v39 }
 0x60b   : > { %3953 = vst [vmem:[%s5125_s17 + $0x60] sm:$0xff] %v3937_v11 }
 0x61a   : > { %v3905_v26 = vpop.xlane.xlu2 %3904 }
 0x61b   : > { %v3922_v6 = vmul.f32 0.0078125, %v3905_v26 }
 0x61d   : > { %v3939_v60 = vsel %vm3924_vm7, %v3922_v6, %v9243_v24 }
 0x61e   : > { %3955 = vst [vmem:[%s5125_s17 + $0x70] sm:$0xff] %v3939_v60 }
 0x628   : > { %v3907_v9 = vpop.xlane.xlu0 %3906 }
 0x629   : > { %v3923_v2 = vmul.f32 0.0078125, %v3907_v9 }
 0x62b   : > { %v3940_v19 = vsel %vm3924_vm7, %v3923_v2, %v9244_v1 }
 0x62c   : > { %3956 = vst [vmem:[%s5125_s17 + $0x78] sm:$0xff] %v3940_v19 }
 0x62d   : > { %4398 = shalt.err (!%p4395_p4)
}
 0x62e   : > { %s4584_s12 = smov 128   ;;  %s4585_s17 = smov 8  }
 0x62f   : > { %4118 = dma.vmem_to_hbm [thread:$0]  (%p4655_p5), %s3971_s19, 2048, %s3973_s20, %s3958_s21, %s4584_s12, %s4584_s12, %s4585_s17  }
 0x630 PF: > { %p4124_p7 = scmp.ge.s32.totalorder %s4503_s25, 2  ;;  %s3987_s9 = sand.u32 1, %s4491_s23  }
 0x631   : > { %s3988_s10 = scalar_lea.sflag [#allocation6], %s3987_s9 }
 0x632   : > { %p4121_p8 = pnand %p4124_p7, %p4659_p6 }
 0x634   : > { %p4122_p9 = pneg %p4121_p8 }
 0x636   : > { %4486 = dma.done.wait (%p4122_p9), %s3988_s10, 2048  }
 0x637   : > { %4488 = vsyncadd (%p4122_p9), %s3988_s10, 4294965248  ;;  %p27_p10 = scmp.ge.s32.totalorder %s4642_s27, 4   ;;  %s9245_s23 = smov %s4495_s24 }
 0x638   : > { %s9246_s24 = smov %s4499_s0  ;;  %s9247_s0 = smov %s4653_s30 }
 0x639   : > { %s9248_s25 = smov %s4642_s27  ;;  %29 = sbr.rel (!%p27_p10) target bundleno = 10 (0xa), region = 84 }
 0x63e   :  { %3994 = vsyncpa [#allocation6], 1 }
 0x63f   :  { %3996 = vsyncpa [#allocation6 + $0x1], 1 }

</bundles_post_ra>
